<compile_context>
chip_gen: v6e
topology: v6e:2x2x1
jax: 0.10.0
libtpu: 0.0.40
codegen_flags: <defaults>
</compile_context>

<pallas_src>
import jax
import jax.numpy as jnp
from jax import lax
from jax.experimental import pallas as pl
from jax.experimental.pallas import tpu as pltpu

EPS = 1e-5


def _bn_relu_conv_bn_kernel(x_ref, w_hbm_ref, p1_ref, p2_ref, o_ref,
                            w_vmem, w_sem):
    # x_ref  : (Cin, M)   f32  channels x flattened pixels (native NCHW view, N=1)
    # w_hbm  : (Cout, Cin) bf16 1x1-conv weight, left in HBM -> manual DMA
    # p1_ref : (8, Cin)   f32  row 0 = gamma1, row 1 = beta1 (rows 2..7 zero pad)
    # p2_ref : (8, Cout)  f32  row 0 = gamma2, row 1 = beta2
    # o_ref  : (Cout, M)  f32
    # w_vmem : (Cout, Cin) bf16 VMEM landing buffer;  w_sem : DMA semaphore

    # Kick off the weight DMA immediately; overlap with param transposes + BN1.
    w_cp = pltpu.make_async_copy(w_hbm_ref, w_vmem, w_sem)
    w_cp.start()

    # Lane-major params -> column form (small XLU transposes, off critical path).
    p1 = jnp.transpose(p1_ref[...])              # (Cin, 8)
    g1, b1 = p1[:, 0:1], p1[:, 1:2]              # (Cin, 1)
    p2 = jnp.transpose(p2_ref[...])              # (Cout, 8)
    g2, b2 = p2[:, 0:1], p2[:, 1:2]              # (Cout, 1)

    x = x_ref[...]                               # (Cin, M) f32
    inv_m = 1.0 / x.shape[1]

    # --- BatchNorm2d #1 (training mode): centered stats, folded affine ---
    mean1 = jnp.sum(x, axis=1, keepdims=True) * inv_m          # (Cin, 1)
    xc = x - mean1
    var1 = jnp.sum(xc * xc, axis=1, keepdims=True) * inv_m     # biased var
    s1 = g1 * lax.rsqrt(var1 + EPS)                            # (Cin, 1)
    # BN1 (one FMA) + ReLU fused, single cast for the MXU.
    xr_bf = jnp.maximum(xc * s1 + b1, 0.0).astype(jnp.bfloat16)

    # --- Conv2d 1x1 (no bias) == matmul on the MXU (bf16 in, f32 acc) ---
    w_cp.wait()
    y = jnp.dot(w_vmem[...], xr_bf,
                preferred_element_type=jnp.float32)            # (Cout, M)

    # --- BatchNorm2d #2 (training mode): centered stats, folded affine ---
    mean2 = jnp.sum(y, axis=1, keepdims=True) * inv_m          # (Cout, 1)
    yc = y - mean2
    var2 = jnp.sum(yc * yc, axis=1, keepdims=True) * inv_m
    s2 = g2 * lax.rsqrt(var2 + EPS)                            # (Cout, 1)
    o_ref[...] = yc * s2 + b2


def _pack_bn_params(gamma, beta):
    """gamma/beta (C,) -> (8, C) lane-major rows (rows 2..7 are zero padding)."""
    C = gamma.shape[0]
    p = jnp.zeros((8, C), jnp.float32)
    p = p.at[0, :].set(gamma.astype(jnp.float32))
    p = p.at[1, :].set(beta.astype(jnp.float32))
    return p


def bn_relu_conv_bn(x_nchw, conv_w, gamma1, beta1, gamma2, beta2):
    """x_nchw: (N, Cin, H, W); conv_w: (Cout, Cin); gammas/betas: (C,)."""
    N, Cin, H, W = x_nchw.shape
    Cout = conv_w.shape[0]
    M = N * H * W

    # Channels-major 2-D view. For the module's N=1 this is a pure reshape
    # (no transpose kernel, no extra HBM pass).
    if N == 1:
        x2d = x_nchw.reshape(Cin, M)
    else:
        x2d = jnp.transpose(x_nchw, (1, 0, 2, 3)).reshape(Cin, M)

    vmem = pl.BlockSpec(memory_space=pltpu.MemorySpace.VMEM)
    hbm = pl.BlockSpec(memory_space=pl.ANY)

    cost = pl.CostEstimate(
        flops=2 * M * Cin * Cout + 8 * M * (Cin + Cout),
        transcendentals=Cin + Cout,
        bytes_accessed=(4 * M * Cin              # x read (f32)
                        + 2 * Cin * Cout         # weight read (bf16)
                        + 4 * M * Cout           # output write (f32)
                        + 4 * 8 * (Cin + Cout)), # packed BN params
    )

    out2d = pl.pallas_call(
        _bn_relu_conv_bn_kernel,
        out_shape=jax.ShapeDtypeStruct((Cout, M), jnp.float32),
        in_specs=[vmem, hbm, vmem, vmem],
        out_specs=vmem,
        scratch_shapes=[
            pltpu.VMEM((Cout, Cin), jnp.bfloat16),  # bf16 weight landing buffer
            pltpu.SemaphoreType.DMA(()),            # weight DMA semaphore
        ],
        cost_estimate=cost,
    )(
        x2d.astype(jnp.float32),
        conv_w.astype(jnp.bfloat16),                # ship the weight as bf16
        _pack_bn_params(gamma1, beta1),
        _pack_bn_params(gamma2, beta2),
    )

    # (Cout, M) -> NCHW. Pure reshape for N=1.
    if N == 1:
        return out2d.reshape(1, Cout, H, W)
    return jnp.transpose(out2d.reshape(Cout, N, H, W), (1, 0, 2, 3))


def _reference(x_nchw, conv_w, gamma1, beta1, gamma2, beta2):
    """Pure-JAX f32 reference of the same forward pass (training-mode BN)."""
    def bn(x, g, b):  # x: NCHW
        mean = jnp.mean(x, axis=(0, 2, 3), keepdims=True)
        var = jnp.mean((x - mean) ** 2, axis=(0, 2, 3), keepdims=True)
        return ((x - mean) * lax.rsqrt(var + EPS) * g.reshape(1, -1, 1, 1)
                + b.reshape(1, -1, 1, 1))

    x = bn(x_nchw, gamma1, beta1)
    x = jnp.maximum(x, 0.0)
    y = jnp.einsum("nchw,oc->nohw", x, conv_w)
    return bn(y, gamma2, beta2)


if __name__ == "__main__":
    # Shapes implied by the module's forward: x468 = [1, 1088, 7, 7]
    N, Cin, H, W = 1, 1088, 7, 7
    Cout = 128

    key = jax.random.PRNGKey(0)
    k_x, k_w, k_g1, k_b1, k_g2, k_b2 = jax.random.split(key, 6)

    x = jax.random.normal(k_x, (N, Cin, H, W), dtype=jnp.float32)
    conv_w = jax.random.normal(k_w, (Cout, Cin), dtype=jnp.float32) * 0.02
    gamma1 = 1.0 + 0.1 * jax.random.normal(k_g1, (Cin,), dtype=jnp.float32)
    beta1 = 0.1 * jax.random.normal(k_b1, (Cin,), dtype=jnp.float32)
    gamma2 = 1.0 + 0.1 * jax.random.normal(k_g2, (Cout,), dtype=jnp.float32)
    beta2 = 0.1 * jax.random.normal(k_b2, (Cout,), dtype=jnp.float32)

    out = bn_relu_conv_bn(x, conv_w, gamma1, beta1, gamma2, beta2)
    out = jax.block_until_ready(out)

    ref = jax.block_until_ready(_reference(x, conv_w, gamma1, beta1, gamma2, beta2))
    assert out.shape == (N, Cout, H, W), out.shape
    max_err = float(jnp.max(jnp.abs(out - ref)))
    # bf16 MXU inputs with a K=1088 contraction -> slightly loosened bound.
    assert max_err < 2e-2, f"max abs error too large: {max_err}"

    print("KERNEL_OK")
</pallas_src>

<mosaic_0001>
module attributes {stable_mosaic.version = 11 : i64} {
  func.func @_bn_relu_conv_bn_kernel(%arg0: memref<1088x49xf32, #tpu.memory_space<vmem>>, %arg1: memref<128x1088xbf16, #tpu.memory_space<any>>, %arg2: memref<8x1088xf32, #tpu.memory_space<vmem>>, %arg3: memref<8x128xf32, #tpu.memory_space<vmem>>, %arg4: memref<128x49xf32, #tpu.memory_space<vmem>>, %arg5: memref<128x1088xbf16, #tpu.memory_space<vmem>>, %arg6: memref<!tpu.dma_semaphore, #tpu.memory_space<semaphore_mem>>) attributes {dimension_semantics = [], scalar_prefetch = 0 : i64, scratch_operands = 2 : i64, tpu.core_type = #tpu.core_type<tc>} {
    tpu.enqueue_dma source(%arg1 : memref<128x1088xbf16, #tpu.memory_space<any>>) target(%arg5 : memref<128x1088xbf16, #tpu.memory_space<vmem>>) target_semaphore(%arg6 : memref<!tpu.dma_semaphore, #tpu.memory_space<semaphore_mem>>)
    %c0 = arith.constant 0 : index
    %c0_0 = arith.constant 0 : index
    %0 = vector.load %arg2[%c0, %c0_0] : memref<8x1088xf32, #tpu.memory_space<vmem>>, vector<8x1088xf32>
    %1 = tpu.transpose %0, [1, 0] : vector<8x1088xf32> -> vector<1088x8xf32>
    %2 = vector.extract_strided_slice %1 {offsets = [0, 0], sizes = [1088, 1], strides = [1, 1]} : vector<1088x8xf32> to vector<1088x1xf32>
    %3 = vector.extract_strided_slice %1 {offsets = [0, 1], sizes = [1088, 1], strides = [1, 1]} : vector<1088x8xf32> to vector<1088x1xf32>
    %c0_1 = arith.constant 0 : index
    %c0_2 = arith.constant 0 : index
    %4 = vector.load %arg3[%c0_1, %c0_2] : memref<8x128xf32, #tpu.memory_space<vmem>>, vector<8x128xf32>
    %5 = tpu.transpose %4, [1, 0] : vector<8x128xf32> -> vector<128x8xf32>
    %6 = vector.extract_strided_slice %5 {offsets = [0, 0], sizes = [128, 1], strides = [1, 1]} : vector<128x8xf32> to vector<128x1xf32>
    %7 = vector.extract_strided_slice %5 {offsets = [0, 1], sizes = [128, 1], strides = [1, 1]} : vector<128x8xf32> to vector<128x1xf32>
    %c0_3 = arith.constant 0 : index
    %c0_4 = arith.constant 0 : index
    %8 = vector.load %arg0[%c0_3, %c0_4] : memref<1088x49xf32, #tpu.memory_space<vmem>>, vector<1088x49xf32>
    %cst = arith.constant dense<0.000000e+00> : vector<1088xf32>
    %9 = vector.multi_reduction <add>, %8, %cst [1] : vector<1088x49xf32> to vector<1088xf32>
    %10 = vector.shape_cast %9 : vector<1088xf32> to vector<1088x1xf32>
    %cst_5 = arith.constant 0.0204081628 : f32
    %11 = vector.broadcast %cst_5 : f32 to vector<1088x1xf32>
    %12 = arith.mulf %10, %11 : vector<1088x1xf32>
    %13 = vector.broadcast %12 : vector<1088x1xf32> to vector<1088x49xf32>
    %14 = arith.subf %8, %13 : vector<1088x49xf32>
    %15 = arith.mulf %14, %14 : vector<1088x49xf32>
    %cst_6 = arith.constant dense<0.000000e+00> : vector<1088xf32>
    %16 = vector.multi_reduction <add>, %15, %cst_6 [1] : vector<1088x49xf32> to vector<1088xf32>
    %17 = vector.shape_cast %16 : vector<1088xf32> to vector<1088x1xf32>
    %cst_7 = arith.constant 0.0204081628 : f32
    %18 = vector.broadcast %cst_7 : f32 to vector<1088x1xf32>
    %19 = arith.mulf %17, %18 : vector<1088x1xf32>
    %cst_8 = arith.constant 9.99999974E-6 : f32
    %20 = vector.broadcast %cst_8 : f32 to vector<1088x1xf32>
    %21 = arith.addf %19, %20 : vector<1088x1xf32>
    %22 = math.rsqrt %21 : vector<1088x1xf32>
    %23 = arith.mulf %2, %22 : vector<1088x1xf32>
    %24 = vector.broadcast %23 : vector<1088x1xf32> to vector<1088x49xf32>
    %25 = arith.mulf %14, %24 : vector<1088x49xf32>
    %26 = vector.broadcast %3 : vector<1088x1xf32> to vector<1088x49xf32>
    %27 = arith.addf %25, %26 : vector<1088x49xf32>
    %cst_9 = arith.constant 0.000000e+00 : f32
    %28 = vector.broadcast %cst_9 : f32 to vector<1088x49xf32>
    %29 = arith.maximumf %27, %28 : vector<1088x49xf32>
    %30 = arith.truncf %29 : vector<1088x49xf32> to vector<1088x49xbf16>
    tpu.wait_dma2 semaphore(%arg6 : memref<!tpu.dma_semaphore, #tpu.memory_space<semaphore_mem>>) src(%arg1 : memref<128x1088xbf16, #tpu.memory_space<any>>) dst(%arg5 : memref<128x1088xbf16, #tpu.memory_space<vmem>>)
    %c0_10 = arith.constant 0 : index
    %c0_11 = arith.constant 0 : index
    %31 = vector.load %arg5[%c0_10, %c0_11] : memref<128x1088xbf16, #tpu.memory_space<vmem>>, vector<128x1088xbf16>
    %cst_12 = arith.constant dense<0.000000e+00> : vector<128x49xf32>
    %32 = tpu.matmul %31, %30, %cst_12 {dimension_numbers = #tpu.dot_dimension_numbers<[1], [0], [0], [1], [0, 0, 1, 1], [], []>} : vector<128x1088xbf16>, vector<1088x49xbf16>, vector<128x49xf32> -> vector<128x49xf32>
    %cst_13 = arith.constant dense<0.000000e+00> : vector<128xf32>
    %33 = vector.multi_reduction <add>, %32, %cst_13 [1] : vector<128x49xf32> to vector<128xf32>
    %34 = vector.shape_cast %33 : vector<128xf32> to vector<128x1xf32>
    %cst_14 = arith.constant 0.0204081628 : f32
    %35 = vector.broadcast %cst_14 : f32 to vector<128x1xf32>
    %36 = arith.mulf %34, %35 : vector<128x1xf32>
    %37 = vector.broadcast %36 : vector<128x1xf32> to vector<128x49xf32>
    %38 = arith.subf %32, %37 : vector<128x49xf32>
    %39 = arith.mulf %38, %38 : vector<128x49xf32>
    %cst_15 = arith.constant dense<0.000000e+00> : vector<128xf32>
    %40 = vector.multi_reduction <add>, %39, %cst_15 [1] : vector<128x49xf32> to vector<128xf32>
    %41 = vector.shape_cast %40 : vector<128xf32> to vector<128x1xf32>
    %cst_16 = arith.constant 0.0204081628 : f32
    %42 = vector.broadcast %cst_16 : f32 to vector<128x1xf32>
    %43 = arith.mulf %41, %42 : vector<128x1xf32>
    %cst_17 = arith.constant 9.99999974E-6 : f32
    %44 = vector.broadcast %cst_17 : f32 to vector<128x1xf32>
    %45 = arith.addf %43, %44 : vector<128x1xf32>
    %46 = math.rsqrt %45 : vector<128x1xf32>
    %47 = arith.mulf %6, %46 : vector<128x1xf32>
    %48 = vector.broadcast %47 : vector<128x1xf32> to vector<128x49xf32>
    %49 = arith.mulf %38, %48 : vector<128x49xf32>
    %50 = vector.broadcast %7 : vector<128x1xf32> to vector<128x49xf32>
    %51 = arith.addf %49, %50 : vector<128x49xf32>
    %c0_18 = arith.constant 0 : index
    %c0_19 = arith.constant 0 : index
    %52 = vector.load %arg4[%c0_18, %c0_19] : memref<128x49xf32, #tpu.memory_space<vmem>>, vector<128x49xf32>
    tpu.vector_store %arg4[%c0_18, %c0_19], %51 {strides = array<i32>} : memref<128x49xf32, #tpu.memory_space<vmem>>, vector<128x49xf32>,
    return
  }
}

</mosaic_0001>

<bundles_post_ra>
// kernel: tpu_custom_call.1
= control target key start
LH: loop header
LB: loop body
LE: loop exit
PB: predicated region body
PF: predicated region fallthrough
CT: control target
= control target key end

     0   :  { %s11211_s0 = inlined_call_operand.vmem [shape: f32[1088,49], index: 0, kind: input, shape index: {}]   ;;  %s11212_s1 = inlined_call_operand.vmem [shape: bf16[128,1088], index: 1, kind: input, shape index: {}]   ;;  %s11213_s2 = inlined_call_operand.vmem [shape: f32[8,1088], index: 2, kind: input, shape index: {}]   ;;  %s11214_s3 = inlined_call_operand.vmem [shape: f32[8,128], index: 3, kind: input, shape index: {}]   ;;  %s11215_s4 = inlined_call_operand.vmem [shape: f32[128,49], index: 4, kind: output, shape index: {}]  }
   0x1   :  { %v49_v0 = vld [vmem:[%s11212_s1] sm:$0xff]  ;;  %v51_v1 = vld [vmem:[%s11212_s1 + $0x8] sm:$0xff]  ;;  %v53_v2 = vld [vmem:[%s11212_s1 + $0x10] sm:$0xff] }
   0x2   :  { %50 = vst [vmem:[#allocation2] sm:$0xff] %v49_v0  ;;  %52 = vst [vmem:[#allocation2 + $0x8] sm:$0xff] %v51_v1  ;;  %v55_v3 = vld [vmem:[%s11212_s1 + $0x18] sm:$0xff]  ;;  %v57_v4 = vld [vmem:[%s11212_s1 + $0x20] sm:$0xff] }
   0x3   :  { %54 = vst [vmem:[#allocation2 + $0x10] sm:$0xff] %v53_v2  ;;  %v59_v5 = vld [vmem:[%s11212_s1 + $0x28] sm:$0xff]  ;;  %56 = vst [vmem:[#allocation2 + $0x18] sm:$0xff] %v55_v3  ;;  %v61_v6 = vld [vmem:[%s11212_s1 + $0x30] sm:$0xff] }
   0x4   :  { %58 = vst [vmem:[#allocation2 + $0x20] sm:$0xff] %v57_v4  ;;  %60 = vst [vmem:[#allocation2 + $0x28] sm:$0xff] %v59_v5  ;;  %v63_v7 = vld [vmem:[%s11212_s1 + $0x38] sm:$0xff]  ;;  %v65_v8 = vld [vmem:[%s11212_s1 + $0x40] sm:$0xff] }
   0x5   :  { %62 = vst [vmem:[#allocation2 + $0x30] sm:$0xff] %v61_v6  ;;  %64 = vst [vmem:[#allocation2 + $0x38] sm:$0xff] %v63_v7  ;;  %v67_v9 = vld [vmem:[%s11212_s1 + $0x48] sm:$0xff]  ;;  %v69_v10 = vld [vmem:[%s11212_s1 + $0x50] sm:$0xff] }
   0x6   :  { %66 = vst [vmem:[#allocation2 + $0x40] sm:$0xff] %v65_v8  ;;  %v71_v11 = vld [vmem:[%s11212_s1 + $0x58] sm:$0xff]  ;;  %68 = vst [vmem:[#allocation2 + $0x48] sm:$0xff] %v67_v9  ;;  %v73_v12 = vld [vmem:[%s11212_s1 + $0x60] sm:$0xff] }
   0x7   :  { %70 = vst [vmem:[#allocation2 + $0x50] sm:$0xff] %v69_v10  ;;  %72 = vst [vmem:[#allocation2 + $0x58] sm:$0xff] %v71_v11  ;;  %v75_v13 = vld [vmem:[%s11212_s1 + $0x68] sm:$0xff]  ;;  %v77_v14 = vld [vmem:[%s11212_s1 + $0x70] sm:$0xff] }
   0x8   :  { %74 = vst [vmem:[#allocation2 + $0x60] sm:$0xff] %v73_v12  ;;  %76 = vst [vmem:[#allocation2 + $0x68] sm:$0xff] %v75_v13  ;;  %v79_v15 = vld [vmem:[%s11212_s1 + $0x78] sm:$0xff]  ;;  %v81_v16 = vld [vmem:[%s11212_s1 + $0x80] sm:$0xff] }
   0x9   :  { %78 = vst [vmem:[#allocation2 + $0x70] sm:$0xff] %v77_v14  ;;  %v83_v17 = vld [vmem:[%s11212_s1 + $0x88] sm:$0xff]  ;;  %80 = vst [vmem:[#allocation2 + $0x78] sm:$0xff] %v79_v15  ;;  %v85_v18 = vld [vmem:[%s11212_s1 + $0x90] sm:$0xff] }
   0xa   :  { %82 = vst [vmem:[#allocation2 + $0x80] sm:$0xff] %v81_v16  ;;  %84 = vst [vmem:[#allocation2 + $0x88] sm:$0xff] %v83_v17  ;;  %v87_v19 = vld [vmem:[%s11212_s1 + $0x98] sm:$0xff]  ;;  %v89_v20 = vld [vmem:[%s11212_s1 + $0xa0] sm:$0xff] }
   0xb   :  { %86 = vst [vmem:[#allocation2 + $0x90] sm:$0xff] %v85_v18  ;;  %88 = vst [vmem:[#allocation2 + $0x98] sm:$0xff] %v87_v19  ;;  %v91_v21 = vld [vmem:[%s11212_s1 + $0xa8] sm:$0xff]  ;;  %v93_v22 = vld [vmem:[%s11212_s1 + $0xb0] sm:$0xff] }
   0xc   :  { %90 = vst [vmem:[#allocation2 + $0xa0] sm:$0xff] %v89_v20  ;;  %v95_v23 = vld [vmem:[%s11212_s1 + $0xb8] sm:$0xff]  ;;  %92 = vst [vmem:[#allocation2 + $0xa8] sm:$0xff] %v91_v21  ;;  %v97_v24 = vld [vmem:[%s11212_s1 + $0xc0] sm:$0xff] }
   0xd   :  { %94 = vst [vmem:[#allocation2 + $0xb0] sm:$0xff] %v93_v22  ;;  %96 = vst [vmem:[#allocation2 + $0xb8] sm:$0xff] %v95_v23  ;;  %v99_v25 = vld [vmem:[%s11212_s1 + $0xc8] sm:$0xff]  ;;  %v101_v26 = vld [vmem:[%s11212_s1 + $0xd0] sm:$0xff] }
   0xe   :  { %98 = vst [vmem:[#allocation2 + $0xc0] sm:$0xff] %v97_v24  ;;  %100 = vst [vmem:[#allocation2 + $0xc8] sm:$0xff] %v99_v25  ;;  %v103_v27 = vld [vmem:[%s11212_s1 + $0xd8] sm:$0xff]  ;;  %v105_v28 = vld [vmem:[%s11212_s1 + $0xe0] sm:$0xff] }
   0xf   :  { %102 = vst [vmem:[#allocation2 + $0xd0] sm:$0xff] %v101_v26  ;;  %v107_v29 = vld [vmem:[%s11212_s1 + $0xe8] sm:$0xff]  ;;  %104 = vst [vmem:[#allocation2 + $0xd8] sm:$0xff] %v103_v27  ;;  %v109_v30 = vld [vmem:[%s11212_s1 + $0xf0] sm:$0xff] }
  0x10   :  { %106 = vst [vmem:[#allocation2 + $0xe0] sm:$0xff] %v105_v28  ;;  %108 = vst [vmem:[#allocation2 + $0xe8] sm:$0xff] %v107_v29  ;;  %v111_v31 = vld [vmem:[%s11212_s1 + $0xf8] sm:$0xff]  ;;  %v113_v32 = vld [vmem:[%s11212_s1 + $0x100] sm:$0xff] }
  0x11   :  { %110 = vst [vmem:[#allocation2 + $0xf0] sm:$0xff] %v109_v30  ;;  %112 = vst [vmem:[#allocation2 + $0xf8] sm:$0xff] %v111_v31  ;;  %v115_v33 = vld [vmem:[%s11212_s1 + $0x108] sm:$0xff]  ;;  %v117_v34 = vld [vmem:[%s11212_s1 + $0x110] sm:$0xff] }
  0x12   :  { %114 = vst [vmem:[#allocation2 + $0x100] sm:$0xff] %v113_v32  ;;  %v119_v35 = vld [vmem:[%s11212_s1 + $0x118] sm:$0xff]  ;;  %116 = vst [vmem:[#allocation2 + $0x108] sm:$0xff] %v115_v33  ;;  %v121_v36 = vld [vmem:[%s11212_s1 + $0x120] sm:$0xff] }
  0x13   :  { %118 = vst [vmem:[#allocation2 + $0x110] sm:$0xff] %v117_v34  ;;  %120 = vst [vmem:[#allocation2 + $0x118] sm:$0xff] %v119_v35  ;;  %v123_v37 = vld [vmem:[%s11212_s1 + $0x128] sm:$0xff]  ;;  %v125_v38 = vld [vmem:[%s11212_s1 + $0x130] sm:$0xff] }
  0x14   :  { %122 = vst [vmem:[#allocation2 + $0x120] sm:$0xff] %v121_v36  ;;  %124 = vst [vmem:[#allocation2 + $0x128] sm:$0xff] %v123_v37  ;;  %v127_v39 = vld [vmem:[%s11212_s1 + $0x138] sm:$0xff]  ;;  %v129_v40 = vld [vmem:[%s11212_s1 + $0x140] sm:$0xff] }
  0x15   :  { %126 = vst [vmem:[#allocation2 + $0x130] sm:$0xff] %v125_v38  ;;  %v131_v41 = vld [vmem:[%s11212_s1 + $0x148] sm:$0xff]  ;;  %128 = vst [vmem:[#allocation2 + $0x138] sm:$0xff] %v127_v39  ;;  %v133_v42 = vld [vmem:[%s11212_s1 + $0x150] sm:$0xff] }
  0x16   :  { %130 = vst [vmem:[#allocation2 + $0x140] sm:$0xff] %v129_v40  ;;  %132 = vst [vmem:[#allocation2 + $0x148] sm:$0xff] %v131_v41  ;;  %v135_v43 = vld [vmem:[%s11212_s1 + $0x158] sm:$0xff]  ;;  %v137_v44 = vld [vmem:[%s11212_s1 + $0x160] sm:$0xff] }
  0x17   :  { %134 = vst [vmem:[#allocation2 + $0x150] sm:$0xff] %v133_v42  ;;  %136 = vst [vmem:[#allocation2 + $0x158] sm:$0xff] %v135_v43  ;;  %v139_v45 = vld [vmem:[%s11212_s1 + $0x168] sm:$0xff]  ;;  %v141_v46 = vld [vmem:[%s11212_s1 + $0x170] sm:$0xff] }
  0x18   :  { %138 = vst [vmem:[#allocation2 + $0x160] sm:$0xff] %v137_v44  ;;  %v143_v47 = vld [vmem:[%s11212_s1 + $0x178] sm:$0xff]  ;;  %140 = vst [vmem:[#allocation2 + $0x168] sm:$0xff] %v139_v45  ;;  %v145_v48 = vld [vmem:[%s11212_s1 + $0x180] sm:$0xff] }
  0x19   :  { %142 = vst [vmem:[#allocation2 + $0x170] sm:$0xff] %v141_v46  ;;  %144 = vst [vmem:[#allocation2 + $0x178] sm:$0xff] %v143_v47  ;;  %v147_v49 = vld [vmem:[%s11212_s1 + $0x188] sm:$0xff]  ;;  %v149_v50 = vld [vmem:[%s11212_s1 + $0x190] sm:$0xff] }
  0x1a   :  { %146 = vst [vmem:[#allocation2 + $0x180] sm:$0xff] %v145_v48  ;;  %148 = vst [vmem:[#allocation2 + $0x188] sm:$0xff] %v147_v49  ;;  %v151_v51 = vld [vmem:[%s11212_s1 + $0x198] sm:$0xff]  ;;  %v153_v52 = vld [vmem:[%s11212_s1 + $0x1a0] sm:$0xff] }
  0x1b   :  { %150 = vst [vmem:[#allocation2 + $0x190] sm:$0xff] %v149_v50  ;;  %v155_v53 = vld [vmem:[%s11212_s1 + $0x1a8] sm:$0xff]  ;;  %152 = vst [vmem:[#allocation2 + $0x198] sm:$0xff] %v151_v51  ;;  %v157_v54 = vld [vmem:[%s11212_s1 + $0x1b0] sm:$0xff] }
  0x1c   :  { %154 = vst [vmem:[#allocation2 + $0x1a0] sm:$0xff] %v153_v52  ;;  %156 = vst [vmem:[#allocation2 + $0x1a8] sm:$0xff] %v155_v53  ;;  %v159_v55 = vld [vmem:[%s11212_s1 + $0x1b8] sm:$0xff]  ;;  %v161_v56 = vld [vmem:[%s11212_s1 + $0x1c0] sm:$0xff] }
  0x1d   :  { %158 = vst [vmem:[#allocation2 + $0x1b0] sm:$0xff] %v157_v54  ;;  %160 = vst [vmem:[#allocation2 + $0x1b8] sm:$0xff] %v159_v55  ;;  %v163_v57 = vld [vmem:[%s11212_s1 + $0x1c8] sm:$0xff]  ;;  %v165_v58 = vld [vmem:[%s11212_s1 + $0x1d0] sm:$0xff] }
  0x1e   :  { %162 = vst [vmem:[#allocation2 + $0x1c0] sm:$0xff] %v161_v56  ;;  %v167_v59 = vld [vmem:[%s11212_s1 + $0x1d8] sm:$0xff]  ;;  %164 = vst [vmem:[#allocation2 + $0x1c8] sm:$0xff] %v163_v57  ;;  %v169_v60 = vld [vmem:[%s11212_s1 + $0x1e0] sm:$0xff] }
  0x1f   :  { %166 = vst [vmem:[#allocation2 + $0x1d0] sm:$0xff] %v165_v58  ;;  %168 = vst [vmem:[#allocation2 + $0x1d8] sm:$0xff] %v167_v59  ;;  %v171_v61 = vld [vmem:[%s11212_s1 + $0x1e8] sm:$0xff]  ;;  %v173_v62 = vld [vmem:[%s11212_s1 + $0x1f0] sm:$0xff] }
  0x20   :  { %170 = vst [vmem:[#allocation2 + $0x1e0] sm:$0xff] %v169_v60  ;;  %172 = vst [vmem:[#allocation2 + $0x1e8] sm:$0xff] %v171_v61  ;;  %v175_v63 = vld [vmem:[%s11212_s1 + $0x1f8] sm:$0xff]  ;;  %v177_v0 = vld [vmem:[%s11212_s1 + $0x200] sm:$0xff] }
  0x21   :  { %174 = vst [vmem:[#allocation2 + $0x1f0] sm:$0xff] %v173_v62  ;;  %v179_v1 = vld [vmem:[%s11212_s1 + $0x208] sm:$0xff]  ;;  %176 = vst [vmem:[#allocation2 + $0x1f8] sm:$0xff] %v175_v63  ;;  %v181_v2 = vld [vmem:[%s11212_s1 + $0x210] sm:$0xff] }
  0x22   :  { %178 = vst [vmem:[#allocation2 + $0x200] sm:$0xff] %v177_v0  ;;  %180 = vst [vmem:[#allocation2 + $0x208] sm:$0xff] %v179_v1  ;;  %v183_v3 = vld [vmem:[%s11212_s1 + $0x218] sm:$0xff]  ;;  %v185_v4 = vld [vmem:[%s11212_s1 + $0x220] sm:$0xff] }
  0x23   :  { %182 = vst [vmem:[#allocation2 + $0x210] sm:$0xff] %v181_v2  ;;  %184 = vst [vmem:[#allocation2 + $0x218] sm:$0xff] %v183_v3  ;;  %v187_v5 = vld [vmem:[%s11212_s1 + $0x228] sm:$0xff]  ;;  %v189_v6 = vld [vmem:[%s11212_s1 + $0x230] sm:$0xff] }
  0x24   :  { %186 = vst [vmem:[#allocation2 + $0x220] sm:$0xff] %v185_v4  ;;  %v191_v7 = vld [vmem:[%s11212_s1 + $0x238] sm:$0xff]  ;;  %188 = vst [vmem:[#allocation2 + $0x228] sm:$0xff] %v187_v5  ;;  %v203_v8 = vld [vmem:[%s11213_s2 + $0x10] sm:$0xff] }
  0x25   :  { %190 = vst [vmem:[#allocation2 + $0x230] sm:$0xff] %v189_v6  ;;  %192 = vst [vmem:[#allocation2 + $0x238] sm:$0xff] %v191_v7  ;;  %v201_v9 = vld [vmem:[%s11213_s2] sm:$0xff]  ;;  %274 = vxpose.xlu1.b32.start.end [1/1] (short) %v203_v8, 128 }
  0x26   :  { %210 = vxpose.xlu0.b32.start.end [1/1] (short) %v201_v9, 128 }
  0x27   :  { %200 = vsyncadd [#allocation3], 9216  ;;  %v204_v10 = vld [vmem:[%s11213_s2 + $0x18] sm:$0xff]  ;;  %v202_v11 = vld [vmem:[%s11213_s2 + $0x8] sm:$0xff]  ;;  %vm667_vm0 = vcmask 400384  }
  0x28   :  { %v206_v12 = vld [vmem:[%s11213_s2 + $0x28] sm:$0xff]  ;;  %v205_v13 = vld [vmem:[%s11213_s2 + $0x20] sm:$0xff]  ;;  %v208_v43 = vld [vmem:[%s11213_s2 + $0x38] sm:$0xff] }
  0x29   :  { %v207_v45 = vld [vmem:[%s11213_s2 + $0x30] sm:$0xff] }
  0x62   :  { %306 = vxpose.xlu1.b32.start.end [1/1] (short) %v204_v10, 128 }
  0x63   :  { %242 = vxpose.xlu0.b32.start.end [1/1] (short) %v202_v11, 128 }
  0x9f   :  { %370 = vxpose.xlu1.b32.start.end [1/1] (short) %v206_v12, 128  ;;  %v498_v12 = vld [vmem:[%s11214_s3] sm:$0xff] }
  0xa0   :  { %338 = vxpose.xlu0.b32.start.end [1/1] (short) %v205_v13, 128  ;;  %v209_v13 = vld [vmem:[%s11213_s2 + $0x40] sm:$0xff] }
  0xa1   :  { %v6860_v14 = vpop.trf.xlu1 }
  0xa2   :  { %11509 = vst [vmem:[#allocation6_spill] sm:$0xff] %v6860_v14  ;;  %v6862_v15 = vpop.trf.xlu0 }
  0xa3   :  { %11510 = vst [vmem:[#allocation7_spill] sm:$0xff] %v6862_v15 }
  0xa5   :  { %v6864_v16 = vpop.trf.xlu1 }
  0xa6   :  { %11511 = vst [vmem:[#allocation8_spill] sm:$0xff] %v6864_v16  ;;  %v6866_v17 = vpop.trf.xlu0 }
  0xa7   :  { %11512 = vst [vmem:[#allocation9_spill] sm:$0xff] %v6866_v17 }
  0xa9   :  { %v6868_v18 = vpop.trf.xlu1 }
  0xaa   :  { %11513 = vst [vmem:[#allocation10_spill] sm:$0xff] %v6868_v18  ;;  %v6870_v19 = vpop.trf.xlu0 }
  0xab   :  { %11514 = vst [vmem:[#allocation11_spill] sm:$0xff] %v6870_v19 }
  0xad   :  { %v6872_v20 = vpop.trf.xlu1 }
  0xae   :  { %11515 = vst [vmem:[#allocation12_spill] sm:$0xff] %v6872_v20  ;;  %v6874_v21 = vpop.trf.xlu0 }
  0xaf   :  { %11516 = vst [vmem:[#allocation13_spill] sm:$0xff] %v6874_v21 }
  0xb1   :  { %v6876_v22 = vpop.trf.xlu1 }
  0xb2   :  { %11517 = vst [vmem:[#allocation14_spill] sm:$0xff] %v6876_v22  ;;  %v6878_v23 = vpop.trf.xlu0 }
  0xb3   :  { %11518 = vst [vmem:[#allocation15_spill] sm:$0xff] %v6878_v23 }
  0xb5   :  { %v6880_v24 = vpop.trf.xlu1 }
  0xb6   :  { %11519 = vst [vmem:[#allocation16_spill] sm:$0xff] %v6880_v24  ;;  %v6882_v25 = vpop.trf.xlu0 }
  0xb7   :  { %11520 = vst [vmem:[#allocation17_spill] sm:$0xff] %v6882_v25 }
  0xb9   :  { %v6884_v26 = vpop.trf.xlu1 }
  0xba   :  { %11521 = vst [vmem:[#allocation18_spill] sm:$0xff] %v6884_v26  ;;  %v6886_v27 = vpop.trf.xlu0 }
  0xbb   :  { %11522 = vst [vmem:[#allocation19_spill] sm:$0xff] %v6886_v27 }
  0xbd   :  { %v6888_v28 = vpop.trf.xlu1 }
  0xbe   :  { %11523 = vst [vmem:[#allocation20_spill] sm:$0xff] %v6888_v28  ;;  %v6890_v29 = vpop.trf.xlu0 }
  0xbf   :  { %11524 = vst [vmem:[#allocation21_spill] sm:$0xff] %v6890_v29 }
  0xc1   :  { %v6892_v30 = vpop.trf.xlu1 }
  0xc2   :  { %11525 = vst [vmem:[#allocation22_spill] sm:$0xff] %v6892_v30  ;;  %v6894_v31 = vpop.trf.xlu0 }
  0xc3   :  { %11526 = vst [vmem:[#allocation23_spill] sm:$0xff] %v6894_v31 }
  0xc5   :  { %v6896_v32 = vpop.trf.xlu1 }
  0xc6   :  { %11527 = vst [vmem:[#allocation24_spill] sm:$0xff] %v6896_v32  ;;  %v6898_v33 = vpop.trf.xlu0 }
  0xc7   :  { %11528 = vst [vmem:[#allocation25_spill] sm:$0xff] %v6898_v33 }
  0xc9   :  { %v6900_v34 = vpop.trf.xlu1 }
  0xca   :  { %11529 = vst [vmem:[#allocation26_spill] sm:$0xff] %v6900_v34  ;;  %v6902_v35 = vpop.trf.xlu0 }
  0xcb   :  { %11530 = vst [vmem:[#allocation27_spill] sm:$0xff] %v6902_v35 }
  0xcd   :  { %v6904_v36 = vpop.trf.xlu1 }
  0xce   :  { %11531 = vst [vmem:[#allocation28_spill] sm:$0xff] %v6904_v36  ;;  %v6906_v37 = vpop.trf.xlu0 }
  0xcf   :  { %11532 = vst [vmem:[#allocation29_spill] sm:$0xff] %v6906_v37 }
  0xd1   :  { %v6908_v38 = vpop.trf.xlu1 }
  0xd2   :  { %11533 = vst [vmem:[#allocation30_spill] sm:$0xff] %v6908_v38  ;;  %v6910_v39 = vpop.trf.xlu0 }
  0xd3   :  { %11534 = vst [vmem:[#allocation31_spill] sm:$0xff] %v6910_v39 }
  0xd5   :  { %v6912_v40 = vpop.trf.xlu1 }
  0xd6   :  { %11535 = vst [vmem:[#allocation32_spill] sm:$0xff] %v6912_v40  ;;  %v6914_v41 = vpop.trf.xlu0 }
  0xd7   :  { %11536 = vst [vmem:[#allocation33_spill] sm:$0xff] %v6914_v41 }
  0xd9   :  { %v6916_v42 = vpop.trf.xlu1 }
  0xda   :  { %11537 = vst [vmem:[#allocation34_spill] sm:$0xff] %v6916_v42  ;;  %v6921_v44 = vpop.trf.xlu0 }
  0xdb   :  { %11538 = vst [vmem:[#allocation35_spill] sm:$0xff] %v6921_v44 }
  0xdc   :  { %434 = vxpose.xlu1.b32.start.end [1/1] (short) %v208_v43, 128 }
  0xdd   :  { %402 = vxpose.xlu0.b32.start.end [1/1] (short) %v207_v45, 128  ;;  %v6926_v46 = vpop.trf.xlu1 }
  0xde   :  { %11539 = vst [vmem:[#allocation36_spill] sm:$0xff] %v6926_v46  ;;  %v6928_v47 = vpop.trf.xlu0 }
  0xdf   :  { %11540 = vst [vmem:[#allocation37_spill] sm:$0xff] %v6928_v47 }
  0xe1   :  { %v6930_v48 = vpop.trf.xlu1 }
  0xe2   :  { %11541 = vst [vmem:[#allocation38_spill] sm:$0xff] %v6930_v48  ;;  %v6932_v49 = vpop.trf.xlu0 }
  0xe3   :  { %11542 = vst [vmem:[#allocation39_spill] sm:$0xff] %v6932_v49 }
  0xe5   :  { %v6934_v50 = vpop.trf.xlu1 }
  0xe6   :  { %11543 = vst [vmem:[#allocation40_spill] sm:$0xff] %v6934_v50  ;;  %v6936_v51 = vpop.trf.xlu0 }
  0xe7   :  { %11544 = vst [vmem:[#allocation41_spill] sm:$0xff] %v6936_v51 }
  0xe9   :  { %v6938_v52 = vpop.trf.xlu1 }
  0xea   :  { %11545 = vst [vmem:[#allocation42_spill] sm:$0xff] %v6938_v52  ;;  %v6940_v53 = vpop.trf.xlu0 }
  0xeb   :  { %11546 = vst [vmem:[#allocation43_spill] sm:$0xff] %v6940_v53 }
  0xed   :  { %v6942_v54 = vpop.trf.xlu1 }
  0xee   :  { %11547 = vst [vmem:[#allocation44_spill] sm:$0xff] %v6942_v54  ;;  %v6944_v55 = vpop.trf.xlu0 }
  0xef   :  { %11548 = vst [vmem:[#allocation45_spill] sm:$0xff] %v6944_v55 }
  0xf1   :  { %v6946_v56 = vpop.trf.xlu1 }
  0xf2   :  { %11549 = vst [vmem:[#allocation46_spill] sm:$0xff] %v6946_v56  ;;  %v6948_v57 = vpop.trf.xlu0 }
  0xf3   :  { %11550 = vst [vmem:[#allocation47_spill] sm:$0xff] %v6948_v57 }
  0xf5   :  { %v6950_v58 = vpop.trf.xlu1 }
  0xf6   :  { %11551 = vst [vmem:[#allocation48_spill] sm:$0xff] %v6950_v58  ;;  %v6952_v59 = vpop.trf.xlu0 }
  0xf7   :  { %11552 = vst [vmem:[#allocation49_spill] sm:$0xff] %v6952_v59 }
  0xf9   :  { %v6954_v60 = vpop.trf.xlu1 }
  0xfa   :  { %11553 = vst [vmem:[#allocation50_spill] sm:$0xff] %v6954_v60  ;;  %v6956_v61 = vpop.trf.xlu0 }
  0xfb   :  { %11554 = vst [vmem:[#allocation51_spill] sm:$0xff] %v6956_v61 }
  0xfd   :  { %v6958_v62 = vpop.trf.xlu1 }
  0xfe   :  { %11555 = vst [vmem:[#allocation52_spill] sm:$0xff] %v6958_v62  ;;  %v6960_v63 = vpop.trf.xlu0 }
  0xff   :  { %11556 = vst [vmem:[#allocation53_spill] sm:$0xff] %v6960_v63 }
 0x101   :  { %v6962_v0 = vpop.trf.xlu1 }
 0x102   :  { %11557 = vst [vmem:[#allocation54_spill] sm:$0xff] %v6962_v0  ;;  %v6964_v1 = vpop.trf.xlu0 }
 0x103   :  { %11558 = vst [vmem:[#allocation55_spill] sm:$0xff] %v6964_v1 }
 0x105   :  { %v6966_v2 = vpop.trf.xlu1 }
 0x106   :  { %11559 = vst [vmem:[#allocation56_spill] sm:$0xff] %v6966_v2  ;;  %v6968_v3 = vpop.trf.xlu0 }
 0x107   :  { %11560 = vst [vmem:[#allocation57_spill] sm:$0xff] %v6968_v3 }
 0x109   :  { %v6970_v4 = vpop.trf.xlu1 }
 0x10a   :  { %11561 = vst [vmem:[#allocation58_spill] sm:$0xff] %v6970_v4  ;;  %v6972_v5 = vpop.trf.xlu0 }
 0x10b   :  { %11562 = vst [vmem:[#allocation59_spill] sm:$0xff] %v6972_v5 }
 0x10d   :  { %v6974_v6 = vpop.trf.xlu1 }
 0x10e   :  { %11563 = vst [vmem:[#allocation60_spill] sm:$0xff] %v6974_v6  ;;  %v6976_v7 = vpop.trf.xlu0 }
 0x10f   :  { %11564 = vst [vmem:[#allocation61_spill] sm:$0xff] %v6976_v7 }
 0x111   :  { %v6978_v8 = vpop.trf.xlu1 }
 0x112   :  { %11565 = vst [vmem:[#allocation62_spill] sm:$0xff] %v6978_v8  ;;  %v6980_v9 = vpop.trf.xlu0 }
 0x113   :  { %11566 = vst [vmem:[#allocation63_spill] sm:$0xff] %v6980_v9 }
 0x115   :  { %v6982_v10 = vpop.trf.xlu1 }
 0x116   :  { %11567 = vst [vmem:[#allocation64_spill] sm:$0xff] %v6982_v10  ;;  %v6984_v11 = vpop.trf.xlu0 }
 0x117   :  { %11568 = vst [vmem:[#allocation65_spill] sm:$0xff] %v6984_v11 }
 0x119   :  { %v6992_v43 = vpop.trf.xlu1  ;;  %499 = vxpose.xlu1.b32.start.end [1/1] (short) %v498_v12, 128 }
 0x11a   :  { %11569 = vst [vmem:[#allocation66_spill] sm:$0xff] %v6992_v43  ;;  %466 = vxpose.xlu0.b32.start.end [1/1] (short) (narrow) %v209_v13, 64  ;;  %v6994_v45 = vpop.trf.xlu0 }
 0x11b   :  { %11570 = vst [vmem:[#allocation67_spill] sm:$0xff] %v6994_v45 }
 0x11d   :  { %v6996_v8 = vpop.trf.xlu1 }
 0x11e   :  { %11571 = vst [vmem:[#allocation68_spill] sm:$0xff] %v6996_v8  ;;  %v6998_v4 = vpop.trf.xlu0 }
 0x11f   :  { %11572 = vst [vmem:[#allocation69_spill] sm:$0xff] %v6998_v4 }
 0x121   :  { %v7000_v0 = vpop.trf.xlu1 }
 0x122   :  { %11573 = vst [vmem:[#allocation70_spill] sm:$0xff] %v7000_v0  ;;  %v7002_v60 = vpop.trf.xlu0 }
 0x123   :  { %11574 = vst [vmem:[#allocation71_spill] sm:$0xff] %v7002_v60 }
 0x125   :  { %v7004_v56 = vpop.trf.xlu1 }
 0x126   :  { %11575 = vst [vmem:[#allocation72_spill] sm:$0xff] %v7004_v56  ;;  %v7006_v52 = vpop.trf.xlu0 }
 0x127   :  { %11576 = vst [vmem:[#allocation73_spill] sm:$0xff] %v7006_v52 }
 0x129   :  { %v7008_v10 = vpop.trf.xlu1 }
 0x12a   :  { %11577 = vst [vmem:[#allocation74_spill] sm:$0xff] %v7008_v10  ;;  %v7010_v48 = vpop.trf.xlu0 }
 0x12b   :  { %11578 = vst [vmem:[#allocation75_spill] sm:$0xff] %v7010_v48 }
 0x12d   :  { %v7012_v12 = vpop.trf.xlu1 }
 0x12e   :  { %11579 = vst [vmem:[#allocation76_spill] sm:$0xff] %v7012_v12  ;;  %v7014_v13 = vpop.trf.xlu0 }
 0x12f   :  { %11580 = vst [vmem:[#allocation77_spill] sm:$0xff] %v7014_v13 }
 0x131   :  { %v7016_v43 = vpop.trf.xlu1 }
 0x132   :  { %11581 = vst [vmem:[#allocation78_spill] sm:$0xff] %v7016_v43  ;;  %v7018_v8 = vpop.trf.xlu0 }
 0x133   :  { %11582 = vst [vmem:[#allocation79_spill] sm:$0xff] %v7018_v8 }
 0x135   :  { %v7020_v6 = vpop.trf.xlu1 }
 0x136   :  { %11583 = vst [vmem:[#allocation80_spill] sm:$0xff] %v7020_v6  ;;  %v7022_v0 = vpop.trf.xlu0 }
 0x137   :  { %11584 = vst [vmem:[#allocation81_spill] sm:$0xff] %v7022_v0 }
 0x139   :  { %v7024_v60 = vpop.trf.xlu1 }
 0x13a   :  { %11585 = vst [vmem:[#allocation82_spill] sm:$0xff] %v7024_v60  ;;  %v7026_v56 = vpop.trf.xlu0 }
 0x13b   :  { %11586 = vst [vmem:[#allocation83_spill] sm:$0xff] %v7026_v56 }
 0x13d   :  { %v7028_v52 = vpop.trf.xlu1 }
 0x13e   :  { %11587 = vst [vmem:[#allocation84_spill] sm:$0xff] %v7028_v52  ;;  %v7030_v10 = vpop.trf.xlu0 }
 0x13f   :  { %11588 = vst [vmem:[#allocation85_spill] sm:$0xff] %v7030_v10 }
 0x141   :  { %v7032_v48 = vpop.trf.xlu1 }
 0x142   :  { %11589 = vst [vmem:[#allocation86_spill] sm:$0xff] %v7032_v48  ;;  %v7034_v12 = vpop.trf.xlu0 }
 0x143   :  { %11590 = vst [vmem:[#allocation87_spill] sm:$0xff] %v7034_v12 }
 0x145   :  { %v7036_v13 = vpop.trf.xlu1 }
 0x146   :  { %11591 = vst [vmem:[#allocation88_spill] sm:$0xff] %v7036_v13  ;;  %v7038_v43 = vpop.trf.xlu0 }
 0x147   :  { %11592 = vst [vmem:[#allocation89_spill] sm:$0xff] %v7038_v43 }
 0x149   :  { %v7040_v8 = vpop.trf.xlu1 }
 0x14a   :  { %11593 = vst [vmem:[#allocation90_spill] sm:$0xff] %v7040_v8  ;;  %v7042_v6 = vpop.trf.xlu0  ;;  %v531_v8 = vld [vmem:[%s11211_s0] sm:$0xff] }
 0x14b   :  { %11594 = vst [vmem:[#allocation91_spill] sm:$0xff] %v7042_v6 }
 0x14d   :  { %v7044_v0 = vpop.trf.xlu1 }
 0x14e   :  { %11595 = vst [vmem:[#allocation92_spill] sm:$0xff] %v7044_v0  ;;  %v7046_v60 = vpop.trf.xlu0 }
 0x14f   :  { %11596 = vst [vmem:[#allocation93_spill] sm:$0xff] %v7046_v60 }
 0x151   :  { %v7048_v56 = vpop.trf.xlu1 }
 0x152   :  { %11597 = vst [vmem:[#allocation94_spill] sm:$0xff] %v7048_v56  ;;  %v7050_v52 = vpop.trf.xlu0  ;;  %v668_v56 = vsel %vm667_vm0, %v531_v8, 0.0 }
 0x153   :  { %11598 = vst [vmem:[#allocation95_spill] sm:$0xff] %v7050_v52 }
 0x155   :  { %v7052_v10 = vpop.trf.xlu1 }
 0x156   :  { %11599 = vst [vmem:[#allocation96_spill] sm:$0xff] %v7052_v10  ;;  %v7054_v48 = vpop.trf.xlu0  ;;  %v533_v10 = vld [vmem:[%s11211_s0 + $0x10] sm:$0xff] }
 0x157   :  { %11600 = vst [vmem:[#allocation97_spill] sm:$0xff] %v7054_v48  ;;  %v534_v48 = vld [vmem:[%s11211_s0 + $0x18] sm:$0xff] }
 0x158   :  { %v677_v8 = vsel %vm667_vm0, %v534_v48, 0.0 }
 0x159   :  { %v7056_v12 = vpop.trf.xlu1 }
 0x15a   :  { %11601 = vst [vmem:[#allocation98_spill] sm:$0xff] %v7056_v12  ;;  %v7058_v13 = vpop.trf.xlu0 }
 0x15b   :  { %11602 = vst [vmem:[#allocation99_spill] sm:$0xff] %v7058_v13  ;;  %v674_v13 = vsel %vm667_vm0, %v533_v10, 0.0 }
 0x15d   :  { %v7063_v0 = vpop.trf.xlu1 }
 0x15e   :  { %11603 = vst [vmem:[#allocation100_spill] sm:$0xff] %v7063_v0  ;;  %v7065_v6 = vpop.trf.xlu0 }
 0x15f   :  { %11604 = vst [vmem:[#allocation101_spill] sm:$0xff] %v7065_v6 }
 0x161   :  { %v7071_v52 = vpop.trf.xlu1 }
 0x162   :  { %11605 = vst [vmem:[#allocation102_spill] sm:$0xff] %v7071_v52  ;;  %v7073_v12 = vpop.trf.xlu0  ;;  %v535_v52 = vld [vmem:[%s11211_s0 + $0x20] sm:$0xff] }
 0x163   :  { %11606 = vst [vmem:[#allocation103_spill] sm:$0xff] %v7073_v12  ;;  %669 = vadd.xlane.f32.xlu0 %v668_v56  ;;  %v680_v10 = vsel %vm667_vm0, %v535_v52, 0.0 }
 0x165   :  { %v7079_v0 = vpop.trf.xlu1 }
 0x166   :  { %11607 = vst [vmem:[#allocation104_spill] sm:$0xff] %v7079_v0  ;;  %v7081_v6 = vpop.trf.xlu0  ;;  %v536_v0 = vld [vmem:[%s11211_s0 + $0x28] sm:$0xff] }
 0x167   :  { %11608 = vst [vmem:[#allocation105_spill] sm:$0xff] %v7081_v6  ;;  %675 = vadd.xlane.f32.xlu0 %v674_v13  ;;  %v683_v48 = vsel %vm667_vm0, %v536_v0, 0.0  ;;  %v7116_v0 = vld [vmem:[%s11211_s0 + $0x8] sm:$0xff] }
 0x169   :  { %v7087_v60 = vpop.trf.xlu1 }
 0x16a   :  { %11609 = vst [vmem:[#allocation106_spill] sm:$0xff] %v7087_v60  ;;  %v7089_v56 = vpop.trf.xlu0  ;;  %v537_v60 = vld [vmem:[%s11211_s0 + $0x30] sm:$0xff] }
 0x16b   :  { %11610 = vst [vmem:[#allocation107_spill] sm:$0xff] %v7089_v56  ;;  %678 = vadd.xlane.f32.xlu0 %v677_v8  ;;  %v686_v52 = vsel %vm667_vm0, %v537_v60, 0.0  ;;  %v539_v60 = vld [vmem:[%s11211_s0 + $0x40] sm:$0xff] }
 0x16d   :  { %v7095_v12 = vpop.trf.xlu1 }
 0x16e   :  { %11611 = vst [vmem:[#allocation108_spill] sm:$0xff] %v7095_v12  ;;  %v7097_v13 = vpop.trf.xlu0  ;;  %v538_v12 = vld [vmem:[%s11211_s0 + $0x38] sm:$0xff] }
 0x16f   :  { %11612 = vst [vmem:[#allocation109_spill] sm:$0xff] %v7097_v13  ;;  %681 = vadd.xlane.f32.xlu0 %v680_v10  ;;  %v689_v10 = vsel %vm667_vm0, %v538_v12, 0.0  ;;  %v541_v12 = vld [vmem:[%s11211_s0 + $0x50] sm:$0xff] }
 0x171   :  { %v7103_v6 = vpop.trf.xlu1 }
 0x172   :  { %11613 = vst [vmem:[#allocation110_spill] sm:$0xff] %v7103_v6  ;;  %v7106_v8 = vpop.trf.xlu0 }
 0x173   :  { %684 = vadd.xlane.f32.xlu0 %v683_v48  ;;  %11614 = vst [vmem:[#allocation111_spill] sm:$0xff] %v7106_v8  ;;  %v671_v48 = vsel %vm667_vm0, %v7116_v0, 0.0 }
 0x175   :  { %v7111_v56 = vpop.trf.xlu1 }
 0x176   :  { %11615 = vst [vmem:[#allocation112_spill] sm:$0xff] %v7111_v56  ;;  %v7126_v8 = vpop.trf.xlu0  ;;  %v692_v56 = vsel %vm667_vm0, %v539_v60, 0.0  ;;  %v543_v60 = vld [vmem:[%s11211_s0 + $0x60] sm:$0xff] }
 0x177   :  { %687 = vadd.xlane.f32.xlu0 %v686_v52  ;;  %11617 = vst [vmem:[#allocation114_spill] sm:$0xff] %v7126_v8  ;;  %v540_v52 = vld [vmem:[%s11211_s0 + $0x48] sm:$0xff] }
 0x178   :  { %v695_v13 = vsel %vm667_vm0, %v540_v52, 0.0  ;;  %v704_v52 = vsel %vm667_vm0, %v543_v60, 0.0  ;;  %v547_v60 = vld [vmem:[%s11211_s0 + $0x80] sm:$0xff] }
 0x179   :  { %v7124_v6 = vpop.trf.xlu1 }
 0x17a   :  { %11616 = vst [vmem:[#allocation113_spill] sm:$0xff] %v7124_v6  ;;  %v698_v6 = vsel %vm667_vm0, %v541_v12, 0.0  ;;  %v7142_v8 = vpop.trf.xlu0 }
 0x17b   :  { %690 = vadd.xlane.f32.xlu0 %v689_v10  ;;  %v542_v10 = vld [vmem:[%s11211_s0 + $0x58] sm:$0xff]  ;;  %11619 = vst [vmem:[#allocation116_spill] sm:$0xff] %v7142_v8 }
 0x17c   :  { %672 = vadd.xlane.f32.xlu1 %v671_v48  ;;  %v701_v48 = vsel %vm667_vm0, %v542_v10, 0.0 }
 0x17d   :  { %v7136_v43 = vpop.trf.xlu1 }
 0x17e   :  { %11618 = vst [vmem:[#allocation115_spill] sm:$0xff] %v7136_v43  ;;  %v7158_v43 = vpop.trf.xlu0 }
 0x17f   :  { %693 = vadd.xlane.f32.xlu0 %v692_v56  ;;  %v544_v56 = vld [vmem:[%s11211_s0 + $0x68] sm:$0xff]  ;;  %11621 = vst [vmem:[#allocation118_spill] sm:$0xff] %v7158_v43 }
 0x180   :  { %696 = vadd.xlane.f32.xlu1 %v695_v13  ;;  %v545_v13 = vld [vmem:[%s11211_s0 + $0x70] sm:$0xff]  ;;  %v707_v12 = vsel %vm667_vm0, %v544_v56, 0.0  ;;  %v548_v56 = vld [vmem:[%s11211_s0 + $0x88] sm:$0xff] }
 0x181   :  { %v7148_v42 = vpop.trf.xlu1  ;;  %v710_v10 = vsel %vm667_vm0, %v545_v13, 0.0  ;;  %v549_v13 = vld [vmem:[%s11211_s0 + $0x90] sm:$0xff] }
 0x182   :  { %11620 = vst [vmem:[#allocation117_spill] sm:$0xff] %v7148_v42 }
 0x183   :  { %699 = vadd.xlane.f32.xlu0 %v698_v6  ;;  %v546_v6 = vld [vmem:[%s11211_s0 + $0x78] sm:$0xff] }
 0x184   :  { %702 = vadd.xlane.f32.xlu1 %v701_v48  ;;  %v713_v48 = vsel %vm667_vm0, %v546_v6, 0.0  ;;  %v550_v6 = vld [vmem:[%s11211_s0 + $0x98] sm:$0xff] }
 0x185   :  { %v7160_v8 = vpop.trf.xlu1 }
 0x186   :  { %11622 = vst [vmem:[#allocation119_spill] sm:$0xff] %v7160_v8  ;;  %v7176_v8 = vpop.trf.xlu0 }
 0x187   :  { %705 = vadd.xlane.f32.xlu0 %v704_v52  ;;  %v716_v52 = vsel %vm667_vm0, %v547_v60, 0.0  ;;  %11624 = vst [vmem:[#allocation121_spill] sm:$0xff] %v7176_v8  ;;  %v551_v60 = vld [vmem:[%s11211_s0 + $0xa0] sm:$0xff] }
 0x188   :  { %708 = vadd.xlane.f32.xlu1 %v707_v12  ;;  %v719_v12 = vsel %vm667_vm0, %v548_v56, 0.0  ;;  %v552_v56 = vld [vmem:[%s11211_s0 + $0xa8] sm:$0xff] }
 0x189   :  { %v7170_v42 = vpop.trf.xlu1 }
 0x18a   :  { %11623 = vst [vmem:[#allocation120_spill] sm:$0xff] %v7170_v42  ;;  %v7192_v42 = vpop.trf.xlu0 }
 0x18b   :  { %711 = vadd.xlane.f32.xlu0 %v710_v10  ;;  %v722_v10 = vsel %vm667_vm0, %v549_v13, 0.0  ;;  %11626 = vst [vmem:[#allocation123_spill] sm:$0xff] %v7192_v42  ;;  %v553_v13 = vld [vmem:[%s11211_s0 + $0xb0] sm:$0xff] }
 0x18c   :  { %714 = vadd.xlane.f32.xlu1 %v713_v48  ;;  %v725_v48 = vsel %vm667_vm0, %v550_v6, 0.0  ;;  %v554_v6 = vld [vmem:[%s11211_s0 + $0xb8] sm:$0xff] }
 0x18d   :  { %v7182_v43 = vpop.trf.xlu1 }
 0x18e   :  { %11625 = vst [vmem:[#allocation122_spill] sm:$0xff] %v7182_v43 }
 0x18f   :  { %717 = vadd.xlane.f32.xlu0 %v716_v52  ;;  %v728_v52 = vsel %vm667_vm0, %v551_v60, 0.0  ;;  %v555_v60 = vld [vmem:[%s11211_s0 + $0xc0] sm:$0xff] }
 0x190   :  { %720 = vadd.xlane.f32.xlu1 %v719_v12  ;;  %v731_v12 = vsel %vm667_vm0, %v552_v56, 0.0  ;;  %v556_v56 = vld [vmem:[%s11211_s0 + $0xc8] sm:$0xff] }
 0x191   :  { %v7194_v8 = vpop.trf.xlu1 }
 0x192   :  { %11627 = vst [vmem:[#allocation124_spill] sm:$0xff] %v7194_v8  ;;  %v7210_v8 = vpop.trf.xlu0 }
 0x193   :  { %723 = vadd.xlane.f32.xlu0 %v722_v10  ;;  %v734_v10 = vsel %vm667_vm0, %v553_v13, 0.0  ;;  %11629 = vst [vmem:[#allocation126_spill] sm:$0xff] %v7210_v8  ;;  %v557_v13 = vld [vmem:[%s11211_s0 + $0xd0] sm:$0xff] }
 0x194   :  { %726 = vadd.xlane.f32.xlu1 %v725_v48  ;;  %v737_v48 = vsel %vm667_vm0, %v554_v6, 0.0  ;;  %v558_v6 = vld [vmem:[%s11211_s0 + $0xd8] sm:$0xff] }
 0x195   :  { %v7204_v43 = vpop.trf.xlu1 }
 0x196   :  { %11628 = vst [vmem:[#allocation125_spill] sm:$0xff] %v7204_v43  ;;  %v7226_v43 = vpop.trf.xlu0 }
 0x197   :  { %729 = vadd.xlane.f32.xlu0 %v728_v52  ;;  %v740_v52 = vsel %vm667_vm0, %v555_v60, 0.0  ;;  %11631 = vst [vmem:[#allocation128_spill] sm:$0xff] %v7226_v43  ;;  %v559_v60 = vld [vmem:[%s11211_s0 + $0xe0] sm:$0xff] }
 0x198   :  { %732 = vadd.xlane.f32.xlu1 %v731_v12  ;;  %v743_v12 = vsel %vm667_vm0, %v556_v56, 0.0  ;;  %v560_v56 = vld [vmem:[%s11211_s0 + $0xe8] sm:$0xff] }
 0x199   :  { %v7216_v42 = vpop.trf.xlu1 }
 0x19a   :  { %11630 = vst [vmem:[#allocation127_spill] sm:$0xff] %v7216_v42 }
 0x19b   :  { %735 = vadd.xlane.f32.xlu0 %v734_v10  ;;  %v746_v10 = vsel %vm667_vm0, %v557_v13, 0.0  ;;  %v561_v13 = vld [vmem:[%s11211_s0 + $0xf0] sm:$0xff] }
 0x19c   :  { %738 = vadd.xlane.f32.xlu1 %v737_v48  ;;  %v749_v48 = vsel %vm667_vm0, %v558_v6, 0.0  ;;  %v562_v6 = vld [vmem:[%s11211_s0 + $0xf8] sm:$0xff] }
 0x19d   :  { %v7228_v8 = vpop.trf.xlu1 }
 0x19e   :  { %11632 = vst [vmem:[#allocation129_spill] sm:$0xff] %v7228_v8  ;;  %v7244_v8 = vpop.trf.xlu0 }
 0x19f   :  { %741 = vadd.xlane.f32.xlu0 %v740_v52  ;;  %v752_v52 = vsel %vm667_vm0, %v559_v60, 0.0  ;;  %11634 = vst [vmem:[#allocation131_spill] sm:$0xff] %v7244_v8  ;;  %v563_v60 = vld [vmem:[%s11211_s0 + $0x100] sm:$0xff] }
 0x1a0   :  { %744 = vadd.xlane.f32.xlu1 %v743_v12  ;;  %v755_v12 = vsel %vm667_vm0, %v560_v56, 0.0  ;;  %v564_v56 = vld [vmem:[%s11211_s0 + $0x108] sm:$0xff] }
 0x1a1   :  { %v7238_v42 = vpop.trf.xlu1 }
 0x1a2   :  { %11633 = vst [vmem:[#allocation130_spill] sm:$0xff] %v7238_v42  ;;  %v7260_v42 = vpop.trf.xlu0 }
 0x1a3   :  { %747 = vadd.xlane.f32.xlu0 %v746_v10  ;;  %v758_v10 = vsel %vm667_vm0, %v561_v13, 0.0  ;;  %11636 = vst [vmem:[#allocation133_spill] sm:$0xff] %v7260_v42  ;;  %v565_v13 = vld [vmem:[%s11211_s0 + $0x110] sm:$0xff] }
 0x1a4   :  { %750 = vadd.xlane.f32.xlu1 %v749_v48  ;;  %v761_v48 = vsel %vm667_vm0, %v562_v6, 0.0  ;;  %v566_v6 = vld [vmem:[%s11211_s0 + $0x118] sm:$0xff] }
 0x1a5   :  { %v7250_v43 = vpop.trf.xlu1 }
 0x1a6   :  { %11635 = vst [vmem:[#allocation132_spill] sm:$0xff] %v7250_v43 }
 0x1a7   :  { %753 = vadd.xlane.f32.xlu0 %v752_v52  ;;  %v764_v52 = vsel %vm667_vm0, %v563_v60, 0.0  ;;  %v567_v60 = vld [vmem:[%s11211_s0 + $0x120] sm:$0xff] }
 0x1a8   :  { %756 = vadd.xlane.f32.xlu1 %v755_v12  ;;  %v767_v12 = vsel %vm667_vm0, %v564_v56, 0.0  ;;  %v568_v56 = vld [vmem:[%s11211_s0 + $0x128] sm:$0xff] }
 0x1a9   :  { %v7262_v8 = vpop.trf.xlu1 }
 0x1aa   :  { %11637 = vst [vmem:[#allocation134_spill] sm:$0xff] %v7262_v8  ;;  %v7278_v8 = vpop.trf.xlu0 }
 0x1ab   :  { %759 = vadd.xlane.f32.xlu0 %v758_v10  ;;  %v770_v10 = vsel %vm667_vm0, %v565_v13, 0.0  ;;  %11639 = vst [vmem:[#allocation136_spill] sm:$0xff] %v7278_v8  ;;  %v569_v13 = vld [vmem:[%s11211_s0 + $0x130] sm:$0xff] }
 0x1ac   :  { %762 = vadd.xlane.f32.xlu1 %v761_v48  ;;  %v773_v48 = vsel %vm667_vm0, %v566_v6, 0.0  ;;  %v570_v6 = vld [vmem:[%s11211_s0 + $0x138] sm:$0xff] }
 0x1ad   :  { %v7272_v43 = vpop.trf.xlu1 }
 0x1ae   :  { %11638 = vst [vmem:[#allocation135_spill] sm:$0xff] %v7272_v43  ;;  %v7294_v43 = vpop.trf.xlu0 }
 0x1af   :  { %765 = vadd.xlane.f32.xlu0 %v764_v52  ;;  %v776_v52 = vsel %vm667_vm0, %v567_v60, 0.0  ;;  %11641 = vst [vmem:[#allocation138_spill] sm:$0xff] %v7294_v43  ;;  %v571_v60 = vld [vmem:[%s11211_s0 + $0x140] sm:$0xff] }
 0x1b0   :  { %768 = vadd.xlane.f32.xlu1 %v767_v12  ;;  %v779_v12 = vsel %vm667_vm0, %v568_v56, 0.0  ;;  %v572_v56 = vld [vmem:[%s11211_s0 + $0x148] sm:$0xff] }
 0x1b1   :  { %v7284_v42 = vpop.trf.xlu1 }
 0x1b2   :  { %11640 = vst [vmem:[#allocation137_spill] sm:$0xff] %v7284_v42 }
 0x1b3   :  { %771 = vadd.xlane.f32.xlu0 %v770_v10  ;;  %v782_v10 = vsel %vm667_vm0, %v569_v13, 0.0  ;;  %v573_v13 = vld [vmem:[%s11211_s0 + $0x150] sm:$0xff] }
 0x1b4   :  { %774 = vadd.xlane.f32.xlu1 %v773_v48  ;;  %v785_v48 = vsel %vm667_vm0, %v570_v6, 0.0  ;;  %v574_v6 = vld [vmem:[%s11211_s0 + $0x158] sm:$0xff] }
 0x1b5   :  { %v7296_v8 = vpop.trf.xlu1 }
 0x1b6   :  { %11642 = vst [vmem:[#allocation139_spill] sm:$0xff] %v7296_v8  ;;  %v7312_v8 = vpop.trf.xlu0 }
 0x1b7   :  { %777 = vadd.xlane.f32.xlu0 %v776_v52  ;;  %v788_v52 = vsel %vm667_vm0, %v571_v60, 0.0  ;;  %11644 = vst [vmem:[#allocation141_spill] sm:$0xff] %v7312_v8  ;;  %v575_v60 = vld [vmem:[%s11211_s0 + $0x160] sm:$0xff] }
 0x1b8   :  { %780 = vadd.xlane.f32.xlu1 %v779_v12  ;;  %v791_v12 = vsel %vm667_vm0, %v572_v56, 0.0  ;;  %v576_v56 = vld [vmem:[%s11211_s0 + $0x168] sm:$0xff] }
 0x1b9   :  { %v7306_v42 = vpop.trf.xlu1 }
 0x1ba   :  { %11643 = vst [vmem:[#allocation140_spill] sm:$0xff] %v7306_v42  ;;  %v7328_v42 = vpop.trf.xlu0 }
 0x1bb   :  { %783 = vadd.xlane.f32.xlu0 %v782_v10  ;;  %v794_v10 = vsel %vm667_vm0, %v573_v13, 0.0  ;;  %11646 = vst [vmem:[#allocation143_spill] sm:$0xff] %v7328_v42  ;;  %v577_v13 = vld [vmem:[%s11211_s0 + $0x170] sm:$0xff] }
 0x1bc   :  { %786 = vadd.xlane.f32.xlu1 %v785_v48  ;;  %v797_v48 = vsel %vm667_vm0, %v574_v6, 0.0  ;;  %v578_v6 = vld [vmem:[%s11211_s0 + $0x178] sm:$0xff] }
 0x1bd   :  { %v7318_v43 = vpop.trf.xlu1 }
 0x1be   :  { %11645 = vst [vmem:[#allocation142_spill] sm:$0xff] %v7318_v43 }
 0x1bf   :  { %789 = vadd.xlane.f32.xlu0 %v788_v52  ;;  %v800_v52 = vsel %vm667_vm0, %v575_v60, 0.0  ;;  %v579_v60 = vld [vmem:[%s11211_s0 + $0x180] sm:$0xff] }
 0x1c0   :  { %792 = vadd.xlane.f32.xlu1 %v791_v12  ;;  %v803_v12 = vsel %vm667_vm0, %v576_v56, 0.0  ;;  %v580_v56 = vld [vmem:[%s11211_s0 + $0x188] sm:$0xff] }
 0x1c1   :  { %v7330_v8 = vpop.trf.xlu1 }
 0x1c2   :  { %11647 = vst [vmem:[#allocation144_spill] sm:$0xff] %v7330_v8  ;;  %v7346_v8 = vpop.trf.xlu0 }
 0x1c3   :  { %795 = vadd.xlane.f32.xlu0 %v794_v10  ;;  %v806_v10 = vsel %vm667_vm0, %v577_v13, 0.0  ;;  %11649 = vst [vmem:[#allocation146_spill] sm:$0xff] %v7346_v8  ;;  %v581_v13 = vld [vmem:[%s11211_s0 + $0x190] sm:$0xff] }
 0x1c4   :  { %798 = vadd.xlane.f32.xlu1 %v797_v48  ;;  %v809_v48 = vsel %vm667_vm0, %v578_v6, 0.0  ;;  %v582_v6 = vld [vmem:[%s11211_s0 + $0x198] sm:$0xff] }
 0x1c5   :  { %v7340_v43 = vpop.trf.xlu1 }
 0x1c6   :  { %11648 = vst [vmem:[#allocation145_spill] sm:$0xff] %v7340_v43  ;;  %v7362_v43 = vpop.trf.xlu0 }
 0x1c7   :  { %801 = vadd.xlane.f32.xlu0 %v800_v52  ;;  %v812_v52 = vsel %vm667_vm0, %v579_v60, 0.0  ;;  %11651 = vst [vmem:[#allocation148_spill] sm:$0xff] %v7362_v43  ;;  %v583_v60 = vld [vmem:[%s11211_s0 + $0x1a0] sm:$0xff] }
 0x1c8   :  { %804 = vadd.xlane.f32.xlu1 %v803_v12  ;;  %v815_v12 = vsel %vm667_vm0, %v580_v56, 0.0  ;;  %v584_v56 = vld [vmem:[%s11211_s0 + $0x1a8] sm:$0xff] }
 0x1c9   :  { %v7352_v42 = vpop.trf.xlu1 }
 0x1ca   :  { %11650 = vst [vmem:[#allocation147_spill] sm:$0xff] %v7352_v42 }
 0x1cb   :  { %807 = vadd.xlane.f32.xlu0 %v806_v10  ;;  %v818_v10 = vsel %vm667_vm0, %v581_v13, 0.0  ;;  %v585_v13 = vld [vmem:[%s11211_s0 + $0x1b0] sm:$0xff] }
 0x1cc   :  { %810 = vadd.xlane.f32.xlu1 %v809_v48  ;;  %v821_v48 = vsel %vm667_vm0, %v582_v6, 0.0  ;;  %v586_v6 = vld [vmem:[%s11211_s0 + $0x1b8] sm:$0xff] }
 0x1cd   :  { %v7364_v8 = vpop.trf.xlu1 }
 0x1ce   :  { %11652 = vst [vmem:[#allocation149_spill] sm:$0xff] %v7364_v8  ;;  %v7380_v8 = vpop.trf.xlu0 }
 0x1cf   :  { %813 = vadd.xlane.f32.xlu0 %v812_v52  ;;  %v824_v52 = vsel %vm667_vm0, %v583_v60, 0.0  ;;  %11654 = vst [vmem:[#allocation151_spill] sm:$0xff] %v7380_v8  ;;  %v587_v60 = vld [vmem:[%s11211_s0 + $0x1c0] sm:$0xff] }
 0x1d0   :  { %816 = vadd.xlane.f32.xlu1 %v815_v12  ;;  %v827_v12 = vsel %vm667_vm0, %v584_v56, 0.0  ;;  %v588_v56 = vld [vmem:[%s11211_s0 + $0x1c8] sm:$0xff] }
 0x1d1   :  { %v7374_v42 = vpop.trf.xlu1 }
 0x1d2   :  { %11653 = vst [vmem:[#allocation150_spill] sm:$0xff] %v7374_v42  ;;  %v7396_v42 = vpop.trf.xlu0 }
 0x1d3   :  { %819 = vadd.xlane.f32.xlu0 %v818_v10  ;;  %v830_v10 = vsel %vm667_vm0, %v585_v13, 0.0  ;;  %11656 = vst [vmem:[#allocation153_spill] sm:$0xff] %v7396_v42  ;;  %v589_v13 = vld [vmem:[%s11211_s0 + $0x1d0] sm:$0xff] }
 0x1d4   :  { %822 = vadd.xlane.f32.xlu1 %v821_v48  ;;  %v833_v48 = vsel %vm667_vm0, %v586_v6, 0.0  ;;  %v590_v6 = vld [vmem:[%s11211_s0 + $0x1d8] sm:$0xff] }
 0x1d5   :  { %v7386_v43 = vpop.trf.xlu1 }
 0x1d6   :  { %11655 = vst [vmem:[#allocation152_spill] sm:$0xff] %v7386_v43 }
 0x1d7   :  { %825 = vadd.xlane.f32.xlu0 %v824_v52  ;;  %v836_v52 = vsel %vm667_vm0, %v587_v60, 0.0  ;;  %v591_v60 = vld [vmem:[%s11211_s0 + $0x1e0] sm:$0xff] }
 0x1d8   :  { %828 = vadd.xlane.f32.xlu1 %v827_v12  ;;  %v839_v12 = vsel %vm667_vm0, %v588_v56, 0.0  ;;  %v592_v56 = vld [vmem:[%s11211_s0 + $0x1e8] sm:$0xff] }
 0x1d9   :  { %v7398_v8 = vpop.trf.xlu1 }
 0x1da   :  { %11657 = vst [vmem:[#allocation154_spill] sm:$0xff] %v7398_v8  ;;  %v7414_v8 = vpop.trf.xlu0 }
 0x1db   :  { %831 = vadd.xlane.f32.xlu0 %v830_v10  ;;  %v842_v10 = vsel %vm667_vm0, %v589_v13, 0.0  ;;  %11659 = vst [vmem:[#allocation156_spill] sm:$0xff] %v7414_v8  ;;  %v593_v13 = vld [vmem:[%s11211_s0 + $0x1f0] sm:$0xff]  ;;  %v596_v8 = vld [vmem:[%s11211_s0 + $0x208] sm:$0xff] }
 0x1dc   :  { %834 = vadd.xlane.f32.xlu1 %v833_v48  ;;  %v845_v48 = vsel %vm667_vm0, %v590_v6, 0.0  ;;  %v594_v6 = vld [vmem:[%s11211_s0 + $0x1f8] sm:$0xff] }
 0x1dd   :  { %v7408_v43 = vpop.trf.xlu1 }
 0x1de   :  { %11658 = vst [vmem:[#allocation155_spill] sm:$0xff] %v7408_v43  ;;  %v7427_v43 = vpop.trf.xlu0 }
 0x1df   :  { %837 = vadd.xlane.f32.xlu0 %v836_v52  ;;  %v848_v52 = vsel %vm667_vm0, %v591_v60, 0.0  ;;  %11660 = vst [vmem:[#allocation157_spill] sm:$0xff] %v7427_v43  ;;  %v595_v60 = vld [vmem:[%s11211_s0 + $0x200] sm:$0xff] }
 0x1e0   :  { %840 = vadd.xlane.f32.xlu1 %v839_v12  ;;  %v851_v12 = vsel %vm667_vm0, %v592_v56, 0.0 }
 0x1e3   :  { %843 = vadd.xlane.f32.xlu0 %v842_v10  ;;  %v854_v10 = vsel %vm667_vm0, %v593_v13, 0.0  ;;  %v597_v13 = vld [vmem:[%s11211_s0 + $0x210] sm:$0xff] }
 0x1e4   :  { %846 = vadd.xlane.f32.xlu1 %v845_v48  ;;  %v857_v48 = vsel %vm667_vm0, %v594_v6, 0.0  ;;  %v598_v6 = vld [vmem:[%s11211_s0 + $0x218] sm:$0xff]  ;;  %v866_v43 = vsel %vm667_vm0, %v597_v13, 0.0  ;;  %v601_v13 = vld [vmem:[%s11211_s0 + $0x230] sm:$0xff] }
 0x1e5   :  { %v878_v2 = vsel %vm667_vm0, %v601_v13, 0.0  ;;  %v605_v13 = vld [vmem:[%s11211_s0 + $0x250] sm:$0xff] }
 0x1e6   :  { %v890_v62 = vsel %vm667_vm0, %v605_v13, 0.0  ;;  %v609_v13 = vld [vmem:[%s11211_s0 + $0x270] sm:$0xff] }
 0x1e7   :  { %849 = vadd.xlane.f32.xlu0 %v848_v52  ;;  %v860_v52 = vsel %vm667_vm0, %v595_v60, 0.0  ;;  %v599_v60 = vld [vmem:[%s11211_s0 + $0x220] sm:$0xff]  ;;  %v902_v30 = vsel %vm667_vm0, %v609_v13, 0.0 }
 0x1e8   :  { %852 = vadd.xlane.f32.xlu1 %v851_v12  ;;  %v863_v12 = vsel %vm667_vm0, %v596_v8, 0.0  ;;  %v600_v8 = vld [vmem:[%s11211_s0 + $0x228] sm:$0xff]  ;;  %v872_v42 = vsel %vm667_vm0, %v599_v60, 0.0  ;;  %v603_v60 = vld [vmem:[%s11211_s0 + $0x240] sm:$0xff] }
 0x1e9   :  { %v884_v38 = vsel %vm667_vm0, %v603_v60, 0.0  ;;  %v607_v60 = vld [vmem:[%s11211_s0 + $0x260] sm:$0xff] }
 0x1ea   :  { %v896_v34 = vsel %vm667_vm0, %v607_v60, 0.0  ;;  %v611_v60 = vld [vmem:[%s11211_s0 + $0x280] sm:$0xff] }
 0x1eb   :  { %855 = vadd.xlane.f32.xlu0 %v854_v10  ;;  %v908_v26 = vsel %vm667_vm0, %v611_v60, 0.0 }
 0x1ec   :  { %v7441_v56 = vpop.xlane.xlu0 %669  ;;  %858 = vadd.xlane.f32.xlu1 %v857_v48  ;;  %v869_v48 = vsel %vm667_vm0, %v598_v6, 0.0 }
 0x1ef   :  { %861 = vadd.xlane.f32.xlu0 %v860_v52 }
 0x1f0   :  { %v7451_v10 = vpop.xlane.xlu0 %675  ;;  %864 = vadd.xlane.f32.xlu1 %v863_v12  ;;  %v875_v12 = vsel %vm667_vm0, %v600_v8, 0.0 }
 0x1f3   :  { %867 = vadd.xlane.f32.xlu0 %v866_v43  ;;  %v602_v43 = vld [vmem:[%s11211_s0 + $0x238] sm:$0xff] }
 0x1f4   :  { %v7461_v52 = vpop.xlane.xlu0 %678  ;;  %870 = vadd.xlane.f32.xlu1 %v869_v48  ;;  %v881_v48 = vsel %vm667_vm0, %v602_v43, 0.0 }
 0x1f7   :  { %873 = vadd.xlane.f32.xlu0 %v872_v42  ;;  %v604_v42 = vld [vmem:[%s11211_s0 + $0x248] sm:$0xff] }
 0x1f8   :  { %v7471_v6 = vpop.xlane.xlu0 %681  ;;  %876 = vadd.xlane.f32.xlu1 %v875_v12  ;;  %v887_v12 = vsel %vm667_vm0, %v604_v42, 0.0 }
 0x1fb   :  { %879 = vadd.xlane.f32.xlu0 %v878_v2  ;;  %v606_v2 = vld [vmem:[%s11211_s0 + $0x258] sm:$0xff] }
 0x1fc   :  { %v7481_v8 = vpop.xlane.xlu0 %684  ;;  %882 = vadd.xlane.f32.xlu1 %v881_v48  ;;  %v893_v48 = vsel %vm667_vm0, %v606_v2, 0.0 }
 0x1ff   :  { %885 = vadd.xlane.f32.xlu0 %v884_v38  ;;  %v608_v38 = vld [vmem:[%s11211_s0 + $0x268] sm:$0xff] }
 0x200   :  { %v7491_v43 = vpop.xlane.xlu0 %687  ;;  %888 = vadd.xlane.f32.xlu1 %v887_v12  ;;  %v899_v58 = vsel %vm667_vm0, %v608_v38, 0.0 }
 0x203   :  { %891 = vadd.xlane.f32.xlu0 %v890_v62  ;;  %v610_v62 = vld [vmem:[%s11211_s0 + $0x278] sm:$0xff] }
 0x204   :  { %v7501_v42 = vpop.xlane.xlu0 %690  ;;  %894 = vadd.xlane.f32.xlu1 %v893_v48  ;;  %v905_v54 = vsel %vm667_vm0, %v610_v62, 0.0 }
 0x205   :  { %v7507_v12 = vpop.xlane.xlu1 %672 }
 0x207   :  { %897 = vadd.xlane.f32.xlu0 %v896_v34  ;;  %v612_v34 = vld [vmem:[%s11211_s0 + $0x288] sm:$0xff] }
 0x208   :  { %v7513_v2 = vpop.xlane.xlu0 %693  ;;  %900 = vadd.xlane.f32.xlu1 %v899_v58  ;;  %v613_v58 = vld [vmem:[%s11211_s0 + $0x290] sm:$0xff]  ;;  %v911_v50 = vsel %vm667_vm0, %v612_v34, 0.0 }
 0x209   :  { %v7519_v48 = vpop.xlane.xlu1 %696  ;;  %v914_v22 = vsel %vm667_vm0, %v613_v58, 0.0 }
 0x20b   :  { %903 = vadd.xlane.f32.xlu0 %v902_v30  ;;  %v614_v30 = vld [vmem:[%s11211_s0 + $0x298] sm:$0xff] }
 0x20c   :  { %v7525_v38 = vpop.xlane.xlu0 %699  ;;  %906 = vadd.xlane.f32.xlu1 %v905_v54  ;;  %v615_v54 = vld [vmem:[%s11211_s0 + $0x2a0] sm:$0xff]  ;;  %v917_v46 = vsel %vm667_vm0, %v614_v30, 0.0 }
 0x20d   :  { %v7531_v13 = vpop.xlane.xlu1 %702  ;;  %v920_v18 = vsel %vm667_vm0, %v615_v54, 0.0 }
 0x20f   :  { %909 = vadd.xlane.f32.xlu0 %v908_v26  ;;  %v616_v26 = vld [vmem:[%s11211_s0 + $0x2a8] sm:$0xff] }
 0x210   :  { %v7537_v62 = vpop.xlane.xlu0 %705  ;;  %912 = vadd.xlane.f32.xlu1 %v911_v50  ;;  %v617_v50 = vld [vmem:[%s11211_s0 + $0x2b0] sm:$0xff]  ;;  %v923_v40 = vsel %vm667_vm0, %v616_v26, 0.0 }
 0x211   :  { %v7543_v60 = vpop.xlane.xlu1 %708  ;;  %v926_v14 = vsel %vm667_vm0, %v617_v50, 0.0 }
 0x213   :  { %915 = vadd.xlane.f32.xlu0 %v914_v22  ;;  %v618_v22 = vld [vmem:[%s11211_s0 + $0x2b8] sm:$0xff] }
 0x214   :  { %v7549_v34 = vpop.xlane.xlu0 %711  ;;  %918 = vadd.xlane.f32.xlu1 %v917_v46  ;;  %v619_v46 = vld [vmem:[%s11211_s0 + $0x2c0] sm:$0xff]  ;;  %v929_v36 = vsel %vm667_vm0, %v618_v22, 0.0 }
 0x215   :  { %v7555_v58 = vpop.xlane.xlu1 %714  ;;  %v932_v45 = vsel %vm667_vm0, %v619_v46, 0.0 }
 0x217   :  { %921 = vadd.xlane.f32.xlu0 %v920_v18  ;;  %v620_v18 = vld [vmem:[%s11211_s0 + $0x2c8] sm:$0xff] }
 0x218   :  { %v7561_v30 = vpop.xlane.xlu0 %717  ;;  %924 = vadd.xlane.f32.xlu1 %v923_v40  ;;  %v621_v40 = vld [vmem:[%s11211_s0 + $0x2d0] sm:$0xff]  ;;  %v935_v32 = vsel %vm667_vm0, %v620_v18, 0.0 }
 0x219   :  { %v7567_v54 = vpop.xlane.xlu1 %720  ;;  %v938_v9 = vsel %vm667_vm0, %v621_v40, 0.0 }
 0x21b   :  { %927 = vadd.xlane.f32.xlu0 %v926_v14  ;;  %v622_v14 = vld [vmem:[%s11211_s0 + $0x2d8] sm:$0xff] }
 0x21c   :  { %v7573_v26 = vpop.xlane.xlu0 %723  ;;  %930 = vadd.xlane.f32.xlu1 %v929_v36  ;;  %v623_v36 = vld [vmem:[%s11211_s0 + $0x2e0] sm:$0xff]  ;;  %v941_v28 = vsel %vm667_vm0, %v622_v14, 0.0 }
 0x21d   :  { %v7579_v50 = vpop.xlane.xlu1 %726  ;;  %v944_v5 = vsel %vm667_vm0, %v623_v36, 0.0 }
 0x21f   :  { %933 = vadd.xlane.f32.xlu0 %v932_v45  ;;  %v624_v45 = vld [vmem:[%s11211_s0 + $0x2e8] sm:$0xff] }
 0x220   :  { %v7585_v22 = vpop.xlane.xlu0 %729  ;;  %936 = vadd.xlane.f32.xlu1 %v935_v32  ;;  %v625_v32 = vld [vmem:[%s11211_s0 + $0x2f0] sm:$0xff]  ;;  %v947_v24 = vsel %vm667_vm0, %v624_v45, 0.0 }
 0x221   :  { %v7591_v46 = vpop.xlane.xlu1 %732  ;;  %v950_v1 = vsel %vm667_vm0, %v625_v32, 0.0 }
 0x223   :  { %939 = vadd.xlane.f32.xlu0 %v938_v9  ;;  %v626_v9 = vld [vmem:[%s11211_s0 + $0x2f8] sm:$0xff] }
 0x224   :  { %v7597_v18 = vpop.xlane.xlu0 %735  ;;  %942 = vadd.xlane.f32.xlu1 %v941_v28  ;;  %v627_v28 = vld [vmem:[%s11211_s0 + $0x300] sm:$0xff]  ;;  %v953_v20 = vsel %vm667_vm0, %v626_v9, 0.0 }
 0x225   :  { %v7603_v40 = vpop.xlane.xlu1 %738  ;;  %v956_v61 = vsel %vm667_vm0, %v627_v28, 0.0 }
 0x227   :  { %945 = vadd.xlane.f32.xlu0 %v944_v5  ;;  %v628_v5 = vld [vmem:[%s11211_s0 + $0x308] sm:$0xff] }
 0x228   :  { %v7609_v14 = vpop.xlane.xlu0 %741  ;;  %948 = vadd.xlane.f32.xlu1 %v947_v24  ;;  %v629_v24 = vld [vmem:[%s11211_s0 + $0x310] sm:$0xff]  ;;  %v959_v16 = vsel %vm667_vm0, %v628_v5, 0.0 }
 0x229   :  { %v7615_v36 = vpop.xlane.xlu1 %744  ;;  %v962_v57 = vsel %vm667_vm0, %v629_v24, 0.0 }
 0x22b   :  { %951 = vadd.xlane.f32.xlu0 %v950_v1  ;;  %v630_v1 = vld [vmem:[%s11211_s0 + $0x318] sm:$0xff] }
 0x22c   :  { %v7621_v45 = vpop.xlane.xlu0 %747  ;;  %954 = vadd.xlane.f32.xlu1 %v953_v20  ;;  %v631_v20 = vld [vmem:[%s11211_s0 + $0x320] sm:$0xff]  ;;  %v965_v4 = vsel %vm667_vm0, %v630_v1, 0.0 }
 0x22d   :  { %v7627_v32 = vpop.xlane.xlu1 %750  ;;  %v968_v53 = vsel %vm667_vm0, %v631_v20, 0.0 }
 0x22f   :  { %957 = vadd.xlane.f32.xlu0 %v956_v61  ;;  %v632_v61 = vld [vmem:[%s11211_s0 + $0x328] sm:$0xff] }
 0x230   :  { %v7633_v9 = vpop.xlane.xlu0 %753  ;;  %960 = vadd.xlane.f32.xlu1 %v959_v16  ;;  %v633_v16 = vld [vmem:[%s11211_s0 + $0x330] sm:$0xff]  ;;  %v971_v11 = vsel %vm667_vm0, %v632_v61, 0.0 }
 0x231   :  { %v7639_v28 = vpop.xlane.xlu1 %756  ;;  %v974_v49 = vsel %vm667_vm0, %v633_v16, 0.0 }
 0x233   :  { %963 = vadd.xlane.f32.xlu0 %v962_v57  ;;  %v634_v57 = vld [vmem:[%s11211_s0 + $0x338] sm:$0xff] }
 0x234   :  { %v7645_v5 = vpop.xlane.xlu0 %759  ;;  %966 = vadd.xlane.f32.xlu1 %v965_v4  ;;  %v635_v4 = vld [vmem:[%s11211_s0 + $0x340] sm:$0xff]  ;;  %v977_v7 = vsel %vm667_vm0, %v634_v57, 0.0 }
 0x235   :  { %v7651_v24 = vpop.xlane.xlu1 %762  ;;  %v980_v44 = vsel %vm667_vm0, %v635_v4, 0.0 }
 0x237   :  { %969 = vadd.xlane.f32.xlu0 %v968_v53  ;;  %v636_v53 = vld [vmem:[%s11211_s0 + $0x348] sm:$0xff] }
 0x238   :  { %v7657_v1 = vpop.xlane.xlu0 %765  ;;  %972 = vadd.xlane.f32.xlu1 %v971_v11  ;;  %v637_v11 = vld [vmem:[%s11211_s0 + $0x350] sm:$0xff]  ;;  %v983_v3 = vsel %vm667_vm0, %v636_v53, 0.0 }
 0x239   :  { %v7663_v20 = vpop.xlane.xlu1 %768  ;;  %v986_v39 = vsel %vm667_vm0, %v637_v11, 0.0 }
 0x23b   :  { %975 = vadd.xlane.f32.xlu0 %v974_v49  ;;  %v638_v49 = vld [vmem:[%s11211_s0 + $0x358] sm:$0xff] }
 0x23c   :  { %v7669_v61 = vpop.xlane.xlu0 %771  ;;  %978 = vadd.xlane.f32.xlu1 %v977_v7  ;;  %v639_v7 = vld [vmem:[%s11211_s0 + $0x360] sm:$0xff]  ;;  %v989_v63 = vsel %vm667_vm0, %v638_v49, 0.0 }
 0x23d   :  { %v7675_v16 = vpop.xlane.xlu1 %774  ;;  %v992_v35 = vsel %vm667_vm0, %v639_v7, 0.0 }
 0x23f   :  { %981 = vadd.xlane.f32.xlu0 %v980_v44  ;;  %v640_v44 = vld [vmem:[%s11211_s0 + $0x368] sm:$0xff] }
 0x240   :  { %v7681_v57 = vpop.xlane.xlu0 %777  ;;  %984 = vadd.xlane.f32.xlu1 %v983_v3  ;;  %v641_v3 = vld [vmem:[%s11211_s0 + $0x370] sm:$0xff]  ;;  %v995_v59 = vsel %vm667_vm0, %v640_v44, 0.0 }
 0x241   :  { %v7687_v4 = vpop.xlane.xlu1 %780  ;;  %v998_v31 = vsel %vm667_vm0, %v641_v3, 0.0 }
 0x243   :  { %987 = vadd.xlane.f32.xlu0 %v986_v39  ;;  %v642_v39 = vld [vmem:[%s11211_s0 + $0x378] sm:$0xff] }
 0x244   :  { %v7693_v53 = vpop.xlane.xlu0 %783  ;;  %990 = vadd.xlane.f32.xlu1 %v989_v63  ;;  %v643_v63 = vld [vmem:[%s11211_s0 + $0x380] sm:$0xff]  ;;  %v1001_v55 = vsel %vm667_vm0, %v642_v39, 0.0 }
 0x245   :  { %v7699_v11 = vpop.xlane.xlu1 %786  ;;  %v1004_v29 = vsel %vm667_vm0, %v643_v63, 0.0 }
 0x247   :  { %993 = vadd.xlane.f32.xlu0 %v992_v35  ;;  %v644_v35 = vld [vmem:[%s11211_s0 + $0x388] sm:$0xff] }
 0x248   :  { %v7705_v49 = vpop.xlane.xlu0 %789  ;;  %996 = vadd.xlane.f32.xlu1 %v995_v59  ;;  %v645_v59 = vld [vmem:[%s11211_s0 + $0x390] sm:$0xff]  ;;  %v1007_v51 = vsel %vm667_vm0, %v644_v35, 0.0 }
 0x249   :  { %v7711_v7 = vpop.xlane.xlu1 %792  ;;  %v1010_v27 = vsel %vm667_vm0, %v645_v59, 0.0 }
 0x24b   :  { %999 = vadd.xlane.f32.xlu0 %v998_v31  ;;  %v646_v31 = vld [vmem:[%s11211_s0 + $0x398] sm:$0xff] }
 0x24c   :  { %v7717_v44 = vpop.xlane.xlu0 %795  ;;  %1002 = vadd.xlane.f32.xlu1 %v1001_v55  ;;  %v647_v55 = vld [vmem:[%s11211_s0 + $0x3a0] sm:$0xff]  ;;  %v1013_v47 = vsel %vm667_vm0, %v646_v31, 0.0 }
 0x24d   :  { %v7723_v3 = vpop.xlane.xlu1 %798  ;;  %v1016_v25 = vsel %vm667_vm0, %v647_v55, 0.0 }
 0x24f   :  { %1005 = vadd.xlane.f32.xlu0 %v1004_v29  ;;  %v648_v29 = vld [vmem:[%s11211_s0 + $0x3a8] sm:$0xff] }
 0x250   :  { %v7729_v39 = vpop.xlane.xlu0 %801  ;;  %1008 = vadd.xlane.f32.xlu1 %v1007_v51  ;;  %v649_v51 = vld [vmem:[%s11211_s0 + $0x3b0] sm:$0xff]  ;;  %v1019_v41 = vsel %vm667_vm0, %v648_v29, 0.0 }
 0x251   :  { %v7735_v63 = vpop.xlane.xlu1 %804  ;;  %v1022_v23 = vsel %vm667_vm0, %v649_v51, 0.0 }
 0x253   :  { %1011 = vadd.xlane.f32.xlu0 %v1010_v27  ;;  %v650_v27 = vld [vmem:[%s11211_s0 + $0x3b8] sm:$0xff] }
 0x254   :  { %v7741_v35 = vpop.xlane.xlu0 %807  ;;  %1014 = vadd.xlane.f32.xlu1 %v1013_v47  ;;  %v651_v47 = vld [vmem:[%s11211_s0 + $0x3c0] sm:$0xff]  ;;  %v1025_v37 = vsel %vm667_vm0, %v650_v27, 0.0 }
 0x255   :  { %v7747_v59 = vpop.xlane.xlu1 %810  ;;  %v1028_v21 = vsel %vm667_vm0, %v651_v47, 0.0 }
 0x257   :  { %1017 = vadd.xlane.f32.xlu0 %v1016_v25  ;;  %v652_v25 = vld [vmem:[%s11211_s0 + $0x3c8] sm:$0xff] }
 0x258   :  { %v7753_v31 = vpop.xlane.xlu0 %813  ;;  %1020 = vadd.xlane.f32.xlu1 %v1019_v41  ;;  %v653_v41 = vld [vmem:[%s11211_s0 + $0x3d0] sm:$0xff]  ;;  %v1031_v33 = vsel %vm667_vm0, %v652_v25, 0.0 }
 0x259   :  { %v7759_v55 = vpop.xlane.xlu1 %816  ;;  %v1034_v19 = vsel %vm667_vm0, %v653_v41, 0.0 }
 0x25b   :  { %1023 = vadd.xlane.f32.xlu0 %v1022_v23  ;;  %v654_v23 = vld [vmem:[%s11211_s0 + $0x3d8] sm:$0xff] }
 0x25c   :  { %v7765_v29 = vpop.xlane.xlu0 %819  ;;  %1026 = vadd.xlane.f32.xlu1 %v1025_v37  ;;  %v655_v37 = vld [vmem:[%s11211_s0 + $0x3e0] sm:$0xff]  ;;  %v1037_v15 = vsel %vm667_vm0, %v654_v23, 0.0 }
 0x25d   :  { %v7771_v51 = vpop.xlane.xlu1 %822  ;;  %v1040_v17 = vsel %vm667_vm0, %v655_v37, 0.0 }
 0x25e   :  { %11661 = vst [vmem:[#allocation158_spill] sm:$0xff] %v7771_v51 }
 0x25f   :  { %1029 = vadd.xlane.f32.xlu0 %v1028_v21  ;;  %v656_v21 = vld [vmem:[%s11211_s0 + $0x3e8] sm:$0xff] }
 0x260   :  { %v7777_v27 = vpop.xlane.xlu0 %825  ;;  %1032 = vadd.xlane.f32.xlu1 %v1031_v33  ;;  %v657_v33 = vld [vmem:[%s11211_s0 + $0x3f0] sm:$0xff] }
 0x261   :  { %11662 = vst [vmem:[#allocation159_spill] sm:$0xff] %v7777_v27  ;;  %v7783_v47 = vpop.xlane.xlu1 %828 }
 0x262   :  { %11663 = vst [vmem:[#allocation160_spill] sm:$0xff] %v7783_v47  ;;  %v1043_v47 = vsel %vm667_vm0, %v656_v21, 0.0 }
 0x263   :  { %1035 = vadd.xlane.f32.xlu0 %v1034_v19  ;;  %v658_v19 = vld [vmem:[%s11211_s0 + $0x3f8] sm:$0xff] }
 0x264   :  { %v7789_v25 = vpop.xlane.xlu0 %831  ;;  %1038 = vadd.xlane.f32.xlu1 %v1037_v15  ;;  %v659_v15 = vld [vmem:[%s11211_s0 + $0x400] sm:$0xff] }
 0x265   :  { %11664 = vst [vmem:[#allocation161_spill] sm:$0xff] %v7789_v25  ;;  %v7795_v41 = vpop.xlane.xlu1 %834  ;;  %v1046_v25 = vsel %vm667_vm0, %v657_v33, 0.0 }
 0x266   :  { %11665 = vst [vmem:[#allocation162_spill] sm:$0xff] %v7795_v41  ;;  %v1049_v41 = vsel %vm667_vm0, %v658_v19, 0.0 }
 0x267   :  { %1041 = vadd.xlane.f32.xlu0 %v1040_v17  ;;  %v660_v17 = vld [vmem:[%s11211_s0 + $0x408] sm:$0xff] }
 0x268   :  { %v7801_v23 = vpop.xlane.xlu0 %837  ;;  %1044 = vadd.xlane.f32.xlu1 %v1043_v47  ;;  %v661_v47 = vld [vmem:[%s11211_s0 + $0x410] sm:$0xff] }
 0x269   :  { %11666 = vst [vmem:[#allocation163_spill] sm:$0xff] %v7801_v23  ;;  %v7807_v37 = vpop.xlane.xlu1 %840  ;;  %v1052_v23 = vsel %vm667_vm0, %v659_v15, 0.0  ;;  %v1076_v15 = vmul.f32 0.020408163, %v7441_v56  ;;  %v665_v56 = vld [vmem:[%s11211_s0 + $0x430] sm:$0xff] }
 0x26a   :  { %11667 = vst [vmem:[#allocation164_spill] sm:$0xff] %v7807_v37  ;;  %v1055_v37 = vsel %vm667_vm0, %v660_v17, 0.0 }
 0x26b   :  { %1047 = vadd.xlane.f32.xlu0 %v1046_v25  ;;  %v662_v25 = vld [vmem:[%s11211_s0 + $0x418] sm:$0xff] }
 0x26c   :  { %v7813_v21 = vpop.xlane.xlu0 %843  ;;  %1050 = vadd.xlane.f32.xlu1 %v1049_v41  ;;  %v663_v41 = vld [vmem:[%s11211_s0 + $0x420] sm:$0xff]  ;;  %v1061_v17 = vsel %vm667_vm0, %v662_v25, 0.0  ;;  %v1078_v25 = vmul.f32 0.020408163, %v7451_v10  ;;  %v6321_v10 = vld [vmem:[%s11211_s0 + $0x10] sm:$0xff] }
 0x26d   :  { %11668 = vst [vmem:[#allocation165_spill] sm:$0xff] %v7813_v21  ;;  %v7819_v33 = vpop.xlane.xlu1 %846  ;;  %v1058_v21 = vsel %vm667_vm0, %v661_v47, 0.0  ;;  %v6320_v47 = vld [vmem:[%s11211_s0] sm:$0xff] }
 0x26e   :  { %11669 = vst [vmem:[#allocation166_spill] sm:$0xff] %v7819_v33 }
 0x26f   :  { %1053 = vadd.xlane.f32.xlu0 %v1052_v23  ;;  %v664_v23 = vld [vmem:[%s11211_s0 + $0x428] sm:$0xff] }
 0x270   :  { %v7825_v19 = vpop.xlane.xlu0 %849  ;;  %1056 = vadd.xlane.f32.xlu1 %v1055_v37  ;;  %v1064_v37 = vsel %vm667_vm0, %v663_v41, 0.0  ;;  %v666_v41 = vld [vmem:[%s11211_s0 + $0x438] sm:$0xff] }
 0x271   :  { %11670 = vst [vmem:[#allocation167_spill] sm:$0xff] %v7825_v19  ;;  %v7832_v27 = vpop.xlane.xlu1 %852  ;;  %v1077_v19 = vmul.f32 0.020408163, %v7507_v12  ;;  %v1067_v12 = vsel %vm667_vm0, %v664_v23, 0.0  ;;  %v7867_v23 = vsub.f32 %v6321_v10, %v1078_v25 }
 0x272   :  { %11671 = vst [vmem:[#allocation168_spill] sm:$0xff] %v7832_v27 }
 0x273   :  { %1059 = vadd.xlane.f32.xlu0 %v1058_v21  ;;  %v7848_v21 = vsub.f32 %v6320_v47, %v1076_v15  ;;  %v1070_v15 = vsel %vm667_vm0, %v665_v56, 0.0  ;;  %11675 = vst [vmem:[#allocation172_spill] sm:$0xff] %v7867_v23 }
 0x274   :  { %v7839_v33 = vpop.xlane.xlu0 %855  ;;  %1062 = vadd.xlane.f32.xlu1 %v1061_v17  ;;  %v1079_v17 = vmul.f32 0.020408163, %v7461_v52  ;;  %v1073_v52 = vsel %vm667_vm0, %v666_v41, 0.0  ;;  %v6323_v41 = vld [vmem:[%s11211_s0 + $0x20] sm:$0xff] }
 0x275   :  { %11672 = vst [vmem:[#allocation169_spill] sm:$0xff] %v7839_v33  ;;  %11673 = vst [vmem:[#allocation170_spill] sm:$0xff] %v7848_v21  ;;  %v7851_v27 = vpop.xlane.xlu1 %858  ;;  %v7859_v33 = vsub.f32 %v7116_v0, %v1077_v19  ;;  %v1348_v0 = vmul.f32 %v7848_v21, %v7848_v21  ;;  %v6322_v19 = vld [vmem:[%s11211_s0 + $0x18] sm:$0xff] }
 0x276   :  { %v7878_v56 = vsub.f32 %v6322_v19, %v1079_v17 }
 0x277   :  { %1065 = vadd.xlane.f32.xlu0 %v1064_v37  ;;  %11674 = vst [vmem:[#allocation171_spill] sm:$0xff] %v7859_v33  ;;  %v1080_v37 = vmul.f32 0.020408163, %v7471_v6  ;;  %v1349_v6 = vmul.f32 %v7859_v33, %v7859_v33  ;;  %v1484_v17 = vsel %vm667_vm0, %v1348_v0, 0.0  ;;  %v1083_v33 = vmul.f32 0.020408163, %v7501_v42 }
 0x278   :  { %v7861_v51 = vpop.xlane.xlu0 %861  ;;  %1068 = vadd.xlane.f32.xlu1 %v1067_v12  ;;  %11676 = vst [vmem:[#allocation173_spill] sm:$0xff] %v7878_v56  ;;  %v1081_v12 = vmul.f32 0.020408163, %v7481_v8  ;;  %v1350_v8 = vmul.f32 %v7867_v23, %v7867_v23  ;;  %v6325_v0 = vld [vmem:[%s11211_s0 + $0x30] sm:$0xff]  ;;  %v1084_v23 = vmul.f32 0.020408163, %v7513_v2 }
 0x279   :  { %v7870_v47 = vpop.xlane.xlu1 %864  ;;  %v7888_v10 = vsub.f32 %v6323_v41, %v1080_v37  ;;  %v1351_v41 = vmul.f32 %v7878_v56, %v7878_v56  ;;  %v1085_v56 = vmul.f32 0.020408163, %v7519_v48 }
 0x27a   :  { %v1490_v42 = vsel %vm667_vm0, %v1350_v8, 0.0  ;;  %v6327_v8 = vld [vmem:[%s11211_s0 + $0x40] sm:$0xff] }
 0x27b   :  { %1071 = vadd.xlane.f32.xlu0 %v1070_v15  ;;  %11677 = vst [vmem:[#allocation174_spill] sm:$0xff] %v7888_v10  ;;  %v1082_v15 = vmul.f32 0.020408163, %v7491_v43  ;;  %v1487_v43 = vsel %vm667_vm0, %v1349_v6, 0.0  ;;  %v6326_v6 = vld [vmem:[%s11211_s0 + $0x38] sm:$0xff]  ;;  %v1493_v2 = vsel %vm667_vm0, %v1351_v41, 0.0 }
 0x27c   :  { %v7881_v25 = vpop.xlane.xlu0 %867  ;;  %1074 = vadd.xlane.f32.xlu1 %v1073_v52  ;;  %v6324_v52 = vld [vmem:[%s11211_s0 + $0x28] sm:$0xff] }
 0x27d   :  { %v7891_v21 = vpop.xlane.xlu1 %870  ;;  %v7899_v19 = vsub.f32 %v6324_v52, %v1081_v12  ;;  %v1352_v52 = vmul.f32 %v7888_v10, %v7888_v10  ;;  %v1086_v10 = vmul.f32 0.020408163, %v7525_v38  ;;  %v6328_v41 = vld [vmem:[%s11211_s0 + $0x48] sm:$0xff] }
 0x27f   :  { %1485 = vadd.xlane.f32.xlu0 %v1484_v17  ;;  %11678 = vst [vmem:[#allocation175_spill] sm:$0xff] %v7899_v19  ;;  %v7910_v17 = vsub.f32 %v6325_v0, %v1082_v15  ;;  %v1353_v0 = vmul.f32 %v7899_v19, %v7899_v19  ;;  %v1496_v48 = vsel %vm667_vm0, %v1352_v52, 0.0  ;;  %v1087_v19 = vmul.f32 0.020408163, %v7531_v13  ;;  %v6329_v52 = vld [vmem:[%s11211_s0 + $0x50] sm:$0xff] }
 0x280   :  { %v7902_v37 = vpop.xlane.xlu0 %873  ;;  %1488 = vadd.xlane.f32.xlu1 %v1487_v43  ;;  %v7921_v43 = vsub.f32 %v6326_v6, %v1083_v33 }
 0x281   :  { %11679 = vst [vmem:[#allocation176_spill] sm:$0xff] %v7910_v17  ;;  %v7913_v12 = vpop.xlane.xlu1 %876  ;;  %v1354_v6 = vmul.f32 %v7910_v17, %v7910_v17  ;;  %v1499_v38 = vsel %vm667_vm0, %v1353_v0, 0.0  ;;  %v1088_v17 = vmul.f32 0.020408163, %v7537_v62  ;;  %v6330_v0 = vld [vmem:[%s11211_s0 + $0x58] sm:$0xff] }
 0x282   :  { %11680 = vst [vmem:[#allocation177_spill] sm:$0xff] %v7921_v43 }
 0x283   :  { %1491 = vadd.xlane.f32.xlu0 %v1490_v42  ;;  %v7932_v42 = vsub.f32 %v6327_v8, %v1084_v23  ;;  %v1355_v8 = vmul.f32 %v7921_v43, %v7921_v43  ;;  %v1502_v13 = vsel %vm667_vm0, %v1354_v6, 0.0  ;;  %v1089_v43 = vmul.f32 0.020408163, %v7543_v60  ;;  %v6331_v6 = vld [vmem:[%s11211_s0 + $0x60] sm:$0xff] }
 0x284   :  { %v7924_v15 = vpop.xlane.xlu0 %879  ;;  %1494 = vadd.xlane.f32.xlu1 %v1493_v2  ;;  %v7943_v2 = vsub.f32 %v6328_v41, %v1085_v56 }
 0x285   :  { %11681 = vst [vmem:[#allocation178_spill] sm:$0xff] %v7932_v42  ;;  %v7935_v33 = vpop.xlane.xlu1 %882  ;;  %v1356_v41 = vmul.f32 %v7932_v42, %v7932_v42  ;;  %v1505_v62 = vsel %vm667_vm0, %v1355_v8, 0.0  ;;  %v1090_v42 = vmul.f32 0.020408163, %v7549_v34  ;;  %v6332_v8 = vld [vmem:[%s11211_s0 + $0x68] sm:$0xff] }
 0x286   :  { %11682 = vst [vmem:[#allocation179_spill] sm:$0xff] %v7943_v2 }
 0x287   :  { %1497 = vadd.xlane.f32.xlu0 %v1496_v48  ;;  %v7954_v48 = vsub.f32 %v6329_v52, %v1086_v10  ;;  %v1357_v52 = vmul.f32 %v7943_v2, %v7943_v2  ;;  %v1508_v60 = vsel %vm667_vm0, %v1356_v41, 0.0  ;;  %v1091_v2 = vmul.f32 0.020408163, %v7555_v58  ;;  %v6333_v41 = vld [vmem:[%s11211_s0 + $0x70] sm:$0xff] }
 0x288   :  { %v7946_v23 = vpop.xlane.xlu0 %885  ;;  %1500 = vadd.xlane.f32.xlu1 %v1499_v38  ;;  %v7965_v38 = vsub.f32 %v6330_v0, %v1087_v19 }
 0x289   :  { %11683 = vst [vmem:[#allocation180_spill] sm:$0xff] %v7954_v48  ;;  %v7957_v56 = vpop.xlane.xlu1 %888  ;;  %v1358_v0 = vmul.f32 %v7954_v48, %v7954_v48  ;;  %v1511_v34 = vsel %vm667_vm0, %v1357_v52, 0.0  ;;  %v1092_v48 = vmul.f32 0.020408163, %v7561_v30  ;;  %v6334_v52 = vld [vmem:[%s11211_s0 + $0x78] sm:$0xff] }
 0x28a   :  { %11684 = vst [vmem:[#allocation181_spill] sm:$0xff] %v7965_v38 }
 0x28b   :  { %1503 = vadd.xlane.f32.xlu0 %v1502_v13  ;;  %v7976_v13 = vsub.f32 %v6331_v6, %v1088_v17  ;;  %v1359_v6 = vmul.f32 %v7965_v38, %v7965_v38  ;;  %v1514_v58 = vsel %vm667_vm0, %v1358_v0, 0.0  ;;  %v1093_v38 = vmul.f32 0.020408163, %v7567_v54  ;;  %v6335_v0 = vld [vmem:[%s11211_s0 + $0x80] sm:$0xff] }
 0x28c   :  { %v7968_v10 = vpop.xlane.xlu0 %891  ;;  %1506 = vadd.xlane.f32.xlu1 %v1505_v62  ;;  %v7987_v62 = vsub.f32 %v6332_v8, %v1089_v43 }
 0x28d   :  { %11685 = vst [vmem:[#allocation182_spill] sm:$0xff] %v7976_v13  ;;  %v7979_v19 = vpop.xlane.xlu1 %894  ;;  %v1360_v8 = vmul.f32 %v7976_v13, %v7976_v13  ;;  %v1517_v30 = vsel %vm667_vm0, %v1359_v6, 0.0  ;;  %v1094_v13 = vmul.f32 0.020408163, %v7573_v26  ;;  %v6336_v6 = vld [vmem:[%s11211_s0 + $0x88] sm:$0xff] }
 0x28e   :  { %11686 = vst [vmem:[#allocation183_spill] sm:$0xff] %v7987_v62 }
 0x28f   :  { %1509 = vadd.xlane.f32.xlu0 %v1508_v60  ;;  %v7998_v60 = vsub.f32 %v6333_v41, %v1090_v42  ;;  %v1361_v41 = vmul.f32 %v7987_v62, %v7987_v62  ;;  %v1520_v54 = vsel %vm667_vm0, %v1360_v8, 0.0  ;;  %v1095_v62 = vmul.f32 0.020408163, %v7579_v50  ;;  %v6337_v8 = vld [vmem:[%s11211_s0 + $0x90] sm:$0xff] }
 0x290   :  { %v7990_v17 = vpop.xlane.xlu0 %897  ;;  %1512 = vadd.xlane.f32.xlu1 %v1511_v34  ;;  %v8009_v34 = vsub.f32 %v6334_v52, %v1091_v2 }
 0x291   :  { %11687 = vst [vmem:[#allocation184_spill] sm:$0xff] %v7998_v60  ;;  %v8001_v43 = vpop.xlane.xlu1 %900  ;;  %v1362_v52 = vmul.f32 %v7998_v60, %v7998_v60  ;;  %v1523_v26 = vsel %vm667_vm0, %v1361_v41, 0.0  ;;  %v1096_v60 = vmul.f32 0.020408163, %v7585_v22  ;;  %v6338_v41 = vld [vmem:[%s11211_s0 + $0x98] sm:$0xff] }
 0x292   :  { %11688 = vst [vmem:[#allocation185_spill] sm:$0xff] %v8009_v34 }
 0x293   :  { %1515 = vadd.xlane.f32.xlu0 %v1514_v58  ;;  %v8020_v58 = vsub.f32 %v6335_v0, %v1092_v48  ;;  %v1363_v0 = vmul.f32 %v8009_v34, %v8009_v34  ;;  %v1526_v50 = vsel %vm667_vm0, %v1362_v52, 0.0  ;;  %v1097_v34 = vmul.f32 0.020408163, %v7591_v46  ;;  %v6339_v52 = vld [vmem:[%s11211_s0 + $0xa0] sm:$0xff] }
 0x294   :  { %v8012_v42 = vpop.xlane.xlu0 %903  ;;  %1518 = vadd.xlane.f32.xlu1 %v1517_v30  ;;  %v8031_v30 = vsub.f32 %v6336_v6, %v1093_v38 }
 0x295   :  { %11689 = vst [vmem:[#allocation186_spill] sm:$0xff] %v8020_v58  ;;  %v8023_v2 = vpop.xlane.xlu1 %906  ;;  %v1364_v6 = vmul.f32 %v8020_v58, %v8020_v58  ;;  %v1529_v22 = vsel %vm667_vm0, %v1363_v0, 0.0  ;;  %v1098_v58 = vmul.f32 0.020408163, %v7597_v18  ;;  %v6340_v0 = vld [vmem:[%s11211_s0 + $0xa8] sm:$0xff] }
 0x296   :  { %11690 = vst [vmem:[#allocation187_spill] sm:$0xff] %v8031_v30 }
 0x297   :  { %1521 = vadd.xlane.f32.xlu0 %v1520_v54  ;;  %v8042_v54 = vsub.f32 %v6337_v8, %v1094_v13  ;;  %v1365_v8 = vmul.f32 %v8031_v30, %v8031_v30  ;;  %v1532_v46 = vsel %vm667_vm0, %v1364_v6, 0.0  ;;  %v1099_v30 = vmul.f32 0.020408163, %v7603_v40  ;;  %v6341_v6 = vld [vmem:[%s11211_s0 + $0xb0] sm:$0xff] }
 0x298   :  { %v8034_v48 = vpop.xlane.xlu0 %909  ;;  %1524 = vadd.xlane.f32.xlu1 %v1523_v26  ;;  %v8053_v26 = vsub.f32 %v6338_v41, %v1095_v62 }
 0x299   :  { %11691 = vst [vmem:[#allocation188_spill] sm:$0xff] %v8042_v54  ;;  %v8045_v38 = vpop.xlane.xlu1 %912  ;;  %v1366_v41 = vmul.f32 %v8042_v54, %v8042_v54  ;;  %v1535_v18 = vsel %vm667_vm0, %v1365_v8, 0.0  ;;  %v1100_v54 = vmul.f32 0.020408163, %v7609_v14  ;;  %v6342_v8 = vld [vmem:[%s11211_s0 + $0xb8] sm:$0xff] }
 0x29a   :  { %11692 = vst [vmem:[#allocation189_spill] sm:$0xff] %v8053_v26 }
 0x29b   :  { %1527 = vadd.xlane.f32.xlu0 %v1526_v50  ;;  %v8064_v50 = vsub.f32 %v6339_v52, %v1096_v60  ;;  %v1367_v52 = vmul.f32 %v8053_v26, %v8053_v26  ;;  %v1538_v40 = vsel %vm667_vm0, %v1366_v41, 0.0  ;;  %v1101_v26 = vmul.f32 0.020408163, %v7615_v36  ;;  %v6343_v41 = vld [vmem:[%s11211_s0 + $0xc0] sm:$0xff] }
 0x29c   :  { %v8056_v13 = vpop.xlane.xlu0 %915  ;;  %1530 = vadd.xlane.f32.xlu1 %v1529_v22  ;;  %v8075_v22 = vsub.f32 %v6340_v0, %v1097_v34 }
 0x29d   :  { %11693 = vst [vmem:[#allocation190_spill] sm:$0xff] %v8064_v50  ;;  %v8067_v62 = vpop.xlane.xlu1 %918  ;;  %v1368_v0 = vmul.f32 %v8064_v50, %v8064_v50  ;;  %v1541_v14 = vsel %vm667_vm0, %v1367_v52, 0.0  ;;  %v1102_v50 = vmul.f32 0.020408163, %v7621_v45  ;;  %v6344_v52 = vld [vmem:[%s11211_s0 + $0xc8] sm:$0xff] }
 0x29e   :  { %11694 = vst [vmem:[#allocation191_spill] sm:$0xff] %v8075_v22 }
 0x29f   :  { %1533 = vadd.xlane.f32.xlu0 %v1532_v46  ;;  %v8086_v46 = vsub.f32 %v6341_v6, %v1098_v58  ;;  %v1369_v6 = vmul.f32 %v8075_v22, %v8075_v22  ;;  %v1544_v36 = vsel %vm667_vm0, %v1368_v0, 0.0  ;;  %v1103_v22 = vmul.f32 0.020408163, %v7627_v32  ;;  %v6345_v0 = vld [vmem:[%s11211_s0 + $0xd0] sm:$0xff] }
 0x2a0   :  { %v8078_v60 = vpop.xlane.xlu0 %921  ;;  %1536 = vadd.xlane.f32.xlu1 %v1535_v18  ;;  %v8097_v18 = vsub.f32 %v6342_v8, %v1099_v30 }
 0x2a1   :  { %11695 = vst [vmem:[#allocation192_spill] sm:$0xff] %v8086_v46  ;;  %v8089_v34 = vpop.xlane.xlu1 %924  ;;  %v1370_v8 = vmul.f32 %v8086_v46, %v8086_v46  ;;  %v1547_v45 = vsel %vm667_vm0, %v1369_v6, 0.0  ;;  %v1104_v46 = vmul.f32 0.020408163, %v7633_v9  ;;  %v6346_v6 = vld [vmem:[%s11211_s0 + $0xd8] sm:$0xff] }
 0x2a2   :  { %11696 = vst [vmem:[#allocation193_spill] sm:$0xff] %v8097_v18 }
 0x2a3   :  { %1539 = vadd.xlane.f32.xlu0 %v1538_v40  ;;  %v8108_v40 = vsub.f32 %v6343_v41, %v1100_v54  ;;  %v1371_v41 = vmul.f32 %v8097_v18, %v8097_v18  ;;  %v1550_v32 = vsel %vm667_vm0, %v1370_v8, 0.0  ;;  %v1105_v18 = vmul.f32 0.020408163, %v7639_v28  ;;  %v6347_v8 = vld [vmem:[%s11211_s0 + $0xe0] sm:$0xff] }
 0x2a4   :  { %v8100_v58 = vpop.xlane.xlu0 %927  ;;  %1542 = vadd.xlane.f32.xlu1 %v1541_v14  ;;  %v8119_v14 = vsub.f32 %v6344_v52, %v1101_v26 }
 0x2a5   :  { %11697 = vst [vmem:[#allocation194_spill] sm:$0xff] %v8108_v40  ;;  %v8111_v30 = vpop.xlane.xlu1 %930  ;;  %v1372_v52 = vmul.f32 %v8108_v40, %v8108_v40  ;;  %v1553_v9 = vsel %vm667_vm0, %v1371_v41, 0.0  ;;  %v1106_v40 = vmul.f32 0.020408163, %v7645_v5  ;;  %v6348_v41 = vld [vmem:[%s11211_s0 + $0xe8] sm:$0xff] }
 0x2a6   :  { %11698 = vst [vmem:[#allocation195_spill] sm:$0xff] %v8119_v14 }
 0x2a7   :  { %1545 = vadd.xlane.f32.xlu0 %v1544_v36  ;;  %v8130_v36 = vsub.f32 %v6345_v0, %v1102_v50  ;;  %v1373_v0 = vmul.f32 %v8119_v14, %v8119_v14  ;;  %v1556_v28 = vsel %vm667_vm0, %v1372_v52, 0.0  ;;  %v1107_v14 = vmul.f32 0.020408163, %v7651_v24  ;;  %v6349_v52 = vld [vmem:[%s11211_s0 + $0xf0] sm:$0xff] }
 0x2a8   :  { %v8122_v54 = vpop.xlane.xlu0 %933  ;;  %1548 = vadd.xlane.f32.xlu1 %v1547_v45  ;;  %v8141_v45 = vsub.f32 %v6346_v6, %v1103_v22 }
 0x2a9   :  { %11699 = vst [vmem:[#allocation196_spill] sm:$0xff] %v8130_v36  ;;  %v8133_v26 = vpop.xlane.xlu1 %936  ;;  %v1374_v6 = vmul.f32 %v8130_v36, %v8130_v36  ;;  %v1559_v5 = vsel %vm667_vm0, %v1373_v0, 0.0  ;;  %v1108_v36 = vmul.f32 0.020408163, %v7657_v1  ;;  %v6350_v0 = vld [vmem:[%s11211_s0 + $0xf8] sm:$0xff] }
 0x2aa   :  { %11700 = vst [vmem:[#allocation197_spill] sm:$0xff] %v8141_v45 }
 0x2ab   :  { %1551 = vadd.xlane.f32.xlu0 %v1550_v32  ;;  %v8152_v32 = vsub.f32 %v6347_v8, %v1104_v46  ;;  %v1375_v8 = vmul.f32 %v8141_v45, %v8141_v45  ;;  %v1562_v24 = vsel %vm667_vm0, %v1374_v6, 0.0  ;;  %v1109_v45 = vmul.f32 0.020408163, %v7663_v20  ;;  %v6351_v6 = vld [vmem:[%s11211_s0 + $0x100] sm:$0xff] }
 0x2ac   :  { %v8144_v50 = vpop.xlane.xlu0 %939  ;;  %1554 = vadd.xlane.f32.xlu1 %v1553_v9  ;;  %v8163_v9 = vsub.f32 %v6348_v41, %v1105_v18 }
 0x2ad   :  { %11701 = vst [vmem:[#allocation198_spill] sm:$0xff] %v8152_v32  ;;  %v8155_v22 = vpop.xlane.xlu1 %942  ;;  %v1376_v41 = vmul.f32 %v8152_v32, %v8152_v32  ;;  %v1565_v1 = vsel %vm667_vm0, %v1375_v8, 0.0  ;;  %v1110_v32 = vmul.f32 0.020408163, %v7669_v61  ;;  %v6352_v8 = vld [vmem:[%s11211_s0 + $0x108] sm:$0xff] }
 0x2ae   :  { %11702 = vst [vmem:[#allocation199_spill] sm:$0xff] %v8163_v9 }
 0x2af   :  { %1557 = vadd.xlane.f32.xlu0 %v1556_v28  ;;  %v8174_v28 = vsub.f32 %v6349_v52, %v1106_v40  ;;  %v1377_v52 = vmul.f32 %v8163_v9, %v8163_v9  ;;  %v1568_v20 = vsel %vm667_vm0, %v1376_v41, 0.0  ;;  %v1111_v9 = vmul.f32 0.020408163, %v7675_v16  ;;  %v6353_v41 = vld [vmem:[%s11211_s0 + $0x110] sm:$0xff] }
 0x2b0   :  { %v8166_v46 = vpop.xlane.xlu0 %945  ;;  %1560 = vadd.xlane.f32.xlu1 %v1559_v5  ;;  %v8185_v5 = vsub.f32 %v6350_v0, %v1107_v14 }
 0x2b1   :  { %11703 = vst [vmem:[#allocation200_spill] sm:$0xff] %v8174_v28  ;;  %v8177_v18 = vpop.xlane.xlu1 %948  ;;  %v1378_v0 = vmul.f32 %v8174_v28, %v8174_v28  ;;  %v1571_v61 = vsel %vm667_vm0, %v1377_v52, 0.0  ;;  %v1112_v28 = vmul.f32 0.020408163, %v7681_v57  ;;  %v6354_v52 = vld [vmem:[%s11211_s0 + $0x118] sm:$0xff] }
 0x2b2   :  { %11704 = vst [vmem:[#allocation201_spill] sm:$0xff] %v8185_v5 }
 0x2b3   :  { %1563 = vadd.xlane.f32.xlu0 %v1562_v24  ;;  %v8196_v24 = vsub.f32 %v6351_v6, %v1108_v36  ;;  %v1379_v6 = vmul.f32 %v8185_v5, %v8185_v5  ;;  %v1574_v16 = vsel %vm667_vm0, %v1378_v0, 0.0  ;;  %v1113_v5 = vmul.f32 0.020408163, %v7687_v4  ;;  %v6355_v0 = vld [vmem:[%s11211_s0 + $0x120] sm:$0xff] }
 0x2b4   :  { %v8188_v40 = vpop.xlane.xlu0 %951  ;;  %1566 = vadd.xlane.f32.xlu1 %v1565_v1  ;;  %v8207_v1 = vsub.f32 %v6352_v8, %v1109_v45 }
 0x2b5   :  { %11705 = vst [vmem:[#allocation202_spill] sm:$0xff] %v8196_v24  ;;  %v8199_v14 = vpop.xlane.xlu1 %954  ;;  %v1380_v8 = vmul.f32 %v8196_v24, %v8196_v24  ;;  %v1577_v57 = vsel %vm667_vm0, %v1379_v6, 0.0  ;;  %v1114_v24 = vmul.f32 0.020408163, %v7693_v53  ;;  %v6356_v6 = vld [vmem:[%s11211_s0 + $0x128] sm:$0xff] }
 0x2b6   :  { %11706 = vst [vmem:[#allocation203_spill] sm:$0xff] %v8207_v1 }
 0x2b7   :  { %1569 = vadd.xlane.f32.xlu0 %v1568_v20  ;;  %v8218_v20 = vsub.f32 %v6353_v41, %v1110_v32  ;;  %v1381_v41 = vmul.f32 %v8207_v1, %v8207_v1  ;;  %v1580_v4 = vsel %vm667_vm0, %v1380_v8, 0.0  ;;  %v1115_v1 = vmul.f32 0.020408163, %v7699_v11  ;;  %v6357_v8 = vld [vmem:[%s11211_s0 + $0x130] sm:$0xff] }
 0x2b8   :  { %v8210_v36 = vpop.xlane.xlu0 %957  ;;  %1572 = vadd.xlane.f32.xlu1 %v1571_v61  ;;  %v8229_v61 = vsub.f32 %v6354_v52, %v1111_v9 }
 0x2b9   :  { %11707 = vst [vmem:[#allocation204_spill] sm:$0xff] %v8218_v20  ;;  %v8221_v45 = vpop.xlane.xlu1 %960  ;;  %v1382_v52 = vmul.f32 %v8218_v20, %v8218_v20  ;;  %v1583_v53 = vsel %vm667_vm0, %v1381_v41, 0.0  ;;  %v1116_v20 = vmul.f32 0.020408163, %v7705_v49  ;;  %v6358_v41 = vld [vmem:[%s11211_s0 + $0x138] sm:$0xff] }
 0x2ba   :  { %11708 = vst [vmem:[#allocation205_spill] sm:$0xff] %v8229_v61 }
 0x2bb   :  { %1575 = vadd.xlane.f32.xlu0 %v1574_v16  ;;  %v8240_v16 = vsub.f32 %v6355_v0, %v1112_v28  ;;  %v1383_v0 = vmul.f32 %v8229_v61, %v8229_v61  ;;  %v1586_v11 = vsel %vm667_vm0, %v1382_v52, 0.0  ;;  %v1117_v61 = vmul.f32 0.020408163, %v7711_v7  ;;  %v6359_v52 = vld [vmem:[%s11211_s0 + $0x140] sm:$0xff] }
 0x2bc   :  { %v8232_v32 = vpop.xlane.xlu0 %963  ;;  %1578 = vadd.xlane.f32.xlu1 %v1577_v57  ;;  %v8251_v57 = vsub.f32 %v6356_v6, %v1113_v5 }
 0x2bd   :  { %11709 = vst [vmem:[#allocation206_spill] sm:$0xff] %v8240_v16  ;;  %v8243_v9 = vpop.xlane.xlu1 %966  ;;  %v1384_v6 = vmul.f32 %v8240_v16, %v8240_v16  ;;  %v1589_v49 = vsel %vm667_vm0, %v1383_v0, 0.0  ;;  %v1118_v16 = vmul.f32 0.020408163, %v7717_v44  ;;  %v6360_v0 = vld [vmem:[%s11211_s0 + $0x148] sm:$0xff] }
 0x2be   :  { %11710 = vst [vmem:[#allocation207_spill] sm:$0xff] %v8251_v57 }
 0x2bf   :  { %1581 = vadd.xlane.f32.xlu0 %v1580_v4  ;;  %v8262_v4 = vsub.f32 %v6357_v8, %v1114_v24  ;;  %v1385_v8 = vmul.f32 %v8251_v57, %v8251_v57  ;;  %v1592_v7 = vsel %vm667_vm0, %v1384_v6, 0.0  ;;  %v1119_v57 = vmul.f32 0.020408163, %v7723_v3  ;;  %v6361_v6 = vld [vmem:[%s11211_s0 + $0x150] sm:$0xff] }
 0x2c0   :  { %v8254_v28 = vpop.xlane.xlu0 %969  ;;  %1584 = vadd.xlane.f32.xlu1 %v1583_v53  ;;  %v8273_v53 = vsub.f32 %v6358_v41, %v1115_v1 }
 0x2c1   :  { %11711 = vst [vmem:[#allocation208_spill] sm:$0xff] %v8262_v4  ;;  %v8265_v5 = vpop.xlane.xlu1 %972  ;;  %v1386_v41 = vmul.f32 %v8262_v4, %v8262_v4  ;;  %v1595_v44 = vsel %vm667_vm0, %v1385_v8, 0.0  ;;  %v1120_v4 = vmul.f32 0.020408163, %v7729_v39  ;;  %v6362_v8 = vld [vmem:[%s11211_s0 + $0x158] sm:$0xff] }
 0x2c2   :  { %11712 = vst [vmem:[#allocation209_spill] sm:$0xff] %v8273_v53 }
 0x2c3   :  { %1587 = vadd.xlane.f32.xlu0 %v1586_v11  ;;  %v8284_v11 = vsub.f32 %v6359_v52, %v1116_v20  ;;  %v1387_v52 = vmul.f32 %v8273_v53, %v8273_v53  ;;  %v1598_v3 = vsel %vm667_vm0, %v1386_v41, 0.0  ;;  %v1121_v53 = vmul.f32 0.020408163, %v7735_v63  ;;  %v6363_v41 = vld [vmem:[%s11211_s0 + $0x160] sm:$0xff] }
 0x2c4   :  { %v8276_v24 = vpop.xlane.xlu0 %975  ;;  %1590 = vadd.xlane.f32.xlu1 %v1589_v49  ;;  %v8295_v49 = vsub.f32 %v6360_v0, %v1117_v61 }
 0x2c5   :  { %11713 = vst [vmem:[#allocation210_spill] sm:$0xff] %v8284_v11  ;;  %v8287_v1 = vpop.xlane.xlu1 %978  ;;  %v1388_v0 = vmul.f32 %v8284_v11, %v8284_v11  ;;  %v1601_v39 = vsel %vm667_vm0, %v1387_v52, 0.0  ;;  %v1122_v11 = vmul.f32 0.020408163, %v7741_v35  ;;  %v6364_v52 = vld [vmem:[%s11211_s0 + $0x168] sm:$0xff] }
 0x2c6   :  { %11714 = vst [vmem:[#allocation211_spill] sm:$0xff] %v8295_v49 }
 0x2c7   :  { %1593 = vadd.xlane.f32.xlu0 %v1592_v7  ;;  %v8306_v7 = vsub.f32 %v6361_v6, %v1118_v16  ;;  %v1389_v6 = vmul.f32 %v8295_v49, %v8295_v49  ;;  %v1604_v63 = vsel %vm667_vm0, %v1388_v0, 0.0  ;;  %v1123_v49 = vmul.f32 0.020408163, %v7747_v59  ;;  %v6365_v0 = vld [vmem:[%s11211_s0 + $0x170] sm:$0xff] }
 0x2c8   :  { %v8298_v20 = vpop.xlane.xlu0 %981  ;;  %1596 = vadd.xlane.f32.xlu1 %v1595_v44  ;;  %v8317_v44 = vsub.f32 %v6362_v8, %v1119_v57 }
 0x2c9   :  { %11715 = vst [vmem:[#allocation212_spill] sm:$0xff] %v8306_v7  ;;  %v8309_v61 = vpop.xlane.xlu1 %984  ;;  %v1390_v8 = vmul.f32 %v8306_v7, %v8306_v7  ;;  %v1607_v35 = vsel %vm667_vm0, %v1389_v6, 0.0  ;;  %v1124_v7 = vmul.f32 0.020408163, %v7753_v31  ;;  %v6366_v6 = vld [vmem:[%s11211_s0 + $0x178] sm:$0xff] }
 0x2ca   :  { %11716 = vst [vmem:[#allocation213_spill] sm:$0xff] %v8317_v44 }
 0x2cb   :  { %1599 = vadd.xlane.f32.xlu0 %v1598_v3  ;;  %v8328_v3 = vsub.f32 %v6363_v41, %v1120_v4  ;;  %v1391_v41 = vmul.f32 %v8317_v44, %v8317_v44  ;;  %v1610_v59 = vsel %vm667_vm0, %v1390_v8, 0.0  ;;  %v1125_v44 = vmul.f32 0.020408163, %v7759_v55  ;;  %v6367_v8 = vld [vmem:[%s11211_s0 + $0x180] sm:$0xff] }
 0x2cc   :  { %v8320_v16 = vpop.xlane.xlu0 %987  ;;  %1602 = vadd.xlane.f32.xlu1 %v1601_v39  ;;  %v8339_v39 = vsub.f32 %v6364_v52, %v1121_v53 }
 0x2cd   :  { %11717 = vst [vmem:[#allocation214_spill] sm:$0xff] %v8328_v3  ;;  %v8331_v57 = vpop.xlane.xlu1 %990  ;;  %v1392_v52 = vmul.f32 %v8328_v3, %v8328_v3  ;;  %v1613_v31 = vsel %vm667_vm0, %v1391_v41, 0.0  ;;  %v1126_v3 = vmul.f32 0.020408163, %v7765_v29  ;;  %v6368_v41 = vld [vmem:[%s11211_s0 + $0x188] sm:$0xff] }
 0x2ce   :  { %11718 = vst [vmem:[#allocation215_spill] sm:$0xff] %v8339_v39 }
 0x2cf   :  { %1605 = vadd.xlane.f32.xlu0 %v1604_v63  ;;  %v8350_v63 = vsub.f32 %v6365_v0, %v1122_v11  ;;  %v1393_v0 = vmul.f32 %v8339_v39, %v8339_v39  ;;  %v1616_v55 = vsel %vm667_vm0, %v1392_v52, 0.0  ;;  %v11725_v39 = vld [vmem:[#allocation158_spill] sm:$0xff]  ;;  %v6369_v52 = vld [vmem:[%s11211_s0 + $0x190] sm:$0xff] }
 0x2d0   :  { %v8342_v4 = vpop.xlane.xlu0 %993  ;;  %1608 = vadd.xlane.f32.xlu1 %v1607_v35  ;;  %v8361_v35 = vsub.f32 %v6366_v6, %v1123_v49 }
 0x2d1   :  { %11719 = vst [vmem:[#allocation216_spill] sm:$0xff] %v8350_v63  ;;  %v8353_v53 = vpop.xlane.xlu1 %996  ;;  %v1394_v6 = vmul.f32 %v8350_v63, %v8350_v63  ;;  %v1619_v29 = vsel %vm667_vm0, %v1393_v0, 0.0  ;;  %v11728_v63 = vld [vmem:[#allocation159_spill] sm:$0xff]  ;;  %v6370_v0 = vld [vmem:[%s11211_s0 + $0x198] sm:$0xff] }
 0x2d2   :  { %11720 = vst [vmem:[#allocation217_spill] sm:$0xff] %v8361_v35 }
 0x2d3   :  { %1611 = vadd.xlane.f32.xlu0 %v1610_v59  ;;  %v8372_v59 = vsub.f32 %v6367_v8, %v1124_v7  ;;  %v1395_v8 = vmul.f32 %v8361_v35, %v8361_v35  ;;  %v11731_v35 = vld [vmem:[#allocation160_spill] sm:$0xff] }
 0x2d4   :  { %v8364_v11 = vpop.xlane.xlu0 %999  ;;  %1614 = vadd.xlane.f32.xlu1 %v1613_v31  ;;  %v8383_v31 = vsub.f32 %v6368_v41, %v1125_v44 }
 0x2d5   :  { %11721 = vst [vmem:[#allocation218_spill] sm:$0xff] %v8364_v11  ;;  %11722 = vst [vmem:[#allocation219_spill] sm:$0xff] %v8372_v59  ;;  %v8375_v49 = vpop.xlane.xlu1 %1002  ;;  %v1127_v11 = vmul.f32 0.020408163, %v11725_v39  ;;  %v1622_v39 = vsel %vm667_vm0, %v1394_v6, 0.0  ;;  %v1396_v41 = vmul.f32 %v8372_v59, %v8372_v59  ;;  %v6371_v6 = vld [vmem:[%s11211_s0 + $0x1a0] sm:$0xff] }
 0x2d6   :  { %11723 = vst [vmem:[#allocation220_spill] sm:$0xff] %v8375_v49  ;;  %11724 = vst [vmem:[#allocation221_spill] sm:$0xff] %v8383_v31  ;;  %v1128_v49 = vmul.f32 0.020408163, %v11728_v63  ;;  %v1625_v63 = vsel %vm667_vm0, %v1395_v8, 0.0  ;;  %v11734_v59 = vld [vmem:[#allocation161_spill] sm:$0xff] }
 0x2d7   :  { %1617 = vadd.xlane.f32.xlu0 %v1616_v55  ;;  %v8394_v55 = vsub.f32 %v6369_v52, %v1126_v3  ;;  %v1397_v52 = vmul.f32 %v8383_v31, %v8383_v31  ;;  %v6372_v8 = vld [vmem:[%s11211_s0 + $0x1a8] sm:$0xff]  ;;  %v11737_v31 = vld [vmem:[#allocation162_spill] sm:$0xff] }
 0x2d8   :  { %v8386_v7 = vpop.xlane.xlu0 %1005  ;;  %1620 = vadd.xlane.f32.xlu1 %v1619_v29  ;;  %v8405_v29 = vsub.f32 %v6370_v0, %v1127_v11 }
 0x2d9   :  { %11726 = vst [vmem:[#allocation158_spill] sm:$0xff] %v8386_v7  ;;  %11727 = vst [vmem:[#allocation222_spill] sm:$0xff] %v8394_v55  ;;  %v8397_v44 = vpop.xlane.xlu1 %1008  ;;  %v1129_v7 = vmul.f32 0.020408163, %v11731_v35  ;;  %v1628_v35 = vsel %vm667_vm0, %v1396_v41, 0.0  ;;  %v1398_v0 = vmul.f32 %v8394_v55, %v8394_v55  ;;  %v6373_v41 = vld [vmem:[%s11211_s0 + $0x1b0] sm:$0xff] }
 0x2da   :  { %11729 = vst [vmem:[#allocation159_spill] sm:$0xff] %v8397_v44  ;;  %11730 = vst [vmem:[#allocation223_spill] sm:$0xff] %v8405_v29  ;;  %v1130_v44 = vmul.f32 0.020408163, %v11734_v59  ;;  %v1631_v59 = vsel %vm667_vm0, %v1397_v52, 0.0  ;;  %v11740_v55 = vld [vmem:[#allocation163_spill] sm:$0xff] }
 0x2db   :  { %1623 = vadd.xlane.f32.xlu0 %v1622_v39  ;;  %v8416_v39 = vsub.f32 %v6371_v6, %v1128_v49  ;;  %v1399_v6 = vmul.f32 %v8405_v29, %v8405_v29  ;;  %v6374_v52 = vld [vmem:[%s11211_s0 + $0x1b8] sm:$0xff]  ;;  %v11743_v29 = vld [vmem:[#allocation164_spill] sm:$0xff] }
 0x2dc   :  { %v8408_v3 = vpop.xlane.xlu0 %1011  ;;  %1626 = vadd.xlane.f32.xlu1 %v1625_v63  ;;  %v8427_v63 = vsub.f32 %v6372_v8, %v1129_v7 }
 0x2dd   :  { %11732 = vst [vmem:[#allocation160_spill] sm:$0xff] %v8408_v3  ;;  %11733 = vst [vmem:[#allocation224_spill] sm:$0xff] %v8416_v39  ;;  %v8419_v11 = vpop.xlane.xlu1 %1014  ;;  %v1131_v3 = vmul.f32 0.020408163, %v11737_v31  ;;  %v1634_v31 = vsel %vm667_vm0, %v1398_v0, 0.0  ;;  %v1400_v8 = vmul.f32 %v8416_v39, %v8416_v39  ;;  %v6375_v0 = vld [vmem:[%s11211_s0 + $0x1c0] sm:$0xff] }
 0x2de   :  { %11735 = vst [vmem:[#allocation161_spill] sm:$0xff] %v8419_v11  ;;  %11736 = vst [vmem:[#allocation225_spill] sm:$0xff] %v8427_v63  ;;  %v1132_v11 = vmul.f32 0.020408163, %v11740_v55  ;;  %v1637_v55 = vsel %vm667_vm0, %v1399_v6, 0.0  ;;  %v11746_v39 = vld [vmem:[#allocation165_spill] sm:$0xff] }
 0x2df   :  { %1629 = vadd.xlane.f32.xlu0 %v1628_v35  ;;  %v8438_v35 = vsub.f32 %v6373_v41, %v1130_v44  ;;  %v1401_v41 = vmul.f32 %v8427_v63, %v8427_v63  ;;  %v6376_v6 = vld [vmem:[%s11211_s0 + $0x1c8] sm:$0xff]  ;;  %v11749_v63 = vld [vmem:[#allocation166_spill] sm:$0xff] }
 0x2e0   :  { %v8430_v49 = vpop.xlane.xlu0 %1017  ;;  %1632 = vadd.xlane.f32.xlu1 %v1631_v59  ;;  %v8449_v59 = vsub.f32 %v6374_v52, %v1131_v3 }
 0x2e1   :  { %11738 = vst [vmem:[#allocation162_spill] sm:$0xff] %v8430_v49  ;;  %11739 = vst [vmem:[#allocation226_spill] sm:$0xff] %v8438_v35  ;;  %v8441_v7 = vpop.xlane.xlu1 %1020  ;;  %v1133_v49 = vmul.f32 0.020408163, %v11743_v29  ;;  %v1640_v29 = vsel %vm667_vm0, %v1400_v8, 0.0  ;;  %v1402_v52 = vmul.f32 %v8438_v35, %v8438_v35  ;;  %v6377_v8 = vld [vmem:[%s11211_s0 + $0x1d0] sm:$0xff] }
 0x2e2   :  { %11741 = vst [vmem:[#allocation163_spill] sm:$0xff] %v8441_v7  ;;  %11742 = vst [vmem:[#allocation227_spill] sm:$0xff] %v8449_v59  ;;  %v1134_v7 = vmul.f32 0.020408163, %v11746_v39  ;;  %v1643_v39 = vsel %vm667_vm0, %v1401_v41, 0.0  ;;  %v11752_v35 = vld [vmem:[#allocation167_spill] sm:$0xff] }
 0x2e3   :  { %1635 = vadd.xlane.f32.xlu0 %v1634_v31  ;;  %v8460_v31 = vsub.f32 %v6375_v0, %v1132_v11  ;;  %v1403_v0 = vmul.f32 %v8449_v59, %v8449_v59  ;;  %v6378_v41 = vld [vmem:[%s11211_s0 + $0x1d8] sm:$0xff]  ;;  %v11755_v59 = vld [vmem:[#allocation168_spill] sm:$0xff] }
 0x2e4   :  { %v8452_v44 = vpop.xlane.xlu0 %1023  ;;  %1638 = vadd.xlane.f32.xlu1 %v1637_v55  ;;  %v8471_v55 = vsub.f32 %v6376_v6, %v1133_v49 }
 0x2e5   :  { %11744 = vst [vmem:[#allocation164_spill] sm:$0xff] %v8452_v44  ;;  %11745 = vst [vmem:[#allocation228_spill] sm:$0xff] %v8460_v31  ;;  %v8463_v3 = vpop.xlane.xlu1 %1026  ;;  %v1135_v44 = vmul.f32 0.020408163, %v11749_v63  ;;  %v1646_v63 = vsel %vm667_vm0, %v1402_v52, 0.0  ;;  %v1404_v6 = vmul.f32 %v8460_v31, %v8460_v31  ;;  %v6379_v52 = vld [vmem:[%s11211_s0 + $0x1e0] sm:$0xff] }
 0x2e6   :  { %11747 = vst [vmem:[#allocation165_spill] sm:$0xff] %v8463_v3  ;;  %11748 = vst [vmem:[#allocation229_spill] sm:$0xff] %v8471_v55  ;;  %v1136_v3 = vmul.f32 0.020408163, %v11752_v35  ;;  %v1649_v35 = vsel %vm667_vm0, %v1403_v0, 0.0  ;;  %v11757_v31 = vld [vmem:[#allocation169_spill] sm:$0xff] }
 0x2e7   :  { %1641 = vadd.xlane.f32.xlu0 %v1640_v29  ;;  %v8482_v29 = vsub.f32 %v6377_v8, %v1134_v7  ;;  %v1405_v8 = vmul.f32 %v8471_v55, %v8471_v55  ;;  %v6380_v0 = vld [vmem:[%s11211_s0 + $0x1e8] sm:$0xff]  ;;  %v1139_v55 = vmul.f32 0.020408163, %v7851_v27 }
 0x2e8   :  { %v8474_v11 = vpop.xlane.xlu0 %1029  ;;  %1644 = vadd.xlane.f32.xlu1 %v1643_v39  ;;  %v8493_v39 = vsub.f32 %v6378_v41, %v1135_v44 }
 0x2e9   :  { %11750 = vst [vmem:[#allocation166_spill] sm:$0xff] %v8474_v11  ;;  %11751 = vst [vmem:[#allocation230_spill] sm:$0xff] %v8482_v29  ;;  %v8485_v49 = vpop.xlane.xlu1 %1032  ;;  %v1137_v11 = vmul.f32 0.020408163, %v11755_v59  ;;  %v1652_v59 = vsel %vm667_vm0, %v1404_v6, 0.0  ;;  %v1406_v41 = vmul.f32 %v8482_v29, %v8482_v29  ;;  %v6381_v6 = vld [vmem:[%s11211_s0 + $0x1f0] sm:$0xff] }
 0x2ea   :  { %11753 = vst [vmem:[#allocation167_spill] sm:$0xff] %v8485_v49  ;;  %11754 = vst [vmem:[#allocation231_spill] sm:$0xff] %v8493_v39  ;;  %v1138_v49 = vmul.f32 0.020408163, %v11757_v31  ;;  %v1655_v31 = vsel %vm667_vm0, %v1405_v8, 0.0  ;;  %v6382_v8 = vld [vmem:[%s11211_s0 + $0x1f8] sm:$0xff] }
 0x2eb   :  { %1647 = vadd.xlane.f32.xlu0 %v1646_v63  ;;  %v8504_v63 = vsub.f32 %v6379_v52, %v1136_v3  ;;  %v1407_v52 = vmul.f32 %v8493_v39, %v8493_v39  ;;  %v1140_v29 = vmul.f32 0.020408163, %v7861_v51  ;;  %v1658_v27 = vsel %vm667_vm0, %v1406_v41, 0.0  ;;  %v6383_v41 = vld [vmem:[%s11211_s0 + $0x200] sm:$0xff] }
 0x2ec   :  { %v8496_v7 = vpop.xlane.xlu0 %1035  ;;  %1650 = vadd.xlane.f32.xlu1 %v1649_v35  ;;  %v8515_v35 = vsub.f32 %v6380_v0, %v1137_v11  ;;  %v1141_v39 = vmul.f32 0.020408163, %v7870_v47 }
 0x2ed   :  { %11756 = vst [vmem:[#allocation168_spill] sm:$0xff] %v8504_v63  ;;  %v8507_v44 = vpop.xlane.xlu1 %1038  ;;  %v1408_v0 = vmul.f32 %v8504_v63, %v8504_v63  ;;  %v1661_v51 = vsel %vm667_vm0, %v1407_v52, 0.0  ;;  %v1142_v63 = vmul.f32 0.020408163, %v7881_v25  ;;  %v6384_v52 = vld [vmem:[%s11211_s0 + $0x208] sm:$0xff] }
 0x2ee   :  { %11758 = vst [vmem:[#allocation169_spill] sm:$0xff] %v8515_v35 }
 0x2ef   :  { %1653 = vadd.xlane.f32.xlu0 %v1652_v59  ;;  %v8526_v59 = vsub.f32 %v6381_v6, %v1138_v49  ;;  %v1409_v6 = vmul.f32 %v8515_v35, %v8515_v35  ;;  %v1664_v47 = vsel %vm667_vm0, %v1408_v0, 0.0  ;;  %v1143_v35 = vmul.f32 0.020408163, %v7891_v21  ;;  %v6385_v0 = vld [vmem:[%s11211_s0 + $0x210] sm:$0xff] }
 0x2f0   :  { %v8518_v3 = vpop.xlane.xlu0 %1041  ;;  %1656 = vadd.xlane.f32.xlu1 %v1655_v31  ;;  %v8537_v31 = vsub.f32 %v6382_v8, %v1139_v55 }
 0x2f1   :  { %11759 = vst [vmem:[#allocation232_spill] sm:$0xff] %v8526_v59  ;;  %v8529_v11 = vpop.xlane.xlu1 %1044  ;;  %v1410_v8 = vmul.f32 %v8526_v59, %v8526_v59  ;;  %v1667_v25 = vsel %vm667_vm0, %v1409_v6, 0.0  ;;  %v1144_v59 = vmul.f32 0.020408163, %v7902_v37  ;;  %v6386_v6 = vld [vmem:[%s11211_s0 + $0x218] sm:$0xff] }
 0x2f2   :  { %11760 = vst [vmem:[#allocation233_spill] sm:$0xff] %v8537_v31 }
 0x2f3   :  { %1659 = vadd.xlane.f32.xlu0 %v1658_v27  ;;  %v8548_v27 = vsub.f32 %v6383_v41, %v1140_v29  ;;  %v1411_v41 = vmul.f32 %v8537_v31, %v8537_v31  ;;  %v1670_v21 = vsel %vm667_vm0, %v1410_v8, 0.0  ;;  %v1145_v31 = vmul.f32 0.020408163, %v7913_v12  ;;  %v6387_v8 = vld [vmem:[%s11211_s0 + $0x220] sm:$0xff] }
 0x2f4   :  { %v8540_v49 = vpop.xlane.xlu0 %1047  ;;  %1662 = vadd.xlane.f32.xlu1 %v1661_v51  ;;  %v8559_v51 = vsub.f32 %v6384_v52, %v1141_v39 }
 0x2f5   :  { %11761 = vst [vmem:[#allocation234_spill] sm:$0xff] %v8548_v27  ;;  %v8551_v55 = vpop.xlane.xlu1 %1050  ;;  %v1412_v52 = vmul.f32 %v8548_v27, %v8548_v27  ;;  %v1673_v37 = vsel %vm667_vm0, %v1411_v41, 0.0  ;;  %v1146_v27 = vmul.f32 0.020408163, %v7924_v15  ;;  %v6388_v41 = vld [vmem:[%s11211_s0 + $0x228] sm:$0xff] }
 0x2f6   :  { %11762 = vst [vmem:[#allocation235_spill] sm:$0xff] %v8559_v51 }
 0x2f7   :  { %1665 = vadd.xlane.f32.xlu0 %v1664_v47  ;;  %v8570_v47 = vsub.f32 %v6385_v0, %v1142_v63  ;;  %v1413_v0 = vmul.f32 %v8559_v51, %v8559_v51  ;;  %v1676_v12 = vsel %vm667_vm0, %v1412_v52, 0.0  ;;  %v1147_v51 = vmul.f32 0.020408163, %v7935_v33  ;;  %v6389_v52 = vld [vmem:[%s11211_s0 + $0x230] sm:$0xff] }
 0x2f8   :  { %v8562_v29 = vpop.xlane.xlu0 %1053  ;;  %1668 = vadd.xlane.f32.xlu1 %v1667_v25  ;;  %v8581_v25 = vsub.f32 %v6386_v6, %v1143_v35 }
 0x2f9   :  { %11763 = vst [vmem:[#allocation236_spill] sm:$0xff] %v8570_v47  ;;  %v8573_v39 = vpop.xlane.xlu1 %1056  ;;  %v1414_v6 = vmul.f32 %v8570_v47, %v8570_v47  ;;  %v1679_v15 = vsel %vm667_vm0, %v1413_v0, 0.0  ;;  %v1148_v47 = vmul.f32 0.020408163, %v7946_v23  ;;  %v6390_v0 = vld [vmem:[%s11211_s0 + $0x238] sm:$0xff] }
 0x2fa   :  { %11764 = vst [vmem:[#allocation237_spill] sm:$0xff] %v8581_v25 }
 0x2fb   :  { %1671 = vadd.xlane.f32.xlu0 %v1670_v21  ;;  %v8592_v21 = vsub.f32 %v6387_v8, %v1144_v59  ;;  %v1415_v8 = vmul.f32 %v8581_v25, %v8581_v25  ;;  %v1682_v33 = vsel %vm667_vm0, %v1414_v6, 0.0  ;;  %v1149_v25 = vmul.f32 0.020408163, %v7957_v56  ;;  %v6391_v6 = vld [vmem:[%s11211_s0 + $0x240] sm:$0xff] }
 0x2fc   :  { %v8584_v63 = vpop.xlane.xlu0 %1059  ;;  %1674 = vadd.xlane.f32.xlu1 %v1673_v37  ;;  %v8603_v37 = vsub.f32 %v6388_v41, %v1145_v31 }
 0x2fd   :  { %11765 = vst [vmem:[#allocation238_spill] sm:$0xff] %v8592_v21  ;;  %v8595_v35 = vpop.xlane.xlu1 %1062  ;;  %v1416_v41 = vmul.f32 %v8592_v21, %v8592_v21  ;;  %v1685_v23 = vsel %vm667_vm0, %v1415_v8, 0.0  ;;  %v1150_v21 = vmul.f32 0.020408163, %v7968_v10  ;;  %v6392_v8 = vld [vmem:[%s11211_s0 + $0x248] sm:$0xff] }
 0x2fe   :  { %11766 = vst [vmem:[#allocation239_spill] sm:$0xff] %v8603_v37 }
 0x2ff   :  { %1677 = vadd.xlane.f32.xlu0 %v1676_v12  ;;  %v8614_v12 = vsub.f32 %v6389_v52, %v1146_v27  ;;  %v1417_v52 = vmul.f32 %v8603_v37, %v8603_v37  ;;  %v1688_v56 = vsel %vm667_vm0, %v1416_v41, 0.0  ;;  %v1151_v37 = vmul.f32 0.020408163, %v7979_v19  ;;  %v6393_v41 = vld [vmem:[%s11211_s0 + $0x250] sm:$0xff] }
 0x300   :  { %v8606_v59 = vpop.xlane.xlu0 %1065  ;;  %1680 = vadd.xlane.f32.xlu1 %v1679_v15  ;;  %v8625_v15 = vsub.f32 %v6390_v0, %v1147_v51 }
 0x301   :  { %11767 = vst [vmem:[#allocation240_spill] sm:$0xff] %v8614_v12  ;;  %v8617_v31 = vpop.xlane.xlu1 %1068  ;;  %v1418_v0 = vmul.f32 %v8614_v12, %v8614_v12  ;;  %v1691_v10 = vsel %vm667_vm0, %v1417_v52, 0.0  ;;  %v1152_v12 = vmul.f32 0.020408163, %v7990_v17  ;;  %v6394_v52 = vld [vmem:[%s11211_s0 + $0x258] sm:$0xff] }
 0x302   :  { %11768 = vst [vmem:[#allocation241_spill] sm:$0xff] %v8625_v15 }
 0x303   :  { %1683 = vadd.xlane.f32.xlu0 %v1682_v33  ;;  %v8636_v33 = vsub.f32 %v6391_v6, %v1148_v47  ;;  %v1419_v6 = vmul.f32 %v8625_v15, %v8625_v15  ;;  %v1694_v19 = vsel %vm667_vm0, %v1418_v0, 0.0  ;;  %v1153_v15 = vmul.f32 0.020408163, %v8001_v43  ;;  %v6395_v0 = vld [vmem:[%s11211_s0 + $0x260] sm:$0xff] }
 0x304   :  { %v8628_v27 = vpop.xlane.xlu0 %1071  ;;  %1686 = vadd.xlane.f32.xlu1 %v1685_v23  ;;  %v8647_v23 = vsub.f32 %v6392_v8, %v1149_v25 }
 0x305   :  { %11769 = vst [vmem:[#allocation242_spill] sm:$0xff] %v8636_v33  ;;  %v8639_v51 = vpop.xlane.xlu1 %1074  ;;  %v1420_v8 = vmul.f32 %v8636_v33, %v8636_v33  ;;  %v1697_v17 = vsel %vm667_vm0, %v1419_v6, 0.0  ;;  %v1154_v33 = vmul.f32 0.020408163, %v8012_v42  ;;  %v1155_v6 = vmul.f32 0.020408163, %v8023_v2 }
 0x306   :  { %11770 = vst [vmem:[#allocation243_spill] sm:$0xff] %v8647_v23 }
 0x307   :  { %1689 = vadd.xlane.f32.xlu0 %v1688_v56  ;;  %v8658_v56 = vsub.f32 %v6393_v41, %v1150_v21  ;;  %v1421_v41 = vmul.f32 %v8647_v23, %v8647_v23  ;;  %v1700_v43 = vsel %vm667_vm0, %v1420_v8, 0.0  ;;  %v6397_v8 = vld [vmem:[%s11211_s0 + $0x270] sm:$0xff] }
 0x308   :  { %v8650_v47 = vpop.xlane.xlu0 %1485  ;;  %1692 = vadd.xlane.f32.xlu1 %v1691_v10  ;;  %v8669_v10 = vsub.f32 %v6394_v52, %v1151_v37  ;;  %v8702_v2 = vsub.f32 %v6397_v8, %v1154_v33 }
 0x309   :  { %11771 = vst [vmem:[#allocation244_spill] sm:$0xff] %v8658_v56  ;;  %v8661_v25 = vpop.xlane.xlu1 %1488  ;;  %v1422_v52 = vmul.f32 %v8658_v56, %v8658_v56  ;;  %v1703_v42 = vsel %vm667_vm0, %v1421_v41, 0.0  ;;  %v6398_v41 = vld [vmem:[%s11211_s0 + $0x278] sm:$0xff] }
 0x30a   :  { %11772 = vst [vmem:[#allocation245_spill] sm:$0xff] %v8669_v10  ;;  %11775 = vst [vmem:[#allocation248_spill] sm:$0xff] %v8702_v2 }
 0x30b   :  { %1695 = vadd.xlane.f32.xlu0 %v1694_v19  ;;  %v8680_v19 = vsub.f32 %v6395_v0, %v1152_v12  ;;  %v1423_v0 = vmul.f32 %v8669_v10, %v8669_v10  ;;  %v1157_v10 = vmul.f32 0.020408163, %v8045_v38 }
 0x30c   :  { %v8672_v21 = vpop.xlane.xlu0 %1491  ;;  %1698 = vadd.xlane.f32.xlu1 %v1697_v17  ;;  %v6396_v17 = vld [vmem:[%s11211_s0 + $0x268] sm:$0xff] }
 0x30d   :  { %11773 = vst [vmem:[#allocation246_spill] sm:$0xff] %v8680_v19  ;;  %v8683_v37 = vpop.xlane.xlu1 %1494  ;;  %v8692_v23 = vsub.f32 %v6396_v17, %v1153_v15  ;;  %v1706_v15 = vsel %vm667_vm0, %v1422_v52, 0.0  ;;  %v1424_v17 = vmul.f32 %v8680_v19, %v8680_v19  ;;  %v6399_v52 = vld [vmem:[%s11211_s0 + $0x280] sm:$0xff] }
 0x30f   :  { %1701 = vadd.xlane.f32.xlu0 %v1700_v43  ;;  %11774 = vst [vmem:[#allocation247_spill] sm:$0xff] %v8692_v23  ;;  %v1156_v43 = vmul.f32 0.020408163, %v8034_v48  ;;  %v1709_v48 = vsel %vm667_vm0, %v1423_v0, 0.0  ;;  %v1425_v8 = vmul.f32 %v8692_v23, %v8692_v23  ;;  %v1712_v38 = vsel %vm667_vm0, %v1424_v17, 0.0  ;;  %v6401_v17 = vld [vmem:[%s11211_s0 + $0x290] sm:$0xff] }
 0x310   :  { %v8694_v12 = vpop.xlane.xlu0 %1497  ;;  %1704 = vadd.xlane.f32.xlu1 %v1703_v42  ;;  %v8713_v42 = vsub.f32 %v6398_v41, %v1155_v6  ;;  %v1158_v6 = vmul.f32 0.020408163, %v8056_v13 }
 0x311   :  { %v8705_v56 = vpop.xlane.xlu1 %1500  ;;  %v8724_v19 = vsub.f32 %v6399_v52, %v1156_v43  ;;  %v1159_v43 = vmul.f32 0.020408163, %v8067_v62  ;;  %v1715_v52 = vsel %vm667_vm0, %v1425_v8, 0.0  ;;  %v6402_v8 = vld [vmem:[%s11211_s0 + $0x298] sm:$0xff] }
 0x312   :  { %11776 = vst [vmem:[#allocation249_spill] sm:$0xff] %v8713_v42  ;;  %v1427_v0 = vmul.f32 %v8713_v42, %v8713_v42  ;;  %v1160_v42 = vmul.f32 0.020408163, %v8078_v60 }
 0x313   :  { %1707 = vadd.xlane.f32.xlu0 %v1706_v15  ;;  %11777 = vst [vmem:[#allocation250_spill] sm:$0xff] %v8724_v19  ;;  %v1426_v15 = vmul.f32 %v8702_v2, %v8702_v2  ;;  %v1428_v62 = vmul.f32 %v8724_v19, %v8724_v19 }
 0x314   :  { %v8716_v33 = vpop.xlane.xlu0 %1503  ;;  %1710 = vadd.xlane.f32.xlu1 %v1709_v48  ;;  %v6400_v48 = vld [vmem:[%s11211_s0 + $0x288] sm:$0xff] }
 0x315   :  { %v8727_v41 = vpop.xlane.xlu1 %1506  ;;  %v8737_v23 = vsub.f32 %v6400_v48, %v1157_v10  ;;  %v1718_v10 = vsel %vm667_vm0, %v1426_v15, 0.0  ;;  %v1721_v48 = vsel %vm667_vm0, %v1427_v0, 0.0  ;;  %v11450_v15 = vmov 0   ;;  %v6403_v0 = vld [vmem:[%s11211_s0 + $0x2a0] sm:$0xff] }
 0x316   :  { %6044 = vset.pattern.permute.xlu0 %v11450_v15  ;;  %6045 = vset.pattern.permute.xlu1 %v11450_v15 }
 0x317   :  { %1713 = vadd.xlane.f32.xlu0 %v1712_v38  ;;  %11778 = vst [vmem:[#allocation251_spill] sm:$0xff] %v8737_v23  ;;  %v8746_v38 = vsub.f32 %v6401_v17, %v1158_v6  ;;  %v1161_v6 = vmul.f32 0.020408163, %v8089_v34  ;;  %v1429_v60 = vmul.f32 %v8737_v23, %v8737_v23  ;;  %v1724_v34 = vsel %vm667_vm0, %v1428_v62, 0.0 }
 0x318   :  { %v8740_v13 = vpop.xlane.xlu0 %1509  ;;  %1716 = vadd.xlane.f32.xlu1 %v1715_v52  ;;  %v8758_v52 = vsub.f32 %v6402_v8, %v1159_v43  ;;  %v1162_v43 = vmul.f32 0.020408163, %v8100_v58 }
 0x319   :  { %11779 = vst [vmem:[#allocation252_spill] sm:$0xff] %v8746_v38  ;;  %v8749_v2 = vpop.xlane.xlu1 %1512  ;;  %v1430_v19 = vmul.f32 %v8746_v38, %v8746_v38  ;;  %v1727_v58 = vsel %vm667_vm0, %v1429_v60, 0.0  ;;  %v1164_v38 = vmul.f32 0.020408163, %v8122_v54  ;;  %v6406_v60 = vld [vmem:[%s11211_s0 + $0x2b8] sm:$0xff] }
 0x31a   :  { %11780 = vst [vmem:[#allocation253_spill] sm:$0xff] %v8758_v52  ;;  %v1431_v62 = vmul.f32 %v8758_v52, %v8758_v52  ;;  %v1165_v52 = vmul.f32 0.020408163, %v8133_v26 }
 0x31b   :  { %1719 = vadd.xlane.f32.xlu0 %v1718_v10  ;;  %v8769_v10 = vsub.f32 %v6403_v0, %v1160_v42  ;;  %v1163_v42 = vmul.f32 0.020408163, %v8111_v30  ;;  %v1730_v30 = vsel %vm667_vm0, %v1430_v19, 0.0  ;;  %v6407_v19 = vld [vmem:[%s11211_s0 + $0x2c0] sm:$0xff] }
 0x31c   :  { %v8761_v17 = vpop.xlane.xlu0 %1515  ;;  %1722 = vadd.xlane.f32.xlu1 %v1721_v48  ;;  %v6404_v48 = vld [vmem:[%s11211_s0 + $0x2a8] sm:$0xff]  ;;  %v1733_v54 = vsel %vm667_vm0, %v1431_v62, 0.0 }
 0x31d   :  { %11781 = vst [vmem:[#allocation254_spill] sm:$0xff] %v8769_v10  ;;  %v8772_v8 = vpop.xlane.xlu1 %1518  ;;  %v8781_v23 = vsub.f32 %v6404_v48, %v1161_v6  ;;  %v1432_v48 = vmul.f32 %v8769_v10, %v8769_v10  ;;  %v1166_v10 = vmul.f32 0.020408163, %v8144_v50  ;;  %v6408_v62 = vld [vmem:[%s11211_s0 + $0x2c8] sm:$0xff] }
 0x31f   :  { %1725 = vadd.xlane.f32.xlu0 %v1724_v34  ;;  %11782 = vst [vmem:[#allocation255_spill] sm:$0xff] %v8781_v23  ;;  %v6405_v34 = vld [vmem:[%s11211_s0 + $0x2b0] sm:$0xff]  ;;  %v1736_v26 = vsel %vm667_vm0, %v1432_v48, 0.0 }
 0x320   :  { %v8784_v0 = vpop.xlane.xlu0 %1521  ;;  %1728 = vadd.xlane.f32.xlu1 %v1727_v58  ;;  %v8792_v15 = vsub.f32 %v6405_v34, %v1162_v43  ;;  %v8803_v58 = vsub.f32 %v6406_v60, %v1163_v42  ;;  %v1433_v34 = vmul.f32 %v8781_v23, %v8781_v23  ;;  %v1167_v23 = vmul.f32 0.020408163, %v8155_v22  ;;  %v6409_v48 = vld [vmem:[%s11211_s0 + $0x2d0] sm:$0xff] }
 0x321   :  { %v8795_v6 = vpop.xlane.xlu1 %1524 }
 0x322   :  { %11783 = vst [vmem:[#allocation256_spill] sm:$0xff] %v8792_v15  ;;  %11784 = vst [vmem:[#allocation257_spill] sm:$0xff] %v8803_v58  ;;  %v1434_v60 = vmul.f32 %v8792_v15, %v8792_v15  ;;  %v1739_v50 = vsel %vm667_vm0, %v1433_v34, 0.0  ;;  %v1168_v15 = vmul.f32 0.020408163, %v8166_v46  ;;  %v6410_v34 = vld [vmem:[%s11211_s0 + $0x2d8] sm:$0xff] }
 0x323   :  { %1731 = vadd.xlane.f32.xlu0 %v1730_v30  ;;  %v8814_v30 = vsub.f32 %v6407_v19, %v1164_v38  ;;  %v1435_v19 = vmul.f32 %v8803_v58, %v8803_v58  ;;  %v1169_v58 = vmul.f32 0.020408163, %v8177_v18 }
 0x324   :  { %v8806_v43 = vpop.xlane.xlu0 %1527  ;;  %1734 = vadd.xlane.f32.xlu1 %v1733_v54  ;;  %v8825_v54 = vsub.f32 %v6408_v62, %v1165_v52  ;;  %v1742_v22 = vsel %vm667_vm0, %v1434_v60, 0.0  ;;  %v6411_v60 = vld [vmem:[%s11211_s0 + $0x2e0] sm:$0xff] }
 0x325   :  { %11785 = vst [vmem:[#allocation258_spill] sm:$0xff] %v8814_v30  ;;  %v8817_v42 = vpop.xlane.xlu1 %1530  ;;  %v1436_v62 = vmul.f32 %v8814_v30, %v8814_v30  ;;  %v1745_v46 = vsel %vm667_vm0, %v1435_v19, 0.0  ;;  %v1170_v30 = vmul.f32 0.020408163, %v8188_v40  ;;  %v6412_v19 = vld [vmem:[%s11211_s0 + $0x2e8] sm:$0xff] }
 0x326   :  { %11786 = vst [vmem:[#allocation259_spill] sm:$0xff] %v8825_v54 }
 0x327   :  { %1737 = vadd.xlane.f32.xlu0 %v1736_v26  ;;  %v8836_v26 = vsub.f32 %v6409_v48, %v1166_v10  ;;  %v1437_v48 = vmul.f32 %v8825_v54, %v8825_v54  ;;  %v1748_v18 = vsel %vm667_vm0, %v1436_v62, 0.0  ;;  %v1171_v54 = vmul.f32 0.020408163, %v8199_v14  ;;  %v6413_v62 = vld [vmem:[%s11211_s0 + $0x2f0] sm:$0xff] }
 0x328   :  { %v8828_v38 = vpop.xlane.xlu0 %1533  ;;  %1740 = vadd.xlane.f32.xlu1 %v1739_v50  ;;  %v8847_v50 = vsub.f32 %v6410_v34, %v1167_v23 }
 0x329   :  { %11787 = vst [vmem:[#allocation260_spill] sm:$0xff] %v8836_v26  ;;  %v8839_v52 = vpop.xlane.xlu1 %1536  ;;  %v1438_v34 = vmul.f32 %v8836_v26, %v8836_v26  ;;  %v1751_v40 = vsel %vm667_vm0, %v1437_v48, 0.0  ;;  %v1172_v26 = vmul.f32 0.020408163, %v8210_v36  ;;  %v6414_v48 = vld [vmem:[%s11211_s0 + $0x2f8] sm:$0xff] }
 0x32a   :  { %11788 = vst [vmem:[#allocation261_spill] sm:$0xff] %v8847_v50 }
 0x32b   :  { %1743 = vadd.xlane.f32.xlu0 %v1742_v22  ;;  %v8858_v22 = vsub.f32 %v6411_v60, %v1168_v15  ;;  %v1439_v60 = vmul.f32 %v8847_v50, %v8847_v50  ;;  %v1754_v14 = vsel %vm667_vm0, %v1438_v34, 0.0  ;;  %v1173_v50 = vmul.f32 0.020408163, %v8221_v45  ;;  %v6415_v34 = vld [vmem:[%s11211_s0 + $0x300] sm:$0xff] }
 0x32c   :  { %v8850_v10 = vpop.xlane.xlu0 %1539  ;;  %1746 = vadd.xlane.f32.xlu1 %v1745_v46  ;;  %v8869_v46 = vsub.f32 %v6412_v19, %v1169_v58 }
 0x32d   :  { %11789 = vst [vmem:[#allocation262_spill] sm:$0xff] %v8858_v22  ;;  %v8861_v23 = vpop.xlane.xlu1 %1542  ;;  %v1440_v19 = vmul.f32 %v8858_v22, %v8858_v22  ;;  %v1757_v36 = vsel %vm667_vm0, %v1439_v60, 0.0  ;;  %v1174_v22 = vmul.f32 0.020408163, %v8232_v32  ;;  %v6416_v60 = vld [vmem:[%s11211_s0 + $0x308] sm:$0xff] }
 0x32e   :  { %11790 = vst [vmem:[#allocation263_spill] sm:$0xff] %v8869_v46 }
 0x32f   :  { %1749 = vadd.xlane.f32.xlu0 %v1748_v18  ;;  %v8880_v18 = vsub.f32 %v6413_v62, %v1170_v30  ;;  %v1441_v62 = vmul.f32 %v8869_v46, %v8869_v46  ;;  %v1760_v45 = vsel %vm667_vm0, %v1440_v19, 0.0  ;;  %v1175_v46 = vmul.f32 0.020408163, %v8243_v9  ;;  %v6417_v19 = vld [vmem:[%s11211_s0 + $0x310] sm:$0xff] }
 0x330   :  { %v8872_v15 = vpop.xlane.xlu0 %1545  ;;  %1752 = vadd.xlane.f32.xlu1 %v1751_v40  ;;  %v8891_v40 = vsub.f32 %v6414_v48, %v1171_v54 }
 0x331   :  { %11791 = vst [vmem:[#allocation264_spill] sm:$0xff] %v8880_v18  ;;  %v8883_v58 = vpop.xlane.xlu1 %1548  ;;  %v1442_v48 = vmul.f32 %v8880_v18, %v8880_v18  ;;  %v1763_v32 = vsel %vm667_vm0, %v1441_v62, 0.0  ;;  %v1176_v18 = vmul.f32 0.020408163, %v8254_v28  ;;  %v6418_v62 = vld [vmem:[%s11211_s0 + $0x318] sm:$0xff] }
 0x332   :  { %11792 = vst [vmem:[#allocation265_spill] sm:$0xff] %v8891_v40 }
 0x333   :  { %1755 = vadd.xlane.f32.xlu0 %v1754_v14  ;;  %v8902_v14 = vsub.f32 %v6415_v34, %v1172_v26  ;;  %v1443_v34 = vmul.f32 %v8891_v40, %v8891_v40  ;;  %v1766_v9 = vsel %vm667_vm0, %v1442_v48, 0.0  ;;  %v1177_v40 = vmul.f32 0.020408163, %v8265_v5  ;;  %v6419_v48 = vld [vmem:[%s11211_s0 + $0x320] sm:$0xff] }
 0x334   :  { %v8894_v30 = vpop.xlane.xlu0 %1551  ;;  %1758 = vadd.xlane.f32.xlu1 %v1757_v36  ;;  %v8913_v36 = vsub.f32 %v6416_v60, %v1173_v50 }
 0x335   :  { %11793 = vst [vmem:[#allocation266_spill] sm:$0xff] %v8902_v14  ;;  %v8905_v54 = vpop.xlane.xlu1 %1554  ;;  %v1444_v60 = vmul.f32 %v8902_v14, %v8902_v14  ;;  %v1769_v28 = vsel %vm667_vm0, %v1443_v34, 0.0  ;;  %v1178_v14 = vmul.f32 0.020408163, %v8276_v24  ;;  %v6420_v34 = vld [vmem:[%s11211_s0 + $0x328] sm:$0xff] }
 0x336   :  { %11794 = vst [vmem:[#allocation267_spill] sm:$0xff] %v8913_v36 }
 0x337   :  { %1761 = vadd.xlane.f32.xlu0 %v1760_v45  ;;  %v8924_v45 = vsub.f32 %v6417_v19, %v1174_v22  ;;  %v1445_v19 = vmul.f32 %v8913_v36, %v8913_v36  ;;  %v1772_v5 = vsel %vm667_vm0, %v1444_v60, 0.0  ;;  %v1179_v36 = vmul.f32 0.020408163, %v8287_v1  ;;  %v6421_v60 = vld [vmem:[%s11211_s0 + $0x330] sm:$0xff] }
 0x338   :  { %v8916_v26 = vpop.xlane.xlu0 %1557  ;;  %1764 = vadd.xlane.f32.xlu1 %v1763_v32  ;;  %v8935_v32 = vsub.f32 %v6418_v62, %v1175_v46 }
 0x339   :  { %11795 = vst [vmem:[#allocation268_spill] sm:$0xff] %v8924_v45  ;;  %v8927_v50 = vpop.xlane.xlu1 %1560  ;;  %v1446_v62 = vmul.f32 %v8924_v45, %v8924_v45  ;;  %v1775_v24 = vsel %vm667_vm0, %v1445_v19, 0.0  ;;  %v1180_v45 = vmul.f32 0.020408163, %v8298_v20  ;;  %v6422_v19 = vld [vmem:[%s11211_s0 + $0x338] sm:$0xff] }
 0x33a   :  { %11796 = vst [vmem:[#allocation269_spill] sm:$0xff] %v8935_v32 }
 0x33b   :  { %1767 = vadd.xlane.f32.xlu0 %v1766_v9  ;;  %v8946_v9 = vsub.f32 %v6419_v48, %v1176_v18  ;;  %v1447_v48 = vmul.f32 %v8935_v32, %v8935_v32  ;;  %v1778_v1 = vsel %vm667_vm0, %v1446_v62, 0.0  ;;  %v1181_v32 = vmul.f32 0.020408163, %v8309_v61  ;;  %v6423_v62 = vld [vmem:[%s11211_s0 + $0x340] sm:$0xff] }
 0x33c   :  { %v8938_v22 = vpop.xlane.xlu0 %1563  ;;  %1770 = vadd.xlane.f32.xlu1 %v1769_v28  ;;  %v8957_v28 = vsub.f32 %v6420_v34, %v1177_v40 }
 0x33d   :  { %11797 = vst [vmem:[#allocation270_spill] sm:$0xff] %v8946_v9  ;;  %v8949_v46 = vpop.xlane.xlu1 %1566  ;;  %v1448_v34 = vmul.f32 %v8946_v9, %v8946_v9  ;;  %v1781_v20 = vsel %vm667_vm0, %v1447_v48, 0.0  ;;  %v1182_v9 = vmul.f32 0.020408163, %v8320_v16  ;;  %v6424_v48 = vld [vmem:[%s11211_s0 + $0x348] sm:$0xff] }
 0x33e   :  { %11798 = vst [vmem:[#allocation271_spill] sm:$0xff] %v8957_v28 }
 0x33f   :  { %1773 = vadd.xlane.f32.xlu0 %v1772_v5  ;;  %v8968_v5 = vsub.f32 %v6421_v60, %v1178_v14  ;;  %v1449_v60 = vmul.f32 %v8957_v28, %v8957_v28  ;;  %v1784_v61 = vsel %vm667_vm0, %v1448_v34, 0.0  ;;  %v1183_v28 = vmul.f32 0.020408163, %v8331_v57  ;;  %v6425_v34 = vld [vmem:[%s11211_s0 + $0x350] sm:$0xff] }
 0x340   :  { %v8960_v18 = vpop.xlane.xlu0 %1569  ;;  %1776 = vadd.xlane.f32.xlu1 %v1775_v24  ;;  %v8979_v24 = vsub.f32 %v6422_v19, %v1179_v36 }
 0x341   :  { %11799 = vst [vmem:[#allocation272_spill] sm:$0xff] %v8960_v18  ;;  %11800 = vst [vmem:[#allocation273_spill] sm:$0xff] %v8968_v5  ;;  %v8971_v40 = vpop.xlane.xlu1 %1572  ;;  %v1450_v19 = vmul.f32 %v8968_v5, %v8968_v5  ;;  %v1787_v16 = vsel %vm667_vm0, %v1449_v60, 0.0  ;;  %v1184_v5 = vmul.f32 0.020408163, %v8342_v4  ;;  %v6426_v60 = vld [vmem:[%s11211_s0 + $0x358] sm:$0xff] }
 0x342   :  { %11801 = vst [vmem:[#allocation274_spill] sm:$0xff] %v8979_v24 }
 0x343   :  { %1779 = vadd.xlane.f32.xlu0 %v1778_v1  ;;  %v8990_v1 = vsub.f32 %v6423_v62, %v1180_v45  ;;  %v1451_v62 = vmul.f32 %v8979_v24, %v8979_v24  ;;  %v1790_v57 = vsel %vm667_vm0, %v1450_v19, 0.0  ;;  %v1185_v24 = vmul.f32 0.020408163, %v8353_v53  ;;  %v6427_v19 = vld [vmem:[%s11211_s0 + $0x360] sm:$0xff] }
 0x344   :  { %v8982_v14 = vpop.xlane.xlu0 %1575  ;;  %1782 = vadd.xlane.f32.xlu1 %v1781_v20  ;;  %v9001_v20 = vsub.f32 %v6424_v48, %v1181_v32 }
 0x345   :  { %11802 = vst [vmem:[#allocation275_spill] sm:$0xff] %v8982_v14  ;;  %11803 = vst [vmem:[#allocation276_spill] sm:$0xff] %v8990_v1  ;;  %v8993_v36 = vpop.xlane.xlu1 %1578  ;;  %v1452_v48 = vmul.f32 %v8990_v1, %v8990_v1  ;;  %v1793_v4 = vsel %vm667_vm0, %v1451_v62, 0.0  ;;  %v11810_v1 = vld [vmem:[#allocation218_spill] sm:$0xff]  ;;  %v6428_v62 = vld [vmem:[%s11211_s0 + $0x368] sm:$0xff] }
 0x346   :  { %11804 = vst [vmem:[#allocation277_spill] sm:$0xff] %v9001_v20 }
 0x347   :  { %1785 = vadd.xlane.f32.xlu0 %v1784_v61  ;;  %v9012_v61 = vsub.f32 %v6425_v34, %v1182_v9  ;;  %v1453_v34 = vmul.f32 %v9001_v20, %v9001_v20  ;;  %v1796_v53 = vsel %vm667_vm0, %v1452_v48, 0.0  ;;  %v11812_v20 = vld [vmem:[#allocation220_spill] sm:$0xff] }
 0x348   :  { %v9004_v45 = vpop.xlane.xlu0 %1581  ;;  %1788 = vadd.xlane.f32.xlu1 %v1787_v16  ;;  %v9023_v16 = vsub.f32 %v6426_v60, %v1183_v28  ;;  %v6429_v48 = vld [vmem:[%s11211_s0 + $0x370] sm:$0xff] }
 0x349   :  { %11805 = vst [vmem:[#allocation278_spill] sm:$0xff] %v9004_v45  ;;  %11806 = vst [vmem:[#allocation279_spill] sm:$0xff] %v9012_v61  ;;  %v9015_v32 = vpop.xlane.xlu1 %1584  ;;  %v1186_v45 = vmul.f32 0.020408163, %v11810_v1  ;;  %v1454_v60 = vmul.f32 %v9012_v61, %v9012_v61  ;;  %v1799_v1 = vsel %vm667_vm0, %v1453_v34, 0.0  ;;  %v11815_v61 = vld [vmem:[#allocation158_spill] sm:$0xff] }
 0x34a   :  { %11807 = vst [vmem:[#allocation280_spill] sm:$0xff] %v9023_v16  ;;  %v1188_v14 = vmul.f32 0.020408163, %v11815_v61  ;;  %v6430_v34 = vld [vmem:[%s11211_s0 + $0x378] sm:$0xff] }
 0x34b   :  { %1791 = vadd.xlane.f32.xlu0 %v1790_v57  ;;  %v9034_v57 = vsub.f32 %v6427_v19, %v1184_v5  ;;  %v1455_v19 = vmul.f32 %v9023_v16, %v9023_v16  ;;  %v11817_v16 = vld [vmem:[#allocation159_spill] sm:$0xff] }
 0x34c   :  { %v9026_v9 = vpop.xlane.xlu0 %1587  ;;  %1794 = vadd.xlane.f32.xlu1 %v1793_v4  ;;  %v9045_v4 = vsub.f32 %v6428_v62, %v1185_v24 }
 0x34d   :  { %11808 = vst [vmem:[#allocation281_spill] sm:$0xff] %v9026_v9  ;;  %11809 = vst [vmem:[#allocation282_spill] sm:$0xff] %v9034_v57  ;;  %v9037_v28 = vpop.xlane.xlu1 %1590  ;;  %v1187_v9 = vmul.f32 0.020408163, %v11812_v20  ;;  %v1802_v20 = vsel %vm667_vm0, %v1454_v60, 0.0  ;;  %v1456_v62 = vmul.f32 %v9034_v57, %v9034_v57  ;;  %v1805_v61 = vsel %vm667_vm0, %v1455_v19, 0.0 }
 0x34e   :  { %11811 = vst [vmem:[#allocation218_spill] sm:$0xff] %v9045_v4  ;;  %v6431_v60 = vld [vmem:[%s11211_s0 + $0x380] sm:$0xff]  ;;  %v11820_v57 = vld [vmem:[#allocation160_spill] sm:$0xff]  ;;  %v6432_v19 = vld [vmem:[%s11211_s0 + $0x388] sm:$0xff] }
 0x34f   :  { %1797 = vadd.xlane.f32.xlu0 %v1796_v53  ;;  %v9056_v53 = vsub.f32 %v6429_v48, %v1186_v45  ;;  %v1457_v48 = vmul.f32 %v9045_v4, %v9045_v4  ;;  %v1190_v18 = vmul.f32 0.020408163, %v11820_v57  ;;  %v11823_v4 = vld [vmem:[#allocation161_spill] sm:$0xff] }
 0x350   :  { %v9048_v5 = vpop.xlane.xlu0 %1593  ;;  %1800 = vadd.xlane.f32.xlu1 %v1799_v1  ;;  %v9067_v1 = vsub.f32 %v6430_v34, %v1187_v9 }
 0x351   :  { %11813 = vst [vmem:[#allocation220_spill] sm:$0xff] %v9048_v5  ;;  %11814 = vst [vmem:[#allocation283_spill] sm:$0xff] %v9056_v53  ;;  %v9059_v24 = vpop.xlane.xlu1 %1596  ;;  %v1189_v5 = vmul.f32 0.020408163, %v11817_v16  ;;  %v1808_v16 = vsel %vm667_vm0, %v1456_v62, 0.0  ;;  %v1458_v34 = vmul.f32 %v9056_v53, %v9056_v53  ;;  %v1811_v57 = vsel %vm667_vm0, %v1457_v48, 0.0 }
 0x352   :  { %11816 = vst [vmem:[#allocation158_spill] sm:$0xff] %v9067_v1  ;;  %v6433_v62 = vld [vmem:[%s11211_s0 + $0x390] sm:$0xff]  ;;  %v11826_v53 = vld [vmem:[#allocation162_spill] sm:$0xff]  ;;  %v6434_v48 = vld [vmem:[%s11211_s0 + $0x398] sm:$0xff] }
 0x353   :  { %1803 = vadd.xlane.f32.xlu0 %v1802_v20  ;;  %v9078_v20 = vsub.f32 %v6431_v60, %v1188_v14  ;;  %v1459_v60 = vmul.f32 %v9067_v1, %v9067_v1  ;;  %v11829_v1 = vld [vmem:[#allocation163_spill] sm:$0xff] }
 0x354   :  { %v9070_v45 = vpop.xlane.xlu0 %1599  ;;  %1806 = vadd.xlane.f32.xlu1 %v1805_v61  ;;  %v9089_v61 = vsub.f32 %v6432_v19, %v1189_v5 }
 0x355   :  { %11818 = vst [vmem:[#allocation159_spill] sm:$0xff] %v9070_v45  ;;  %11819 = vst [vmem:[#allocation284_spill] sm:$0xff] %v9078_v20  ;;  %v9081_v9 = vpop.xlane.xlu1 %1602  ;;  %v1191_v45 = vmul.f32 0.020408163, %v11823_v4  ;;  %v1814_v4 = vsel %vm667_vm0, %v1458_v34, 0.0  ;;  %v1460_v19 = vmul.f32 %v9078_v20, %v9078_v20  ;;  %v6435_v34 = vld [vmem:[%s11211_s0 + $0x3a0] sm:$0xff] }
 0x356   :  { %11821 = vst [vmem:[#allocation160_spill] sm:$0xff] %v9081_v9  ;;  %11822 = vst [vmem:[#allocation285_spill] sm:$0xff] %v9089_v61  ;;  %v1192_v9 = vmul.f32 0.020408163, %v11826_v53  ;;  %v1817_v53 = vsel %vm667_vm0, %v1459_v60, 0.0  ;;  %v11832_v20 = vld [vmem:[#allocation164_spill] sm:$0xff] }
 0x357   :  { %1809 = vadd.xlane.f32.xlu0 %v1808_v16  ;;  %v9100_v16 = vsub.f32 %v6433_v62, %v1190_v18  ;;  %v1461_v62 = vmul.f32 %v9089_v61, %v9089_v61  ;;  %v6436_v60 = vld [vmem:[%s11211_s0 + $0x3a8] sm:$0xff]  ;;  %v11835_v61 = vld [vmem:[#allocation165_spill] sm:$0xff] }
 0x358   :  { %v9092_v14 = vpop.xlane.xlu0 %1605  ;;  %1812 = vadd.xlane.f32.xlu1 %v1811_v57  ;;  %v9111_v57 = vsub.f32 %v6434_v48, %v1191_v45 }
 0x359   :  { %11824 = vst [vmem:[#allocation161_spill] sm:$0xff] %v9092_v14  ;;  %11825 = vst [vmem:[#allocation286_spill] sm:$0xff] %v9100_v16  ;;  %v9103_v5 = vpop.xlane.xlu1 %1608  ;;  %v1193_v14 = vmul.f32 0.020408163, %v11829_v1  ;;  %v1820_v1 = vsel %vm667_vm0, %v1460_v19, 0.0  ;;  %v1462_v48 = vmul.f32 %v9100_v16, %v9100_v16  ;;  %v6437_v19 = vld [vmem:[%s11211_s0 + $0x3b0] sm:$0xff] }
 0x35a   :  { %11827 = vst [vmem:[#allocation162_spill] sm:$0xff] %v9103_v5  ;;  %11828 = vst [vmem:[#allocation287_spill] sm:$0xff] %v9111_v57  ;;  %v1194_v5 = vmul.f32 0.020408163, %v11832_v20  ;;  %v1823_v20 = vsel %vm667_vm0, %v1461_v62, 0.0  ;;  %v11838_v16 = vld [vmem:[#allocation166_spill] sm:$0xff] }
 0x35b   :  { %1815 = vadd.xlane.f32.xlu0 %v1814_v4  ;;  %v9122_v4 = vsub.f32 %v6435_v34, %v1192_v9  ;;  %v1463_v34 = vmul.f32 %v9111_v57, %v9111_v57  ;;  %v6438_v62 = vld [vmem:[%s11211_s0 + $0x3b8] sm:$0xff]  ;;  %v11840_v57 = vld [vmem:[#allocation167_spill] sm:$0xff] }
 0x35c   :  { %v9114_v18 = vpop.xlane.xlu0 %1611  ;;  %1818 = vadd.xlane.f32.xlu1 %v1817_v53  ;;  %v9133_v53 = vsub.f32 %v6436_v60, %v1193_v14 }
 0x35d   :  { %11830 = vst [vmem:[#allocation163_spill] sm:$0xff] %v9114_v18  ;;  %11831 = vst [vmem:[#allocation288_spill] sm:$0xff] %v9122_v4  ;;  %v9125_v45 = vpop.xlane.xlu1 %1614  ;;  %v1195_v18 = vmul.f32 0.020408163, %v11835_v61  ;;  %v1826_v61 = vsel %vm667_vm0, %v1462_v48, 0.0  ;;  %v1464_v60 = vmul.f32 %v9122_v4, %v9122_v4  ;;  %v6439_v48 = vld [vmem:[%s11211_s0 + $0x3c0] sm:$0xff] }
 0x35e   :  { %11833 = vst [vmem:[#allocation164_spill] sm:$0xff] %v9125_v45  ;;  %11834 = vst [vmem:[#allocation289_spill] sm:$0xff] %v9133_v53  ;;  %v1196_v45 = vmul.f32 0.020408163, %v11838_v16  ;;  %v1829_v16 = vsel %vm667_vm0, %v1463_v34, 0.0  ;;  %v6440_v34 = vld [vmem:[%s11211_s0 + $0x3c8] sm:$0xff] }
 0x35f   :  { %1821 = vadd.xlane.f32.xlu0 %v1820_v1  ;;  %v9144_v1 = vsub.f32 %v6437_v19, %v1194_v5  ;;  %v1465_v19 = vmul.f32 %v9133_v53, %v9133_v53  ;;  %v1198_v4 = vmul.f32 0.020408163, %v8496_v7  ;;  %v1199_v53 = vmul.f32 0.020408163, %v8507_v44 }
 0x360   :  { %v9136_v9 = vpop.xlane.xlu0 %1617  ;;  %1824 = vadd.xlane.f32.xlu1 %v1823_v20  ;;  %v9155_v20 = vsub.f32 %v6438_v62, %v1195_v18 }
 0x361   :  { %11836 = vst [vmem:[#allocation165_spill] sm:$0xff] %v9136_v9  ;;  %11837 = vst [vmem:[#allocation290_spill] sm:$0xff] %v9144_v1  ;;  %v9147_v14 = vpop.xlane.xlu1 %1620  ;;  %v1197_v9 = vmul.f32 0.020408163, %v11840_v57  ;;  %v1832_v57 = vsel %vm667_vm0, %v1464_v60, 0.0  ;;  %v1466_v62 = vmul.f32 %v9144_v1, %v9144_v1  ;;  %v1835_v7 = vsel %vm667_vm0, %v1465_v19, 0.0 }
 0x362   :  { %11839 = vst [vmem:[#allocation166_spill] sm:$0xff] %v9155_v20  ;;  %v6441_v60 = vld [vmem:[%s11211_s0 + $0x3d0] sm:$0xff]  ;;  %v1200_v1 = vmul.f32 0.020408163, %v8518_v3  ;;  %v6442_v19 = vld [vmem:[%s11211_s0 + $0x3d8] sm:$0xff] }
 0x363   :  { %1827 = vadd.xlane.f32.xlu0 %v1826_v61  ;;  %v9166_v61 = vsub.f32 %v6439_v48, %v1196_v45  ;;  %v1467_v48 = vmul.f32 %v9155_v20, %v9155_v20  ;;  %v1838_v44 = vsel %vm667_vm0, %v1466_v62, 0.0  ;;  %v1201_v20 = vmul.f32 0.020408163, %v8529_v11  ;;  %v6443_v62 = vld [vmem:[%s11211_s0 + $0x3e0] sm:$0xff] }
 0x364   :  { %v9158_v5 = vpop.xlane.xlu0 %1623  ;;  %1830 = vadd.xlane.f32.xlu1 %v1829_v16  ;;  %v9177_v16 = vsub.f32 %v6440_v34, %v1197_v9 }
 0x365   :  { %11841 = vst [vmem:[#allocation167_spill] sm:$0xff] %v9166_v61  ;;  %v9169_v18 = vpop.xlane.xlu1 %1626  ;;  %v1468_v34 = vmul.f32 %v9166_v61, %v9166_v61  ;;  %v1841_v3 = vsel %vm667_vm0, %v1467_v48, 0.0  ;;  %v1202_v61 = vmul.f32 0.020408163, %v8540_v49  ;;  %v6444_v48 = vld [vmem:[%s11211_s0 + $0x3e8] sm:$0xff] }
 0x366   :  { %11842 = vst [vmem:[#allocation291_spill] sm:$0xff] %v9177_v16 }
 0x367   :  { %1833 = vadd.xlane.f32.xlu0 %v1832_v57  ;;  %v9188_v57 = vsub.f32 %v6441_v60, %v1198_v4  ;;  %v1469_v60 = vmul.f32 %v9177_v16, %v9177_v16  ;;  %v1844_v11 = vsel %vm667_vm0, %v1468_v34, 0.0  ;;  %v1203_v16 = vmul.f32 0.020408163, %v8551_v55  ;;  %v6445_v34 = vld [vmem:[%s11211_s0 + $0x3f0] sm:$0xff] }
 0x368   :  { %v9180_v45 = vpop.xlane.xlu0 %1629  ;;  %1836 = vadd.xlane.f32.xlu1 %v1835_v7  ;;  %v9199_v7 = vsub.f32 %v6442_v19, %v1199_v53 }
 0x369   :  { %11843 = vst [vmem:[#allocation292_spill] sm:$0xff] %v9188_v57  ;;  %v9191_v9 = vpop.xlane.xlu1 %1632  ;;  %v1470_v19 = vmul.f32 %v9188_v57, %v9188_v57  ;;  %v1847_v49 = vsel %vm667_vm0, %v1469_v60, 0.0  ;;  %v1204_v57 = vmul.f32 0.020408163, %v8562_v29  ;;  %v6446_v60 = vld [vmem:[%s11211_s0 + $0x3f8] sm:$0xff] }
 0x36a   :  { %11844 = vst [vmem:[#allocation293_spill] sm:$0xff] %v9199_v7 }
 0x36b   :  { %1839 = vadd.xlane.f32.xlu0 %v1838_v44  ;;  %v9210_v44 = vsub.f32 %v6443_v62, %v1200_v1  ;;  %v1471_v62 = vmul.f32 %v9199_v7, %v9199_v7  ;;  %v1850_v55 = vsel %vm667_vm0, %v1470_v19, 0.0  ;;  %v1205_v7 = vmul.f32 0.020408163, %v8573_v39  ;;  %v6447_v19 = vld [vmem:[%s11211_s0 + $0x400] sm:$0xff] }
 0x36c   :  { %v9202_v4 = vpop.xlane.xlu0 %1635  ;;  %1842 = vadd.xlane.f32.xlu1 %v1841_v3  ;;  %v9221_v3 = vsub.f32 %v6444_v48, %v1201_v20 }
 0x36d   :  { %11845 = vst [vmem:[#allocation294_spill] sm:$0xff] %v9210_v44  ;;  %v9213_v53 = vpop.xlane.xlu1 %1638  ;;  %v1472_v48 = vmul.f32 %v9210_v44, %v9210_v44  ;;  %v1853_v29 = vsel %vm667_vm0, %v1471_v62, 0.0  ;;  %v1206_v44 = vmul.f32 0.020408163, %v8584_v63  ;;  %v6448_v62 = vld [vmem:[%s11211_s0 + $0x408] sm:$0xff] }
 0x36e   :  { %11846 = vst [vmem:[#allocation295_spill] sm:$0xff] %v9221_v3 }
 0x36f   :  { %1845 = vadd.xlane.f32.xlu0 %v1844_v11  ;;  %v9232_v11 = vsub.f32 %v6445_v34, %v1202_v61  ;;  %v1473_v34 = vmul.f32 %v9221_v3, %v9221_v3  ;;  %v1856_v39 = vsel %vm667_vm0, %v1472_v48, 0.0  ;;  %v1207_v3 = vmul.f32 0.020408163, %v8595_v35  ;;  %v6449_v48 = vld [vmem:[%s11211_s0 + $0x410] sm:$0xff] }
 0x370   :  { %v9224_v1 = vpop.xlane.xlu0 %1641  ;;  %1848 = vadd.xlane.f32.xlu1 %v1847_v49  ;;  %v9243_v49 = vsub.f32 %v6446_v60, %v1203_v16 }
 0x371   :  { %11847 = vst [vmem:[#allocation296_spill] sm:$0xff] %v9232_v11  ;;  %v9235_v20 = vpop.xlane.xlu1 %1644  ;;  %v1474_v60 = vmul.f32 %v9232_v11, %v9232_v11  ;;  %v1859_v63 = vsel %vm667_vm0, %v1473_v34, 0.0  ;;  %v1208_v11 = vmul.f32 0.020408163, %v8606_v59  ;;  %v6450_v34 = vld [vmem:[%s11211_s0 + $0x418] sm:$0xff] }
 0x372   :  { %11848 = vst [vmem:[#allocation297_spill] sm:$0xff] %v9243_v49 }
 0x373   :  { %1851 = vadd.xlane.f32.xlu0 %v1850_v55  ;;  %v9254_v55 = vsub.f32 %v6447_v19, %v1204_v57  ;;  %v1475_v19 = vmul.f32 %v9243_v49, %v9243_v49  ;;  %v1862_v35 = vsel %vm667_vm0, %v1474_v60, 0.0  ;;  %v1209_v49 = vmul.f32 0.020408163, %v8617_v31  ;;  %v6451_v60 = vld [vmem:[%s11211_s0 + $0x420] sm:$0xff] }
 0x374   :  { %v9246_v61 = vpop.xlane.xlu0 %1647  ;;  %1854 = vadd.xlane.f32.xlu1 %v1853_v29  ;;  %v9265_v29 = vsub.f32 %v6448_v62, %v1205_v7 }
 0x375   :  { %11849 = vst [vmem:[#allocation298_spill] sm:$0xff] %v9254_v55  ;;  %v9257_v16 = vpop.xlane.xlu1 %1650  ;;  %v1476_v62 = vmul.f32 %v9254_v55, %v9254_v55  ;;  %v1865_v59 = vsel %vm667_vm0, %v1475_v19, 0.0  ;;  %v1210_v55 = vmul.f32 0.020408163, %v8628_v27  ;;  %v6452_v19 = vld [vmem:[%s11211_s0 + $0x428] sm:$0xff] }
 0x376   :  { %11850 = vst [vmem:[#allocation299_spill] sm:$0xff] %v9265_v29 }
 0x377   :  { %1857 = vadd.xlane.f32.xlu0 %v1856_v39  ;;  %v9276_v39 = vsub.f32 %v6449_v48, %v1206_v44  ;;  %v1477_v48 = vmul.f32 %v9265_v29, %v9265_v29  ;;  %v1868_v31 = vsel %vm667_vm0, %v1476_v62, 0.0  ;;  %v1211_v29 = vmul.f32 0.020408163, %v8639_v51  ;;  %v6453_v62 = vld [vmem:[%s11211_s0 + $0x430] sm:$0xff] }
 0x378   :  { %v9268_v57 = vpop.xlane.xlu0 %1653  ;;  %1860 = vadd.xlane.f32.xlu1 %v1859_v63  ;;  %v9287_v63 = vsub.f32 %v6450_v34, %v1207_v3 }
 0x379   :  { %11851 = vst [vmem:[#allocation300_spill] sm:$0xff] %v9276_v39  ;;  %v9279_v7 = vpop.xlane.xlu1 %1656  ;;  %v1478_v34 = vmul.f32 %v9276_v39, %v9276_v39  ;;  %v1871_v27 = vsel %vm667_vm0, %v1477_v48, 0.0  ;;  %v6454_v48 = vld [vmem:[%s11211_s0 + $0x438] sm:$0xff] }
 0x37a   :  { %11852 = vst [vmem:[#allocation301_spill] sm:$0xff] %v9287_v63 }
 0x37b   :  { %1863 = vadd.xlane.f32.xlu0 %v1862_v35  ;;  %v9298_v35 = vsub.f32 %v6451_v60, %v1208_v11  ;;  %v1479_v60 = vmul.f32 %v9287_v63, %v9287_v63 }
 0x37c   :  { %v9290_v44 = vpop.xlane.xlu0 %1659  ;;  %1866 = vadd.xlane.f32.xlu1 %v1865_v59  ;;  %v9309_v59 = vsub.f32 %v6452_v19, %v1209_v49  ;;  %v1874_v49 = vsel %vm667_vm0, %v1478_v34, 0.0  ;;  %v9330_v19 = vsub.f32 %v6454_v48, %v1211_v29  ;;  %v1892_v29 = vmul.f32 0.020408163, %v8650_v47 }
 0x37d   :  { %11853 = vst [vmem:[#allocation302_spill] sm:$0xff] %v9298_v35  ;;  %v9301_v3 = vpop.xlane.xlu1 %1662  ;;  %v1480_v51 = vmul.f32 %v9298_v35, %v9298_v35 }
 0x37e   :  { %11854 = vst [vmem:[#allocation303_spill] sm:$0xff] %v9309_v59  ;;  %11857 = vst [vmem:[#allocation306_spill] sm:$0xff] %v9330_v19 }
 0x37f   :  { %1869 = vadd.xlane.f32.xlu0 %v1868_v31  ;;  %v9320_v31 = vsub.f32 %v6453_v62, %v1210_v55  ;;  %v1877_v55 = vsel %vm667_vm0, %v1479_v60, 0.0  ;;  %v1481_v62 = vmul.f32 %v9309_v59, %v9309_v59 }
 0x380   :  { %v9312_v11 = vpop.xlane.xlu0 %1665  ;;  %1872 = vadd.xlane.f32.xlu1 %v1871_v27  ;;  %v1893_v27 = vmul.f32 0.020408163, %v8661_v25  ;;  %v1894_v25 = vmul.f32 0.020408163, %v8672_v21  ;;  %v1895_v21 = vmul.f32 0.020408163, %v8683_v37 }
 0x381   :  { %11855 = vst [vmem:[#allocation304_spill] sm:$0xff] %v9312_v11  ;;  %11856 = vst [vmem:[#allocation305_spill] sm:$0xff] %v9320_v31  ;;  %v9322_v39 = vpop.xlane.xlu1 %1668  ;;  %v1482_v35 = vmul.f32 %v9320_v31, %v9320_v31  ;;  %v1883_v60 = vsel %vm667_vm0, %v1481_v62, 0.0  ;;  %v2028_v11 = vadd.f32 1e-05, %v1892_v29 }
 0x382   :  { %v2029_v48 = vadd.f32 1e-05, %v1893_v27  ;;  %v1901_v31 = vmul.f32 0.020408163, %v8749_v2  ;;  %v2030_v47 = vadd.f32 1e-05, %v1894_v25 }
 0x383   :  { %1875 = vadd.xlane.f32.xlu0 %v1874_v49  ;;  %v1880_v49 = vsel %vm667_vm0, %v1480_v51, 0.0  ;;  %v1886_v51 = vsel %vm667_vm0, %v1482_v35, 0.0  ;;  %v2031_v35 = vadd.f32 1e-05, %v1895_v21  ;;  %v1896_v2 = vmul.f32 0.020408163, %v8694_v12 }
 0x384   :  { %v9333_v63 = vpop.xlane.xlu0 %1671  ;;  %1878 = vadd.xlane.f32.xlu1 %v1877_v55  ;;  %v1483_v55 = vmul.f32 %v9330_v19, %v9330_v19  ;;  %6048 = vrsqrt.f32 %v2029_v48  ;;  %v1903_v19 = vmul.f32 0.020408163, %v8772_v8  ;;  %v1905_v25 = vmul.f32 0.020408163, %v8795_v6 }
 0x385   :  { %11858 = vst [vmem:[#allocation307_spill] sm:$0xff] %v9333_v63  ;;  %v9338_v34 = vpop.xlane.xlu1 %1674  ;;  %6050 = vrsqrt.f32 %v2028_v11  ;;  %v1907_v12 = vmul.f32 0.020408163, %v8817_v42  ;;  %v1898_v21 = vmul.f32 0.020408163, %v8716_v33  ;;  %v11863_v42 = vld [vmem:[#allocation9_spill] sm:$0xff] }
 0x386   :  { %v1889_v62 = vsel %vm667_vm0, %v1483_v55, 0.0  ;;  %6052 = vrsqrt.f32 %v2030_v47  ;;  %v2039_v37 = vadd.f32 1e-05, %v1903_v19  ;;  %v2032_v55 = vadd.f32 1e-05, %v1896_v2 }
 0x387   :  { %1881 = vadd.xlane.f32.xlu0 %v1880_v49  ;;  %v2041_v8 = vadd.f32 1e-05, %v1905_v25  ;;  %v2034_v2 = vadd.f32 1e-05, %v1898_v21  ;;  %v1900_v21 = vmul.f32 0.020408163, %v8740_v13 }
 0x388   :  { %v9345_v63 = vpop.xlane.xlu0 %1677  ;;  %1884 = vadd.xlane.f32.xlu1 %v1883_v60  ;;  %v2037_v60 = vadd.f32 1e-05, %v1901_v31  ;;  %v1902_v13 = vmul.f32 0.020408163, %v8761_v17  ;;  %v1904_v17 = vmul.f32 0.020408163, %v8784_v0 }
 0x389   :  { %v9350_v59 = vpop.xlane.xlu1 %1680  ;;  %v1906_v0 = vmul.f32 0.020408163, %v8806_v43  ;;  %v1908_v43 = vmul.f32 0.020408163, %v8828_v38  ;;  %v1910_v38 = vmul.f32 0.020408163, %v8850_v10 }
 0x38a   :  { %6054 = vrsqrt.f32 %v2037_v60  ;;  %v2043_v60 = vadd.f32 1e-05, %v1907_v12  ;;  %v11864_v12 = vld [vmem:[#allocation7_spill] sm:$0xff]  ;;  %v1912_v10 = vmul.f32 0.020408163, %v8872_v15 }
 0x38b   :  { %1887 = vadd.xlane.f32.xlu0 %v1886_v51  ;;  %6056 = vrsqrt.f32 %v2031_v35  ;;  %v1897_v51 = vmul.f32 0.020408163, %v8705_v56  ;;  %v1909_v56 = vmul.f32 0.020408163, %v8839_v52  ;;  %v1914_v15 = vmul.f32 0.020408163, %v8894_v30 }
 0x38c   :  { %v9355_v27 = vpop.xlane.xlu0 %1683  ;;  %1890 = vadd.xlane.f32.xlu1 %v1889_v62  ;;  %6058 = vrsqrt.f32 %v2039_v37  ;;  %v1899_v37 = vmul.f32 0.020408163, %v8727_v41  ;;  %v1916_v30 = vmul.f32 0.020408163, %v8916_v26  ;;  %v1918_v26 = vmul.f32 0.020408163, %v8938_v22 }
 0x38d   :  { %v9358_v49 = vpop.xlane.xlu1 %1686  ;;  %6060 = vrsqrt.f32 %v2032_v55  ;;  %v2033_v47 = vadd.f32 1e-05, %v1897_v51 }
 0x38e   :  { %6062 = vrsqrt.f32 %v2041_v8  ;;  %v1911_v8 = vmul.f32 0.020408163, %v8861_v23  ;;  %v1913_v23 = vmul.f32 0.020408163, %v8883_v58  ;;  %v1915_v58 = vmul.f32 0.020408163, %v8905_v54 }
 0x38f   :  { %6064 = vrsqrt.f32 %v2033_v47  ;;  %v2035_v47 = vadd.f32 1e-05, %v1899_v37  ;;  %v1917_v54 = vmul.f32 0.020408163, %v8927_v50  ;;  %v1919_v50 = vmul.f32 0.020408163, %v8949_v46 }
 0x390   :  { %v9362_v29 = vpop.xlane.xlu0 %1689  ;;  %6066 = vrsqrt.f32 %v2043_v60  ;;  %v2047_v60 = vadd.f32 1e-05, %v1911_v8  ;;  %v1921_v46 = vmul.f32 0.020408163, %v8971_v40  ;;  %v1923_v40 = vmul.f32 0.020408163, %v8993_v36 }
 0x391   :  { %11859 = vst [vmem:[#allocation308_spill] sm:$0xff] %v9362_v29  ;;  %v9364_v48 = vpop.xlane.xlu1 %1692  ;;  %v6049_v19 = vpop.eup %6048  ;;  %6068 = vrsqrt.f32 %v2034_v2  ;;  %v2036_v2 = vadd.f32 1e-05, %v1900_v21  ;;  %v1925_v36 = vmul.f32 0.020408163, %v9015_v32 }
 0x392   :  { %v6051_v35 = vpop.eup %6050  ;;  %v2301_v55 = vmul.f32 %v6049_v19, %v11863_v42  ;;  %v11867_v42 = vld [vmem:[#allocation13_spill] sm:$0xff]  ;;  %v1927_v32 = vmul.f32 0.020408163, %v9037_v28  ;;  %v1929_v28 = vmul.f32 0.020408163, %v9059_v24 }
 0x393   :  { %v6053_v51 = vpop.eup %6052 }
 0x394   :  { %v9368_v11 = vpop.xlane.xlu0 %1695 }
 0x395   :  { %11860 = vst [vmem:[#allocation309_spill] sm:$0xff] %v9368_v11  ;;  %v9370_v31 = vpop.xlane.xlu1 %1698  ;;  %v2300_v11 = vmul.f32 %v6051_v35, %v11864_v12 }
 0x397   :  { %v6055_v52 = vpop.eup %6054 }
 0x398   :  { %v9374_v62 = vpop.xlane.xlu0 %1701  ;;  %v6057_v19 = vpop.eup %6056 }
 0x399   :  { %11861 = vst [vmem:[#allocation310_spill] sm:$0xff] %v9374_v62  ;;  %v9376_v6 = vpop.xlane.xlu1 %1704  ;;  %v2045_v62 = vadd.f32 1e-05, %v1909_v56  ;;  %v11866_v56 = vld [vmem:[#allocation25_spill] sm:$0xff]  ;;  %v6059_v12 = vpop.eup %6058 }
 0x39a   :  { %v2309_v35 = vmul.f32 %v6055_v52, %v11866_v56  ;;  %v11869_v56 = vld [vmem:[#allocation15_spill] sm:$0xff] }
 0x39b   :  { %6070 = vrsqrt.f32 %v2045_v62  ;;  %v11868_v62 = vld [vmem:[#allocation29_spill] sm:$0xff] }
 0x39c   :  { %v9380_v25 = vpop.xlane.xlu0 %1707  ;;  %6072 = vrsqrt.f32 %v2035_v47  ;;  %v2311_v8 = vmul.f32 %v6059_v12, %v11868_v62  ;;  %v2038_v47 = vadd.f32 1e-05, %v1902_v13  ;;  %v11871_v62 = vld [vmem:[#allocation17_spill] sm:$0xff] }
 0x39d   :  { %11862 = vst [vmem:[#allocation311_spill] sm:$0xff] %v9380_v25  ;;  %2443 = vperm.xlu1 %6045, %v2301_v55   ;;  %v9383_v33 = vpop.xlane.xlu1 %1710  ;;  %v11865_v25 = vld [vmem:[#allocation11_spill] sm:$0xff]  ;;  %6074 = vrsqrt.f32 %v2047_v60  ;;  %v2051_v60 = vadd.f32 1e-05, %v1915_v58  ;;  %v11872_v58 = vld [vmem:[#allocation37_spill] sm:$0xff] }
 0x39e   :  { %v2302_v29 = vmul.f32 %v6053_v51, %v11865_v25  ;;  %v2303_v51 = vmul.f32 %v6057_v19, %v11867_v42  ;;  %v6061_v25 = vpop.eup %6060  ;;  %6076 = vrsqrt.f32 %v2036_v2  ;;  %v2040_v2 = vadd.f32 1e-05, %v1904_v17 }
 0x39f   :  { %v6063_v52 = vpop.eup %6062  ;;  %v2304_v19 = vmul.f32 %v6061_v25, %v11869_v56 }
 0x3a0   :  { %v9388_v41 = vpop.xlane.xlu0 %1713  ;;  %v6065_v42 = vpop.eup %6064 }
 0x3a1   :  { %2438 = vperm.xlu0 %6044, %v2300_v11   ;;  %v9391_v55 = vpop.xlane.xlu1 %1716  ;;  %2448 = vperm.xlu1 %6045, %v2302_v29   ;;  %v2049_v29 = vadd.f32 1e-05, %v1913_v23  ;;  %v11870_v23 = vld [vmem:[#allocation33_spill] sm:$0xff]  ;;  %v2305_v25 = vmul.f32 %v6065_v42, %v11871_v62 }
 0x3a2   :  { %v2313_v12 = vmul.f32 %v6063_v52, %v11870_v23  ;;  %v11873_v23 = vld [vmem:[#allocation19_spill] sm:$0xff] }
 0x3a3   :  { %6078 = vrsqrt.f32 %v2049_v29  ;;  %v2053_v29 = vadd.f32 1e-05, %v1917_v54  ;;  %v11874_v54 = vld [vmem:[#allocation41_spill] sm:$0xff] }
 0x3a4   :  { %v9396_v37 = vpop.xlane.xlu0 %1719  ;;  %6080 = vrsqrt.f32 %v2038_v47  ;;  %v2042_v47 = vadd.f32 1e-05, %v1906_v0 }
 0x3a5   :  { %2483 = vperm.xlu0 %6044, %v2309_v35   ;;  %v9399_v11 = vpop.xlane.xlu1 %1722  ;;  %2453 = vperm.xlu1 %6045, %v2303_v51   ;;  %v6067_v51 = vpop.eup %6066  ;;  %6082 = vrsqrt.f32 %v2051_v60  ;;  %v2055_v60 = vadd.f32 1e-05, %v1919_v50  ;;  %v11876_v50 = vld [vmem:[#allocation45_spill] sm:$0xff] }
 0x3a6   :  { %v6069_v56 = vpop.eup %6068  ;;  %v2315_v52 = vmul.f32 %v6067_v51, %v11872_v58  ;;  %6084 = vrsqrt.f32 %v2040_v2  ;;  %v2044_v2 = vadd.f32 1e-05, %v1908_v43  ;;  %v11875_v58 = vld [vmem:[#allocation21_spill] sm:$0xff] }
 0x3a7   :  { %v2306_v42 = vmul.f32 %v6069_v56, %v11873_v23  ;;  %6086 = vrsqrt.f32 %v2053_v29  ;;  %v2057_v29 = vadd.f32 1e-05, %v1921_v46  ;;  %v11879_v46 = vld [vmem:[#allocation49_spill] sm:$0xff] }
 0x3a8   :  { %v9404_v21 = vpop.xlane.xlu0 %1725  ;;  %6088 = vrsqrt.f32 %v2042_v47  ;;  %v2046_v47 = vadd.f32 1e-05, %v1910_v38 }
 0x3a9   :  { %2493 = vperm.xlu0 %6044, %v2311_v8   ;;  %v9407_v35 = vpop.xlane.xlu1 %1728  ;;  %2458 = vperm.xlu1 %6045, %v2304_v19   ;;  %v6071_v19 = vpop.eup %6070  ;;  %6090 = vrsqrt.f32 %v2055_v60  ;;  %v2059_v60 = vadd.f32 1e-05, %v1923_v40  ;;  %v11882_v40 = vld [vmem:[#allocation53_spill] sm:$0xff] }
 0x3aa   :  { %v6073_v62 = vpop.eup %6072  ;;  %v2317_v51 = vmul.f32 %v6071_v19, %v11874_v54  ;;  %6092 = vrsqrt.f32 %v2044_v2  ;;  %v11878_v54 = vld [vmem:[#allocation23_spill] sm:$0xff]  ;;  %v2048_v2 = vadd.f32 1e-05, %v1912_v10 }
 0x3ab   :  { %v2307_v56 = vmul.f32 %v6073_v62, %v11875_v58  ;;  %6094 = vrsqrt.f32 %v2057_v29  ;;  %v2061_v29 = vadd.f32 1e-05, %v1925_v36  ;;  %v11885_v36 = vld [vmem:[#allocation57_spill] sm:$0xff] }
 0x3ac   :  { %v9412_v13 = vpop.xlane.xlu0 %1731  ;;  %6096 = vrsqrt.f32 %v2046_v47  ;;  %v2050_v47 = vadd.f32 1e-05, %v1914_v15 }
 0x3ad   :  { %2503 = vperm.xlu0 %6044, %v2313_v12   ;;  %v9415_v8 = vpop.xlane.xlu1 %1734  ;;  %2463 = vperm.xlu1 %6045, %v2305_v25   ;;  %v6075_v25 = vpop.eup %6074  ;;  %6098 = vrsqrt.f32 %v2059_v60  ;;  %v2063_v60 = vadd.f32 1e-05, %v1927_v32  ;;  %v11888_v32 = vld [vmem:[#allocation160_spill] sm:$0xff] }
 0x3ae   :  { %v6077_v23 = vpop.eup %6076  ;;  %v2319_v19 = vmul.f32 %v6075_v25, %v11876_v50  ;;  %v11881_v50 = vld [vmem:[#allocation27_spill] sm:$0xff]  ;;  %6100 = vrsqrt.f32 %v2048_v2  ;;  %v2052_v2 = vadd.f32 1e-05, %v1916_v30  ;;  %v1931_v24 = vmul.f32 0.020408163, %v11888_v32  ;;  %v11890_v30 = vld [vmem:[#allocation272_spill] sm:$0xff] }
 0x3af   :  { %v2308_v62 = vmul.f32 %v6077_v23, %v11878_v54  ;;  %6102 = vrsqrt.f32 %v2061_v29  ;;  %v2065_v29 = vadd.f32 1e-05, %v1929_v28  ;;  %v1920_v22 = vmul.f32 0.020408163, %v11890_v30  ;;  %v11893_v28 = vld [vmem:[#allocation162_spill] sm:$0xff]  ;;  %v11894_v32 = vld [vmem:[#allocation65_spill] sm:$0xff] }
 0x3b0   :  { %v9420_v17 = vpop.xlane.xlu0 %1737  ;;  %6104 = vrsqrt.f32 %v2050_v47  ;;  %v2054_v47 = vadd.f32 1e-05, %v1918_v26  ;;  %v11895_v26 = vld [vmem:[#allocation275_spill] sm:$0xff] }
 0x3b1   :  { %2513 = vperm.xlu0 %6044, %v2315_v52   ;;  %v9423_v12 = vpop.xlane.xlu1 %1740  ;;  %2468 = vperm.xlu1 %6045, %v2306_v42   ;;  %v6079_v42 = vpop.eup %6078  ;;  %6106 = vrsqrt.f32 %v2063_v60  ;;  %v2067_v60 = vadd.f32 1e-05, %v1931_v24  ;;  %v1922_v30 = vmul.f32 0.020408163, %v11895_v26  ;;  %v11898_v24 = vld [vmem:[#allocation164_spill] sm:$0xff] }
 0x3b2   :  { %v6081_v58 = vpop.eup %6080  ;;  %v2321_v25 = vmul.f32 %v6079_v42, %v11879_v46  ;;  %v11884_v46 = vld [vmem:[#allocation31_spill] sm:$0xff]  ;;  %6108 = vrsqrt.f32 %v2052_v2  ;;  %v2056_v2 = vadd.f32 1e-05, %v1920_v22  ;;  %v11900_v22 = vld [vmem:[#allocation278_spill] sm:$0xff] }
 0x3b3   :  { %v2310_v23 = vmul.f32 %v6081_v58, %v11881_v50  ;;  %6110 = vrsqrt.f32 %v2065_v29  ;;  %v1924_v26 = vmul.f32 0.020408163, %v11900_v22 }
 0x3b4   :  { %v9428_v0 = vpop.xlane.xlu0 %1743  ;;  %6112 = vrsqrt.f32 %v2054_v47  ;;  %v2058_v47 = vadd.f32 1e-05, %v1922_v30  ;;  %v11904_v30 = vld [vmem:[#allocation281_spill] sm:$0xff] }
 0x3b5   :  { %2523 = vperm.xlu0 %6044, %v2317_v51   ;;  %v9431_v52 = vpop.xlane.xlu1 %1746  ;;  %2473 = vperm.xlu1 %6045, %v2307_v56   ;;  %v6083_v56 = vpop.eup %6082  ;;  %6114 = vrsqrt.f32 %v2067_v60  ;;  %v1926_v22 = vmul.f32 0.020408163, %v11904_v30 }
 0x3b6   :  { %v6085_v54 = vpop.eup %6084  ;;  %v2323_v42 = vmul.f32 %v6083_v56, %v11882_v40  ;;  %v11887_v40 = vld [vmem:[#allocation35_spill] sm:$0xff]  ;;  %6116 = vrsqrt.f32 %v2056_v2  ;;  %v2060_v2 = vadd.f32 1e-05, %v1924_v26  ;;  %v11908_v26 = vld [vmem:[#allocation220_spill] sm:$0xff] }
 0x3b7   :  { %v2312_v58 = vmul.f32 %v6085_v54, %v11884_v46  ;;  %v1928_v30 = vmul.f32 0.020408163, %v11908_v26 }
 0x3b8   :  { %v9436_v43 = vpop.xlane.xlu0 %1749 }
 0x3b9   :  { %11877 = vst [vmem:[#allocation312_spill] sm:$0xff] %v9436_v43  ;;  %2533 = vperm.xlu0 %6044, %v2319_v19   ;;  %v9439_v51 = vpop.xlane.xlu1 %1752  ;;  %2478 = vperm.xlu1 %6045, %v2308_v62   ;;  %v6087_v62 = vpop.eup %6086 }
 0x3ba   :  { %v6089_v50 = vpop.eup %6088  ;;  %v2325_v56 = vmul.f32 %v6087_v62, %v11885_v36 }
 0x3bb   :  { %v2314_v54 = vmul.f32 %v6089_v50, %v11887_v40 }
 0x3bc   :  { %v9444_v38 = vpop.xlane.xlu0 %1755 }
 0x3bd   :  { %11880 = vst [vmem:[#allocation313_spill] sm:$0xff] %v9444_v38  ;;  %2543 = vperm.xlu0 %6044, %v2321_v25   ;;  %v9447_v19 = vpop.xlane.xlu1 %1758  ;;  %2488 = vperm.xlu1 %6045, %v2310_v23   ;;  %v6091_v23 = vpop.eup %6090 }
 0x3be   :  { %v6093_v46 = vpop.eup %6092 }
 0x3bf   :  { %v6095_v36 = vpop.eup %6094 }
 0x3c0   :  { %v9452_v10 = vpop.xlane.xlu0 %1761  ;;  %v6097_v40 = vpop.eup %6096 }
 0x3c1   :  { %11883 = vst [vmem:[#allocation314_spill] sm:$0xff] %v9452_v10  ;;  %2553 = vperm.xlu0 %6044, %v2323_v42   ;;  %v9455_v25 = vpop.xlane.xlu1 %1764  ;;  %2498 = vperm.xlu1 %6045, %v2312_v58   ;;  %v11889_v58 = vld [vmem:[#allocation61_spill] sm:$0xff] }
 0x3c2   :  { %v2327_v62 = vmul.f32 %v6091_v23, %v11889_v58  ;;  %v2329_v23 = vmul.f32 %v6095_v36, %v11894_v32  ;;  %v6099_v58 = vpop.eup %6098 }
 0x3c4   :  { %v9460_v15 = vpop.xlane.xlu0 %1767 }
 0x3c5   :  { %11886 = vst [vmem:[#allocation315_spill] sm:$0xff] %v9460_v15  ;;  %2563 = vperm.xlu0 %6044, %v2325_v56   ;;  %v9463_v42 = vpop.xlane.xlu1 %1770  ;;  %2508 = vperm.xlu1 %6045, %v2314_v54   ;;  %v11892_v15 = vld [vmem:[#allocation39_spill] sm:$0xff]  ;;  %v1933_v54 = vmul.f32 0.020408163, %v11893_v28  ;;  %v11899_v28 = vld [vmem:[#allocation69_spill] sm:$0xff] }
 0x3c6   :  { %v2316_v50 = vmul.f32 %v6093_v46, %v11892_v15  ;;  %v6101_v15 = vpop.eup %6100  ;;  %v2331_v36 = vmul.f32 %v6099_v58, %v11899_v28 }
 0x3c7   :  { %v2069_v29 = vadd.f32 1e-05, %v1933_v54  ;;  %v6103_v32 = vpop.eup %6102  ;;  %v1937_v54 = vmul.f32 0.020408163, %v9147_v14  ;;  %v1939_v14 = vmul.f32 0.020408163, %v9169_v18 }
 0x3c8   :  { %v9468_v10 = vpop.xlane.xlu0 %1773  ;;  %v1941_v18 = vmul.f32 0.020408163, %v9191_v9  ;;  %v1943_v9 = vmul.f32 0.020408163, %v9213_v53  ;;  %v1945_v53 = vmul.f32 0.020408163, %v9235_v20 }
 0x3c9   :  { %11891 = vst [vmem:[#allocation160_spill] sm:$0xff] %v9468_v10  ;;  %2573 = vperm.xlu0 %6044, %v2327_v62   ;;  %v9471_v56 = vpop.xlane.xlu1 %1776  ;;  %2518 = vperm.xlu1 %6045, %v2316_v50   ;;  %v11897_v10 = vld [vmem:[#allocation43_spill] sm:$0xff]  ;;  %v1935_v50 = vmul.f32 0.020408163, %v11898_v24  ;;  %6118 = vrsqrt.f32 %v2069_v29  ;;  %v2073_v29 = vadd.f32 1e-05, %v1937_v54 }
 0x3ca   :  { %v2318_v46 = vmul.f32 %v6097_v40, %v11897_v10  ;;  %v6105_v10 = vpop.eup %6104  ;;  %6120 = vrsqrt.f32 %v2058_v47  ;;  %v2062_v47 = vadd.f32 1e-05, %v1926_v22  ;;  %v11911_v54 = vld [vmem:[#allocation16_spill] sm:$0xff]  ;;  %v11912_v22 = vld [vmem:[#allocation159_spill] sm:$0xff]  ;;  %v1947_v20 = vmul.f32 0.020408163, %v9257_v16 }
 0x3cb   :  { %v2071_v60 = vadd.f32 1e-05, %v1935_v50  ;;  %v6107_v24 = vpop.eup %6106  ;;  %v11907_v50 = vld [vmem:[#allocation12_spill] sm:$0xff]  ;;  %v1930_v26 = vmul.f32 0.020408163, %v11912_v22 }
 0x3cc   :  { %v9476_v38 = vpop.xlane.xlu0 %1779  ;;  %v1949_v16 = vmul.f32 0.020408163, %v9279_v7  ;;  %v1951_v7 = vmul.f32 0.020408163, %v9301_v3  ;;  %v1953_v3 = vmul.f32 0.020408163, %v9322_v39 }
 0x3cd   :  { %11896 = vst [vmem:[#allocation272_spill] sm:$0xff] %v9476_v38  ;;  %2583 = vperm.xlu0 %6044, %v2329_v23   ;;  %v9479_v62 = vpop.xlane.xlu1 %1782  ;;  %2528 = vperm.xlu1 %6045, %v2318_v46   ;;  %v11902_v38 = vld [vmem:[#allocation47_spill] sm:$0xff]  ;;  %v11903_v46 = vld [vmem:[#allocation8_spill] sm:$0xff]  ;;  %6122 = vrsqrt.f32 %v2071_v60  ;;  %v2075_v60 = vadd.f32 1e-05, %v1939_v14 }
 0x3ce   :  { %v2320_v40 = vmul.f32 %v6101_v15, %v11902_v38  ;;  %v2333_v58 = vmul.f32 %v6103_v32, %v11903_v46  ;;  %v6109_v38 = vpop.eup %6108  ;;  %v2335_v32 = vmul.f32 %v6107_v24, %v11907_v50  ;;  %6124 = vrsqrt.f32 %v2060_v2  ;;  %v11915_v14 = vld [vmem:[#allocation20_spill] sm:$0xff] }
 0x3cf   :  { %6126 = vrsqrt.f32 %v2073_v29  ;;  %v2064_v2 = vadd.f32 1e-05, %v1928_v30  ;;  %v2077_v29 = vadd.f32 1e-05, %v1941_v18  ;;  %v11916_v30 = vld [vmem:[#allocation161_spill] sm:$0xff]  ;;  %v11919_v18 = vld [vmem:[#allocation24_spill] sm:$0xff] }
 0x3d0   :  { %v9484_v43 = vpop.xlane.xlu0 %1785  ;;  %6128 = vrsqrt.f32 %v2062_v47  ;;  %v2066_v47 = vadd.f32 1e-05, %v1930_v26  ;;  %v1932_v22 = vmul.f32 0.020408163, %v11916_v30  ;;  %v11920_v26 = vld [vmem:[#allocation163_spill] sm:$0xff] }
 0x3d1   :  { %11901 = vst [vmem:[#allocation162_spill] sm:$0xff] %v9484_v43  ;;  %2593 = vperm.xlu0 %6044, %v2331_v36   ;;  %v9487_v23 = vpop.xlane.xlu1 %1788  ;;  %2538 = vperm.xlu1 %6045, %v2320_v40   ;;  %v11906_v43 = vld [vmem:[#allocation51_spill] sm:$0xff]  ;;  %v6111_v40 = vpop.eup %6110  ;;  %6130 = vrsqrt.f32 %v2075_v60  ;;  %v2079_v60 = vadd.f32 1e-05, %v1943_v9  ;;  %v1934_v30 = vmul.f32 0.020408163, %v11920_v26 }
 0x3d2   :  { %v2322_v15 = vmul.f32 %v6105_v10, %v11906_v43  ;;  %v6113_v43 = vpop.eup %6112  ;;  %v2337_v24 = vmul.f32 %v6111_v40, %v11911_v54  ;;  %6132 = vrsqrt.f32 %v2064_v2  ;;  %v2068_v2 = vadd.f32 1e-05, %v1932_v22  ;;  %v11923_v9 = vld [vmem:[#allocation28_spill] sm:$0xff]  ;;  %v11924_v22 = vld [vmem:[#allocation165_spill] sm:$0xff] }
 0x3d3   :  { %6134 = vrsqrt.f32 %v2077_v29  ;;  %v2081_v29 = vadd.f32 1e-05, %v1945_v53  ;;  %v1936_v26 = vmul.f32 0.020408163, %v11924_v22  ;;  %v11926_v53 = vld [vmem:[#allocation32_spill] sm:$0xff] }
 0x3d4   :  { %v9492_v28 = vpop.xlane.xlu0 %1791  ;;  %6136 = vrsqrt.f32 %v2066_v47  ;;  %v2070_v47 = vadd.f32 1e-05, %v1934_v30  ;;  %v1938_v30 = vmul.f32 0.020408163, %v9158_v5  ;;  %v1940_v5 = vmul.f32 0.020408163, %v9180_v45 }
 0x3d5   :  { %11905 = vst [vmem:[#allocation275_spill] sm:$0xff] %v9492_v28  ;;  %2603 = vperm.xlu0 %6044, %v2333_v58   ;;  %v9495_v36 = vpop.xlane.xlu1 %1794  ;;  %2548 = vperm.xlu1 %6045, %v2322_v15   ;;  %v11910_v28 = vld [vmem:[#allocation55_spill] sm:$0xff]  ;;  %v6115_v15 = vpop.eup %6114  ;;  %6138 = vrsqrt.f32 %v2079_v60  ;;  %v2083_v60 = vadd.f32 1e-05, %v1947_v20  ;;  %v11928_v20 = vld [vmem:[#allocation36_spill] sm:$0xff] }
 0x3d6   :  { %v2324_v10 = vmul.f32 %v6109_v38, %v11910_v28  ;;  %v6117_v28 = vpop.eup %6116  ;;  %v2339_v40 = vmul.f32 %v6115_v15, %v11915_v14  ;;  %6140 = vrsqrt.f32 %v2068_v2  ;;  %v2072_v2 = vadd.f32 1e-05, %v1936_v26 }
 0x3d7   :  { %6142 = vrsqrt.f32 %v2081_v29  ;;  %v2085_v29 = vadd.f32 1e-05, %v1949_v16  ;;  %v11930_v16 = vld [vmem:[#allocation40_spill] sm:$0xff]  ;;  %v1942_v45 = vmul.f32 0.020408163, %v9202_v4 }
 0x3d8   :  { %v9500_v46 = vpop.xlane.xlu0 %1797  ;;  %6144 = vrsqrt.f32 %v2070_v47  ;;  %v2074_v47 = vadd.f32 1e-05, %v1938_v30  ;;  %v1955_v39 = vmul.f32 0.020408163, %v9338_v34  ;;  %v1944_v4 = vmul.f32 0.020408163, %v9224_v1 }
 0x3d9   :  { %11909 = vst [vmem:[#allocation164_spill] sm:$0xff] %v9500_v46  ;;  %2613 = vperm.xlu0 %6044, %v2335_v32   ;;  %v9503_v58 = vpop.xlane.xlu1 %1800  ;;  %2558 = vperm.xlu1 %6045, %v2324_v10   ;;  %v11914_v46 = vld [vmem:[#allocation59_spill] sm:$0xff]  ;;  %v6119_v10 = vpop.eup %6118  ;;  %6146 = vrsqrt.f32 %v2083_v60  ;;  %v2087_v60 = vadd.f32 1e-05, %v1951_v7  ;;  %v11932_v7 = vld [vmem:[#allocation44_spill] sm:$0xff] }
 0x3da   :  { %v2326_v38 = vmul.f32 %v6113_v43, %v11914_v46  ;;  %v6121_v46 = vpop.eup %6120  ;;  %v2341_v15 = vmul.f32 %v6119_v10, %v11919_v18  ;;  %6148 = vrsqrt.f32 %v2072_v2  ;;  %v2076_v2 = vadd.f32 1e-05, %v1940_v5 }
 0x3db   :  { %6150 = vrsqrt.f32 %v2085_v29  ;;  %v2089_v29 = vadd.f32 1e-05, %v1953_v3  ;;  %v1957_v34 = vmul.f32 0.020408163, %v9350_v59  ;;  %v11934_v3 = vld [vmem:[#allocation48_spill] sm:$0xff] }
 0x3dc   :  { %v9508_v50 = vpop.xlane.xlu0 %1803  ;;  %6152 = vrsqrt.f32 %v2074_v47  ;;  %v2078_v47 = vadd.f32 1e-05, %v1942_v45  ;;  %v1946_v1 = vmul.f32 0.020408163, %v9246_v61  ;;  %v1959_v59 = vmul.f32 0.020408163, %v9358_v49 }
 0x3dd   :  { %11913 = vst [vmem:[#allocation278_spill] sm:$0xff] %v9508_v50  ;;  %2623 = vperm.xlu0 %6044, %v2337_v24   ;;  %v9511_v32 = vpop.xlane.xlu1 %1806  ;;  %2568 = vperm.xlu1 %6045, %v2326_v38   ;;  %v11918_v50 = vld [vmem:[#allocation63_spill] sm:$0xff]  ;;  %v6123_v38 = vpop.eup %6122  ;;  %6154 = vrsqrt.f32 %v2087_v60  ;;  %v2091_v60 = vadd.f32 1e-05, %v1955_v39  ;;  %v11936_v39 = vld [vmem:[#allocation52_spill] sm:$0xff] }
 0x3de   :  { %v2328_v43 = vmul.f32 %v6117_v28, %v11918_v50  ;;  %v6125_v50 = vpop.eup %6124  ;;  %v2343_v10 = vmul.f32 %v6123_v38, %v11923_v9  ;;  %v11927_v9 = vld [vmem:[#allocation10_spill] sm:$0xff]  ;;  %6156 = vrsqrt.f32 %v2076_v2  ;;  %v2080_v2 = vadd.f32 1e-05, %v1944_v4 }
 0x3df   :  { %v1948_v61 = vmul.f32 0.020408163, %v9268_v57  ;;  %v1961_v49 = vmul.f32 0.020408163, %v9364_v48  ;;  %v1950_v57 = vmul.f32 0.020408163, %v9290_v44 }
 0x3e0   :  { %v9516_v54 = vpop.xlane.xlu0 %1809  ;;  %v1963_v48 = vmul.f32 0.020408163, %v9370_v31  ;;  %v1965_v31 = vmul.f32 0.020408163, %v9376_v6  ;;  %v1967_v6 = vmul.f32 0.020408163, %v9383_v33 }
 0x3e1   :  { %11917 = vst [vmem:[#allocation281_spill] sm:$0xff] %v9516_v54  ;;  %2633 = vperm.xlu0 %6044, %v2339_v40   ;;  %v9519_v24 = vpop.xlane.xlu1 %1812  ;;  %2578 = vperm.xlu1 %6045, %v2328_v43   ;;  %v11922_v54 = vld [vmem:[#allocation67_spill] sm:$0xff]  ;;  %v6127_v43 = vpop.eup %6126  ;;  %6158 = vrsqrt.f32 %v2089_v29  ;;  %v2093_v29 = vadd.f32 1e-05, %v1957_v34  ;;  %v11938_v34 = vld [vmem:[#allocation56_spill] sm:$0xff] }
 0x3e2   :  { %v2330_v28 = vmul.f32 %v6121_v46, %v11922_v54  ;;  %v6129_v54 = vpop.eup %6128  ;;  %v2345_v38 = vmul.f32 %v6127_v43, %v11926_v53  ;;  %v11929_v53 = vld [vmem:[#allocation14_spill] sm:$0xff]  ;;  %6160 = vrsqrt.f32 %v2078_v47  ;;  %v2082_v47 = vadd.f32 1e-05, %v1946_v1 }
 0x3e3   :  { %v1969_v33 = vmul.f32 0.020408163, %v9391_v55 }
 0x3e4   :  { %v9524_v14 = vpop.xlane.xlu0 %1815 }
 0x3e5   :  { %11921 = vst [vmem:[#allocation220_spill] sm:$0xff] %v9524_v14  ;;  %2643 = vperm.xlu0 %6044, %v2341_v15   ;;  %v9527_v40 = vpop.xlane.xlu1 %1818  ;;  %2588 = vperm.xlu1 %6045, %v2330_v28   ;;  %v11925_v14 = vld [vmem:[#allocation6_spill] sm:$0xff]  ;;  %v6131_v28 = vpop.eup %6130  ;;  %6162 = vrsqrt.f32 %v2091_v60  ;;  %v2095_v60 = vadd.f32 1e-05, %v1959_v59  ;;  %v11941_v59 = vld [vmem:[#allocation60_spill] sm:$0xff] }
 0x3e6   :  { %v2332_v46 = vmul.f32 %v6125_v50, %v11925_v14  ;;  %v2334_v50 = vmul.f32 %v6129_v54, %v11927_v9  ;;  %v6133_v14 = vpop.eup %6132  ;;  %v2347_v43 = vmul.f32 %v6131_v28, %v11928_v20  ;;  %v11931_v20 = vld [vmem:[#allocation18_spill] sm:$0xff]  ;;  %6164 = vrsqrt.f32 %v2080_v2 }
 0x3e7   :  { %v2336_v54 = vmul.f32 %v6133_v14, %v11929_v53  ;;  %v2084_v2 = vadd.f32 1e-05, %v1948_v61  ;;  %v11942_v61 = vld [vmem:[#allocation304_spill] sm:$0xff] }
 0x3e8   :  { %v9532_v18 = vpop.xlane.xlu0 %1821  ;;  %v1952_v44 = vmul.f32 0.020408163, %v11942_v61 }
 0x3e9   :  { %2653 = vperm.xlu0 %6044, %v2343_v10   ;;  %v9535_v15 = vpop.xlane.xlu1 %1824  ;;  %2598 = vperm.xlu1 %6045, %v2332_v46   ;;  %v6135_v46 = vpop.eup %6134  ;;  %6166 = vrsqrt.f32 %v2093_v29  ;;  %v2097_v29 = vadd.f32 1e-05, %v1961_v49  ;;  %v11945_v49 = vld [vmem:[#allocation64_spill] sm:$0xff] }
 0x3ea   :  { %v6137_v9 = vpop.eup %6136  ;;  %v2349_v28 = vmul.f32 %v6135_v46, %v11930_v16  ;;  %v11933_v16 = vld [vmem:[#allocation22_spill] sm:$0xff]  ;;  %6168 = vrsqrt.f32 %v2082_v47  ;;  %v2086_v47 = vadd.f32 1e-05, %v1950_v57  ;;  %v11946_v57 = vld [vmem:[#allocation307_spill] sm:$0xff] }
 0x3eb   :  { %v2338_v14 = vmul.f32 %v6137_v9, %v11931_v20  ;;  %v1954_v61 = vmul.f32 0.020408163, %v11946_v57  ;;  %v11950_v57 = vld [vmem:[#allocation46_spill] sm:$0xff] }
 0x3ec   :  { %v9540_v22 = vpop.xlane.xlu0 %1827 }
 0x3ed   :  { %2663 = vperm.xlu0 %6044, %v2345_v38   ;;  %v9543_v10 = vpop.xlane.xlu1 %1830  ;;  %2608 = vperm.xlu1 %6045, %v2334_v50   ;;  %v6139_v50 = vpop.eup %6138  ;;  %6170 = vrsqrt.f32 %v2095_v60  ;;  %v2099_v60 = vadd.f32 1e-05, %v1963_v48  ;;  %v11949_v48 = vld [vmem:[#allocation68_spill] sm:$0xff] }
 0x3ee   :  { %v6141_v53 = vpop.eup %6140  ;;  %v2351_v46 = vmul.f32 %v6139_v50, %v11932_v7  ;;  %v11935_v7 = vld [vmem:[#allocation26_spill] sm:$0xff]  ;;  %6172 = vrsqrt.f32 %v2084_v2  ;;  %v2088_v2 = vadd.f32 1e-05, %v1952_v44  ;;  %v1956_v44 = vmul.f32 0.020408163, %v9345_v63 }
 0x3ef   :  { %v2340_v9 = vmul.f32 %v6141_v53, %v11933_v16  ;;  %v1958_v63 = vmul.f32 0.020408163, %v9355_v27  ;;  %v11955_v27 = vld [vmem:[#allocation54_spill] sm:$0xff] }
 0x3f0   :  { %v9548_v26 = vpop.xlane.xlu0 %1833 }
 0x3f1   :  { %2673 = vperm.xlu0 %6044, %v2347_v43   ;;  %v9551_v38 = vpop.xlane.xlu1 %1836  ;;  %2618 = vperm.xlu1 %6045, %v2336_v54   ;;  %v6143_v54 = vpop.eup %6142  ;;  %6174 = vrsqrt.f32 %v2097_v29  ;;  %v2101_v29 = vadd.f32 1e-05, %v1965_v31  ;;  %v11951_v31 = vld [vmem:[#allocation73_spill] sm:$0xff] }
 0x3f2   :  { %v6145_v20 = vpop.eup %6144  ;;  %v2353_v50 = vmul.f32 %v6143_v54, %v11934_v3  ;;  %v11937_v3 = vld [vmem:[#allocation30_spill] sm:$0xff]  ;;  %6176 = vrsqrt.f32 %v2086_v47  ;;  %v2090_v47 = vadd.f32 1e-05, %v1954_v61 }
 0x3f3   :  { %v2342_v53 = vmul.f32 %v6145_v20, %v11935_v7  ;;  %v11952_v61 = vld [vmem:[#allocation50_spill] sm:$0xff] }
 0x3f4   :  { %v9556_v30 = vpop.xlane.xlu0 %1839 }
 0x3f5   :  { %2683 = vperm.xlu0 %6044, %v2349_v28   ;;  %v9559_v43 = vpop.xlane.xlu1 %1842  ;;  %2628 = vperm.xlu1 %6045, %v2338_v14   ;;  %v6147_v14 = vpop.eup %6146  ;;  %6178 = vrsqrt.f32 %v2099_v60  ;;  %v2103_v60 = vadd.f32 1e-05, %v1967_v6  ;;  %v11953_v6 = vld [vmem:[#allocation77_spill] sm:$0xff] }
 0x3f6   :  { %v6149_v16 = vpop.eup %6148  ;;  %v2355_v54 = vmul.f32 %v6147_v14, %v11936_v39  ;;  %v11940_v39 = vld [vmem:[#allocation34_spill] sm:$0xff]  ;;  %6180 = vrsqrt.f32 %v2088_v2  ;;  %v2092_v2 = vadd.f32 1e-05, %v1956_v44 }
 0x3f7   :  { %v2344_v20 = vmul.f32 %v6149_v16, %v11937_v3 }
 0x3f8   :  { %v9564_v5 = vpop.xlane.xlu0 %1845 }
 0x3f9   :  { %2693 = vperm.xlu0 %6044, %v2351_v46   ;;  %v9567_v28 = vpop.xlane.xlu1 %1848  ;;  %2638 = vperm.xlu1 %6045, %v2340_v9   ;;  %v6151_v9 = vpop.eup %6150  ;;  %6182 = vrsqrt.f32 %v2101_v29  ;;  %v1971_v29 = vmul.f32 0.020408163, %v9399_v11  ;;  %v1973_v11 = vmul.f32 0.020408163, %v9407_v35  ;;  %v1975_v35 = vmul.f32 0.020408163, %v9415_v8 }
 0x3fa   :  { %v6153_v7 = vpop.eup %6152  ;;  %v2357_v14 = vmul.f32 %v6151_v9, %v11938_v34  ;;  %6184 = vrsqrt.f32 %v2090_v47  ;;  %v11954_v47 = vld [vmem:[#allocation308_spill] sm:$0xff]  ;;  %v1977_v8 = vmul.f32 0.020408163, %v9423_v12  ;;  %v1979_v12 = vmul.f32 0.020408163, %v9431_v52 }
 0x3fb   :  { %v2346_v16 = vmul.f32 %v6153_v7, %v11940_v39  ;;  %v1960_v44 = vmul.f32 0.020408163, %v11954_v47  ;;  %v1981_v52 = vmul.f32 0.020408163, %v9439_v51  ;;  %v1983_v51 = vmul.f32 0.020408163, %v9447_v19 }
 0x3fc   :  { %v9572_v45 = vpop.xlane.xlu0 %1851  ;;  %v1985_v19 = vmul.f32 0.020408163, %v9455_v25  ;;  %v1987_v25 = vmul.f32 0.020408163, %v9463_v42  ;;  %v1989_v42 = vmul.f32 0.020408163, %v9471_v56 }
 0x3fd   :  { %2703 = vperm.xlu0 %6044, %v2353_v50   ;;  %v9575_v46 = vpop.xlane.xlu1 %1854  ;;  %2648 = vperm.xlu1 %6045, %v2342_v53   ;;  %v6155_v53 = vpop.eup %6154  ;;  %6186 = vrsqrt.f32 %v2103_v60  ;;  %v2107_v60 = vadd.f32 1e-05, %v1971_v29  ;;  %v11962_v29 = vld [vmem:[#allocation85_spill] sm:$0xff]  ;;  %v1991_v56 = vmul.f32 0.020408163, %v9479_v62 }
 0x3fe   :  { %v6157_v3 = vpop.eup %6156  ;;  %v2359_v9 = vmul.f32 %v6155_v53, %v11941_v59  ;;  %6188 = vrsqrt.f32 %v2092_v2  ;;  %v2096_v2 = vadd.f32 1e-05, %v1960_v44  ;;  %v11963_v44 = vld [vmem:[#allocation310_spill] sm:$0xff]  ;;  %v1993_v62 = vmul.f32 0.020408163, %v9487_v23 }
 0x3ff   :  { %v1995_v23 = vmul.f32 0.020408163, %v9495_v36  ;;  %v1997_v36 = vmul.f32 0.020408163, %v9503_v58  ;;  %v1999_v58 = vmul.f32 0.020408163, %v9511_v32 }
 0x400   :  { %v9580_v4 = vpop.xlane.xlu0 %1857  ;;  %v2001_v32 = vmul.f32 0.020408163, %v9519_v24  ;;  %v2003_v24 = vmul.f32 0.020408163, %v9527_v40  ;;  %v2005_v40 = vmul.f32 0.020408163, %v9535_v15 }
 0x401   :  { %2713 = vperm.xlu0 %6044, %v2355_v54   ;;  %v9583_v50 = vpop.xlane.xlu1 %1860  ;;  %2658 = vperm.xlu1 %6045, %v2344_v20   ;;  %v6159_v20 = vpop.eup %6158  ;;  %v2007_v15 = vmul.f32 0.020408163, %v9543_v10  ;;  %v2009_v10 = vmul.f32 0.020408163, %v9551_v38  ;;  %v2011_v38 = vmul.f32 0.020408163, %v9559_v43 }
 0x402   :  { %v6161_v39 = vpop.eup %6160  ;;  %v2361_v53 = vmul.f32 %v6159_v20, %v11945_v49  ;;  %v2013_v43 = vmul.f32 0.020408163, %v9567_v28  ;;  %v2015_v28 = vmul.f32 0.020408163, %v9575_v46  ;;  %v2017_v46 = vmul.f32 0.020408163, %v9583_v50 }
 0x404   :  { %v9588_v1 = vpop.xlane.xlu0 %1863 }
 0x405   :  { %11939 = vst [vmem:[#allocation159_spill] sm:$0xff] %v9588_v1  ;;  %2723 = vperm.xlu0 %6044, %v2357_v14   ;;  %v9591_v54 = vpop.xlane.xlu1 %1866  ;;  %2668 = vperm.xlu1 %6045, %v2346_v16   ;;  %v11944_v1 = vld [vmem:[#allocation38_spill] sm:$0xff]  ;;  %v6163_v16 = vpop.eup %6162 }
 0x406   :  { %v2348_v7 = vmul.f32 %v6157_v3, %v11944_v1  ;;  %v6165_v1 = vpop.eup %6164  ;;  %v2363_v20 = vmul.f32 %v6163_v16, %v11949_v48  ;;  %v2019_v50 = vmul.f32 0.020408163, %v9591_v54 }
 0x407   :  { %v2352_v49 = vmul.f32 %v6165_v1, %v11950_v57 }
 0x408   :  { %v9596_v34 = vpop.xlane.xlu0 %1869 }
 0x409   :  { %11943 = vst [vmem:[#allocation161_spill] sm:$0xff] %v9596_v34  ;;  %2733 = vperm.xlu0 %6044, %v2359_v9   ;;  %v9599_v14 = vpop.xlane.xlu1 %1872  ;;  %2678 = vperm.xlu1 %6045, %v2348_v7   ;;  %v11948_v34 = vld [vmem:[#allocation42_spill] sm:$0xff]  ;;  %v6167_v7 = vpop.eup %6166 }
 0x40a   :  { %v2350_v3 = vmul.f32 %v6161_v39, %v11948_v34  ;;  %v2365_v16 = vmul.f32 %v6167_v7, %v11951_v31  ;;  %v2094_v7 = vadd.f32 1e-05, %v1958_v63  ;;  %v11958_v63 = vld [vmem:[#allocation309_spill] sm:$0xff]  ;;  %v11960_v34 = vld [vmem:[#allocation58_spill] sm:$0xff]  ;;  %v2021_v54 = vmul.f32 0.020408163, %v9599_v14 }
 0x40b   :  { %v1962_v47 = vmul.f32 0.020408163, %v11958_v63  ;;  %v1964_v63 = vmul.f32 0.020408163, %v11963_v44 }
 0x40c   :  { %v9604_v59 = vpop.xlane.xlu0 %1875 }
 0x40d   :  { %11947 = vst [vmem:[#allocation163_spill] sm:$0xff] %v9604_v59  ;;  %2743 = vperm.xlu0 %6044, %v2361_v53   ;;  %v9607_v9 = vpop.xlane.xlu1 %1878  ;;  %2688 = vperm.xlu1 %6045, %v2350_v3   ;;  %v6169_v59 = vpop.eup %6168 }
 0x40e   :  { %v6171_v3 = vpop.eup %6170  ;;  %v2354_v1 = vmul.f32 %v6169_v59, %v11952_v61  ;;  %v2023_v14 = vmul.f32 0.020408163, %v9607_v9 }
 0x40f   :  { %v6173_v48 = vpop.eup %6172  ;;  %v2367_v55 = vmul.f32 %v6171_v3, %v11953_v6 }
 0x410   :  { %v9613_v39 = vpop.xlane.xlu0 %1881  ;;  %v6175_v57 = vpop.eup %6174  ;;  %v2356_v59 = vmul.f32 %v6173_v48, %v11955_v27 }
 0x411   :  { %2753 = vperm.xlu0 %6044, %v2363_v20   ;;  %v9615_v53 = vpop.xlane.xlu1 %1884  ;;  %2698 = vperm.xlu1 %6045, %v2352_v49   ;;  %v2105_v49 = vadd.f32 1e-05, %v1969_v33  ;;  %v6177_v61 = vpop.eup %6176  ;;  %v11957_v33 = vld [vmem:[#allocation81_spill] sm:$0xff] }
 0x412   :  { %v2369_v3 = vmul.f32 %v6175_v57, %v11957_v33  ;;  %v2358_v48 = vmul.f32 %v6177_v61, %v11960_v34  ;;  %v2025_v9 = vmul.f32 0.020408163, %v9615_v53 }
 0x413   :  { %6190 = vrsqrt.f32 %v2105_v49  ;;  %v2109_v49 = vadd.f32 1e-05, %v1973_v11  ;;  %v11966_v11 = vld [vmem:[#allocation89_spill] sm:$0xff] }
 0x414   :  { %v9626_v31 = vpop.xlane.xlu0 %1887  ;;  %6192 = vrsqrt.f32 %v2094_v7  ;;  %v2098_v7 = vadd.f32 1e-05, %v1962_v47  ;;  %v11967_v47 = vld [vmem:[#allocation311_spill] sm:$0xff] }
 0x415   :  { %2763 = vperm.xlu0 %6044, %v2365_v16   ;;  %v9621_v20 = vpop.xlane.xlu1 %1890  ;;  %2708 = vperm.xlu1 %6045, %v2354_v1   ;;  %v6179_v1 = vpop.eup %6178  ;;  %6194 = vrsqrt.f32 %v2107_v60  ;;  %v2111_v60 = vadd.f32 1e-05, %v1975_v35  ;;  %v1966_v44 = vmul.f32 0.020408163, %v11967_v47  ;;  %v11970_v35 = vld [vmem:[#allocation93_spill] sm:$0xff] }
 0x416   :  { %v6181_v27 = vpop.eup %6180  ;;  %v2371_v57 = vmul.f32 %v6179_v1, %v11962_v29  ;;  %6196 = vrsqrt.f32 %v2096_v2  ;;  %v2100_v2 = vadd.f32 1e-05, %v1964_v63  ;;  %v1968_v63 = vmul.f32 0.020408163, %v9388_v41 }
 0x417   :  { %6198 = vrsqrt.f32 %v2109_v49  ;;  %v2113_v49 = vadd.f32 1e-05, %v1977_v8  ;;  %v11973_v8 = vld [vmem:[#allocation97_spill] sm:$0xff]  ;;  %v1970_v41 = vmul.f32 0.020408163, %v9396_v37 }
 0x418   :  { %6200 = vrsqrt.f32 %v2098_v7  ;;  %v2102_v7 = vadd.f32 1e-05, %v1966_v44  ;;  %v1972_v37 = vmul.f32 0.020408163, %v9404_v21  ;;  %v1974_v21 = vmul.f32 0.020408163, %v9412_v13 }
 0x419   :  { %2773 = vperm.xlu0 %6044, %v2367_v55   ;;  %v9629_v16 = vpop.permute.xlu1 %2443  ;;  %2718 = vperm.xlu1 %6045, %v2356_v59   ;;  %v6183_v59 = vpop.eup %6182  ;;  %6202 = vrsqrt.f32 %v2111_v60  ;;  %v2115_v60 = vadd.f32 1e-05, %v1979_v12  ;;  %v11976_v12 = vld [vmem:[#allocation101_spill] sm:$0xff]  ;;  %v1976_v13 = vmul.f32 0.020408163, %v9420_v17 }
 0x41a   :  { %11956 = vst [vmem:[#allocation165_spill] sm:$0xff] %v9629_v16  ;;  %v6185_v16 = vpop.eup %6184  ;;  %v2373_v1 = vmul.f32 %v6183_v59, %v11966_v11  ;;  %6204 = vrsqrt.f32 %v2100_v2  ;;  %v11972_v11 = vld [vmem:[#allocation71_spill] sm:$0xff]  ;;  %v2104_v2 = vadd.f32 1e-05, %v1968_v63  ;;  %v1978_v17 = vmul.f32 0.020408163, %v9428_v0 }
 0x41b   :  { %6206 = vrsqrt.f32 %v2113_v49  ;;  %v2117_v49 = vadd.f32 1e-05, %v1981_v52  ;;  %v11979_v52 = vld [vmem:[#allocation72_spill] sm:$0xff]  ;;  %v2027_v53 = vmul.f32 0.020408163, %v9621_v20 }
 0x41c   :  { %v9634_v6 = vpop.permute.xlu0 %2438  ;;  %6208 = vrsqrt.f32 %v2102_v7  ;;  %v2106_v7 = vadd.f32 1e-05, %v1970_v41 }
 0x41d   :  { %11959 = vst [vmem:[#allocation304_spill] sm:$0xff] %v9634_v6  ;;  %2783 = vperm.xlu0 %6044, %v2369_v3   ;;  %v9637_v55 = vpop.permute.xlu1 %2448  ;;  %2728 = vperm.xlu1 %6045, %v2358_v48   ;;  %v11965_v6 = vld [vmem:[#allocation62_spill] sm:$0xff]  ;;  %v6187_v48 = vpop.eup %6186  ;;  %6210 = vrsqrt.f32 %v2115_v60  ;;  %v2119_v60 = vadd.f32 1e-05, %v1983_v51  ;;  %v11982_v51 = vld [vmem:[#allocation76_spill] sm:$0xff] }
 0x41e   :  { %11961 = vst [vmem:[#allocation307_spill] sm:$0xff] %v9637_v55  ;;  %v2360_v61 = vmul.f32 %v6181_v27, %v11965_v6  ;;  %v6189_v55 = vpop.eup %6188  ;;  %v2375_v59 = vmul.f32 %v6187_v48, %v11970_v35  ;;  %v11975_v35 = vld [vmem:[#allocation75_spill] sm:$0xff]  ;;  %6212 = vrsqrt.f32 %v2104_v2  ;;  %v2108_v2 = vadd.f32 1e-05, %v1972_v37 }
 0x41f   :  { %6214 = vrsqrt.f32 %v2117_v49  ;;  %v2121_v49 = vadd.f32 1e-05, %v1985_v19  ;;  %v11986_v19 = vld [vmem:[#allocation80_spill] sm:$0xff] }
 0x420   :  { %v9642_v33 = vpop.permute.xlu0 %2483  ;;  %6216 = vrsqrt.f32 %v2106_v7  ;;  %v2110_v7 = vadd.f32 1e-05, %v1974_v21 }
 0x421   :  { %11964 = vst [vmem:[#allocation308_spill] sm:$0xff] %v9642_v33  ;;  %2793 = vperm.xlu0 %6044, %v2371_v57   ;;  %v9645_v3 = vpop.permute.xlu1 %2453  ;;  %2738 = vperm.xlu1 %6045, %v2360_v61   ;;  %v11969_v33 = vld [vmem:[#allocation66_spill] sm:$0xff]  ;;  %v6191_v61 = vpop.eup %6190  ;;  %6218 = vrsqrt.f32 %v2119_v60  ;;  %v2123_v60 = vadd.f32 1e-05, %v1987_v25  ;;  %v11990_v25 = vld [vmem:[#allocation84_spill] sm:$0xff] }
 0x422   :  { %v2362_v27 = vmul.f32 %v6185_v16, %v11969_v33  ;;  %v2364_v16 = vmul.f32 %v6189_v55, %v11972_v11  ;;  %v2377_v48 = vmul.f32 %v6191_v61, %v11973_v8  ;;  %v11978_v8 = vld [vmem:[#allocation79_spill] sm:$0xff]  ;;  %6220 = vrsqrt.f32 %v2108_v2 }
 0x423   :  { %6222 = vrsqrt.f32 %v2121_v49  ;;  %v2112_v2 = vadd.f32 1e-05, %v1976_v13  ;;  %v2125_v49 = vadd.f32 1e-05, %v1989_v42  ;;  %v11991_v13 = vld [vmem:[#allocation312_spill] sm:$0xff] }
 0x424   :  { %v9650_v29 = vpop.permute.xlu0 %2493  ;;  %v1980_v0 = vmul.f32 0.020408163, %v11991_v13  ;;  %v11995_v42 = vld [vmem:[#allocation88_spill] sm:$0xff] }
 0x425   :  { %11968 = vst [vmem:[#allocation309_spill] sm:$0xff] %v9650_v29  ;;  %2803 = vperm.xlu0 %6044, %v2373_v1   ;;  %v9653_v57 = vpop.permute.xlu1 %2458  ;;  %2748 = vperm.xlu1 %6045, %v2362_v27   ;;  %v6193_v29 = vpop.eup %6192  ;;  %6224 = vrsqrt.f32 %v2110_v7  ;;  %v2114_v7 = vadd.f32 1e-05, %v1978_v17  ;;  %v11996_v17 = vld [vmem:[#allocation313_spill] sm:$0xff] }
 0x426   :  { %v6195_v27 = vpop.eup %6194  ;;  %v2366_v55 = vmul.f32 %v6193_v29, %v11975_v35  ;;  %6226 = vrsqrt.f32 %v2123_v60  ;;  %v2127_v60 = vadd.f32 1e-05, %v1991_v56  ;;  %v1982_v13 = vmul.f32 0.020408163, %v11996_v17  ;;  %v12000_v56 = vld [vmem:[#allocation92_spill] sm:$0xff] }
 0x427   :  { %v2379_v61 = vmul.f32 %v6195_v27, %v11976_v12  ;;  %v11981_v12 = vld [vmem:[#allocation83_spill] sm:$0xff] }
 0x428   :  { %v9658_v47 = vpop.permute.xlu0 %2503 }
 0x429   :  { %11971 = vst [vmem:[#allocation58_spill] sm:$0xff] %v9658_v47  ;;  %2813 = vperm.xlu0 %6044, %v2375_v59   ;;  %v9661_v1 = vpop.permute.xlu1 %2463  ;;  %2758 = vperm.xlu1 %6045, %v2364_v16   ;;  %v6197_v47 = vpop.eup %6196  ;;  %6228 = vrsqrt.f32 %v2112_v2  ;;  %v2116_v2 = vadd.f32 1e-05, %v1980_v0  ;;  %v12001_v0 = vld [vmem:[#allocation314_spill] sm:$0xff] }
 0x42a   :  { %v6199_v16 = vpop.eup %6198  ;;  %v2368_v29 = vmul.f32 %v6197_v47, %v11978_v8  ;;  %6230 = vrsqrt.f32 %v2125_v49  ;;  %v2129_v49 = vadd.f32 1e-05, %v1993_v62  ;;  %v1984_v17 = vmul.f32 0.020408163, %v12001_v0  ;;  %v12005_v62 = vld [vmem:[#allocation96_spill] sm:$0xff] }
 0x42b   :  { %v2381_v27 = vmul.f32 %v6199_v16, %v11979_v52  ;;  %v11984_v52 = vld [vmem:[#allocation87_spill] sm:$0xff] }
 0x42c   :  { %v9666_v44 = vpop.permute.xlu0 %2513 }
 0x42d   :  { %11974 = vst [vmem:[#allocation310_spill] sm:$0xff] %v9666_v44  ;;  %2823 = vperm.xlu0 %6044, %v2377_v48   ;;  %v9669_v59 = vpop.permute.xlu1 %2468  ;;  %2768 = vperm.xlu1 %6045, %v2366_v55   ;;  %v6201_v44 = vpop.eup %6200  ;;  %6232 = vrsqrt.f32 %v2114_v7  ;;  %v2118_v7 = vadd.f32 1e-05, %v1982_v13  ;;  %v12006_v13 = vld [vmem:[#allocation315_spill] sm:$0xff] }
 0x42e   :  { %v6203_v55 = vpop.eup %6202  ;;  %v2370_v47 = vmul.f32 %v6201_v44, %v11981_v12  ;;  %6234 = vrsqrt.f32 %v2127_v60  ;;  %v2131_v60 = vadd.f32 1e-05, %v1995_v23  ;;  %v1986_v0 = vmul.f32 0.020408163, %v12006_v13  ;;  %v12010_v23 = vld [vmem:[#allocation100_spill] sm:$0xff] }
 0x42f   :  { %v2383_v16 = vmul.f32 %v6203_v55, %v11982_v51  ;;  %v11988_v51 = vld [vmem:[#allocation91_spill] sm:$0xff] }
 0x430   :  { %v9674_v63 = vpop.permute.xlu0 %2523 }
 0x431   :  { %11977 = vst [vmem:[#allocation62_spill] sm:$0xff] %v9674_v63  ;;  %2833 = vperm.xlu0 %6044, %v2379_v61   ;;  %v9677_v48 = vpop.permute.xlu1 %2473  ;;  %2778 = vperm.xlu1 %6045, %v2368_v29   ;;  %v6205_v63 = vpop.eup %6204  ;;  %6236 = vrsqrt.f32 %v2116_v2  ;;  %v2120_v2 = vadd.f32 1e-05, %v1984_v17  ;;  %v12011_v17 = vld [vmem:[#allocation160_spill] sm:$0xff] }
 0x432   :  { %v6207_v29 = vpop.eup %6206  ;;  %v2372_v44 = vmul.f32 %v6205_v63, %v11984_v52  ;;  %6238 = vrsqrt.f32 %v2129_v49  ;;  %v2133_v49 = vadd.f32 1e-05, %v1997_v36  ;;  %v1988_v13 = vmul.f32 0.020408163, %v12011_v17  ;;  %v12015_v36 = vld [vmem:[#allocation105_spill] sm:$0xff] }
 0x433   :  { %v2385_v55 = vmul.f32 %v6207_v29, %v11986_v19 }
 0x434   :  { %v9682_v41 = vpop.permute.xlu0 %2533 }
 0x435   :  { %11980 = vst [vmem:[#allocation311_spill] sm:$0xff] %v9682_v41  ;;  %2843 = vperm.xlu0 %6044, %v2381_v27   ;;  %v9685_v61 = vpop.permute.xlu1 %2478  ;;  %2788 = vperm.xlu1 %6045, %v2370_v47   ;;  %v6209_v41 = vpop.eup %6208  ;;  %6240 = vrsqrt.f32 %v2118_v7  ;;  %v2122_v7 = vadd.f32 1e-05, %v1986_v0  ;;  %v12016_v0 = vld [vmem:[#allocation272_spill] sm:$0xff] }
 0x436   :  { %v6211_v47 = vpop.eup %6210  ;;  %v2374_v63 = vmul.f32 %v6209_v41, %v11988_v51  ;;  %6242 = vrsqrt.f32 %v2131_v60  ;;  %v2135_v60 = vadd.f32 1e-05, %v1999_v58  ;;  %v1990_v17 = vmul.f32 0.020408163, %v12016_v0  ;;  %v12020_v58 = vld [vmem:[#allocation109_spill] sm:$0xff] }
 0x437   :  { %v2387_v29 = vmul.f32 %v6211_v47, %v11990_v25 }
 0x438   :  { %v9690_v37 = vpop.permute.xlu0 %2543 }
 0x439   :  { %11983 = vst [vmem:[#allocation66_spill] sm:$0xff] %v9690_v37  ;;  %2853 = vperm.xlu0 %6044, %v2383_v16   ;;  %v9693_v27 = vpop.permute.xlu1 %2488  ;;  %2798 = vperm.xlu1 %6045, %v2372_v44   ;;  %v6213_v37 = vpop.eup %6212  ;;  %6244 = vrsqrt.f32 %v2120_v2  ;;  %v2124_v2 = vadd.f32 1e-05, %v1988_v13  ;;  %v12021_v13 = vld [vmem:[#allocation162_spill] sm:$0xff] }
 0x43a   :  { %11985 = vst [vmem:[#allocation71_spill] sm:$0xff] %v9693_v27  ;;  %v6215_v44 = vpop.eup %6214  ;;  %6246 = vrsqrt.f32 %v2133_v49  ;;  %v2137_v49 = vadd.f32 1e-05, %v2001_v32  ;;  %v1992_v0 = vmul.f32 0.020408163, %v12021_v13  ;;  %v12025_v32 = vld [vmem:[#allocation114_spill] sm:$0xff] }
 0x43b   :  { %v6217_v27 = vpop.eup %6216  ;;  %v2389_v47 = vmul.f32 %v6215_v44, %v11995_v42  ;;  %6248 = vrsqrt.f32 %v2122_v7  ;;  %v2126_v7 = vadd.f32 1e-05, %v1990_v17  ;;  %v12026_v17 = vld [vmem:[#allocation275_spill] sm:$0xff] }
 0x43c   :  { %v9698_v21 = vpop.permute.xlu0 %2553  ;;  %v1994_v13 = vmul.f32 0.020408163, %v12026_v17 }
 0x43d   :  { %11987 = vst [vmem:[#allocation75_spill] sm:$0xff] %v9698_v21  ;;  %2863 = vperm.xlu0 %6044, %v2385_v55   ;;  %v9701_v16 = vpop.permute.xlu1 %2498  ;;  %2808 = vperm.xlu1 %6045, %v2374_v63   ;;  %v11993_v21 = vld [vmem:[#allocation95_spill] sm:$0xff]  ;;  %v6219_v63 = vpop.eup %6218  ;;  %6250 = vrsqrt.f32 %v2135_v60  ;;  %v2139_v60 = vadd.f32 1e-05, %v2003_v24  ;;  %v12030_v24 = vld [vmem:[#allocation118_spill] sm:$0xff] }
 0x43e   :  { %11989 = vst [vmem:[#allocation79_spill] sm:$0xff] %v9701_v16  ;;  %v2376_v41 = vmul.f32 %v6213_v37, %v11993_v21  ;;  %v6221_v16 = vpop.eup %6220  ;;  %v2391_v44 = vmul.f32 %v6219_v63, %v12000_v56  ;;  %6252 = vrsqrt.f32 %v2124_v2  ;;  %v2128_v2 = vadd.f32 1e-05, %v1992_v0  ;;  %v12031_v0 = vld [vmem:[#allocation164_spill] sm:$0xff] }
 0x43f   :  { %v1996_v17 = vmul.f32 0.020408163, %v12031_v0 }
 0x440   :  { %v9706_v19 = vpop.permute.xlu0 %2563 }
 0x441   :  { %11992 = vst [vmem:[#allocation83_spill] sm:$0xff] %v9706_v19  ;;  %2873 = vperm.xlu0 %6044, %v2387_v29   ;;  %v9709_v55 = vpop.permute.xlu1 %2508  ;;  %2818 = vperm.xlu1 %6045, %v2376_v41   ;;  %v11998_v19 = vld [vmem:[#allocation99_spill] sm:$0xff]  ;;  %v6223_v41 = vpop.eup %6222  ;;  %6254 = vrsqrt.f32 %v2137_v49  ;;  %v2141_v49 = vadd.f32 1e-05, %v2005_v40 }
 0x442   :  { %11994 = vst [vmem:[#allocation87_spill] sm:$0xff] %v9709_v55  ;;  %v2378_v37 = vmul.f32 %v6217_v27, %v11998_v19  ;;  %v6225_v55 = vpop.eup %6224  ;;  %v2393_v63 = vmul.f32 %v6223_v41, %v12005_v62  ;;  %6256 = vrsqrt.f32 %v2126_v7  ;;  %v2130_v7 = vadd.f32 1e-05, %v1994_v13  ;;  %v12035_v40 = vld [vmem:[#allocation123_spill] sm:$0xff]  ;;  %v12036_v13 = vld [vmem:[#allocation278_spill] sm:$0xff] }
 0x443   :  { %v1998_v0 = vmul.f32 0.020408163, %v12036_v13 }
 0x444   :  { %v9714_v25 = vpop.permute.xlu0 %2573 }
 0x445   :  { %11997 = vst [vmem:[#allocation91_spill] sm:$0xff] %v9714_v25  ;;  %2883 = vperm.xlu0 %6044, %v2389_v47   ;;  %v9717_v29 = vpop.permute.xlu1 %2518  ;;  %2828 = vperm.xlu1 %6045, %v2378_v37   ;;  %v12003_v25 = vld [vmem:[#allocation70_spill] sm:$0xff]  ;;  %v6227_v37 = vpop.eup %6226  ;;  %6258 = vrsqrt.f32 %v2139_v60  ;;  %v2143_v60 = vadd.f32 1e-05, %v2007_v15  ;;  %v12040_v15 = vld [vmem:[#allocation128_spill] sm:$0xff] }
 0x446   :  { %11999 = vst [vmem:[#allocation312_spill] sm:$0xff] %v9717_v29  ;;  %v2380_v27 = vmul.f32 %v6221_v16, %v12003_v25  ;;  %v6229_v29 = vpop.eup %6228  ;;  %v2395_v41 = vmul.f32 %v6227_v37, %v12010_v23  ;;  %6260 = vrsqrt.f32 %v2128_v2  ;;  %v2132_v2 = vadd.f32 1e-05, %v1996_v17  ;;  %v12041_v17 = vld [vmem:[#allocation281_spill] sm:$0xff] }
 0x447   :  { %v2000_v13 = vmul.f32 0.020408163, %v12041_v17 }
 0x448   :  { %v9722_v42 = vpop.permute.xlu0 %2583 }
 0x449   :  { %12002 = vst [vmem:[#allocation95_spill] sm:$0xff] %v9722_v42  ;;  %2893 = vperm.xlu0 %6044, %v2391_v44   ;;  %v9725_v47 = vpop.permute.xlu1 %2528  ;;  %2838 = vperm.xlu1 %6045, %v2380_v27   ;;  %v12008_v42 = vld [vmem:[#allocation74_spill] sm:$0xff]  ;;  %v6231_v27 = vpop.eup %6230  ;;  %6262 = vrsqrt.f32 %v2141_v49  ;;  %v2145_v49 = vadd.f32 1e-05, %v2009_v10  ;;  %v12044_v10 = vld [vmem:[#allocation133_spill] sm:$0xff] }
 0x44a   :  { %12004 = vst [vmem:[#allocation313_spill] sm:$0xff] %v9725_v47  ;;  %v2382_v16 = vmul.f32 %v6225_v55, %v12008_v42  ;;  %v6233_v47 = vpop.eup %6232  ;;  %v2397_v37 = vmul.f32 %v6231_v27, %v12015_v36  ;;  %6264 = vrsqrt.f32 %v2130_v7  ;;  %v2134_v7 = vadd.f32 1e-05, %v1998_v0  ;;  %v12045_v0 = vld [vmem:[#allocation220_spill] sm:$0xff] }
 0x44b   :  { %v2002_v17 = vmul.f32 0.020408163, %v12045_v0 }
 0x44c   :  { %v9730_v56 = vpop.permute.xlu0 %2593 }
 0x44d   :  { %12007 = vst [vmem:[#allocation99_spill] sm:$0xff] %v9730_v56  ;;  %2903 = vperm.xlu0 %6044, %v2393_v63   ;;  %v9733_v44 = vpop.permute.xlu1 %2538  ;;  %2848 = vperm.xlu1 %6045, %v2382_v16   ;;  %v12013_v56 = vld [vmem:[#allocation78_spill] sm:$0xff]  ;;  %v6235_v16 = vpop.eup %6234  ;;  %6266 = vrsqrt.f32 %v2143_v60  ;;  %v2147_v60 = vadd.f32 1e-05, %v2011_v38 }
 0x44e   :  { %12009 = vst [vmem:[#allocation314_spill] sm:$0xff] %v9733_v44  ;;  %v2384_v55 = vmul.f32 %v6229_v29, %v12013_v56  ;;  %v6237_v44 = vpop.eup %6236  ;;  %v2399_v27 = vmul.f32 %v6235_v16, %v12020_v58  ;;  %6268 = vrsqrt.f32 %v2132_v2  ;;  %v2136_v2 = vadd.f32 1e-05, %v2000_v13  ;;  %v12048_v38 = vld [vmem:[#allocation138_spill] sm:$0xff] }
 0x44f   :  { %v2004_v13 = vmul.f32 0.020408163, %v9532_v18  ;;  %v2006_v18 = vmul.f32 0.020408163, %v9540_v22  ;;  %v2008_v22 = vmul.f32 0.020408163, %v9548_v26 }
 0x450   :  { %v9738_v62 = vpop.permute.xlu0 %2603  ;;  %v2010_v26 = vmul.f32 0.020408163, %v9556_v30  ;;  %v2012_v30 = vmul.f32 0.020408163, %v9564_v5  ;;  %v2014_v5 = vmul.f32 0.020408163, %v9572_v45 }
 0x451   :  { %12012 = vst [vmem:[#allocation70_spill] sm:$0xff] %v9738_v62  ;;  %2913 = vperm.xlu0 %6044, %v2395_v41   ;;  %v9741_v63 = vpop.permute.xlu1 %2548  ;;  %2858 = vperm.xlu1 %6045, %v2384_v55   ;;  %v12018_v62 = vld [vmem:[#allocation82_spill] sm:$0xff]  ;;  %v6239_v55 = vpop.eup %6238  ;;  %6270 = vrsqrt.f32 %v2145_v49  ;;  %v2149_v49 = vadd.f32 1e-05, %v2013_v43  ;;  %v12051_v43 = vld [vmem:[#allocation104_spill] sm:$0xff] }
 0x452   :  { %12014 = vst [vmem:[#allocation315_spill] sm:$0xff] %v9741_v63  ;;  %v2386_v29 = vmul.f32 %v6233_v47, %v12018_v62  ;;  %v6241_v63 = vpop.eup %6240  ;;  %v2401_v16 = vmul.f32 %v6239_v55, %v12025_v32  ;;  %6272 = vrsqrt.f32 %v2134_v7  ;;  %v2138_v7 = vadd.f32 1e-05, %v2002_v17 }
 0x453   :  { %v2016_v45 = vmul.f32 0.020408163, %v9580_v4  ;;  %v12074_v4 = vld [vmem:[#allocation106_spill] sm:$0xff] }
 0x454   :  { %v9746_v23 = vpop.permute.xlu0 %2613 }
 0x455   :  { %12017 = vst [vmem:[#allocation74_spill] sm:$0xff] %v9746_v23  ;;  %2923 = vperm.xlu0 %6044, %v2397_v37   ;;  %v9749_v41 = vpop.permute.xlu1 %2558  ;;  %2868 = vperm.xlu1 %6045, %v2386_v29   ;;  %v12023_v23 = vld [vmem:[#allocation86_spill] sm:$0xff]  ;;  %v6243_v29 = vpop.eup %6242  ;;  %6274 = vrsqrt.f32 %v2147_v60  ;;  %v2151_v60 = vadd.f32 1e-05, %v2015_v28  ;;  %v12054_v28 = vld [vmem:[#allocation108_spill] sm:$0xff] }
 0x456   :  { %12019 = vst [vmem:[#allocation160_spill] sm:$0xff] %v9749_v41  ;;  %v2388_v47 = vmul.f32 %v6237_v44, %v12023_v23  ;;  %v6245_v41 = vpop.eup %6244  ;;  %v2403_v55 = vmul.f32 %v6243_v29, %v12030_v24  ;;  %6276 = vrsqrt.f32 %v2136_v2  ;;  %v2140_v2 = vadd.f32 1e-05, %v2004_v13 }
 0x458   :  { %v9754_v36 = vpop.permute.xlu0 %2623 }
 0x459   :  { %12022 = vst [vmem:[#allocation78_spill] sm:$0xff] %v9754_v36  ;;  %2933 = vperm.xlu0 %6044, %v2399_v27   ;;  %v9757_v37 = vpop.permute.xlu1 %2568  ;;  %2878 = vperm.xlu1 %6045, %v2388_v47   ;;  %v12028_v36 = vld [vmem:[#allocation90_spill] sm:$0xff]  ;;  %v6247_v47 = vpop.eup %6246  ;;  %6278 = vrsqrt.f32 %v2149_v49  ;;  %v2153_v49 = vadd.f32 1e-05, %v2017_v46  ;;  %v12057_v46 = vld [vmem:[#allocation112_spill] sm:$0xff] }
 0x45a   :  { %12024 = vst [vmem:[#allocation272_spill] sm:$0xff] %v9757_v37  ;;  %v2390_v44 = vmul.f32 %v6241_v63, %v12028_v36  ;;  %v6249_v37 = vpop.eup %6248  ;;  %v2405_v29 = vmul.f32 %v6247_v47, %v12035_v40  ;;  %6280 = vrsqrt.f32 %v2138_v7  ;;  %v2142_v7 = vadd.f32 1e-05, %v2006_v18 }
 0x45c   :  { %v9762_v58 = vpop.permute.xlu0 %2633 }
 0x45d   :  { %12027 = vst [vmem:[#allocation82_spill] sm:$0xff] %v9762_v58  ;;  %2943 = vperm.xlu0 %6044, %v2401_v16   ;;  %v9765_v27 = vpop.permute.xlu1 %2578  ;;  %2888 = vperm.xlu1 %6045, %v2390_v44   ;;  %v12033_v58 = vld [vmem:[#allocation94_spill] sm:$0xff]  ;;  %v6251_v44 = vpop.eup %6250  ;;  %6282 = vrsqrt.f32 %v2151_v60  ;;  %v2155_v60 = vadd.f32 1e-05, %v2019_v50  ;;  %v12060_v50 = vld [vmem:[#allocation115_spill] sm:$0xff] }
 0x45e   :  { %12029 = vst [vmem:[#allocation162_spill] sm:$0xff] %v9765_v27  ;;  %v2392_v63 = vmul.f32 %v6245_v41, %v12033_v58  ;;  %v6253_v27 = vpop.eup %6252  ;;  %v2407_v47 = vmul.f32 %v6251_v44, %v12040_v15  ;;  %6284 = vrsqrt.f32 %v2140_v2  ;;  %v2144_v2 = vadd.f32 1e-05, %v2008_v22 }
 0x460   :  { %v9770_v32 = vpop.permute.xlu0 %2643 }
 0x461   :  { %12032 = vst [vmem:[#allocation86_spill] sm:$0xff] %v9770_v32  ;;  %2953 = vperm.xlu0 %6044, %v2403_v55   ;;  %v9773_v16 = vpop.permute.xlu1 %2588  ;;  %2898 = vperm.xlu1 %6045, %v2392_v63   ;;  %v12038_v32 = vld [vmem:[#allocation98_spill] sm:$0xff]  ;;  %v6255_v63 = vpop.eup %6254  ;;  %6286 = vrsqrt.f32 %v2153_v49  ;;  %v2157_v49 = vadd.f32 1e-05, %v2021_v54  ;;  %v12063_v54 = vld [vmem:[#allocation119_spill] sm:$0xff] }
 0x462   :  { %12034 = vst [vmem:[#allocation275_spill] sm:$0xff] %v9773_v16  ;;  %v2394_v41 = vmul.f32 %v6249_v37, %v12038_v32  ;;  %v6257_v16 = vpop.eup %6256  ;;  %v2409_v44 = vmul.f32 %v6255_v63, %v12044_v10  ;;  %v12050_v10 = vld [vmem:[#allocation111_spill] sm:$0xff]  ;;  %6288 = vrsqrt.f32 %v2142_v7  ;;  %v2146_v7 = vadd.f32 1e-05, %v2010_v26 }
 0x464   :  { %v9778_v24 = vpop.permute.xlu0 %2653 }
 0x465   :  { %12037 = vst [vmem:[#allocation90_spill] sm:$0xff] %v9778_v24  ;;  %2963 = vperm.xlu0 %6044, %v2405_v29   ;;  %v9781_v55 = vpop.permute.xlu1 %2598  ;;  %2908 = vperm.xlu1 %6045, %v2394_v41   ;;  %v12043_v24 = vld [vmem:[#allocation103_spill] sm:$0xff]  ;;  %v6259_v41 = vpop.eup %6258  ;;  %6290 = vrsqrt.f32 %v2155_v60  ;;  %v2159_v60 = vadd.f32 1e-05, %v2023_v14  ;;  %v12067_v14 = vld [vmem:[#allocation122_spill] sm:$0xff] }
 0x466   :  { %12039 = vst [vmem:[#allocation164_spill] sm:$0xff] %v9781_v55  ;;  %v2396_v37 = vmul.f32 %v6253_v27, %v12043_v24  ;;  %v6261_v55 = vpop.eup %6260  ;;  %v2411_v63 = vmul.f32 %v6259_v41, %v12048_v38  ;;  %v12053_v38 = vld [vmem:[#allocation116_spill] sm:$0xff]  ;;  %6292 = vrsqrt.f32 %v2144_v2  ;;  %v2148_v2 = vadd.f32 1e-05, %v2012_v30 }
 0x468   :  { %v9786_v40 = vpop.permute.xlu0 %2663 }
 0x469   :  { %12042 = vst [vmem:[#allocation94_spill] sm:$0xff] %v9786_v40  ;;  %2973 = vperm.xlu0 %6044, %v2407_v47   ;;  %v9789_v29 = vpop.permute.xlu1 %2608  ;;  %2918 = vperm.xlu1 %6045, %v2396_v37   ;;  %v12047_v40 = vld [vmem:[#allocation107_spill] sm:$0xff]  ;;  %v6263_v37 = vpop.eup %6262  ;;  %6294 = vrsqrt.f32 %v2157_v49  ;;  %v2161_v49 = vadd.f32 1e-05, %v2025_v9  ;;  %v12071_v9 = vld [vmem:[#allocation125_spill] sm:$0xff] }
 0x46a   :  { %v2398_v27 = vmul.f32 %v6257_v16, %v12047_v40  ;;  %v2400_v16 = vmul.f32 %v6261_v55, %v12050_v10  ;;  %v2413_v41 = vmul.f32 %v6263_v37, %v12051_v43  ;;  %v12056_v43 = vld [vmem:[#allocation121_spill] sm:$0xff] }
 0x46c   :  { %v9794_v15 = vpop.permute.xlu0 %2673 }
 0x46d   :  { %12046 = vst [vmem:[#allocation278_spill] sm:$0xff] %v9794_v15  ;;  %2983 = vperm.xlu0 %6044, %v2409_v44   ;;  %v9797_v47 = vpop.permute.xlu1 %2618  ;;  %2928 = vperm.xlu1 %6045, %v2398_v27   ;;  %v6265_v15 = vpop.eup %6264  ;;  %6296 = vrsqrt.f32 %v2146_v7  ;;  %v2150_v7 = vadd.f32 1e-05, %v2014_v5 }
 0x46e   :  { %v6267_v27 = vpop.eup %6266  ;;  %v2402_v55 = vmul.f32 %v6265_v15, %v12053_v38  ;;  %6298 = vrsqrt.f32 %v2159_v60  ;;  %v2163_v60 = vadd.f32 1e-05, %v2027_v53 }
 0x46f   :  { %v2415_v37 = vmul.f32 %v6267_v27, %v12054_v28  ;;  %v12059_v28 = vld [vmem:[#allocation126_spill] sm:$0xff] }
 0x470   :  { %v9802_v0 = vpop.permute.xlu0 %2683 }
 0x471   :  { %12049 = vst [vmem:[#allocation98_spill] sm:$0xff] %v9802_v0  ;;  %2993 = vperm.xlu0 %6044, %v2411_v63   ;;  %v9805_v44 = vpop.permute.xlu1 %2628  ;;  %2938 = vperm.xlu1 %6045, %v2400_v16   ;;  %v6269_v0 = vpop.eup %6268  ;;  %6300 = vrsqrt.f32 %v2148_v2  ;;  %v12072_v2 = vld [vmem:[#allocation159_spill] sm:$0xff] }
 0x472   :  { %v6271_v16 = vpop.eup %6270  ;;  %v2404_v15 = vmul.f32 %v6269_v0, %v12056_v43  ;;  %6302 = vrsqrt.f32 %v2161_v49  ;;  %v2018_v5 = vmul.f32 0.020408163, %v12072_v2  ;;  %v12079_v2 = vld [vmem:[#allocation110_spill] sm:$0xff] }
 0x473   :  { %v2417_v27 = vmul.f32 %v6271_v16, %v12057_v46  ;;  %v12062_v46 = vld [vmem:[#allocation131_spill] sm:$0xff] }
 0x474   :  { %v9810_v17 = vpop.permute.xlu0 %2693 }
 0x475   :  { %12052 = vst [vmem:[#allocation281_spill] sm:$0xff] %v9810_v17  ;;  %3003 = vperm.xlu0 %6044, %v2413_v41   ;;  %v9813_v63 = vpop.permute.xlu1 %2638  ;;  %2948 = vperm.xlu1 %6045, %v2402_v55   ;;  %v6273_v17 = vpop.eup %6272  ;;  %6304 = vrsqrt.f32 %v2150_v7 }
 0x476   :  { %v6275_v55 = vpop.eup %6274  ;;  %v2406_v0 = vmul.f32 %v6273_v17, %v12059_v28  ;;  %6306 = vrsqrt.f32 %v2163_v60 }
 0x477   :  { %v2419_v16 = vmul.f32 %v6275_v55, %v12060_v50  ;;  %v12065_v50 = vld [vmem:[#allocation136_spill] sm:$0xff] }
 0x478   :  { %v9818_v13 = vpop.permute.xlu0 %2703 }
 0x479   :  { %12055 = vst [vmem:[#allocation103_spill] sm:$0xff] %v9818_v13  ;;  %3013 = vperm.xlu0 %6044, %v2415_v37   ;;  %v9821_v41 = vpop.permute.xlu1 %2648  ;;  %2958 = vperm.xlu1 %6045, %v2404_v15   ;;  %v6277_v13 = vpop.eup %6276 }
 0x47a   :  { %v6279_v15 = vpop.eup %6278  ;;  %v2408_v17 = vmul.f32 %v6277_v13, %v12062_v46 }
 0x47b   :  { %v2421_v55 = vmul.f32 %v6279_v15, %v12063_v54  ;;  %v12069_v54 = vld [vmem:[#allocation102_spill] sm:$0xff] }
 0x47c   :  { %v9826_v18 = vpop.permute.xlu0 %2713 }
 0x47d   :  { %12058 = vst [vmem:[#allocation220_spill] sm:$0xff] %v9826_v18  ;;  %3023 = vperm.xlu0 %6044, %v2417_v27   ;;  %v9829_v37 = vpop.permute.xlu1 %2658  ;;  %2968 = vperm.xlu1 %6045, %v2406_v0   ;;  %v6281_v18 = vpop.eup %6280 }
 0x47e   :  { %v6283_v0 = vpop.eup %6282  ;;  %v2410_v13 = vmul.f32 %v6281_v18, %v12065_v50 }
 0x47f   :  { %v2423_v15 = vmul.f32 %v6283_v0, %v12067_v14  ;;  %v2152_v0 = vadd.f32 1e-05, %v2016_v45 }
 0x480   :  { %v9834_v22 = vpop.permute.xlu0 %2723 }
 0x481   :  { %12061 = vst [vmem:[#allocation107_spill] sm:$0xff] %v9834_v22  ;;  %3033 = vperm.xlu0 %6044, %v2419_v16   ;;  %v9837_v27 = vpop.permute.xlu1 %2668  ;;  %2978 = vperm.xlu1 %6045, %v2408_v17   ;;  %v6285_v22 = vpop.eup %6284  ;;  %6308 = vrsqrt.f32 %v2152_v0 }
 0x482   :  { %v6287_v17 = vpop.eup %6286  ;;  %v2412_v18 = vmul.f32 %v6285_v22, %v12069_v54 }
 0x483   :  { %v2425_v20 = vmul.f32 %v6287_v17, %v12071_v9  ;;  %v2154_v17 = vadd.f32 1e-05, %v2018_v5  ;;  %v12084_v5 = vld [vmem:[#allocation113_spill] sm:$0xff] }
 0x484   :  { %v9842_v26 = vpop.permute.xlu0 %2733 }
 0x485   :  { %12064 = vst [vmem:[#allocation111_spill] sm:$0xff] %v9842_v26  ;;  %3043 = vperm.xlu0 %6044, %v2421_v55   ;;  %v9845_v16 = vpop.permute.xlu1 %2678  ;;  %2988 = vperm.xlu1 %6045, %v2410_v13   ;;  %v6289_v26 = vpop.eup %6288  ;;  %6310 = vrsqrt.f32 %v2154_v17 }
 0x486   :  { %12066 = vst [vmem:[#allocation116_spill] sm:$0xff] %v9845_v16  ;;  %v6291_v13 = vpop.eup %6290 }
 0x487   :  { %v6293_v16 = vpop.eup %6292 }
 0x488   :  { %v9850_v30 = vpop.permute.xlu0 %2743  ;;  %v6295_v53 = vpop.eup %6294  ;;  %v2416_v9 = vmul.f32 %v6293_v16, %v12079_v2  ;;  %v12086_v16 = vld [vmem:[#allocation148_spill] sm:$0xff] }
 0x489   :  { %12068 = vst [vmem:[#allocation121_spill] sm:$0xff] %v9850_v30  ;;  %3053 = vperm.xlu0 %6044, %v2423_v15   ;;  %v9853_v55 = vpop.permute.xlu1 %2688  ;;  %2998 = vperm.xlu1 %6045, %v2412_v18   ;;  %v2414_v30 = vmul.f32 %v6289_v26, %v12074_v4  ;;  %v12076_v15 = vld [vmem:[#allocation129_spill] sm:$0xff] }
 0x48a   :  { %12070 = vst [vmem:[#allocation126_spill] sm:$0xff] %v9853_v55  ;;  %v2427_v49 = vmul.f32 %v6291_v13, %v12076_v15  ;;  %v12077_v18 = vld [vmem:[#allocation161_spill] sm:$0xff]  ;;  %v12082_v13 = vld [vmem:[#allocation163_spill] sm:$0xff] }
 0x48b   :  { %v2020_v7 = vmul.f32 0.020408163, %v12077_v18  ;;  %v2022_v15 = vmul.f32 0.020408163, %v12082_v13 }
 0x48c   :  { %v9857_v14 = vpop.permute.xlu0 %2753 }
 0x48d   :  { %12073 = vst [vmem:[#allocation131_spill] sm:$0xff] %v9857_v14  ;;  %3063 = vperm.xlu0 %6044, %v2425_v20   ;;  %v9860_v22 = vpop.permute.xlu1 %2698  ;;  %3008 = vperm.xlu1 %6045, %v2414_v30   ;;  %v6297_v14 = vpop.eup %6296  ;;  %v12081_v20 = vld [vmem:[#allocation143_spill] sm:$0xff]  ;;  %v2156_v60 = vadd.f32 1e-05, %v2020_v7  ;;  %v12088_v7 = vld [vmem:[#allocation117_spill] sm:$0xff] }
 0x48e   :  { %12075 = vst [vmem:[#allocation136_spill] sm:$0xff] %v9860_v22  ;;  %v2429_v22 = vmul.f32 %v6295_v53, %v12081_v20  ;;  %v6299_v30 = vpop.eup %6298  ;;  %v2418_v18 = vmul.f32 %v6297_v14, %v12084_v5  ;;  %v2024_v53 = vmul.f32 0.020408163, %v9613_v39  ;;  %v12090_v14 = vld [vmem:[#allocation153_spill] sm:$0xff] }
 0x48f   :  { %v6301_v55 = vpop.eup %6300  ;;  %6312 = vrsqrt.f32 %v2156_v60 }
 0x490   :  { %v9864_v45 = vpop.permute.xlu0 %2763  ;;  %v2420_v13 = vmul.f32 %v6301_v55, %v12088_v7  ;;  %v12094_v55 = vld [vmem:[#allocation157_spill] sm:$0xff] }
 0x491   :  { %12078 = vst [vmem:[#allocation102_spill] sm:$0xff] %v9864_v45  ;;  %3073 = vperm.xlu0 %6044, %v2427_v49   ;;  %v9867_v26 = vpop.permute.xlu1 %2708  ;;  %3018 = vperm.xlu1 %6045, %v2416_v9   ;;  %v2431_v49 = vmul.f32 %v6299_v30, %v12086_v16  ;;  %v2158_v9 = vadd.f32 1e-05, %v2022_v15  ;;  %v2026_v30 = vmul.f32 0.020408163, %v9626_v31  ;;  %v12092_v15 = vld [vmem:[#allocation120_spill] sm:$0xff] }
 0x492   :  { %12080 = vst [vmem:[#allocation159_spill] sm:$0xff] %v9867_v26  ;;  %v6303_v26 = vpop.eup %6302 }
 0x493   :  { %v6305_v20 = vpop.eup %6304  ;;  %6314 = vrsqrt.f32 %v2158_v9 }
 0x494   :  { %v9871_v0 = vpop.permute.xlu0 %2773  ;;  %v2422_v39 = vmul.f32 %v6305_v20, %v12092_v15 }
 0x495   :  { %12083 = vst [vmem:[#allocation106_spill] sm:$0xff] %v9871_v0  ;;  %3083 = vperm.xlu0 %6044, %v2429_v22   ;;  %v9874_v45 = vpop.permute.xlu1 %2718  ;;  %3028 = vperm.xlu1 %6045, %v2418_v18   ;;  %v2433_v22 = vmul.f32 %v6303_v26, %v12090_v14  ;;  %v2160_v18 = vadd.f32 1e-05, %v2024_v53  ;;  %v12096_v26 = vld [vmem:[#allocation124_spill] sm:$0xff] }
 0x496   :  { %12085 = vst [vmem:[#allocation161_spill] sm:$0xff] %v9874_v45  ;;  %v6307_v45 = vpop.eup %6306 }
 0x497   :  { %v6309_v16 = vpop.eup %6308  ;;  %6316 = vrsqrt.f32 %v2160_v18  ;;  %v12101_v18 = vld [vmem:[#allocation9_spill] sm:$0xff] }
 0x498   :  { %v9878_v17 = vpop.permute.xlu0 %2783  ;;  %v2424_v9 = vmul.f32 %v6309_v16, %v12096_v26  ;;  %v6311_v53 = vpop.eup %6310 }
 0x499   :  { %12087 = vst [vmem:[#allocation110_spill] sm:$0xff] %v9878_v17  ;;  %3093 = vperm.xlu0 %6044, %v2431_v49   ;;  %v9881_v0 = vpop.permute.xlu1 %2728  ;;  %3038 = vperm.xlu1 %6045, %v2420_v13   ;;  %v2435_v49 = vmul.f32 %v6307_v45, %v12094_v55  ;;  %v2162_v13 = vadd.f32 1e-05, %v2026_v30  ;;  %v12103_v30 = vld [vmem:[#allocation141_spill] sm:$0xff] }
 0x49a   :  { %12089 = vst [vmem:[#allocation163_spill] sm:$0xff] %v9881_v0 }
 0x49b   :  { %6318 = vrsqrt.f32 %v2162_v13  ;;  %v12105_v13 = vld [vmem:[#allocation15_spill] sm:$0xff] }
 0x49c   :  { %v9885_v60 = vpop.permute.xlu0 %2793 }
 0x49d   :  { %12091 = vst [vmem:[#allocation113_spill] sm:$0xff] %v9885_v60  ;;  %3103 = vperm.xlu0 %6044, %v2433_v22   ;;  %v9888_v17 = vpop.permute.xlu1 %2738  ;;  %3048 = vperm.xlu1 %6045, %v2422_v39   ;;  %v12099_v22 = vld [vmem:[#allocation127_spill] sm:$0xff]  ;;  %v6313_v60 = vpop.eup %6312  ;;  %v11506_v39 = vmov 1  }
 0x49e   :  { %12093 = vst [vmem:[#allocation117_spill] sm:$0xff] %v9888_v17  ;;  %v2426_v14 = vmul.f32 %v6311_v53, %v12099_v22 }
 0x4a0   :  { %v9891_v0 = vpop.permute.xlu0 %2803  ;;  %v6315_v55 = vpop.eup %6314 }
 0x4a1   :  { %12095 = vst [vmem:[#allocation120_spill] sm:$0xff] %v9891_v0  ;;  %3113 = vperm.xlu0 %6044, %v2435_v49   ;;  %v9894_v31 = vpop.permute.xlu1 %2748  ;;  %3058 = vperm.xlu1 %6045, %v2424_v9   ;;  %v2428_v49 = vmul.f32 %v6313_v60, %v12103_v30 }
 0x4a2   :  { %12097 = vst [vmem:[#allocation124_spill] sm:$0xff] %v9894_v31 }
 0x4a4   :  { %v9896_v20 = vpop.permute.xlu0 %2813 }
 0x4a5   :  { %12098 = vst [vmem:[#allocation316_spill] sm:$0xff] %v9896_v20  ;;  %6047 = vset.pattern.permute.xlu0 %v11506_v39  ;;  %v9900_v45 = vpop.permute.xlu1 %2758  ;;  %3068 = vperm.xlu1 %6045, %v2426_v14   ;;  %v12107_v20 = vld [vmem:[#allocation146_spill] sm:$0xff]  ;;  %v6317_v39 = vpop.eup %6316  ;;  %v12109_v14 = vld [vmem:[#allocation19_spill] sm:$0xff] }
 0x4a6   :  { %12100 = vst [vmem:[#allocation127_spill] sm:$0xff] %v9900_v45  ;;  %3259 = vperm.xlu0 %6047, %v12101_v18   ;;  %v2430_v0 = vmul.f32 %v6315_v55, %v12107_v20 }
 0x4a8   :  { %v9903_v16 = vpop.permute.xlu0 %2823  ;;  %v6319_v45 = vpop.eup %6318 }
 0x4a9   :  { %12102 = vst [vmem:[#allocation9_spill] sm:$0xff] %v9903_v16  ;;  %v9906_v9 = vpop.permute.xlu1 %2768  ;;  %3078 = vperm.xlu1 %6045, %v2428_v49   ;;  %v12111_v16 = vld [vmem:[#allocation151_spill] sm:$0xff] }
 0x4aa   :  { %12104 = vst [vmem:[#allocation141_spill] sm:$0xff] %v9906_v9  ;;  %3274 = vperm.xlu0 %6047, %v12105_v13   ;;  %v2432_v60 = vmul.f32 %v6317_v39, %v12111_v16  ;;  %v12113_v49 = vld [vmem:[#allocation23_spill] sm:$0xff]  ;;  %v12120_v39 = vmov 1  }
 0x4ac   :  { %v9909_v53 = vpop.permute.xlu0 %2833 }
 0x4ad   :  { %12106 = vst [vmem:[#allocation15_spill] sm:$0xff] %v9909_v53  ;;  %v9912_v31 = vpop.permute.xlu1 %2778  ;;  %3088 = vperm.xlu1 %6045, %v2430_v0   ;;  %v12115_v53 = vld [vmem:[#allocation156_spill] sm:$0xff]  ;;  %v12117_v0 = vld [vmem:[#allocation27_spill] sm:$0xff] }
 0x4ae   :  { %12108 = vst [vmem:[#allocation146_spill] sm:$0xff] %v9912_v31  ;;  %3284 = vperm.xlu0 %6047, %v12109_v14   ;;  %v2434_v55 = vmul.f32 %v6319_v45, %v12115_v53  ;;  %v12121_v31 = vld [vmem:[#allocation31_spill] sm:$0xff] }
 0x4af   :  { %v12125_v45 = vld [vmem:[#allocation35_spill] sm:$0xff] }
 0x4b0   :  { %v9915_v18 = vpop.permute.xlu0 %2843 }
 0x4b1   :  { %12110 = vst [vmem:[#allocation19_spill] sm:$0xff] %v9915_v18  ;;  %v9918_v17 = vpop.permute.xlu1 %2788  ;;  %3098 = vperm.xlu1 %6045, %v2432_v60   ;;  %v12122_v60 = vld [vmem:[#allocation7_spill] sm:$0xff] }
 0x4b2   :  { %12112 = vst [vmem:[#allocation151_spill] sm:$0xff] %v9918_v17  ;;  %3294 = vperm.xlu0 %6047, %v12113_v49  }
 0x4b4   :  { %v9921_v13 = vpop.permute.xlu0 %2853 }
 0x4b5   :  { %12114 = vst [vmem:[#allocation23_spill] sm:$0xff] %v9921_v13  ;;  %v9924_v9 = vpop.permute.xlu1 %2798  ;;  %3108 = vperm.xlu1 %6045, %v2434_v55  }
 0x4b6   :  { %12116 = vst [vmem:[#allocation317_spill] sm:$0xff] %v9924_v9  ;;  %3304 = vperm.xlu0 %6047, %v12117_v0   ;;  %v12126_v9 = vld [vmem:[#allocation11_spill] sm:$0xff] }
 0x4b8   :  { %v9927_v14 = vpop.permute.xlu0 %2863 }
 0x4b9   :  { %12118 = vst [vmem:[#allocation27_spill] sm:$0xff] %v9927_v14  ;;  %v9929_v18 = vpop.permute.xlu1 %2808  ;;  %6046 = vset.pattern.permute.xlu1 %v12120_v39  ;;  %v12129_v14 = vld [vmem:[#allocation39_spill] sm:$0xff] }
 0x4ba   :  { %12119 = vst [vmem:[#allocation318_spill] sm:$0xff] %v9929_v18  ;;  %3314 = vperm.xlu0 %6047, %v12121_v31   ;;  %3254 = vperm.xlu1 %6046, %v12122_v60   ;;  %v12130_v18 = vld [vmem:[#allocation13_spill] sm:$0xff]  ;;  %v12133_v60 = vld [vmem:[#allocation43_spill] sm:$0xff] }
 0x4bc   :  { %v9934_v49 = vpop.permute.xlu0 %2873 }
 0x4bd   :  { %12123 = vst [vmem:[#allocation31_spill] sm:$0xff] %v9934_v49  ;;  %v9936_v13 = vpop.permute.xlu1 %2818  ;;  %v12134_v49 = vld [vmem:[#allocation17_spill] sm:$0xff] }
 0x4be   :  { %12124 = vst [vmem:[#allocation7_spill] sm:$0xff] %v9936_v13  ;;  %3324 = vperm.xlu0 %6047, %v12125_v45   ;;  %3264 = vperm.xlu1 %6046, %v12126_v9   ;;  %v12137_v9 = vld [vmem:[#allocation47_spill] sm:$0xff] }
 0x4c0   :  { %v9940_v55 = vpop.permute.xlu0 %2883 }
 0x4c1   :  { %12127 = vst [vmem:[#allocation35_spill] sm:$0xff] %v9940_v55  ;;  %v9942_v0 = vpop.permute.xlu1 %2828  ;;  %v12138_v55 = vld [vmem:[#allocation21_spill] sm:$0xff] }
 0x4c2   :  { %12128 = vst [vmem:[#allocation11_spill] sm:$0xff] %v9942_v0  ;;  %3334 = vperm.xlu0 %6047, %v12129_v14   ;;  %3269 = vperm.xlu1 %6046, %v12130_v18   ;;  %v12141_v18 = vld [vmem:[#allocation51_spill] sm:$0xff] }
 0x4c4   :  { %v9946_v39 = vpop.permute.xlu0 %2893 }
 0x4c5   :  { %12131 = vst [vmem:[#allocation39_spill] sm:$0xff] %v9946_v39  ;;  %v9948_v31 = vpop.permute.xlu1 %2838  ;;  %v12142_v39 = vld [vmem:[#allocation25_spill] sm:$0xff] }
 0x4c6   :  { %12132 = vst [vmem:[#allocation13_spill] sm:$0xff] %v9948_v31  ;;  %3344 = vperm.xlu0 %6047, %v12133_v60   ;;  %3279 = vperm.xlu1 %6046, %v12134_v49   ;;  %v12145_v49 = vld [vmem:[#allocation55_spill] sm:$0xff] }
 0x4c8   :  { %v9952_v13 = vpop.permute.xlu0 %2903 }
 0x4c9   :  { %12135 = vst [vmem:[#allocation43_spill] sm:$0xff] %v9952_v13  ;;  %v9954_v45 = vpop.permute.xlu1 %2848  ;;  %v12146_v13 = vld [vmem:[#allocation29_spill] sm:$0xff] }
 0x4ca   :  { %12136 = vst [vmem:[#allocation17_spill] sm:$0xff] %v9954_v45  ;;  %3354 = vperm.xlu0 %6047, %v12137_v9   ;;  %3289 = vperm.xlu1 %6046, %v12138_v55   ;;  %v12149_v55 = vld [vmem:[#allocation59_spill] sm:$0xff] }
 0x4cc   :  { %v9958_v0 = vpop.permute.xlu0 %2913 }
 0x4cd   :  { %12139 = vst [vmem:[#allocation47_spill] sm:$0xff] %v9958_v0  ;;  %v9960_v14 = vpop.permute.xlu1 %2858  ;;  %v12150_v0 = vld [vmem:[#allocation33_spill] sm:$0xff] }
 0x4ce   :  { %12140 = vst [vmem:[#allocation21_spill] sm:$0xff] %v9960_v14  ;;  %3364 = vperm.xlu0 %6047, %v12141_v18   ;;  %3299 = vperm.xlu1 %6046, %v12142_v39   ;;  %v12153_v39 = vld [vmem:[#allocation63_spill] sm:$0xff] }
 0x4d0   :  { %v9964_v31 = vpop.permute.xlu0 %2923 }
 0x4d1   :  { %12143 = vst [vmem:[#allocation51_spill] sm:$0xff] %v9964_v31  ;;  %v9966_v60 = vpop.permute.xlu1 %2868  ;;  %v12154_v31 = vld [vmem:[#allocation37_spill] sm:$0xff] }
 0x4d2   :  { %12144 = vst [vmem:[#allocation25_spill] sm:$0xff] %v9966_v60  ;;  %3374 = vperm.xlu0 %6047, %v12145_v49   ;;  %3309 = vperm.xlu1 %6046, %v12146_v13   ;;  %v12157_v13 = vld [vmem:[#allocation67_spill] sm:$0xff] }
 0x4d4   :  { %v9970_v45 = vpop.permute.xlu0 %2933 }
 0x4d5   :  { %12147 = vst [vmem:[#allocation55_spill] sm:$0xff] %v9970_v45  ;;  %v9972_v9 = vpop.permute.xlu1 %2878  ;;  %v12158_v45 = vld [vmem:[#allocation41_spill] sm:$0xff] }
 0x4d6   :  { %12148 = vst [vmem:[#allocation29_spill] sm:$0xff] %v9972_v9  ;;  %3384 = vperm.xlu0 %6047, %v12149_v55   ;;  %3319 = vperm.xlu1 %6046, %v12150_v0   ;;  %v12161_v0 = vld [vmem:[#allocation6_spill] sm:$0xff] }
 0x4d8   :  { %v9976_v14 = vpop.permute.xlu0 %2943 }
 0x4d9   :  { %12151 = vst [vmem:[#allocation59_spill] sm:$0xff] %v9976_v14  ;;  %v9978_v18 = vpop.permute.xlu1 %2888  ;;  %v12162_v14 = vld [vmem:[#allocation45_spill] sm:$0xff] }
 0x4da   :  { %12152 = vst [vmem:[#allocation33_spill] sm:$0xff] %v9978_v18  ;;  %3394 = vperm.xlu0 %6047, %v12153_v39   ;;  %3329 = vperm.xlu1 %6046, %v12154_v31   ;;  %v12165_v31 = vld [vmem:[#allocation10_spill] sm:$0xff] }
 0x4dc   :  { %v9982_v60 = vpop.permute.xlu0 %2953 }
 0x4dd   :  { %12155 = vst [vmem:[#allocation63_spill] sm:$0xff] %v9982_v60  ;;  %v9984_v49 = vpop.permute.xlu1 %2898  ;;  %v12166_v60 = vld [vmem:[#allocation49_spill] sm:$0xff] }
 0x4de   :  { %12156 = vst [vmem:[#allocation37_spill] sm:$0xff] %v9984_v49  ;;  %3404 = vperm.xlu0 %6047, %v12157_v13   ;;  %3339 = vperm.xlu1 %6046, %v12158_v45   ;;  %v12169_v45 = vld [vmem:[#allocation14_spill] sm:$0xff] }
 0x4e0   :  { %v9988_v9 = vpop.permute.xlu0 %2963 }
 0x4e1   :  { %12159 = vst [vmem:[#allocation67_spill] sm:$0xff] %v9988_v9  ;;  %v9990_v55 = vpop.permute.xlu1 %2908  ;;  %v12170_v9 = vld [vmem:[#allocation53_spill] sm:$0xff] }
 0x4e2   :  { %12160 = vst [vmem:[#allocation41_spill] sm:$0xff] %v9990_v55  ;;  %3414 = vperm.xlu0 %6047, %v12161_v0   ;;  %3349 = vperm.xlu1 %6046, %v12162_v14   ;;  %v12173_v14 = vld [vmem:[#allocation18_spill] sm:$0xff] }
 0x4e4   :  { %v9994_v18 = vpop.permute.xlu0 %2973 }
 0x4e5   :  { %12163 = vst [vmem:[#allocation6_spill] sm:$0xff] %v9994_v18  ;;  %v9996_v39 = vpop.permute.xlu1 %2918  ;;  %v12174_v18 = vld [vmem:[#allocation57_spill] sm:$0xff] }
 0x4e6   :  { %12164 = vst [vmem:[#allocation45_spill] sm:$0xff] %v9996_v39  ;;  %3424 = vperm.xlu0 %6047, %v12165_v31   ;;  %3359 = vperm.xlu1 %6046, %v12166_v60   ;;  %v12177_v60 = vld [vmem:[#allocation22_spill] sm:$0xff] }
 0x4e8   :  { %v10000_v49 = vpop.permute.xlu0 %2983 }
 0x4e9   :  { %12167 = vst [vmem:[#allocation10_spill] sm:$0xff] %v10000_v49  ;;  %v10002_v13 = vpop.permute.xlu1 %2928  ;;  %v12178_v49 = vld [vmem:[#allocation61_spill] sm:$0xff] }
 0x4ea   :  { %12168 = vst [vmem:[#allocation49_spill] sm:$0xff] %v10002_v13  ;;  %3434 = vperm.xlu0 %6047, %v12169_v45   ;;  %3369 = vperm.xlu1 %6046, %v12170_v9   ;;  %v12181_v9 = vld [vmem:[#allocation26_spill] sm:$0xff] }
 0x4ec   :  { %v10006_v55 = vpop.permute.xlu0 %2993 }
 0x4ed   :  { %12171 = vst [vmem:[#allocation14_spill] sm:$0xff] %v10006_v55  ;;  %v10008_v0 = vpop.permute.xlu1 %2938  ;;  %v12182_v55 = vld [vmem:[#allocation65_spill] sm:$0xff] }
 0x4ee   :  { %12172 = vst [vmem:[#allocation53_spill] sm:$0xff] %v10008_v0  ;;  %3444 = vperm.xlu0 %6047, %v12173_v14   ;;  %3379 = vperm.xlu1 %6046, %v12174_v18   ;;  %v12185_v18 = vld [vmem:[#allocation30_spill] sm:$0xff] }
 0x4f0   :  { %v10012_v39 = vpop.permute.xlu0 %3003 }
 0x4f1   :  { %12175 = vst [vmem:[#allocation18_spill] sm:$0xff] %v10012_v39  ;;  %v10014_v31 = vpop.permute.xlu1 %2948  ;;  %v12186_v39 = vld [vmem:[#allocation69_spill] sm:$0xff] }
 0x4f2   :  { %12176 = vst [vmem:[#allocation57_spill] sm:$0xff] %v10014_v31  ;;  %3454 = vperm.xlu0 %6047, %v12177_v60   ;;  %3389 = vperm.xlu1 %6046, %v12178_v49   ;;  %v12189_v49 = vld [vmem:[#allocation34_spill] sm:$0xff] }
 0x4f4   :  { %v10018_v13 = vpop.permute.xlu0 %3013 }
 0x4f5   :  { %12179 = vst [vmem:[#allocation22_spill] sm:$0xff] %v10018_v13  ;;  %v10020_v45 = vpop.permute.xlu1 %2958  ;;  %v12190_v13 = vld [vmem:[#allocation8_spill] sm:$0xff] }
 0x4f6   :  { %12180 = vst [vmem:[#allocation61_spill] sm:$0xff] %v10020_v45  ;;  %3464 = vperm.xlu0 %6047, %v12181_v9   ;;  %3399 = vperm.xlu1 %6046, %v12182_v55   ;;  %v12193_v55 = vld [vmem:[#allocation38_spill] sm:$0xff] }
 0x4f8   :  { %v10024_v0 = vpop.permute.xlu0 %3023 }
 0x4f9   :  { %12183 = vst [vmem:[#allocation26_spill] sm:$0xff] %v10024_v0  ;;  %v10026_v14 = vpop.permute.xlu1 %2968  ;;  %v12194_v0 = vld [vmem:[#allocation12_spill] sm:$0xff] }
 0x4fa   :  { %12184 = vst [vmem:[#allocation65_spill] sm:$0xff] %v10026_v14  ;;  %3474 = vperm.xlu0 %6047, %v12185_v18   ;;  %3409 = vperm.xlu1 %6046, %v12186_v39   ;;  %v12197_v39 = vld [vmem:[#allocation42_spill] sm:$0xff] }
 0x4fc   :  { %v10030_v31 = vpop.permute.xlu0 %3033 }
 0x4fd   :  { %12187 = vst [vmem:[#allocation30_spill] sm:$0xff] %v10030_v31  ;;  %v10032_v60 = vpop.permute.xlu1 %2978  ;;  %v12198_v31 = vld [vmem:[#allocation16_spill] sm:$0xff] }
 0x4fe   :  { %12188 = vst [vmem:[#allocation69_spill] sm:$0xff] %v10032_v60  ;;  %3484 = vperm.xlu0 %6047, %v12189_v49   ;;  %3419 = vperm.xlu1 %6046, %v12190_v13   ;;  %v12201_v13 = vld [vmem:[#allocation46_spill] sm:$0xff] }
 0x500   :  { %v10036_v45 = vpop.permute.xlu0 %3043 }
 0x501   :  { %12191 = vst [vmem:[#allocation34_spill] sm:$0xff] %v10036_v45  ;;  %v10038_v9 = vpop.permute.xlu1 %2988  ;;  %v12202_v45 = vld [vmem:[#allocation20_spill] sm:$0xff] }
 0x502   :  { %12192 = vst [vmem:[#allocation8_spill] sm:$0xff] %v10038_v9  ;;  %3494 = vperm.xlu0 %6047, %v12193_v55   ;;  %3429 = vperm.xlu1 %6046, %v12194_v0   ;;  %v12205_v0 = vld [vmem:[#allocation50_spill] sm:$0xff] }
 0x504   :  { %v10042_v14 = vpop.permute.xlu0 %3053 }
 0x505   :  { %12195 = vst [vmem:[#allocation38_spill] sm:$0xff] %v10042_v14  ;;  %v10044_v18 = vpop.permute.xlu1 %2998  ;;  %v12206_v14 = vld [vmem:[#allocation24_spill] sm:$0xff] }
 0x506   :  { %12196 = vst [vmem:[#allocation12_spill] sm:$0xff] %v10044_v18  ;;  %3504 = vperm.xlu0 %6047, %v12197_v39   ;;  %3439 = vperm.xlu1 %6046, %v12198_v31   ;;  %v12209_v31 = vld [vmem:[#allocation54_spill] sm:$0xff] }
 0x508   :  { %v10048_v60 = vpop.permute.xlu0 %3063 }
 0x509   :  { %12199 = vst [vmem:[#allocation42_spill] sm:$0xff] %v10048_v60  ;;  %v10050_v49 = vpop.permute.xlu1 %3008  ;;  %v12210_v60 = vld [vmem:[#allocation28_spill] sm:$0xff] }
 0x50a   :  { %12200 = vst [vmem:[#allocation16_spill] sm:$0xff] %v10050_v49  ;;  %3514 = vperm.xlu0 %6047, %v12201_v13   ;;  %3449 = vperm.xlu1 %6046, %v12202_v45   ;;  %v12213_v45 = vld [vmem:[#allocation32_spill] sm:$0xff] }
 0x50c   :  { %v10054_v9 = vpop.permute.xlu0 %3073 }
 0x50d   :  { %12203 = vst [vmem:[#allocation46_spill] sm:$0xff] %v10054_v9  ;;  %v10056_v55 = vpop.permute.xlu1 %3018 }
 0x50e   :  { %12204 = vst [vmem:[#allocation20_spill] sm:$0xff] %v10056_v55  ;;  %3524 = vperm.xlu0 %6047, %v12205_v0   ;;  %3459 = vperm.xlu1 %6046, %v12206_v14   ;;  %v12216_v14 = vld [vmem:[#allocation36_spill] sm:$0xff] }
 0x50f   :  { %v12234_v55 = vld [vmem:[#allocation64_spill] sm:$0xff] }
 0x510   :  { %v10060_v18 = vpop.permute.xlu0 %3083 }
 0x511   :  { %12207 = vst [vmem:[#allocation50_spill] sm:$0xff] %v10060_v18  ;;  %v10062_v39 = vpop.permute.xlu1 %3028 }
 0x512   :  { %12208 = vst [vmem:[#allocation24_spill] sm:$0xff] %v10062_v39  ;;  %3534 = vperm.xlu0 %6047, %v12209_v31   ;;  %3469 = vperm.xlu1 %6046, %v12210_v60   ;;  %v12219_v60 = vld [vmem:[#allocation40_spill] sm:$0xff] }
 0x514   :  { %v10066_v49 = vpop.permute.xlu0 %3093 }
 0x515   :  { %12211 = vst [vmem:[#allocation54_spill] sm:$0xff] %v10066_v49  ;;  %v10068_v13 = vpop.permute.xlu1 %3038 }
 0x516   :  { %12212 = vst [vmem:[#allocation28_spill] sm:$0xff] %v10068_v13  ;;  %3544 = vperm.xlu0 %6047, %v11960_v34   ;;  %3479 = vperm.xlu1 %6046, %v12213_v45   ;;  %v12221_v45 = vld [vmem:[#allocation44_spill] sm:$0xff] }
 0x518   :  { %v10072_v9 = vpop.permute.xlu0 %3103 }
 0x519   :  { %12214 = vst [vmem:[#allocation32_spill] sm:$0xff] %v10072_v9  ;;  %v10074_v0 = vpop.permute.xlu1 %3048 }
 0x51a   :  { %12215 = vst [vmem:[#allocation319_spill] sm:$0xff] %v10074_v0  ;;  %3554 = vperm.xlu0 %6047, %v11965_v6   ;;  %3489 = vperm.xlu1 %6046, %v12216_v14   ;;  %v12223_v6 = vld [vmem:[#allocation48_spill] sm:$0xff] }
 0x51c   :  { %v10078_v18 = vpop.permute.xlu0 %3113 }
 0x51d   :  { %12217 = vst [vmem:[#allocation36_spill] sm:$0xff] %v10078_v18  ;;  %v10080_v31 = vpop.permute.xlu1 %3058 }
 0x51e   :  { %12218 = vst [vmem:[#allocation320_spill] sm:$0xff] %v10080_v31  ;;  %3564 = vperm.xlu0 %6047, %v11969_v33   ;;  %3499 = vperm.xlu1 %6046, %v12219_v60   ;;  %v12225_v33 = vld [vmem:[#allocation52_spill] sm:$0xff] }
 0x51f   :  { %v12231_v31 = vld [vmem:[#allocation60_spill] sm:$0xff] }
 0x521   :  { %v3260_v49 = vpop.permute.xlu0 %3259  ;;  %v10084_v34 = vpop.permute.xlu1 %3068 }
 0x522   :  { %12220 = vst [vmem:[#allocation40_spill] sm:$0xff] %v10084_v34  ;;  %3574 = vperm.xlu0 %6047, %v11972_v11   ;;  %3509 = vperm.xlu1 %6046, %v12221_v45   ;;  %v12227_v11 = vld [vmem:[#allocation56_spill] sm:$0xff] }
 0x525   :  { %v3275_v9 = vpop.permute.xlu0 %3274  ;;  %v10088_v0 = vpop.permute.xlu1 %3078 }
 0x526   :  { %12222 = vst [vmem:[#allocation44_spill] sm:$0xff] %v10088_v0  ;;  %3584 = vperm.xlu0 %6047, %v11975_v35   ;;  %3519 = vperm.xlu1 %6046, %v12223_v6   ;;  %v12229_v35 = vld [vmem:[#allocation171_spill] sm:$0xff]  ;;  %v12230_v6 = vld [vmem:[#allocation165_spill] sm:$0xff] }
 0x529   :  { %v3285_v14 = vpop.permute.xlu0 %3284  ;;  %v10092_v18 = vpop.permute.xlu1 %3088 }
 0x52a   :  { %12224 = vst [vmem:[#allocation48_spill] sm:$0xff] %v10092_v18  ;;  %3594 = vperm.xlu0 %6047, %v11978_v8   ;;  %3529 = vperm.xlu1 %6046, %v12225_v33   ;;  %v3117_v18 = vmul.f32 %v12230_v6, %v12229_v35  ;;  %v12232_v8 = vld [vmem:[#allocation170_spill] sm:$0xff]  ;;  %v12233_v33 = vld [vmem:[#allocation304_spill] sm:$0xff]  ;;  %v12236_v35 = vld [vmem:[#allocation307_spill] sm:$0xff] }
 0x52b   :  { %v3116_v13 = vmul.f32 %v12233_v33, %v12232_v8 }
 0x52c   :  { %v3933_v39 = vadd.f32 %v3260_v49, %v3117_v18  ;;  %v12238_v18 = vld [vmem:[#allocation68_spill] sm:$0xff]  ;;  %v12239_v49 = vld [vmem:[#allocation173_spill] sm:$0xff] }
 0x52d   :  { %v3295_v60 = vpop.permute.xlu0 %3294  ;;  %v10096_v34 = vpop.permute.xlu1 %3098 }
 0x52e   :  { %12226 = vst [vmem:[#allocation52_spill] sm:$0xff] %v10096_v34  ;;  %3604 = vperm.xlu0 %6047, %v11981_v12   ;;  %3539 = vperm.xlu1 %6046, %v12227_v11  }
 0x531   :  { %v10100_v45 = vpop.permute.xlu0 %3304  ;;  %v10102_v0 = vpop.permute.xlu1 %3108 }
 0x532   :  { %12228 = vst [vmem:[#allocation56_spill] sm:$0xff] %v10102_v0  ;;  %3614 = vperm.xlu0 %6047, %v11984_v52   ;;  %3549 = vperm.xlu1 %6046, %v12231_v31   ;;  %v4069_v0 = vmax.f32 %v3933_v39, 0.0  ;;  %v12235_v31 = vld [vmem:[#allocation172_spill] sm:$0xff]  ;;  %v12240_v39 = vld [vmem:[#allocation174_spill] sm:$0xff] }
 0x533   :  { %v3118_v6 = vmul.f32 %v12236_v35, %v12235_v31  ;;  %v12242_v31 = vld [vmem:[#allocation175_spill] sm:$0xff] }
 0x535   :  { %v10110_v34 = vpop.permute.xlu0 %3314  ;;  %v3255_v12 = vpop.permute.xlu1 %3254 }
 0x536   :  { %3624 = vperm.xlu0 %6047, %v11988_v51   ;;  %v3932_v11 = vadd.f32 %v3255_v12, %v3116_v13  ;;  %3559 = vperm.xlu1 %6046, %v12234_v55   ;;  %v3119_v51 = vmul.f32 %v9645_v3, %v12239_v49  ;;  %v3120_v12 = vmul.f32 %v9653_v57, %v12240_v39  ;;  %v12244_v49 = vld [vmem:[#allocation77_spill] sm:$0xff] }
 0x538   :  { %v4068_v17 = vmax.f32 %v3932_v11, 0.0  ;;  %v12241_v11 = vld [vmem:[#allocation73_spill] sm:$0xff] }
 0x539   :  { %v10114_v52 = vpop.permute.xlu0 %3324  ;;  %v3265_v53 = vpop.permute.xlu1 %3264 }
 0x53a   :  { %3634 = vperm.xlu0 %6047, %v11993_v21   ;;  %v10119_v8 = vpack.c.bf16 %v4069_v0, %v4068_v17  ;;  %3569 = vperm.xlu1 %6046, %v12238_v18   ;;  %v3934_v13 = vadd.f32 %v3265_v53, %v3118_v6  ;;  %v3121_v17 = vmul.f32 %v9661_v1, %v12242_v31  ;;  %v12243_v53 = vld [vmem:[#allocation176_spill] sm:$0xff]  ;;  %v12247_v31 = vld [vmem:[#allocation81_spill] sm:$0xff] }
 0x53b   :  { %v3936_v0 = vadd.f32 %v3275_v9, %v3120_v12 }
 0x53c   :  { %12237 = vst [vmem:[#allocation171_spill] sm:$0xff] %v10119_v8  ;;  %v4070_v35 = vmax.f32 %v3934_v13, 0.0 }
 0x53d   :  { %v10124_v33 = vpop.permute.xlu0 %3334  ;;  %v3270_v55 = vpop.permute.xlu1 %3269  ;;  %v4072_v1 = vmax.f32 %v3936_v0, 0.0 }
 0x53e   :  { %3644 = vperm.xlu0 %6047, %v11998_v19   ;;  %v3935_v21 = vadd.f32 %v3270_v55, %v3119_v51  ;;  %3579 = vperm.xlu1 %6046, %v12241_v11   ;;  %v3122_v19 = vmul.f32 %v9669_v59, %v12243_v53  ;;  %v12245_v51 = vld [vmem:[#allocation177_spill] sm:$0xff] }
 0x53f   :  { %v3123_v55 = vmul.f32 %v9677_v48, %v12245_v51  ;;  %v12252_v51 = vld [vmem:[#allocation85_spill] sm:$0xff] }
 0x540   :  { %v4071_v18 = vmax.f32 %v3935_v21, 0.0  ;;  %v3938_v9 = vadd.f32 %v3285_v14, %v3122_v19  ;;  %v12251_v19 = vld [vmem:[#allocation71_spill] sm:$0xff] }
 0x541   :  { %v10132_v8 = vpop.permute.xlu0 %3344  ;;  %v3280_v3 = vpop.permute.xlu1 %3279 }
 0x542   :  { %3654 = vperm.xlu0 %6047, %v12003_v25   ;;  %v10137_v6 = vpack.c.bf16 %v4071_v18, %v4070_v35  ;;  %v3937_v57 = vadd.f32 %v3280_v3, %v3121_v17  ;;  %3589 = vperm.xlu1 %6046, %v12244_v49   ;;  %v12246_v25 = vld [vmem:[#allocation178_spill] sm:$0xff]  ;;  %v12248_v17 = vld [vmem:[#allocation179_spill] sm:$0xff]  ;;  %v12249_v35 = vld [vmem:[#allocation308_spill] sm:$0xff]  ;;  %v4074_v48 = vmax.f32 %v3938_v9, 0.0 }
 0x543   :  { %v3124_v21 = vmul.f32 %v9685_v61, %v12246_v25  ;;  %v3125_v18 = vmul.f32 %v12249_v35, %v12248_v17 }
 0x544   :  { %v4073_v13 = vmax.f32 %v3937_v57, 0.0 }
 0x545   :  { %v10142_v39 = vpop.permute.xlu0 %3354  ;;  %v3290_v12 = vpop.permute.xlu1 %3289  ;;  %v3940_v0 = vadd.f32 %v3295_v60, %v3124_v21 }
 0x546   :  { %3664 = vperm.xlu0 %6047, %v12008_v42   ;;  %v10147_v59 = vpack.c.bf16 %v4073_v13, %v4072_v1  ;;  %v3939_v11 = vadd.f32 %v3290_v12, %v3123_v55  ;;  %3599 = vperm.xlu1 %6046, %v12247_v31   ;;  %v12250_v42 = vld [vmem:[#allocation180_spill] sm:$0xff]  ;;  %v12253_v55 = vld [vmem:[#allocation181_spill] sm:$0xff] }
 0x547   :  { %v3126_v57 = vmul.f32 %v12251_v19, %v12250_v42  ;;  %v12254_v1 = vld [vmem:[#allocation309_spill] sm:$0xff]  ;;  %v4076_v12 = vmax.f32 %v3940_v0, 0.0 }
 0x548   :  { %v4075_v14 = vmax.f32 %v3939_v11, 0.0  ;;  %v3127_v13 = vmul.f32 %v12254_v1, %v12253_v55  ;;  %v12256_v11 = vld [vmem:[#allocation79_spill] sm:$0xff] }
 0x549   :  { %v10152_v3 = vpop.permute.xlu0 %3364  ;;  %v3300_v53 = vpop.permute.xlu1 %3299  ;;  %v3942_v60 = vadd.f32 %v10100_v45, %v3126_v57 }
 0x54a   :  { %3674 = vperm.xlu0 %6047, %v12013_v56   ;;  %v10157_v61 = vpack.c.bf16 %v4075_v14, %v4074_v48  ;;  %v3941_v49 = vadd.f32 %v3300_v53, %v3125_v18  ;;  %3609 = vperm.xlu1 %6046, %v12252_v51   ;;  %v12255_v56 = vld [vmem:[#allocation182_spill] sm:$0xff]  ;;  %v12257_v18 = vld [vmem:[#allocation89_spill] sm:$0xff]  ;;  %v12258_v48 = vld [vmem:[#allocation183_spill] sm:$0xff] }
 0x54b   :  { %v3128_v31 = vmul.f32 %v12256_v11, %v12255_v56  ;;  %v12259_v14 = vld [vmem:[#allocation58_spill] sm:$0xff]  ;;  %v4078_v0 = vmax.f32 %v3942_v60, 0.0 }
 0x54c   :  { %v4077_v9 = vmax.f32 %v3941_v49, 0.0  ;;  %v3129_v53 = vmul.f32 %v12259_v14, %v12258_v48  ;;  %v12261_v49 = vld [vmem:[#allocation87_spill] sm:$0xff] }
 0x54d   :  { %v10163_v25 = vpop.permute.xlu0 %3374  ;;  %v3310_v21 = vpop.permute.xlu1 %3309  ;;  %v3944_v45 = vadd.f32 %v10110_v34, %v3128_v31 }
 0x54e   :  { %3684 = vperm.xlu0 %6047, %v12018_v62   ;;  %v10168_v17 = vpack.c.bf16 %v4077_v9, %v4076_v12  ;;  %v3943_v35 = vadd.f32 %v3310_v21, %v3127_v13  ;;  %3619 = vperm.xlu1 %6046, %v12257_v18   ;;  %v12260_v62 = vld [vmem:[#allocation184_spill] sm:$0xff]  ;;  %v12262_v13 = vld [vmem:[#allocation93_spill] sm:$0xff]  ;;  %v12264_v9 = vld [vmem:[#allocation310_spill] sm:$0xff] }
 0x54f   :  { %v3130_v51 = vmul.f32 %v12261_v49, %v12260_v62  ;;  %v12263_v12 = vld [vmem:[#allocation185_spill] sm:$0xff]  ;;  %v4080_v60 = vmax.f32 %v3944_v45, 0.0 }
 0x550   :  { %v4079_v42 = vmax.f32 %v3943_v35, 0.0  ;;  %v3131_v21 = vmul.f32 %v12264_v9, %v12263_v12  ;;  %v12266_v35 = vld [vmem:[#allocation312_spill] sm:$0xff] }
 0x551   :  { %v10174_v19 = vpop.permute.xlu0 %3384  ;;  %v3320_v57 = vpop.permute.xlu1 %3319  ;;  %v3946_v34 = vadd.f32 %v10114_v52, %v3130_v51 }
 0x552   :  { %3694 = vperm.xlu0 %6047, %v12023_v23   ;;  %v10179_v55 = vpack.c.bf16 %v4079_v42, %v4078_v0  ;;  %v3945_v1 = vadd.f32 %v3320_v57, %v3129_v53  ;;  %3629 = vperm.xlu1 %6046, %v12262_v13   ;;  %v12265_v23 = vld [vmem:[#allocation186_spill] sm:$0xff]  ;;  %v12267_v53 = vld [vmem:[#allocation97_spill] sm:$0xff]  ;;  %v12268_v0 = vld [vmem:[#allocation187_spill] sm:$0xff] }
 0x553   :  { %v3132_v18 = vmul.f32 %v12266_v35, %v12265_v23  ;;  %v12269_v42 = vld [vmem:[#allocation62_spill] sm:$0xff]  ;;  %v4082_v45 = vmax.f32 %v3946_v34, 0.0 }
 0x554   :  { %v4081_v56 = vmax.f32 %v3945_v1, 0.0  ;;  %v3133_v57 = vmul.f32 %v12269_v42, %v12268_v0  ;;  %v12271_v1 = vld [vmem:[#allocation313_spill] sm:$0xff] }
 0x555   :  { %v10185_v11 = vpop.permute.xlu0 %3394  ;;  %v3330_v31 = vpop.permute.xlu1 %3329  ;;  %v3948_v52 = vadd.f32 %v10124_v33, %v3132_v18 }
 0x556   :  { %3704 = vperm.xlu0 %6047, %v12028_v36   ;;  %v10190_v48 = vpack.c.bf16 %v4081_v56, %v4080_v60  ;;  %v3947_v14 = vadd.f32 %v3330_v31, %v3131_v21  ;;  %3639 = vperm.xlu1 %6046, %v12267_v53   ;;  %v12270_v36 = vld [vmem:[#allocation188_spill] sm:$0xff]  ;;  %v12272_v21 = vld [vmem:[#allocation101_spill] sm:$0xff]  ;;  %v12274_v56 = vld [vmem:[#allocation311_spill] sm:$0xff] }
 0x557   :  { %v3134_v13 = vmul.f32 %v12271_v1, %v12270_v36  ;;  %v12273_v60 = vld [vmem:[#allocation189_spill] sm:$0xff]  ;;  %v4084_v34 = vmax.f32 %v3948_v52, 0.0 }
 0x558   :  { %v4083_v62 = vmax.f32 %v3947_v14, 0.0  ;;  %v3135_v31 = vmul.f32 %v12274_v56, %v12273_v60  ;;  %v12276_v14 = vld [vmem:[#allocation314_spill] sm:$0xff] }
 0x559   :  { %v10196_v49 = vpop.permute.xlu0 %3404  ;;  %v3340_v51 = vpop.permute.xlu1 %3339  ;;  %v3950_v33 = vadd.f32 %v10132_v8, %v3134_v13 }
 0x55a   :  { %3714 = vperm.xlu0 %6047, %v12033_v58   ;;  %v10201_v12 = vpack.c.bf16 %v4083_v62, %v4082_v45  ;;  %v3949_v9 = vadd.f32 %v3340_v51, %v3133_v57  ;;  %3649 = vperm.xlu1 %6046, %v12272_v21   ;;  %v12275_v58 = vld [vmem:[#allocation190_spill] sm:$0xff]  ;;  %v12277_v57 = vld [vmem:[#allocation72_spill] sm:$0xff]  ;;  %v12278_v45 = vld [vmem:[#allocation191_spill] sm:$0xff] }
 0x55b   :  { %v3136_v53 = vmul.f32 %v12276_v14, %v12275_v58  ;;  %v12279_v62 = vld [vmem:[#allocation66_spill] sm:$0xff]  ;;  %v4086_v52 = vmax.f32 %v3950_v33, 0.0 }
 0x55c   :  { %v4085_v23 = vmax.f32 %v3949_v9, 0.0  ;;  %v3137_v51 = vmul.f32 %v12279_v62, %v12278_v45  ;;  %v12281_v9 = vld [vmem:[#allocation315_spill] sm:$0xff] }
 0x55d   :  { %v10207_v35 = vpop.permute.xlu0 %3414  ;;  %v3350_v18 = vpop.permute.xlu1 %3349  ;;  %v3952_v8 = vadd.f32 %v10142_v39, %v3136_v53 }
 0x55e   :  { %3724 = vperm.xlu0 %6047, %v12038_v32   ;;  %v10212_v0 = vpack.c.bf16 %v4085_v23, %v4084_v34  ;;  %v3951_v42 = vadd.f32 %v3350_v18, %v3135_v31  ;;  %3659 = vperm.xlu1 %6046, %v12277_v57   ;;  %v12280_v32 = vld [vmem:[#allocation192_spill] sm:$0xff]  ;;  %v12283_v34 = vld [vmem:[#allocation193_spill] sm:$0xff]  ;;  %v12284_v23 = vld [vmem:[#allocation75_spill] sm:$0xff] }
 0x55f   :  { %v3138_v21 = vmul.f32 %v12281_v9, %v12280_v32  ;;  %v12282_v31 = vld [vmem:[#allocation76_spill] sm:$0xff]  ;;  %v3139_v18 = vmul.f32 %v12284_v23, %v12283_v34  ;;  %v4088_v33 = vmax.f32 %v3952_v8, 0.0 }
 0x560   :  { %v4087_v36 = vmax.f32 %v3951_v42, 0.0  ;;  %v12286_v42 = vld [vmem:[#allocation160_spill] sm:$0xff] }
 0x561   :  { %v10218_v1 = vpop.permute.xlu0 %3424  ;;  %v3360_v13 = vpop.permute.xlu1 %3359  ;;  %v3954_v39 = vadd.f32 %v10152_v3, %v3138_v21 }
 0x562   :  { %3734 = vperm.xlu0 %6047, %v12043_v24   ;;  %v10223_v60 = vpack.c.bf16 %v4087_v36, %v4086_v52  ;;  %v3953_v56 = vadd.f32 %v3360_v13, %v3137_v51  ;;  %3669 = vperm.xlu1 %6046, %v12282_v31   ;;  %v12285_v24 = vld [vmem:[#allocation194_spill] sm:$0xff]  ;;  %v12287_v51 = vld [vmem:[#allocation80_spill] sm:$0xff]  ;;  %v12288_v52 = vld [vmem:[#allocation195_spill] sm:$0xff] }
 0x563   :  { %v3140_v57 = vmul.f32 %v12286_v42, %v12285_v24  ;;  %v12289_v36 = vld [vmem:[#allocation83_spill] sm:$0xff]  ;;  %v4090_v8 = vmax.f32 %v3954_v39, 0.0 }
 0x564   :  { %v4089_v58 = vmax.f32 %v3953_v56, 0.0  ;;  %v3141_v13 = vmul.f32 %v12289_v36, %v12288_v52  ;;  %v12291_v56 = vld [vmem:[#allocation272_spill] sm:$0xff] }
 0x565   :  { %v10229_v14 = vpop.permute.xlu0 %3434  ;;  %v3370_v53 = vpop.permute.xlu1 %3369  ;;  %v3956_v3 = vadd.f32 %v10163_v25, %v3140_v57 }
 0x566   :  { %3744 = vperm.xlu0 %6047, %v12047_v40   ;;  %v10234_v45 = vpack.c.bf16 %v4089_v58, %v4088_v33  ;;  %v3955_v62 = vadd.f32 %v3370_v53, %v3139_v18  ;;  %3679 = vperm.xlu1 %6046, %v12287_v51   ;;  %v12290_v40 = vld [vmem:[#allocation196_spill] sm:$0xff]  ;;  %v12293_v33 = vld [vmem:[#allocation197_spill] sm:$0xff]  ;;  %v12294_v58 = vld [vmem:[#allocation91_spill] sm:$0xff] }
 0x567   :  { %v3142_v31 = vmul.f32 %v12291_v56, %v12290_v40  ;;  %v12292_v18 = vld [vmem:[#allocation84_spill] sm:$0xff]  ;;  %v3143_v53 = vmul.f32 %v12294_v58, %v12293_v33  ;;  %v4092_v39 = vmax.f32 %v3956_v3, 0.0 }
 0x568   :  { %v4091_v32 = vmax.f32 %v3955_v62, 0.0  ;;  %v12296_v62 = vld [vmem:[#allocation162_spill] sm:$0xff] }
 0x569   :  { %v10240_v9 = vpop.permute.xlu0 %3444  ;;  %v3380_v21 = vpop.permute.xlu1 %3379  ;;  %v3958_v25 = vadd.f32 %v10174_v19, %v3142_v31 }
 0x56a   :  { %3754 = vperm.xlu0 %6047, %v12050_v10   ;;  %v10245_v34 = vpack.c.bf16 %v4091_v32, %v4090_v8  ;;  %v3957_v23 = vadd.f32 %v3380_v21, %v3141_v13  ;;  %3689 = vperm.xlu1 %6046, %v12292_v18   ;;  %v12295_v10 = vld [vmem:[#allocation198_spill] sm:$0xff]  ;;  %v12297_v13 = vld [vmem:[#allocation88_spill] sm:$0xff]  ;;  %v12298_v8 = vld [vmem:[#allocation199_spill] sm:$0xff] }
 0x56b   :  { %v3144_v51 = vmul.f32 %v12296_v62, %v12295_v10  ;;  %v12299_v32 = vld [vmem:[#allocation95_spill] sm:$0xff]  ;;  %v4094_v3 = vmax.f32 %v3958_v25, 0.0 }
 0x56c   :  { %v4093_v24 = vmax.f32 %v3957_v23, 0.0  ;;  %v3145_v21 = vmul.f32 %v12299_v32, %v12298_v8  ;;  %v12301_v23 = vld [vmem:[#allocation275_spill] sm:$0xff] }
 0x56d   :  { %v10251_v42 = vpop.permute.xlu0 %3454  ;;  %v3390_v57 = vpop.permute.xlu1 %3389  ;;  %v3960_v19 = vadd.f32 %v10185_v11, %v3144_v51 }
 0x56e   :  { %3764 = vperm.xlu0 %6047, %v12053_v38   ;;  %v10256_v52 = vpack.c.bf16 %v4093_v24, %v4092_v39  ;;  %v3959_v36 = vadd.f32 %v3390_v57, %v3143_v53  ;;  %3699 = vperm.xlu1 %6046, %v12297_v13   ;;  %v12300_v38 = vld [vmem:[#allocation200_spill] sm:$0xff]  ;;  %v12303_v39 = vld [vmem:[#allocation201_spill] sm:$0xff]  ;;  %v12304_v24 = vld [vmem:[#allocation99_spill] sm:$0xff] }
 0x56f   :  { %v3146_v18 = vmul.f32 %v12301_v23, %v12300_v38  ;;  %v12302_v53 = vld [vmem:[#allocation92_spill] sm:$0xff]  ;;  %v3147_v57 = vmul.f32 %v12304_v24, %v12303_v39  ;;  %v4096_v25 = vmax.f32 %v3960_v19, 0.0 }
 0x570   :  { %v4095_v40 = vmax.f32 %v3959_v36, 0.0  ;;  %v12306_v36 = vld [vmem:[#allocation164_spill] sm:$0xff] }
 0x571   :  { %v10262_v56 = vpop.permute.xlu0 %3464  ;;  %v3400_v31 = vpop.permute.xlu1 %3399  ;;  %v3962_v11 = vadd.f32 %v10196_v49, %v3146_v18  ;;  %v12311_v24 = vld [vmem:[#allocation100_spill] sm:$0xff] }
 0x572   :  { %3774 = vperm.xlu0 %6047, %v12056_v43   ;;  %v10267_v33 = vpack.c.bf16 %v4095_v40, %v4094_v3  ;;  %v3961_v58 = vadd.f32 %v3400_v31, %v3145_v21  ;;  %3709 = vperm.xlu1 %6046, %v12302_v53   ;;  %v12305_v43 = vld [vmem:[#allocation202_spill] sm:$0xff]  ;;  %v12307_v21 = vld [vmem:[#allocation96_spill] sm:$0xff]  ;;  %v12308_v3 = vld [vmem:[#allocation203_spill] sm:$0xff] }
 0x573   :  { %v3148_v13 = vmul.f32 %v12306_v36, %v12305_v43  ;;  %v12309_v40 = vld [vmem:[#allocation70_spill] sm:$0xff]  ;;  %v4098_v19 = vmax.f32 %v3962_v11, 0.0 }
 0x574   :  { %v4097_v10 = vmax.f32 %v3961_v58, 0.0  ;;  %v3149_v31 = vmul.f32 %v12309_v40, %v12308_v3  ;;  %v12316_v3 = vld [vmem:[#allocation207_spill] sm:$0xff]  ;;  %v12317_v40 = vld [vmem:[#allocation78_spill] sm:$0xff] }
 0x575   :  { %v10273_v62 = vpop.permute.xlu0 %3474  ;;  %v3410_v51 = vpop.permute.xlu1 %3409  ;;  %v3964_v49 = vadd.f32 %v10207_v35, %v3148_v13 }
 0x576   :  { %3784 = vperm.xlu0 %6047, %v12059_v28   ;;  %v10278_v8 = vpack.c.bf16 %v4097_v10, %v4096_v25  ;;  %v3963_v32 = vadd.f32 %v3410_v51, %v3147_v57  ;;  %3719 = vperm.xlu1 %6046, %v12307_v21   ;;  %v12310_v28 = vld [vmem:[#allocation204_spill] sm:$0xff]  ;;  %v12312_v57 = vld [vmem:[#allocation205_spill] sm:$0xff]  ;;  %v12313_v25 = vld [vmem:[#allocation74_spill] sm:$0xff] }
 0x577   :  { %v3150_v58 = vmul.f32 %v9789_v29, %v12310_v28  ;;  %v3151_v10 = vmul.f32 %v12313_v25, %v12312_v57  ;;  %v4100_v11 = vmax.f32 %v3964_v49, 0.0  ;;  %v12315_v21 = vld [vmem:[#allocation105_spill] sm:$0xff]  ;;  %v12321_v57 = vld [vmem:[#allocation82_spill] sm:$0xff] }
 0x578   :  { %v4099_v38 = vmax.f32 %v3963_v32, 0.0 }
 0x579   :  { %v10284_v23 = vpop.permute.xlu0 %3484  ;;  %v3420_v18 = vpop.permute.xlu1 %3419  ;;  %v3966_v35 = vadd.f32 %v10218_v1, %v3150_v58 }
 0x57a   :  { %3794 = vperm.xlu0 %6047, %v12062_v46   ;;  %v10289_v53 = vpack.c.bf16 %v4099_v38, %v4098_v19  ;;  %v3965_v39 = vadd.f32 %v3420_v18, %v3149_v31  ;;  %3729 = vperm.xlu1 %6046, %v12311_v24   ;;  %v12314_v46 = vld [vmem:[#allocation206_spill] sm:$0xff]  ;;  %v3153_v31 = vmul.f32 %v12317_v40, %v12316_v3  ;;  %v12320_v24 = vld [vmem:[#allocation209_spill] sm:$0xff] }
 0x57b   :  { %v3152_v29 = vmul.f32 %v9797_v47, %v12314_v46  ;;  %v4102_v19 = vmax.f32 %v3966_v35, 0.0  ;;  %v3155_v25 = vmul.f32 %v12321_v57, %v12320_v24 }
 0x57c   :  { %v4101_v51 = vmax.f32 %v3965_v39, 0.0  ;;  %v12319_v39 = vld [vmem:[#allocation109_spill] sm:$0xff]  ;;  %5741 = vmatprep.subr.bf16.mxu0 %v10289_v53 }
 0x57d   :  { %v10295_v43 = vpop.permute.xlu0 %3494  ;;  %v3430_v36 = vpop.permute.xlu1 %3429  ;;  %v3968_v1 = vadd.f32 %v10229_v14, %v3152_v29  ;;  %v12323_v29 = vld [vmem:[#allocation114_spill] sm:$0xff] }
 0x57e   :  { %3804 = vperm.xlu0 %6047, %v12065_v50   ;;  %v10300_v13 = vpack.c.bf16 %v4101_v51, %v4100_v11  ;;  %v3967_v32 = vadd.f32 %v3430_v36, %v3151_v10  ;;  %3739 = vperm.xlu1 %6046, %v12315_v21   ;;  %v12318_v50 = vld [vmem:[#allocation208_spill] sm:$0xff]  ;;  %v12325_v21 = vld [vmem:[#allocation86_spill] sm:$0xff] }
 0x57f   :  { %v3154_v47 = vmul.f32 %v9805_v44, %v12318_v50  ;;  %v4104_v10 = vmax.f32 %v3968_v1, 0.0  ;;  %v12327_v50 = vld [vmem:[#allocation118_spill] sm:$0xff] }
 0x580   :  { %v4103_v49 = vmax.f32 %v3967_v32, 0.0  ;;  %v12324_v32 = vld [vmem:[#allocation211_spill] sm:$0xff] }
 0x581   :  { %v10306_v38 = vpop.permute.xlu0 %3504  ;;  %v3440_v18 = vpop.permute.xlu1 %3439  ;;  %v3970_v14 = vadd.f32 %v10240_v9, %v3154_v47  ;;  %v3157_v3 = vmul.f32 %v12325_v21, %v12324_v32  ;;  %v12328_v47 = vld [vmem:[#allocation213_spill] sm:$0xff] }
 0x582   :  { %3814 = vperm.xlu0 %6047, %v12069_v54   ;;  %v10311_v28 = vpack.c.bf16 %v4103_v49, %v4102_v19  ;;  %v3969_v58 = vadd.f32 %v3440_v18, %v3153_v31  ;;  %3749 = vperm.xlu1 %6046, %v12319_v39   ;;  %v12322_v54 = vld [vmem:[#allocation210_spill] sm:$0xff] }
 0x583   :  { %v3156_v44 = vmul.f32 %v9813_v63, %v12322_v54  ;;  %v4106_v40 = vmax.f32 %v3970_v14, 0.0  ;;  %v12332_v54 = vld [vmem:[#allocation215_spill] sm:$0xff] }
 0x584   :  { %v4105_v11 = vmax.f32 %v3969_v58, 0.0  ;;  %v12329_v58 = vld [vmem:[#allocation90_spill] sm:$0xff] }
 0x585   :  { %v10317_v35 = vpop.permute.xlu0 %3514  ;;  %v3450_v51 = vpop.permute.xlu1 %3449  ;;  %v3972_v9 = vadd.f32 %v10251_v42, %v3156_v44  ;;  %v3159_v39 = vmul.f32 %v12329_v58, %v12328_v47  ;;  %v12333_v44 = vld [vmem:[#allocation94_spill] sm:$0xff] }
 0x586   :  { %3824 = vperm.xlu0 %6047, %v12074_v4   ;;  %v10322_v36 = vpack.c.bf16 %v4105_v11, %v4104_v10  ;;  %v3971_v46 = vadd.f32 %v3450_v51, %v3155_v25  ;;  %3759 = vperm.xlu1 %6046, %v12323_v29   ;;  %v12326_v4 = vld [vmem:[#allocation212_spill] sm:$0xff]  ;;  %v12331_v51 = vld [vmem:[#allocation123_spill] sm:$0xff] }
 0x587   :  { %v3158_v63 = vmul.f32 %v9821_v41, %v12326_v4  ;;  %v4108_v24 = vmax.f32 %v3972_v9, 0.0  ;;  %v12337_v4 = vld [vmem:[#allocation278_spill] sm:$0xff] }
 0x588   :  { %v4107_v31 = vmax.f32 %v3971_v46, 0.0  ;;  %v3161_v46 = vmul.f32 %v12333_v44, %v12332_v54 }
 0x589   :  { %v10328_v19 = vpop.permute.xlu0 %3524  ;;  %v3460_v1 = vpop.permute.xlu1 %3459  ;;  %v3974_v42 = vadd.f32 %v10262_v56, %v3158_v63 }
 0x58a   :  { %3834 = vperm.xlu0 %6047, %v12079_v2   ;;  %v10333_v49 = vpack.c.bf16 %v4107_v31, %v4106_v40  ;;  %v3973_v18 = vadd.f32 %v3460_v1, %v3157_v3  ;;  %3769 = vperm.xlu1 %6046, %v12327_v50   ;;  %v12330_v2 = vld [vmem:[#allocation214_spill] sm:$0xff]  ;;  %v12335_v31 = vld [vmem:[#allocation128_spill] sm:$0xff]  ;;  %v12336_v1 = vld [vmem:[#allocation217_spill] sm:$0xff] }
 0x58b   :  { %v3160_v41 = vmul.f32 %v9829_v37, %v12330_v2  ;;  %v4110_v29 = vmax.f32 %v3974_v42, 0.0  ;;  %v3163_v63 = vmul.f32 %v12337_v4, %v12336_v1  ;;  %v12342_v2 = vld [vmem:[#allocation98_spill] sm:$0xff] }
 0x58c   :  { %v4109_v57 = vmax.f32 %v3973_v18, 0.0 }
 0x58d   :  { %v10339_v25 = vpop.permute.xlu0 %3534  ;;  %v3470_v10 = vpop.permute.xlu1 %3469  ;;  %v3976_v56 = vadd.f32 %v10273_v62, %v3160_v41 }
 0x58e   :  { %3844 = vperm.xlu0 %6047, %v12084_v5   ;;  %v10344_v14 = vpack.c.bf16 %v4109_v57, %v4108_v24  ;;  %v3975_v11 = vadd.f32 %v3470_v10, %v3159_v39  ;;  %3779 = vperm.xlu1 %6046, %v12331_v51   ;;  %v12334_v5 = vld [vmem:[#allocation216_spill] sm:$0xff]  ;;  %v12340_v57 = vld [vmem:[#allocation133_spill] sm:$0xff] }
 0x58f   :  { %v3162_v37 = vmul.f32 %v9837_v27, %v12334_v5  ;;  %v4112_v18 = vmax.f32 %v3976_v56, 0.0  ;;  %v12339_v39 = vld [vmem:[#allocation116_spill] sm:$0xff]  ;;  %v12341_v10 = vld [vmem:[#allocation221_spill] sm:$0xff]  ;;  %v12346_v5 = vld [vmem:[#allocation223_spill] sm:$0xff] }
 0x590   :  { %v4111_v32 = vmax.f32 %v3975_v11, 0.0  ;;  %v3165_v41 = vmul.f32 %v12342_v2, %v12341_v10 }
 0x591   :  { %v10350_v21 = vpop.permute.xlu0 %3544  ;;  %v3480_v3 = vpop.permute.xlu1 %3479  ;;  %v3978_v62 = vadd.f32 %v10284_v23, %v3162_v37  ;;  %v12347_v37 = vld [vmem:[#allocation281_spill] sm:$0xff] }
 0x592   :  { %3854 = vperm.xlu0 %6047, %v12088_v7   ;;  %v10355_v40 = vpack.c.bf16 %v4111_v32, %v4110_v29  ;;  %v3977_v9 = vadd.f32 %v3480_v3, %v3161_v46  ;;  %3789 = vperm.xlu1 %6046, %v12335_v31   ;;  %v12338_v7 = vld [vmem:[#allocation219_spill] sm:$0xff]  ;;  %v12344_v46 = vld [vmem:[#allocation126_spill] sm:$0xff] }
 0x593   :  { %v3164_v27 = vmul.f32 %v12339_v39, %v12338_v7  ;;  %v4114_v11 = vmax.f32 %v3978_v62, 0.0  ;;  %v12345_v3 = vld [vmem:[#allocation138_spill] sm:$0xff]  ;;  %v12350_v7 = vld [vmem:[#allocation104_spill] sm:$0xff]  ;;  %v12351_v39 = vld [vmem:[#allocation225_spill] sm:$0xff] }
 0x594   :  { %v4113_v50 = vmax.f32 %v3977_v9, 0.0  ;;  %v3167_v9 = vmul.f32 %v12347_v37, %v12346_v5 }
 0x595   :  { %v10361_v47 = vpop.permute.xlu0 %3554  ;;  %v3490_v58 = vpop.permute.xlu1 %3489  ;;  %v3980_v23 = vadd.f32 %v10295_v43, %v3164_v27  ;;  %v12352_v27 = vld [vmem:[#allocation103_spill] sm:$0xff] }
 0x596   :  { %3864 = vperm.xlu0 %6047, %v12092_v15   ;;  %v10366_v24 = vpack.c.bf16 %v4113_v50, %v4112_v18  ;;  %v3979_v42 = vadd.f32 %v3490_v58, %v3163_v63  ;;  %3799 = vperm.xlu1 %6046, %v12340_v57   ;;  %v12343_v15 = vld [vmem:[#allocation222_spill] sm:$0xff]  ;;  %v12349_v18 = vld [vmem:[#allocation136_spill] sm:$0xff] }
 0x597   :  { %v3166_v29 = vmul.f32 %v12344_v46, %v12343_v15  ;;  %v4116_v31 = vmax.f32 %v3980_v23, 0.0  ;;  %v12355_v15 = vld [vmem:[#allocation108_spill] sm:$0xff]  ;;  %v12356_v46 = vld [vmem:[#allocation227_spill] sm:$0xff] }
 0x598   :  { %v4115_v51 = vmax.f32 %v3979_v42, 0.0  ;;  %v3169_v42 = vmul.f32 %v12352_v27, %v12351_v39 }
 0x599   :  { %v10372_v54 = vpop.permute.xlu0 %3564  ;;  %v3500_v44 = vpop.permute.xlu1 %3499  ;;  %v3982_v43 = vadd.f32 %v10306_v38, %v3166_v29  ;;  %v12357_v29 = vld [vmem:[#allocation220_spill] sm:$0xff] }
 0x59a   :  { %3874 = vperm.xlu0 %6047, %v12096_v26   ;;  %v10377_v56 = vpack.c.bf16 %v4115_v51, %v4114_v11  ;;  %v3981_v32 = vadd.f32 %v3500_v44, %v3165_v41  ;;  %3809 = vperm.xlu1 %6046, %v12345_v3   ;;  %v12348_v26 = vld [vmem:[#allocation224_spill] sm:$0xff]  ;;  %v12354_v11 = vld [vmem:[#allocation159_spill] sm:$0xff] }
 0x59b   :  { %v3168_v62 = vmul.f32 %v12349_v18, %v12348_v26  ;;  %v4118_v57 = vmax.f32 %v3982_v43, 0.0  ;;  %v12360_v26 = vld [vmem:[#allocation112_spill] sm:$0xff]  ;;  %v12361_v18 = vld [vmem:[#allocation229_spill] sm:$0xff] }
 0x59c   :  { %v4117_v1 = vmax.f32 %v3981_v32, 0.0  ;;  %v3171_v32 = vmul.f32 %v12357_v29, %v12356_v46 }
 0x59d   :  { %v10383_v4 = vpop.permute.xlu0 %3574  ;;  %v3510_v63 = vpop.permute.xlu1 %3509  ;;  %v3984_v38 = vadd.f32 %v10317_v35, %v3168_v62  ;;  %v12362_v62 = vld [vmem:[#allocation107_spill] sm:$0xff] }
 0x59e   :  { %3884 = vperm.xlu0 %6047, %v12099_v22   ;;  %v10388_v50 = vpack.c.bf16 %v4117_v1, %v4116_v31  ;;  %v3983_v58 = vadd.f32 %v3510_v63, %v3167_v9  ;;  %3819 = vperm.xlu1 %6046, %v12350_v7   ;;  %v12353_v22 = vld [vmem:[#allocation226_spill] sm:$0xff]  ;;  %v12359_v31 = vld [vmem:[#allocation161_spill] sm:$0xff] }
 0x59f   :  { %v3170_v23 = vmul.f32 %v12354_v11, %v12353_v22  ;;  %v4120_v3 = vmax.f32 %v3984_v38, 0.0  ;;  %v12365_v22 = vld [vmem:[#allocation115_spill] sm:$0xff] }
 0x5a0   :  { %v4119_v10 = vmax.f32 %v3983_v58, 0.0  ;;  %v3173_v58 = vmul.f32 %v12362_v62, %v12361_v18  ;;  %v12366_v11 = vld [vmem:[#allocation231_spill] sm:$0xff] }
 0x5a1   :  { %v10394_v2 = vpop.permute.xlu0 %3584  ;;  %v3520_v41 = vpop.permute.xlu1 %3519  ;;  %v3986_v35 = vadd.f32 %v10328_v19, %v3170_v23  ;;  %v12367_v23 = vld [vmem:[#allocation111_spill] sm:$0xff] }
 0x5a2   :  { %3894 = vperm.xlu0 %6047, %v12103_v30   ;;  %v10399_v51 = vpack.c.bf16 %v4119_v10, %v4118_v57  ;;  %v3985_v44 = vadd.f32 %v3520_v41, %v3169_v42  ;;  %3829 = vperm.xlu1 %6046, %v12355_v15   ;;  %v12358_v30 = vld [vmem:[#allocation228_spill] sm:$0xff]  ;;  %v12364_v57 = vld [vmem:[#allocation163_spill] sm:$0xff] }
 0x5a3   :  { %v3172_v43 = vmul.f32 %v12359_v31, %v12358_v30  ;;  %v4122_v7 = vmax.f32 %v3986_v35, 0.0  ;;  %v12370_v35 = vld [vmem:[#allocation117_spill] sm:$0xff]  ;;  %v12371_v31 = vld [vmem:[#allocation119_spill] sm:$0xff] }
 0x5a4   :  { %v4121_v5 = vmax.f32 %v3985_v44, 0.0  ;;  %v3175_v44 = vmul.f32 %v12367_v23, %v12366_v11 }
 0x5a5   :  { %v10405_v37 = vpop.permute.xlu0 %3594  ;;  %v3530_v9 = vpop.permute.xlu1 %3529  ;;  %v3988_v19 = vadd.f32 %v10339_v25, %v3172_v43  ;;  %v12372_v43 = vld [vmem:[#allocation169_spill] sm:$0xff] }
 0x5a6   :  { %3904 = vperm.xlu0 %6047, %v12107_v20   ;;  %v10410_v1 = vpack.c.bf16 %v4121_v5, %v4120_v3  ;;  %v3987_v63 = vadd.f32 %v3530_v9, %v3171_v32  ;;  %3839 = vperm.xlu1 %6046, %v12360_v26   ;;  %v12363_v20 = vld [vmem:[#allocation230_spill] sm:$0xff]  ;;  %v12368_v3 = vld [vmem:[#allocation156_spill] sm:$0xff] }
 0x5a7   :  { %v3174_v38 = vmul.f32 %v12364_v57, %v12363_v20  ;;  %v4124_v15 = vmax.f32 %v3988_v19, 0.0  ;;  %v12374_v19 = vld [vmem:[#allocation232_spill] sm:$0xff] }
 0x5a8   :  { %v4123_v39 = vmax.f32 %v3987_v63, 0.0  ;;  %v12373_v63 = vld [vmem:[#allocation121_spill] sm:$0xff] }
 0x5a9   :  { %v10416_v27 = vpop.permute.xlu0 %3604  ;;  %v3540_v42 = vpop.permute.xlu1 %3539  ;;  %v3990_v25 = vadd.f32 %v10350_v21, %v3174_v38  ;;  %v3177_v26 = vmul.f32 %v12373_v63, %v12372_v43  ;;  %v12376_v38 = vld [vmem:[#allocation122_spill] sm:$0xff] }
 0x5aa   :  { %3914 = vperm.xlu0 %6047, %v12111_v16   ;;  %v10421_v10 = vpack.c.bf16 %v4123_v39, %v4122_v7  ;;  %v3989_v41 = vadd.f32 %v3540_v42, %v3173_v58  ;;  %3849 = vperm.xlu1 %6046, %v12365_v22   ;;  %v12369_v16 = vld [vmem:[#allocation168_spill] sm:$0xff]  ;;  %v12378_v22 = vld [vmem:[#allocation131_spill] sm:$0xff] }
 0x5ab   :  { %v3176_v5 = vmul.f32 %v12370_v35, %v12369_v16  ;;  %v4126_v18 = vmax.f32 %v3990_v25, 0.0  ;;  %v12375_v39 = vld [vmem:[#allocation124_spill] sm:$0xff] }
 0x5ac   :  { %v4125_v46 = vmax.f32 %v3989_v41, 0.0  ;;  %v3178_v42 = vmul.f32 %v12375_v39, %v12374_v19  ;;  %v12377_v41 = vld [vmem:[#allocation233_spill] sm:$0xff] }
 0x5ad   :  { %v10427_v29 = vpop.permute.xlu0 %3614  ;;  %v3550_v32 = vpop.permute.xlu1 %3549  ;;  %v3992_v21 = vadd.f32 %v10361_v47, %v3176_v5  ;;  %v3179_v11 = vmul.f32 %v12378_v22, %v12377_v41  ;;  %v12381_v5 = vld [vmem:[#allocation125_spill] sm:$0xff]  ;;  %v12388_v41 = vld [vmem:[#allocation106_spill] sm:$0xff] }
 0x5ae   :  { %3924 = vperm.xlu0 %6047, %v12368_v3   ;;  %v10432_v9 = vpack.c.bf16 %v4125_v46, %v4124_v15  ;;  %v3991_v30 = vadd.f32 %v3550_v32, %v3175_v44  ;;  %3859 = vperm.xlu1 %6046, %v12371_v31   ;;  %v3994_v44 = vadd.f32 %v10372_v54, %v3178_v42  ;;  %v12379_v46 = vld [vmem:[#allocation234_spill] sm:$0xff]  ;;  %v12380_v32 = vld [vmem:[#allocation127_spill] sm:$0xff] }
 0x5af   :  { %v4128_v23 = vmax.f32 %v3992_v21, 0.0  ;;  %v3180_v3 = vmul.f32 %v12380_v32, %v12379_v46  ;;  %v12383_v31 = vld [vmem:[#allocation102_spill] sm:$0xff] }
 0x5b0   :  { %v4127_v62 = vmax.f32 %v3991_v30, 0.0  ;;  %v12382_v30 = vld [vmem:[#allocation235_spill] sm:$0xff]  ;;  %v4130_v63 = vmax.f32 %v3994_v44, 0.0  ;;  %v12390_v46 = vld [vmem:[#allocation146_spill] sm:$0xff] }
 0x5b1   :  { %v10438_v58 = vpop.permute.xlu0 %3624  ;;  %v3560_v7 = vpop.permute.xlu1 %3559  ;;  %v3181_v43 = vmul.f32 %v12383_v31, %v12382_v30  ;;  %v12393_v30 = vld [vmem:[#allocation239_spill] sm:$0xff]  ;;  %v12394_v31 = vld [vmem:[#allocation110_spill] sm:$0xff] }
 0x5b2   :  { %v10442_v20 = vpack.c.bf16 %v4127_v62, %v4126_v18  ;;  %v3993_v57 = vadd.f32 %v3560_v7, %v3177_v26  ;;  %3869 = vperm.xlu1 %6046, %v12376_v38   ;;  %v3996_v26 = vadd.f32 %v10383_v4, %v3180_v3  ;;  %v12384_v62 = vld [vmem:[#allocation236_spill] sm:$0xff]  ;;  %v12385_v7 = vld [vmem:[#allocation141_spill] sm:$0xff] }
 0x5b3   :  { %v3182_v19 = vmul.f32 %v12385_v7, %v12384_v62  ;;  %v12387_v38 = vld [vmem:[#allocation237_spill] sm:$0xff]  ;;  %v12395_v62 = vld [vmem:[#allocation240_spill] sm:$0xff]  ;;  %v12396_v7 = vld [vmem:[#allocation151_spill] sm:$0xff] }
 0x5b4   :  { %v4129_v15 = vmax.f32 %v3993_v57, 0.0  ;;  %v12386_v57 = vld [vmem:[#allocation129_spill] sm:$0xff]  ;;  %v3183_v22 = vmul.f32 %v12388_v41, %v12387_v38  ;;  %v12398_v38 = vld [vmem:[#allocation148_spill] sm:$0xff] }
 0x5b5   :  { %v10448_v47 = vpop.permute.xlu0 %3634  ;;  %v3570_v25 = vpop.permute.xlu1 %3569  ;;  %v12399_v41 = vld [vmem:[#allocation241_spill] sm:$0xff] }
 0x5b6   :  { %v10452_v16 = vpack.c.bf16 %v4129_v15, %v4128_v23  ;;  %v3995_v35 = vadd.f32 %v3570_v25, %v3179_v11  ;;  %3879 = vperm.xlu1 %6046, %v12381_v5   ;;  %v4132_v11 = vmax.f32 %v3996_v26, 0.0  ;;  %v3998_v23 = vadd.f32 %v10394_v2, %v3182_v19  ;;  %v12389_v25 = vld [vmem:[#allocation238_spill] sm:$0xff]  ;;  %v12392_v5 = vld [vmem:[#allocation143_spill] sm:$0xff] }
 0x5b7   :  { %v3184_v32 = vmul.f32 %v12390_v46, %v12389_v25  ;;  %v3186_v19 = vmul.f32 %v12396_v7, %v12395_v62  ;;  %v12401_v46 = vld [vmem:[#allocation242_spill] sm:$0xff] }
 0x5b8   :  { %v4131_v18 = vmax.f32 %v3995_v35, 0.0 }
 0x5b9   :  { %v10458_v54 = vpop.permute.xlu0 %3644  ;;  %v3580_v21 = vpop.permute.xlu1 %3579  ;;  %v4000_v26 = vadd.f32 %v10405_v37, %v3184_v32  ;;  %v12402_v32 = vld [vmem:[#allocation317_spill] sm:$0xff] }
 0x5ba   :  { %v10462_v39 = vpack.c.bf16 %v4131_v18, %v4130_v63  ;;  %v3997_v42 = vadd.f32 %v3580_v21, %v3181_v43  ;;  %3889 = vperm.xlu1 %6046, %v12386_v57   ;;  %v3185_v43 = vmul.f32 %v12394_v31, %v12393_v30  ;;  %v4134_v63 = vmax.f32 %v3998_v23, 0.0  ;;  %v12404_v31 = vld [vmem:[#allocation153_spill] sm:$0xff] }
 0x5bb   :  { %v4002_v23 = vadd.f32 %v10416_v27, %v3186_v19  ;;  %v12407_v19 = vld [vmem:[#allocation244_spill] sm:$0xff] }
 0x5bc   :  { %v4133_v44 = vmax.f32 %v3997_v42, 0.0  ;;  %5805 = vmatprep.subr.bf16.mxu1 %v10462_v39 }
 0x5bd   :  { %v10468_v4 = vpop.permute.xlu0 %3654  ;;  %v3590_v15 = vpop.permute.xlu1 %3589 }
 0x5be   :  { %v10472_v3 = vpack.c.bf16 %v4133_v44, %v4132_v11  ;;  %v3999_v35 = vadd.f32 %v3590_v15, %v3183_v22  ;;  %3899 = vperm.xlu1 %6046, %v12392_v5   ;;  %v12400_v22 = vld [vmem:[#allocation113_spill] sm:$0xff]  ;;  %v4136_v44 = vmax.f32 %v4000_v26, 0.0 }
 0x5bf   :  { %v3187_v11 = vmul.f32 %v12400_v22, %v12399_v41 }
 0x5c0   :  { %12391 = vst [vmem:[#allocation165_spill] sm:$0xff] %v10472_v3  ;;  %v4135_v18 = vmax.f32 %v3999_v35, 0.0  ;;  %v3188_v35 = vmul.f32 %v12402_v32, %v12401_v46 }
 0x5c1   :  { %v10478_v2 = vpop.permute.xlu0 %3664  ;;  %v3600_v21 = vpop.permute.xlu1 %3599 }
 0x5c2   :  { %v10482_v42 = vpack.c.bf16 %v4135_v18, %v4134_v63  ;;  %v4001_v57 = vadd.f32 %v3600_v21, %v3185_v43  ;;  %3909 = vperm.xlu1 %6046, %v12398_v38   ;;  %v12405_v43 = vld [vmem:[#allocation243_spill] sm:$0xff]  ;;  %v12406_v63 = vld [vmem:[#allocation120_spill] sm:$0xff]  ;;  %v4138_v21 = vmax.f32 %v4002_v23, 0.0  ;;  %v4004_v26 = vadd.f32 %v10427_v29, %v3188_v35  ;;  %v12413_v35 = vld [vmem:[#allocation246_spill] sm:$0xff] }
 0x5c3   :  { %v3189_v18 = vmul.f32 %v12406_v63, %v12405_v43 }
 0x5c4   :  { %12397 = vst [vmem:[#allocation60_spill] sm:$0xff] %v10482_v42  ;;  %v4137_v15 = vmax.f32 %v4001_v57, 0.0  ;;  %v12408_v57 = vld [vmem:[#allocation318_spill] sm:$0xff]  ;;  %v4140_v46 = vmax.f32 %v4004_v26, 0.0  ;;  %v12421_v42 = vld [vmem:[#allocation249_spill] sm:$0xff] }
 0x5c5   :  { %v10488_v37 = vpop.permute.xlu0 %3674  ;;  %v3610_v25 = vpop.permute.xlu1 %3609  ;;  %v3190_v38 = vmul.f32 %v12408_v57, %v12407_v19 }
 0x5c6   :  { %v10492_v5 = vpack.c.bf16 %v4137_v15, %v4136_v44  ;;  %v4003_v30 = vadd.f32 %v3610_v25, %v3187_v11  ;;  %3919 = vperm.xlu1 %6046, %v12404_v31   ;;  %v12410_v44 = vld [vmem:[#allocation157_spill] sm:$0xff]  ;;  %v12412_v15 = vld [vmem:[#allocation316_spill] sm:$0xff] }
 0x5c7   :  { %v12411_v11 = vld [vmem:[#allocation245_spill] sm:$0xff]  ;;  %v4006_v32 = vadd.f32 %v10438_v58, %v3190_v38  ;;  %v12419_v58 = vld [vmem:[#allocation11_spill] sm:$0xff] }
 0x5c8   :  { %12403 = vst [vmem:[#allocation170_spill] sm:$0xff] %v10492_v5  ;;  %v4139_v62 = vmax.f32 %v4003_v30, 0.0  ;;  %v3191_v25 = vmul.f32 %v12412_v15, %v12411_v11  ;;  %v12414_v30 = vld [vmem:[#allocation7_spill] sm:$0xff]  ;;  %v12418_v15 = vld [vmem:[#allocation248_spill] sm:$0xff] }
 0x5c9   :  { %v3685_v27 = vpop.permute.xlu0 %3684  ;;  %v3620_v7 = vpop.permute.xlu1 %3619  ;;  %v3192_v43 = vmul.f32 %v12414_v30, %v12413_v35  ;;  %v3194_v38 = vmul.f32 %v12419_v58, %v12418_v15  ;;  %v12422_v35 = vld [vmem:[#allocation15_spill] sm:$0xff]  ;;  %v12428_v58 = vld [vmem:[#allocation252_spill] sm:$0xff] }
 0x5ca   :  { %v10500_v41 = vpack.c.bf16 %v4139_v62, %v4138_v21  ;;  %v4005_v22 = vadd.f32 %v3620_v7, %v3189_v18  ;;  %3929 = vperm.xlu1 %6046, %v12410_v44   ;;  %v12416_v21 = vld [vmem:[#allocation247_spill] sm:$0xff]  ;;  %v12417_v62 = vld [vmem:[#allocation9_spill] sm:$0xff]  ;;  %v4142_v7 = vmax.f32 %v4006_v32, 0.0 }
 0x5cb   :  { %v3193_v18 = vmul.f32 %v12417_v62, %v12416_v21  ;;  %v4008_v57 = vadd.f32 %v10448_v47, %v3192_v43  ;;  %v12423_v21 = vld [vmem:[#allocation250_spill] sm:$0xff]  ;;  %v12424_v47 = vld [vmem:[#allocation13_spill] sm:$0xff]  ;;  %v12426_v5 = vld [vmem:[#allocation251_spill] sm:$0xff] }
 0x5cc   :  { %12409 = vst [vmem:[#allocation304_spill] sm:$0xff] %v10500_v41  ;;  %v4141_v23 = vmax.f32 %v4005_v22, 0.0  ;;  %v3196_v43 = vmul.f32 %v12424_v47, %v12423_v21  ;;  %v12427_v15 = vld [vmem:[#allocation19_spill] sm:$0xff]  ;;  %v12430_v41 = vld [vmem:[#allocation253_spill] sm:$0xff]  ;;  %v12432_v47 = vld [vmem:[#allocation254_spill] sm:$0xff] }
 0x5cd   :  { %v3695_v31 = vpop.permute.xlu0 %3694  ;;  %v3630_v29 = vpop.permute.xlu1 %3629  ;;  %v12431_v21 = vld [vmem:[#allocation23_spill] sm:$0xff] }
 0x5ce   :  { %v10508_v63 = vpack.c.bf16 %v4141_v23, %v4140_v46  ;;  %v4007_v19 = vadd.f32 %v3630_v29, %v3191_v25  ;;  %v3195_v46 = vmul.f32 %v12422_v35, %v12421_v42  ;;  %v4144_v23 = vmax.f32 %v4008_v57, 0.0 }
 0x5cf   :  { %v4010_v25 = vadd.f32 %v10458_v54, %v3194_v38  ;;  %v12429_v54 = vld [vmem:[#allocation17_spill] sm:$0xff] }
 0x5d0   :  { %12415 = vst [vmem:[#allocation64_spill] sm:$0xff] %v10508_v63  ;;  %v4143_v44 = vmax.f32 %v4007_v19, 0.0  ;;  %v12435_v63 = vld [vmem:[#allocation255_spill] sm:$0xff] }
 0x5d1   :  { %v3705_v11 = vpop.permute.xlu0 %3704  ;;  %v3640_v26 = vpop.permute.xlu1 %3639 }
 0x5d2   :  { %v10515_v22 = vpack.c.bf16 %v4143_v44, %v4142_v7  ;;  %v4009_v3 = vadd.f32 %v3640_v26, %v3193_v18  ;;  %v3197_v7 = vmul.f32 %v12427_v15, %v12426_v5  ;;  %v4146_v44 = vmax.f32 %v4010_v25, 0.0 }
 0x5d3   :  { %v4012_v18 = vadd.f32 %v10468_v4, %v3196_v43  ;;  %v12433_v4 = vld [vmem:[#allocation21_spill] sm:$0xff] }
 0x5d4   :  { %12420 = vst [vmem:[#allocation172_spill] sm:$0xff] %v10515_v22  ;;  %v4145_v29 = vmax.f32 %v4009_v3, 0.0  ;;  %v3198_v3 = vmul.f32 %v12429_v54, %v12428_v58  ;;  %v3200_v43 = vmul.f32 %v12433_v4, %v12432_v47  ;;  %v12436_v58 = vld [vmem:[#allocation27_spill] sm:$0xff]  ;;  %v12437_v54 = vld [vmem:[#allocation256_spill] sm:$0xff]  ;;  %v12440_v22 = vld [vmem:[#allocation257_spill] sm:$0xff] }
 0x5d5   :  { %v3715_v30 = vpop.permute.xlu0 %3714  ;;  %v3650_v32 = vpop.permute.xlu1 %3649  ;;  %v12441_v47 = vld [vmem:[#allocation31_spill] sm:$0xff] }
 0x5d6   :  { %v10522_v19 = vpack.c.bf16 %v4145_v29, %v4144_v23  ;;  %v4011_v62 = vadd.f32 %v3650_v32, %v3195_v46  ;;  %v3199_v23 = vmul.f32 %v12431_v21, %v12430_v41  ;;  %v4148_v29 = vmax.f32 %v4012_v18, 0.0 }
 0x5d7   :  { %v4014_v46 = vadd.f32 %v10478_v2, %v3198_v3  ;;  %v12438_v2 = vld [vmem:[#allocation25_spill] sm:$0xff] }
 0x5d8   :  { %12425 = vst [vmem:[#allocation307_spill] sm:$0xff] %v10522_v19  ;;  %v4147_v26 = vmax.f32 %v4011_v62, 0.0  ;;  %v3202_v3 = vmul.f32 %v12438_v2, %v12437_v54  ;;  %v12446_v19 = vld [vmem:[#allocation35_spill] sm:$0xff] }
 0x5d9   :  { %v3725_v42 = vpop.permute.xlu0 %3724  ;;  %v3660_v57 = vpop.permute.xlu1 %3659 }
 0x5da   :  { %v10529_v38 = vpack.c.bf16 %v4147_v26, %v4146_v44  ;;  %v4013_v35 = vadd.f32 %v3660_v57, %v3197_v7  ;;  %v3201_v44 = vmul.f32 %v12436_v58, %v12435_v63  ;;  %v4150_v26 = vmax.f32 %v4014_v46, 0.0  ;;  %v12442_v46 = vld [vmem:[#allocation258_spill] sm:$0xff]  ;;  %v12443_v58 = vld [vmem:[#allocation29_spill] sm:$0xff] }
 0x5db   :  { %v4016_v7 = vadd.f32 %v10488_v37, %v3200_v43  ;;  %v3204_v37 = vmul.f32 %v12443_v58, %v12442_v46 }
 0x5dc   :  { %v4149_v32 = vmax.f32 %v4013_v35, 0.0 }
 0x5dd   :  { %v3735_v5 = vpop.permute.xlu0 %3734  ;;  %v3670_v25 = vpop.permute.xlu1 %3669 }
 0x5de   :  { %v10536_v62 = vpack.c.bf16 %v4149_v32, %v4148_v29  ;;  %v4015_v15 = vadd.f32 %v3670_v25, %v3199_v23  ;;  %v3203_v29 = vmul.f32 %v12441_v47, %v12440_v22  ;;  %v4152_v32 = vmax.f32 %v4016_v7, 0.0  ;;  %v12447_v22 = vld [vmem:[#allocation260_spill] sm:$0xff]  ;;  %v12448_v7 = vld [vmem:[#allocation33_spill] sm:$0xff] }
 0x5df   :  { %v4018_v23 = vadd.f32 %v3685_v27, %v3202_v3  ;;  %v3206_v27 = vmul.f32 %v12448_v7, %v12447_v22  ;;  %v12450_v47 = vld [vmem:[#allocation261_spill] sm:$0xff] }
 0x5e0   :  { %12434 = vst [vmem:[#allocation68_spill] sm:$0xff] %v10536_v62  ;;  %v4151_v57 = vmax.f32 %v4015_v15, 0.0  ;;  %v12445_v62 = vld [vmem:[#allocation259_spill] sm:$0xff] }
 0x5e1   :  { %v3745_v41 = vpop.permute.xlu0 %3744  ;;  %v3680_v18 = vpop.permute.xlu1 %3679  ;;  %v3205_v54 = vmul.f32 %v12446_v19, %v12445_v62  ;;  %v12452_v19 = vld [vmem:[#allocation262_spill] sm:$0xff]  ;;  %v12453_v62 = vld [vmem:[#allocation37_spill] sm:$0xff] }
 0x5e2   :  { %v10543_v35 = vpack.c.bf16 %v4151_v57, %v4150_v26  ;;  %v4017_v21 = vadd.f32 %v3680_v18, %v3201_v44  ;;  %v4154_v26 = vmax.f32 %v4018_v23, 0.0  ;;  %v4020_v57 = vadd.f32 %v3695_v31, %v3204_v37 }
 0x5e3   :  { %v3208_v31 = vmul.f32 %v12453_v62, %v12452_v19 }
 0x5e4   :  { %12439 = vst [vmem:[#allocation173_spill] sm:$0xff] %v10543_v35  ;;  %v4153_v25 = vmax.f32 %v4017_v21, 0.0  ;;  %v12451_v35 = vld [vmem:[#allocation39_spill] sm:$0xff] }
 0x5e5   :  { %v3755_v4 = vpop.permute.xlu0 %3754  ;;  %v3690_v63 = vpop.permute.xlu1 %3689  ;;  %v3207_v46 = vmul.f32 %v12451_v35, %v12450_v47  ;;  %v12457_v35 = vld [vmem:[#allocation264_spill] sm:$0xff]  ;;  %v12460_v47 = vld [vmem:[#allocation265_spill] sm:$0xff] }
 0x5e6   :  { %v10549_v43 = vpack.c.bf16 %v4153_v25, %v4152_v32  ;;  %v4019_v15 = vadd.f32 %v3690_v63, %v3203_v29  ;;  %v4156_v32 = vmax.f32 %v4020_v57, 0.0  ;;  %v4022_v25 = vadd.f32 %v3705_v11, %v3206_v27  ;;  %v12458_v57 = vld [vmem:[#allocation41_spill] sm:$0xff] }
 0x5e7   :  { %v3210_v11 = vmul.f32 %v12458_v57, %v12457_v35 }
 0x5e8   :  { %12444 = vst [vmem:[#allocation174_spill] sm:$0xff] %v10549_v43  ;;  %v4155_v44 = vmax.f32 %v4019_v15, 0.0  ;;  %v12455_v15 = vld [vmem:[#allocation263_spill] sm:$0xff] }
 0x5e9   :  { %v3765_v18 = vpop.permute.xlu0 %3764  ;;  %v3700_v2 = vpop.permute.xlu1 %3699  ;;  %v12456_v43 = vld [vmem:[#allocation43_spill] sm:$0xff] }
 0x5ea   :  { %v10555_v3 = vpack.c.bf16 %v4155_v44, %v4154_v26  ;;  %v4021_v21 = vadd.f32 %v3700_v2, %v3205_v54  ;;  %v3209_v22 = vmul.f32 %v12456_v43, %v12455_v15  ;;  %v4158_v26 = vmax.f32 %v4022_v25, 0.0  ;;  %v12462_v43 = vld [vmem:[#allocation266_spill] sm:$0xff]  ;;  %v12463_v25 = vld [vmem:[#allocation45_spill] sm:$0xff]  ;;  %v12465_v15 = vld [vmem:[#allocation267_spill] sm:$0xff] }
 0x5eb   :  { %v4024_v44 = vadd.f32 %v3715_v30, %v3208_v31  ;;  %v3212_v30 = vmul.f32 %v12463_v25, %v12462_v43  ;;  %v12471_v25 = vld [vmem:[#allocation270_spill] sm:$0xff] }
 0x5ec   :  { %12449 = vst [vmem:[#allocation73_spill] sm:$0xff] %v10555_v3  ;;  %v4157_v29 = vmax.f32 %v4021_v21, 0.0  ;;  %v12461_v3 = vld [vmem:[#allocation47_spill] sm:$0xff] }
 0x5ed   :  { %v3775_v63 = vpop.permute.xlu0 %3774  ;;  %v3710_v58 = vpop.permute.xlu1 %3709  ;;  %v3211_v19 = vmul.f32 %v12461_v3, %v12460_v47  ;;  %v12467_v3 = vld [vmem:[#allocation268_spill] sm:$0xff]  ;;  %v12469_v47 = vld [vmem:[#allocation269_spill] sm:$0xff] }
 0x5ee   :  { %v10561_v23 = vpack.c.bf16 %v4157_v29, %v4156_v32  ;;  %v4023_v37 = vadd.f32 %v3710_v58, %v3207_v46  ;;  %v4160_v32 = vmax.f32 %v4024_v44, 0.0  ;;  %v4026_v29 = vadd.f32 %v3725_v42, %v3210_v11  ;;  %v12468_v44 = vld [vmem:[#allocation49_spill] sm:$0xff] }
 0x5ef   :  { %v3214_v42 = vmul.f32 %v12468_v44, %v12467_v3  ;;  %v12476_v44 = vld [vmem:[#allocation273_spill] sm:$0xff] }
 0x5f0   :  { %12454 = vst [vmem:[#allocation175_spill] sm:$0xff] %v10561_v23  ;;  %v4159_v54 = vmax.f32 %v4023_v37, 0.0  ;;  %v12466_v23 = vld [vmem:[#allocation51_spill] sm:$0xff] }
 0x5f1   :  { %v3785_v2 = vpop.permute.xlu0 %3784  ;;  %v3720_v7 = vpop.permute.xlu1 %3719  ;;  %v3213_v35 = vmul.f32 %v12466_v23, %v12465_v15  ;;  %v12472_v23 = vld [vmem:[#allocation53_spill] sm:$0xff]  ;;  %v12474_v15 = vld [vmem:[#allocation271_spill] sm:$0xff] }
 0x5f2   :  { %v10567_v27 = vpack.c.bf16 %v4159_v54, %v4158_v26  ;;  %v4025_v21 = vadd.f32 %v3720_v7, %v3209_v22  ;;  %v4162_v26 = vmax.f32 %v4026_v29, 0.0  ;;  %v4028_v54 = vadd.f32 %v3735_v5, %v3212_v30 }
 0x5f3   :  { %v3216_v29 = vmul.f32 %v12472_v23, %v12471_v25 }
 0x5f4   :  { %12459 = vst [vmem:[#allocation176_spill] sm:$0xff] %v10567_v27  ;;  %v4161_v46 = vmax.f32 %v4025_v21, 0.0  ;;  %v12470_v27 = vld [vmem:[#allocation55_spill] sm:$0xff] }
 0x5f5   :  { %v3795_v58 = vpop.permute.xlu0 %3794  ;;  %v3730_v62 = vpop.permute.xlu1 %3729  ;;  %v3215_v43 = vmul.f32 %v12470_v27, %v12469_v47  ;;  %v12477_v27 = vld [vmem:[#allocation57_spill] sm:$0xff]  ;;  %v12480_v47 = vld [vmem:[#allocation63_spill] sm:$0xff] }
 0x5f6   :  { %v10573_v31 = vpack.c.bf16 %v4161_v46, %v4160_v32  ;;  %v4027_v37 = vadd.f32 %v3730_v62, %v3211_v19  ;;  %v4164_v32 = vmax.f32 %v4028_v54, 0.0  ;;  %v4030_v46 = vadd.f32 %v3745_v41, %v3214_v42 }
 0x5f7   :  { %v3218_v54 = vmul.f32 %v12477_v27, %v12476_v44  ;;  %v12486_v27 = vld [vmem:[#allocation279_spill] sm:$0xff] }
 0x5f8   :  { %12464 = vst [vmem:[#allocation77_spill] sm:$0xff] %v10573_v31  ;;  %v4163_v22 = vmax.f32 %v4027_v37, 0.0  ;;  %v12475_v31 = vld [vmem:[#allocation59_spill] sm:$0xff] }
 0x5f9   :  { %v3805_v7 = vpop.permute.xlu0 %3804  ;;  %v3740_v57 = vpop.permute.xlu1 %3739  ;;  %v3217_v3 = vmul.f32 %v12475_v31, %v12474_v15  ;;  %v12482_v31 = vld [vmem:[#allocation61_spill] sm:$0xff]  ;;  %v12485_v15 = vld [vmem:[#allocation67_spill] sm:$0xff] }
 0x5fa   :  { %v10579_v11 = vpack.c.bf16 %v4163_v22, %v4162_v26  ;;  %v4029_v21 = vadd.f32 %v3740_v57, %v3213_v35  ;;  %v4166_v26 = vmax.f32 %v4030_v46, 0.0  ;;  %v4032_v22 = vadd.f32 %v3755_v4, %v3216_v29 }
 0x5fc   :  { %v4165_v19 = vmax.f32 %v4029_v21, 0.0  ;;  %v12479_v21 = vld [vmem:[#allocation274_spill] sm:$0xff] }
 0x5fd   :  { %v3750_v62 = vpop.permute.xlu1 %3749  ;;  %v3815_v37 = vpop.permute.xlu0 %3814  ;;  %v3219_v25 = vmul.f32 %v12480_v47, %v12479_v21  ;;  %v12487_v21 = vld [vmem:[#allocation65_spill] sm:$0xff]  ;;  %v12489_v47 = vld [vmem:[#allocation280_spill] sm:$0xff] }
 0x5fe   :  { %v10585_v5 = vpack.c.bf16 %v4165_v19, %v4164_v32  ;;  %v4031_v30 = vadd.f32 %v3750_v62, %v3215_v43  ;;  %v4168_v32 = vmax.f32 %v4032_v22, 0.0  ;;  %v4034_v19 = vadd.f32 %v3765_v18, %v3218_v54 }
 0x5ff   :  { %v3222_v22 = vmul.f32 %v12487_v21, %v12486_v27 }
 0x600   :  { %12473 = vst [vmem:[#allocation177_spill] sm:$0xff] %v10585_v5  ;;  %v4167_v35 = vmax.f32 %v4031_v30, 0.0  ;;  %v12481_v5 = vld [vmem:[#allocation276_spill] sm:$0xff]  ;;  %v12484_v30 = vld [vmem:[#allocation277_spill] sm:$0xff] }
 0x601   :  { %v3760_v57 = vpop.permute.xlu1 %3759  ;;  %v3825_v62 = vpop.permute.xlu0 %3824  ;;  %v3220_v46 = vmul.f32 %v12482_v31, %v12481_v5  ;;  %v3221_v44 = vmul.f32 %v12485_v15, %v12484_v30  ;;  %v12491_v31 = vld [vmem:[#allocation282_spill] sm:$0xff]  ;;  %v12492_v30 = vld [vmem:[#allocation69_spill] sm:$0xff] }
 0x602   :  { %v10591_v41 = vpack.c.bf16 %v4167_v35, %v4166_v26  ;;  %v4033_v42 = vadd.f32 %v3760_v57, %v3217_v3  ;;  %v4170_v26 = vmax.f32 %v4034_v19, 0.0  ;;  %v3224_v19 = vmul.f32 %v12492_v30, %v12491_v31  ;;  %v12495_v15 = vld [vmem:[#allocation10_spill] sm:$0xff]  ;;  %v12501_v30 = vld [vmem:[#allocation284_spill] sm:$0xff] }
 0x603   :  { %v4036_v35 = vadd.f32 %v3775_v63, %v3220_v46 }
 0x604   :  { %12478 = vst [vmem:[#allocation178_spill] sm:$0xff] %v10591_v41  ;;  %v4169_v43 = vmax.f32 %v4033_v42, 0.0  ;;  %v12490_v41 = vld [vmem:[#allocation6_spill] sm:$0xff] }
 0x605   :  { %v3770_v23 = vpop.permute.xlu1 %3769  ;;  %v3835_v42 = vpop.permute.xlu0 %3834  ;;  %v3223_v5 = vmul.f32 %v12490_v41, %v12489_v47  ;;  %v12497_v41 = vld [vmem:[#allocation8_spill] sm:$0xff]  ;;  %v12500_v47 = vld [vmem:[#allocation14_spill] sm:$0xff] }
 0x606   :  { %v10597_v4 = vpack.c.bf16 %v4169_v43, %v4168_v32  ;;  %v4035_v29 = vadd.f32 %v3770_v23, %v3219_v25  ;;  %v4172_v32 = vmax.f32 %v4036_v35, 0.0  ;;  %v4038_v43 = vadd.f32 %v3785_v2, %v3222_v22 }
 0x608   :  { %12483 = vst [vmem:[#allocation81_spill] sm:$0xff] %v10597_v4  ;;  %v4171_v3 = vmax.f32 %v4035_v29, 0.0  ;;  %v12494_v29 = vld [vmem:[#allocation218_spill] sm:$0xff]  ;;  %v12496_v4 = vld [vmem:[#allocation283_spill] sm:$0xff] }
 0x609   :  { %v3780_v57 = vpop.permute.xlu1 %3779  ;;  %v3225_v27 = vmul.f32 %v12495_v15, %v12494_v29  ;;  %v3226_v35 = vmul.f32 %v12497_v41, %v12496_v4  ;;  %v12502_v29 = vld [vmem:[#allocation12_spill] sm:$0xff]  ;;  %v12503_v15 = vld [vmem:[#allocation285_spill] sm:$0xff]  ;;  %v12505_v41 = vld [vmem:[#allocation286_spill] sm:$0xff] }
 0x60a   :  { %v10603_v18 = vpack.c.bf16 %v4171_v3, %v4170_v26  ;;  %v4037_v54 = vadd.f32 %v3780_v57, %v3221_v44  ;;  %v4174_v26 = vmax.f32 %v4038_v43, 0.0  ;;  %v4040_v3 = vadd.f32 %v3795_v58, %v3224_v19  ;;  %v3845_v57 = vpop.permute.xlu0 %3844 }
 0x60b   :  { %v3228_v43 = vmul.f32 %v12502_v29, %v12501_v30 }
 0x60c   :  { %12488 = vst [vmem:[#allocation179_spill] sm:$0xff] %v10603_v18  ;;  %v4173_v25 = vmax.f32 %v4037_v54, 0.0  ;;  %v12499_v54 = vld [vmem:[#allocation158_spill] sm:$0xff] }
 0x60d   :  { %v3790_v23 = vpop.permute.xlu1 %3789  ;;  %v3227_v31 = vmul.f32 %v12500_v47, %v12499_v54  ;;  %v12504_v18 = vld [vmem:[#allocation18_spill] sm:$0xff]  ;;  %v12506_v54 = vld [vmem:[#allocation16_spill] sm:$0xff] }
 0x60e   :  { %v10609_v63 = vpack.c.bf16 %v4173_v25, %v4172_v32  ;;  %v4039_v46 = vadd.f32 %v3790_v23, %v3223_v5  ;;  %v4176_v32 = vmax.f32 %v4040_v3, 0.0  ;;  %v4042_v25 = vadd.f32 %v3805_v7, %v3226_v35  ;;  %v12508_v47 = vld [vmem:[#allocation22_spill] sm:$0xff] }
 0x60f   :  { %v3229_v4 = vmul.f32 %v12504_v18, %v12503_v15  ;;  %v3230_v3 = vmul.f32 %v12506_v54, %v12505_v41  ;;  %v12510_v18 = vld [vmem:[#allocation20_spill] sm:$0xff]  ;;  %v12513_v15 = vld [vmem:[#allocation26_spill] sm:$0xff] }
 0x610   :  { %12493 = vst [vmem:[#allocation308_spill] sm:$0xff] %v10609_v63  ;;  %v4175_v44 = vmax.f32 %v4039_v46, 0.0  ;;  %v3855_v46 = vpop.permute.xlu0 %3854  ;;  %v12509_v63 = vld [vmem:[#allocation288_spill] sm:$0xff]  ;;  %v12514_v54 = vld [vmem:[#allocation290_spill] sm:$0xff] }
 0x611   :  { %v3800_v21 = vpop.permute.xlu1 %3799 }
 0x612   :  { %v10615_v2 = vpack.c.bf16 %v4175_v44, %v4174_v26  ;;  %v4041_v22 = vadd.f32 %v3800_v21, %v3225_v27  ;;  %v4178_v26 = vmax.f32 %v4042_v25, 0.0  ;;  %v4044_v44 = vadd.f32 %v3815_v37, %v3228_v43 }
 0x613   :  { %v3232_v25 = vmul.f32 %v12510_v18, %v12509_v63  ;;  %v12519_v18 = vld [vmem:[#allocation167_spill] sm:$0xff] }
 0x614   :  { %12498 = vst [vmem:[#allocation180_spill] sm:$0xff] %v10615_v2  ;;  %v4177_v5 = vmax.f32 %v4041_v22, 0.0  ;;  %v12507_v22 = vld [vmem:[#allocation287_spill] sm:$0xff]  ;;  %v12518_v2 = vld [vmem:[#allocation30_spill] sm:$0xff] }
 0x615   :  { %v3810_v23 = vpop.permute.xlu1 %3809  ;;  %v3231_v30 = vmul.f32 %v12508_v47, %v12507_v22  ;;  %v12515_v22 = vld [vmem:[#allocation24_spill] sm:$0xff]  ;;  %v12517_v47 = vld [vmem:[#allocation166_spill] sm:$0xff] }
 0x616   :  { %v10621_v58 = vpack.c.bf16 %v4177_v5, %v4176_v32  ;;  %v4043_v19 = vadd.f32 %v3810_v23, %v3227_v31  ;;  %v4180_v32 = vmax.f32 %v4044_v44, 0.0  ;;  %v4046_v5 = vadd.f32 %v3825_v62, %v3230_v3  ;;  %v3865_v23 = vpop.permute.xlu0 %3864 }
 0x617   :  { %v3234_v44 = vmul.f32 %v12515_v22, %v12514_v54  ;;  %v3235_v63 = vmul.f32 %v12518_v2, %v12517_v47  ;;  %v12525_v2 = vld [vmem:[#allocation319_spill] sm:$0xff]  ;;  %v12528_v47 = vld [vmem:[#allocation38_spill] sm:$0xff] }
 0x618   :  { %v4179_v27 = vmax.f32 %v4043_v19, 0.0  ;;  %v12512_v19 = vld [vmem:[#allocation289_spill] sm:$0xff] }
 0x619   :  { %v3820_v21 = vpop.permute.xlu1 %3819  ;;  %v3233_v41 = vmul.f32 %v12513_v15, %v12512_v19  ;;  %v12520_v19 = vld [vmem:[#allocation28_spill] sm:$0xff]  ;;  %v12523_v15 = vld [vmem:[#allocation34_spill] sm:$0xff] }
 0x61a   :  { %v10627_v7 = vpack.c.bf16 %v4179_v27, %v4178_v26  ;;  %v4045_v35 = vadd.f32 %v3820_v21, %v3229_v4  ;;  %v4182_v26 = vmax.f32 %v4046_v5, 0.0  ;;  %v4048_v27 = vadd.f32 %v3835_v42, %v3232_v25 }
 0x61b   :  { %v3236_v5 = vmul.f32 %v12520_v19, %v12519_v18  ;;  %v12529_v19 = vld [vmem:[#allocation294_spill] sm:$0xff] }
 0x61c   :  { %v4181_v31 = vmax.f32 %v4045_v35, 0.0  ;;  %v3875_v35 = vpop.permute.xlu0 %3874 }
 0x61d   :  { %v3830_v29 = vpop.permute.xlu1 %3829 }
 0x61e   :  { %v10633_v37 = vpack.c.bf16 %v4181_v31, %v4180_v32  ;;  %v4047_v43 = vadd.f32 %v3830_v29, %v3231_v30  ;;  %v4184_v32 = vmax.f32 %v4048_v27, 0.0  ;;  %v4050_v31 = vadd.f32 %v3845_v57, %v3234_v44 }
 0x620   :  { %12511 = vst [vmem:[#allocation71_spill] sm:$0xff] %v10633_v37  ;;  %v4183_v4 = vmax.f32 %v4047_v43, 0.0  ;;  %v12522_v43 = vld [vmem:[#allocation291_spill] sm:$0xff]  ;;  %v12524_v37 = vld [vmem:[#allocation292_spill] sm:$0xff] }
 0x621   :  { %v3840_v21 = vpop.permute.xlu1 %3839  ;;  %v3237_v54 = vmul.f32 %v12523_v15, %v12522_v43  ;;  %v3238_v27 = vmul.f32 %v12525_v2, %v12524_v37  ;;  %v12530_v43 = vld [vmem:[#allocation320_spill] sm:$0xff]  ;;  %v12532_v15 = vld [vmem:[#allocation295_spill] sm:$0xff] }
 0x622   :  { %v10639_v62 = vpack.c.bf16 %v4183_v4, %v4182_v26  ;;  %v4049_v3 = vadd.f32 %v3840_v21, %v3233_v41  ;;  %v4186_v26 = vmax.f32 %v4050_v31, 0.0  ;;  %v4052_v4 = vadd.f32 %v3855_v46, %v3236_v5  ;;  %v3885_v21 = vpop.permute.xlu0 %3884  ;;  %v12534_v2 = vld [vmem:[#allocation296_spill] sm:$0xff] }
 0x623   :  { %v3240_v31 = vmul.f32 %v12530_v43, %v12529_v19 }
 0x624   :  { %12516 = vst [vmem:[#allocation85_spill] sm:$0xff] %v10639_v62  ;;  %v4185_v30 = vmax.f32 %v4049_v3, 0.0  ;;  %v12527_v3 = vld [vmem:[#allocation293_spill] sm:$0xff]  ;;  %v12533_v62 = vld [vmem:[#allocation42_spill] sm:$0xff] }
 0x625   :  { %v3850_v29 = vpop.permute.xlu1 %3849  ;;  %v3239_v18 = vmul.f32 %v12528_v47, %v12527_v3  ;;  %v3241_v37 = vmul.f32 %v12533_v62, %v12532_v15  ;;  %v12535_v3 = vld [vmem:[#allocation40_spill] sm:$0xff]  ;;  %v12537_v47 = vld [vmem:[#allocation46_spill] sm:$0xff] }
 0x626   :  { %v10645_v42 = vpack.c.bf16 %v4185_v30, %v4184_v32  ;;  %v4051_v25 = vadd.f32 %v3850_v29, %v3235_v63  ;;  %v4188_v32 = vmax.f32 %v4052_v4, 0.0  ;;  %v4054_v30 = vadd.f32 %v3865_v23, %v3238_v27  ;;  %v12539_v62 = vld [vmem:[#allocation44_spill] sm:$0xff]  ;;  %v12541_v15 = vld [vmem:[#allocation50_spill] sm:$0xff] }
 0x627   :  { %v3242_v4 = vmul.f32 %v12535_v3, %v12534_v2  ;;  %v12542_v3 = vld [vmem:[#allocation300_spill] sm:$0xff] }
 0x628   :  { %12521 = vst [vmem:[#allocation181_spill] sm:$0xff] %v10645_v42  ;;  %v4187_v41 = vmax.f32 %v4051_v25, 0.0  ;;  %v3895_v25 = vpop.permute.xlu0 %3894  ;;  %v12538_v42 = vld [vmem:[#allocation298_spill] sm:$0xff] }
 0x629   :  { %v3860_v22 = vpop.permute.xlu1 %3859 }
 0x62a   :  { %v10651_v57 = vpack.c.bf16 %v4187_v41, %v4186_v26  ;;  %v4053_v44 = vadd.f32 %v3860_v22, %v3237_v54  ;;  %v4190_v26 = vmax.f32 %v4054_v30, 0.0  ;;  %v4056_v41 = vadd.f32 %v3875_v35, %v3240_v31 }
 0x62b   :  { %v3244_v30 = vmul.f32 %v12539_v62, %v12538_v42  ;;  %v12546_v62 = vld [vmem:[#allocation302_spill] sm:$0xff] }
 0x62c   :  { %12526 = vst [vmem:[#allocation309_spill] sm:$0xff] %v10651_v57  ;;  %v4189_v63 = vmax.f32 %v4053_v44, 0.0  ;;  %v12536_v44 = vld [vmem:[#allocation297_spill] sm:$0xff]  ;;  %v12545_v57 = vld [vmem:[#allocation54_spill] sm:$0xff] }
 0x62d   :  { %v3870_v29 = vpop.permute.xlu1 %3869  ;;  %v3243_v19 = vmul.f32 %v12537_v47, %v12536_v44  ;;  %v12543_v44 = vld [vmem:[#allocation48_spill] sm:$0xff]  ;;  %v12544_v47 = vld [vmem:[#allocation301_spill] sm:$0xff] }
 0x62e   :  { %v10657_v46 = vpack.c.bf16 %v4189_v63, %v4188_v32  ;;  %v4055_v5 = vadd.f32 %v3870_v29, %v3239_v18  ;;  %v4192_v32 = vmax.f32 %v4056_v41, 0.0  ;;  %v4058_v63 = vadd.f32 %v3885_v21, %v3242_v4  ;;  %v3905_v29 = vpop.permute.xlu0 %3904 }
 0x62f   :  { %v3246_v41 = vmul.f32 %v12543_v44, %v12542_v3  ;;  %v3247_v42 = vmul.f32 %v12545_v57, %v12544_v47  ;;  %v12551_v57 = vld [vmem:[#allocation56_spill] sm:$0xff] }
 0x630   :  { %12531 = vst [vmem:[#allocation182_spill] sm:$0xff] %v10657_v46  ;;  %v4191_v54 = vmax.f32 %v4055_v5, 0.0  ;;  %v12540_v5 = vld [vmem:[#allocation299_spill] sm:$0xff]  ;;  %v12550_v46 = vld [vmem:[#allocation305_spill] sm:$0xff]  ;;  %v12553_v47 = vld [vmem:[#allocation36_spill] sm:$0xff] }
 0x631   :  { %v3880_v22 = vpop.permute.xlu1 %3879  ;;  %v3245_v2 = vmul.f32 %v12541_v15, %v12540_v5  ;;  %v12547_v5 = vld [vmem:[#allocation52_spill] sm:$0xff] }
 0x632   :  { %v10663_v23 = vpack.c.bf16 %v4191_v54, %v4190_v26  ;;  %v4057_v27 = vadd.f32 %v3880_v22, %v3241_v37  ;;  %v4194_v26 = vmax.f32 %v4058_v63, 0.0  ;;  %v4060_v54 = vadd.f32 %v3895_v25, %v3244_v30  ;;  %v12549_v15 = vld [vmem:[#allocation32_spill] sm:$0xff] }
 0x633   :  { %v3248_v63 = vmul.f32 %v12547_v5, %v12546_v62 }
 0x634   :  { %v4193_v18 = vmax.f32 %v4057_v27, 0.0  ;;  %v3915_v27 = vpop.permute.xlu0 %3914 }
 0x635   :  { %v3890_v43 = vpop.permute.xlu1 %3889 }
 0x636   :  { %v10669_v35 = vpack.c.bf16 %v4193_v18, %v4192_v32  ;;  %v4059_v31 = vadd.f32 %v3890_v43, %v3243_v19  ;;  %v4196_v32 = vmax.f32 %v4060_v54, 0.0  ;;  %v4062_v18 = vadd.f32 %v3905_v29, %v3246_v41 }
 0x637   :  { %v3250_v54 = vmul.f32 %v12551_v57, %v12550_v46 }
 0x638   :  { %v4195_v37 = vmax.f32 %v4059_v31, 0.0  ;;  %v12548_v31 = vld [vmem:[#allocation303_spill] sm:$0xff] }
 0x639   :  { %v3900_v22 = vpop.permute.xlu1 %3899  ;;  %v3249_v3 = vmul.f32 %v12549_v15, %v12548_v31 }
 0x63a   :  { %v10675_v21 = vpack.c.bf16 %v4195_v37, %v4194_v26  ;;  %v4061_v4 = vadd.f32 %v3900_v22, %v3245_v2  ;;  %v4198_v26 = vmax.f32 %v4062_v18, 0.0  ;;  %v4064_v37 = vadd.f32 %v3915_v27, %v3248_v63  ;;  %v3925_v22 = vpop.permute.xlu0 %3924 }
 0x63c   :  { %v4197_v19 = vmax.f32 %v4061_v4, 0.0  ;;  %v12552_v4 = vld [vmem:[#allocation306_spill] sm:$0xff] }
 0x63d   :  { %v3910_v43 = vpop.permute.xlu1 %3909  ;;  %v3251_v62 = vmul.f32 %v12553_v47, %v12552_v4 }
 0x63e   :  { %v10681_v25 = vpack.c.bf16 %v4197_v19, %v4196_v32  ;;  %v4063_v30 = vadd.f32 %v3910_v43, %v3247_v42  ;;  %v4200_v32 = vmax.f32 %v4064_v37, 0.0  ;;  %v4066_v19 = vadd.f32 %v3925_v22, %v3250_v54 }
 0x640   :  { %v4199_v2 = vmax.f32 %v4063_v30, 0.0  ;;  %v4202_v27 = vmax.f32 %v4066_v19, 0.0 }
 0x641   :  { %v3920_v44 = vpop.permute.xlu1 %3919 }
 0x642   :  { %v10687_v29 = vpack.c.bf16 %v4199_v2, %v4198_v26  ;;  %v4065_v41 = vadd.f32 %v3920_v44, %v3249_v3 }
 0x644   :  { %v4201_v42 = vmax.f32 %v4065_v41, 0.0 }
 0x645   :  { %v3930_v43 = vpop.permute.xlu1 %3929 }
 0x646   :  { %v10691_v5 = vpack.c.bf16 %v4201_v42, %v4200_v32  ;;  %v4067_v18 = vadd.f32 %v3930_v43, %v3251_v62 }
 0x648   :  { %v4203_v63 = vmax.f32 %v4067_v18, 0.0 }
 0x64a   :  { %v10693_v30 = vpack.c.bf16 %v4203_v63, %v4202_v27 }
 0x64b   :  { %6597 = dma.done.wait [#allocation3], 9216 }
 0x64c   :  { %6598 = vsyncadd [#allocation3], 4294958080  ;;  %5742 = vmatpush3.bf16.msra.mxu0 %v10201_v12  ;;  %5806 = vmatpush3.bf16.msra.mxu1 %v10377_v56  ;;  %v12554_v46 = vmov 1   ;;  %v6463_v53 = vld [vmem:[#allocation2 + $0x4] ss:$36 sps:$4 sm:$0xff]   ;;  %v12563_v56 = vld [vmem:[#allocation64_spill] sm:$0xff] }
 0x64d   :  { %5743 = vmatprep.subr.bf16.mxu0 %v10278_v8  ;;  %5807 = vmatprep.subr.bf16.mxu1 %v10452_v16  ;;  %v6466_v12 = vld [vmem:[#allocation2 + $0xc] ss:$36 sps:$4 sm:$0xff]   ;;  %v6484_v16 = vld [vmem:[#allocation2 + $0xe0] ss:$36 sps:$4 sm:$0xff]   ;;  %v6493_v44 = vld [vmem:[#allocation2 + $0x174] ss:$36 sps:$4 sm:$0xff]  }
 0x64e   :  { %6455 = vset.pattern.permute.xlu1 %v12554_v46  ;;  %6456 = vset.pattern.permute.xlu0 %v12554_v46  ;;  %v12559_v8 = vld [vmem:[#allocation172_spill] sm:$0xff]  ;;  %v12569_v39 = vld [vmem:[#allocation174_spill] sm:$0xff]  ;;  %v12578_v26 = vld [vmem:[#allocation71_spill] sm:$0xff]  ;;  %vm4716_vm1 = vcmask 523264  }
 0x64f   :  { %4773 = vmatprep.mubr.bf16.mxu0 %v6463_v53  ;;  %4870 = vmatprep.mubr.bf16.mxu1 %v6466_v12  ;;  %v12575_v31 = vld [vmem:[#allocation60_spill] sm:$0xff]  ;;  %v12576_v15 = vld [vmem:[#allocation178_spill] sm:$0xff]  ;;  %v6490_v2 = vld [vmem:[#allocation2 + $0x128] ss:$36 sps:$4 sm:$0xff]  }
 0x650   :  { %5744 = vmatpush3.bf16.msra.mxu0 %v10190_v48  ;;  %5808 = vmatpush3.bf16.msra.mxu1 %v10366_v24  ;;  %v6469_v48 = vld [vmem:[#allocation2 + $0x54] ss:$36 sps:$4 sm:$0xff]   ;;  %v6481_v24 = vld [vmem:[#allocation2 + $0xe4] ss:$36 sps:$4 sm:$0xff]   ;;  %v6491_v22 = vld [vmem:[#allocation2 + $0x16c] ss:$36 sps:$4 sm:$0xff]  }
 0x651   :  { %5745 = vmatprep.subr.bf16.mxu0 %v10267_v33  ;;  %5809 = vmatprep.subr.bf16.mxu1 %v10442_v20  ;;  %v12558_v33 = vld [vmem:[#allocation176_spill] sm:$0xff]  ;;  %v12568_v20 = vld [vmem:[#allocation179_spill] sm:$0xff]  ;;  %v6489_v37 = vld [vmem:[#allocation2 + $0x120] ss:$36 sps:$4 sm:$0xff]  }
 0x652   :  { %v12577_v3 = vld [vmem:[#allocation68_spill] sm:$0xff]  ;;  %v12579_v57 = vld [vmem:[#allocation165_spill] sm:$0xff]  ;;  %v6495_v41 = vld [vmem:[#allocation2 + $0x168] ss:$36 sps:$4 sm:$0xff]  }
 0x653   :  { %v12580_v54 = vld [vmem:[#allocation177_spill] sm:$0xff]  ;;  %v6496_v4 = vld [vmem:[#allocation2 + $0x170] ss:$36 sps:$4 sm:$0xff]   ;;  %v6505_v43 = vld [vmem:[#allocation2 + $0x204] ss:$36 sps:$4 sm:$0xff]  }
 0x654   :  { %5746 = vmatpush3.bf16.msra.mxu0 %v10179_v55  ;;  %5810 = vmatpush3.bf16.msra.mxu1 %v10355_v40  ;;  %v12555_v55 = vld [vmem:[#allocation171_spill] sm:$0xff]  ;;  %v6479_v40 = vld [vmem:[#allocation2 + $0xdc] ss:$36 sps:$4 sm:$0xff]   ;;  %v6497_v47 = vld [vmem:[#allocation2 + $0x1b4] ss:$36 sps:$4 sm:$0xff]  }
 0x655   :  { %5747 = vmatprep.subr.bf16.mxu0 %v10256_v52  ;;  %5811 = vmatprep.subr.bf16.mxu1 %v10432_v9  ;;  %v6475_v52 = vld [vmem:[#allocation2 + $0x9c] ss:$36 sps:$4 sm:$0xff]   ;;  %v12567_v9 = vld [vmem:[#allocation304_spill] sm:$0xff] }
 0x656   :  { %v6499_v62 = vld [vmem:[#allocation2 + $0x1bc] ss:$36 sps:$4 sm:$0xff]   ;;  %v6501_v32 = vld [vmem:[#allocation2 + $0x1b0] ss:$36 sps:$4 sm:$0xff]  }
 0x657   :  { %v6502_v19 = vld [vmem:[#allocation2 + $0x1b8] ss:$36 sps:$4 sm:$0xff]   ;;  %v6508_v27 = vld [vmem:[#allocation2 + $0x200] ss:$36 sps:$4 sm:$0xff]   ;;  %v6509_v12 = vld [vmem:[#allocation2 + $0x10] ss:$36 sps:$4 sm:$0xff]  }
 0x658   :  { %5748 = vmatpush3.bf16.msra.mxu0 %v10168_v17  ;;  %5812 = vmatpush3.bf16.msra.mxu1 %v10344_v14  ;;  %v6464_v17 = vld [vmem:[#allocation2 + $0x8] ss:$36 sps:$4 sm:$0xff]   ;;  %v12562_v14 = vld [vmem:[#allocation182_spill] sm:$0xff]  ;;  %v6507_v18 = vld [vmem:[#allocation2 + $0x1f8] ss:$36 sps:$4 sm:$0xff]  }
 0x659   :  { %5749 = vmatprep.subr.bf16.mxu0 %v10245_v34  ;;  %5813 = vmatprep.subr.bf16.mxu1 %v10421_v10  ;;  %v12557_v34 = vld [vmem:[#allocation307_spill] sm:$0xff]  ;;  %v6483_v10 = vld [vmem:[#allocation2 + $0xd8] ss:$36 sps:$4 sm:$0xff]  }
 0x65a   :  { %v6503_v42 = vld [vmem:[#allocation2 + $0x1fc] ss:$36 sps:$4 sm:$0xff]   ;;  %v6511_v63 = vld [vmem:[#allocation2 + $0x14] ss:$36 sps:$4 sm:$0xff]  }
 0x65b   :  { %v6514_v53 = vld [vmem:[#allocation2 + $0x1c] ss:$36 sps:$4 sm:$0xff]  }
 0x65c   :  { %5750 = vmatpush3.bf16.msra.mxu0 %v10157_v61  ;;  %5814 = vmatpush3.bf16.msra.mxu1 %v10333_v49  ;;  %v6461_v61 = vld [vmem:[#allocation2] ss:$36 sps:$4 sm:$0xff]   ;;  %v12561_v49 = vld [vmem:[#allocation175_spill] sm:$0xff] }
 0x65d   :  { %5751 = vmatprep.subr.bf16.mxu0 %v10234_v45  ;;  %5815 = vmatprep.subr.bf16.mxu1 %v10410_v1  ;;  %v6473_v45 = vld [vmem:[#allocation2 + $0x94] ss:$36 sps:$4 sm:$0xff]  }
 0x65e   :  { %v12566_v1 = vld [vmem:[#allocation309_spill] sm:$0xff] }
 0x660   :  { %5752 = vmatpush3.bf16.msra.mxu0 %v10147_v59  ;;  %5816 = vmatpush3.bf16.msra.mxu1 %v10322_v36  ;;  %v6467_v59 = vld [vmem:[#allocation2 + $0x4c] ss:$36 sps:$4 sm:$0xff]   ;;  %v6478_v36 = vld [vmem:[#allocation2 + $0x98] ss:$36 sps:$4 sm:$0xff]  }
 0x661   :  { %5753 = vmatprep.subr.bf16.mxu0 %v10223_v60  ;;  %5817 = vmatprep.subr.bf16.mxu1 %v10399_v51  ;;  %v12556_v60 = vld [vmem:[#allocation77_spill] sm:$0xff] }
 0x662   :  { %v12565_v51 = vld [vmem:[#allocation73_spill] sm:$0xff] }
 0x664   :  { %5754 = vmatpush3.bf16.msra.mxu0 %v10137_v6  ;;  %5818 = vmatpush3.bf16.msra.mxu1 %v10311_v28  ;;  %v6471_v6 = vld [vmem:[#allocation2 + $0x48] ss:$36 sps:$4 sm:$0xff]   ;;  %v6477_v28 = vld [vmem:[#allocation2 + $0x90] ss:$36 sps:$4 sm:$0xff]  }
 0x665   :  { %5755 = vmatprep.subr.bf16.mxu0 %v10212_v0  ;;  %5819 = vmatprep.subr.bf16.mxu1 %v10388_v50  ;;  %v6472_v0 = vld [vmem:[#allocation2 + $0x50] ss:$36 sps:$4 sm:$0xff]  }
 0x666   :  { %v12564_v50 = vld [vmem:[#allocation308_spill] sm:$0xff] }
 0x668   :  { %5756 = vmatpush3.bf16.msra.mxu0 %v12555_v55  ;;  %5820 = vmatpush3.bf16.msra.mxu1 %v10300_v13  ;;  %v12560_v13 = vld [vmem:[#allocation180_spill] sm:$0xff]  ;;  %v6517_v55 = vld [vmem:[#allocation2 + $0x64] ss:$36 sps:$4 sm:$0xff]  }
 0x669   :  { %5869 = vmatprep.subr.bf16.mxu0 %v10579_v11  ;;  %5933 = vmatprep.subr.bf16.mxu1 %v10675_v21  ;;  %v6485_v11 = vld [vmem:[#allocation2 + $0x124] ss:$36 sps:$4 sm:$0xff]   ;;  %v12574_v21 = vld [vmem:[#allocation85_spill] sm:$0xff] }
 0x66b   :  { %4774 = vmatmul.mubr.bf16.vlgmr.msra.gmra.mxu0 %v6461_v61  ;;  %4871 = vmatmul.mubr.bf16.vlgmr.msra.gmra.mxu1 %v6464_v17  ;;  %v6512_v61 = vld [vmem:[#allocation2 + $0x18] ss:$36 sps:$4 sm:$0xff]  }
 0x66c   :  { %5870 = vmatpush3.bf16.msra.mxu0 %v10529_v38  ;;  %5934 = vmatpush3.bf16.msra.mxu1 %v10627_v7  ;;  %v12570_v38 = vld [vmem:[#allocation181_spill] sm:$0xff]  ;;  %v12571_v7 = vld [vmem:[#allocation170_spill] sm:$0xff] }
 0x66d   :  { %4781 = vmatprep.mubr.bf16.mxu0 %v6467_v59  ;;  %4878 = vmatprep.mubr.bf16.mxu1 %v6469_v48  ;;  %v6515_v17 = vld [vmem:[#allocation2 + $0x5c] ss:$36 sps:$4 sm:$0xff]  }
 0x66e   :  { %5871 = vmatprep.subr.bf16.mxu0 %v12556_v60  ;;  %5935 = vmatprep.subr.bf16.mxu1 %v10669_v35  ;;  %v12573_v35 = vld [vmem:[#allocation173_spill] sm:$0xff]  ;;  %v6520_v48 = vld [vmem:[#allocation2 + $0x60] ss:$36 sps:$4 sm:$0xff]   ;;  %v6526_v60 = vld [vmem:[#allocation2 + $0xa8] ss:$36 sps:$4 sm:$0xff]  }
 0x66f   :  { %v6519_v59 = vld [vmem:[#allocation2 + $0x58] ss:$36 sps:$4 sm:$0xff]  }
 0x670   :  { %5872 = vmatpush3.bf16.msra.mxu0 %v12557_v34  ;;  %5936 = vmatpush3.bf16.msra.mxu1 %v10621_v58  ;;  %v6487_v58 = vld [vmem:[#allocation2 + $0x12c] ss:$36 sps:$4 sm:$0xff]  }
 0x671   :  { %5873 = vmatprep.subr.bf16.mxu0 %v12558_v33  ;;  %5937 = vmatprep.subr.bf16.mxu1 %v10663_v23  ;;  %v12572_v23 = vld [vmem:[#allocation81_spill] sm:$0xff]  ;;  %v6531_v34 = vld [vmem:[#allocation2 + $0xe8] ss:$36 sps:$4 sm:$0xff]  }
 0x672   :  { %v6533_v33 = vld [vmem:[#allocation2 + $0x134] ss:$36 sps:$4 sm:$0xff]  }
 0x673   :  { %4782 = vmatmul.mubr.bf16.gmra.mxu0 %v6471_v6  ;;  %4879 = vmatmul.mubr.bf16.gmra.mxu1 %v6472_v0  ;;  %v6521_v6 = vld [vmem:[#allocation2 + $0xa4] ss:$36 sps:$4 sm:$0xff]   ;;  %v6523_v0 = vld [vmem:[#allocation2 + $0xac] ss:$36 sps:$4 sm:$0xff]  }
 0x674   :  { %4789 = vmatprep.mubr.bf16.mxu0 %v6473_v45  ;;  %4886 = vmatprep.mubr.bf16.mxu1 %v6475_v52  ;;  %v6527_v45 = vld [vmem:[#allocation2 + $0xec] ss:$36 sps:$4 sm:$0xff]  }
 0x675   :  { %5874 = vmatpush3.bf16.msra.mxu0 %v12559_v8  ;;  %5938 = vmatpush3.bf16.msra.mxu1 %v12560_v13  ;;  %v6532_v52 = vld [vmem:[#allocation2 + $0xf0] ss:$36 sps:$4 sm:$0xff]   ;;  %v6538_v13 = vld [vmem:[#allocation2 + $0x138] ss:$36 sps:$4 sm:$0xff]  }
 0x676   :  { %5875 = vmatprep.subr.bf16.mxu0 %v12561_v49  ;;  %5939 = vmatprep.subr.bf16.mxu1 %v12562_v14  ;;  %v6537_v8 = vld [vmem:[#allocation2 + $0x130] ss:$36 sps:$4 sm:$0xff]   ;;  %v6544_v49 = vld [vmem:[#allocation2 + $0x180] ss:$36 sps:$4 sm:$0xff]  }
 0x677   :  { %v6545_v14 = vld [vmem:[#allocation2 + $0x1c4] ss:$36 sps:$4 sm:$0xff]  }
 0x679   :  { %5876 = vmatpush3.bf16.msra.mxu0 %v12563_v56  ;;  %5940 = vmatpush3.bf16.msra.mxu1 %v12564_v50  ;;  %v6550_v56 = vld [vmem:[#allocation2 + $0x1c8] ss:$36 sps:$4 sm:$0xff]  }
 0x67a   :  { %5877 = vmatprep.subr.bf16.mxu0 %v12565_v51  ;;  %5941 = vmatprep.subr.bf16.mxu1 %v12566_v1  ;;  %v6551_v50 = vld [vmem:[#allocation2 + $0x20c] ss:$36 sps:$4 sm:$0xff]   ;;  %v6553_v51 = vld [vmem:[#allocation2 + $0x214] ss:$36 sps:$4 sm:$0xff]  }
 0x67b   :  { %4790 = vmatmul.mubr.bf16.gmra.mxu0 %v6477_v28  ;;  %4887 = vmatmul.mubr.bf16.gmra.mxu1 %v6478_v36  ;;  %v6539_v28 = vld [vmem:[#allocation2 + $0x17c] ss:$36 sps:$4 sm:$0xff]   ;;  %v6541_v36 = vld [vmem:[#allocation2 + $0x184] ss:$36 sps:$4 sm:$0xff]  }
 0x67c   :  { %4797 = vmatprep.mubr.bf16.mxu0 %v6479_v40  ;;  %4894 = vmatprep.mubr.bf16.mxu1 %v6481_v24  ;;  %v6547_v40 = vld [vmem:[#allocation2 + $0x1cc] ss:$36 sps:$4 sm:$0xff]   ;;  %v6549_v24 = vld [vmem:[#allocation2 + $0x1c0] ss:$36 sps:$4 sm:$0xff]  }
 0x67d   :  { %5878 = vmatpush3.bf16.msra.mxu0 %v12567_v9  ;;  %5942 = vmatpush3.bf16.msra.mxu1 %v12568_v20  ;;  %v6555_v1 = vld [vmem:[#allocation2 + $0x208] ss:$36 sps:$4 sm:$0xff]   ;;  %v6557_v9 = vld [vmem:[#allocation2 + $0x20] ss:$36 sps:$4 sm:$0xff]  }
 0x67e   :  { %5879 = vmatprep.subr.bf16.mxu0 %v12569_v39  ;;  %5943 = vmatprep.subr.bf16.mxu1 %v12570_v38  ;;  %v6558_v20 = vld [vmem:[#allocation2 + $0x140] ss:$36 sps:$4 sm:$0xff]   ;;  %v6560_v39 = vld [vmem:[#allocation2 + $0x188] ss:$36 sps:$4 sm:$0xff]   ;;  %v6561_v38 = vld [vmem:[#allocation2 + $0xb0] ss:$36 sps:$4 sm:$0xff]  }
 0x681   :  { %5880 = vmatpush3.bf16.msra.mxu0 %v12571_v7  ;;  %5944 = vmatpush3.bf16.msra.mxu1 %v12572_v23  ;;  %v6564_v7 = vld [vmem:[#allocation2 + $0x218] ss:$36 sps:$4 sm:$0xff]  }
 0x682   :  { %5881 = vmatprep.subr.bf16.mxu0 %v12573_v35  ;;  %5945 = vmatprep.subr.bf16.mxu1 %v12574_v21 }
 0x683   :  { %4798 = vmatmul.mubr.bf16.gmra.mxu0 %v6483_v10  ;;  %4895 = vmatmul.mubr.bf16.gmra.mxu1 %v6484_v16  ;;  %v6556_v10 = vld [vmem:[#allocation2 + $0x210] ss:$36 sps:$4 sm:$0xff]   ;;  %v6559_v16 = vld [vmem:[#allocation2 + $0x68] ss:$36 sps:$4 sm:$0xff]  }
 0x684   :  { %4805 = vmatprep.mubr.bf16.mxu0 %v6485_v11  ;;  %4902 = vmatprep.mubr.bf16.mxu1 %v6487_v58  ;;  %v6562_v11 = vld [vmem:[#allocation2 + $0x1d0] ss:$36 sps:$4 sm:$0xff]   ;;  %v6563_v58 = vld [vmem:[#allocation2 + $0xf8] ss:$36 sps:$4 sm:$0xff]  }
 0x685   :  { %5882 = vmatpush3.bf16.msra.mxu0 %v12575_v31  ;;  %5946 = vmatpush3.bf16.msra.mxu1 %v12576_v15 }
 0x686   :  { %5883 = vmatprep.subr.bf16.mxu0 %v12577_v3  ;;  %5947 = vmatprep.subr.bf16.mxu1 %v12578_v26 }
 0x689   :  { %5884 = vmatpush3.bf16.msra.mxu0 %v12579_v57  ;;  %5948 = vmatpush3.bf16.msra.mxu1 %v12580_v54 }
 0x68a   :  { %6009 = vmatprep.subr.bf16.mxu0 %v10693_v30  ;;  %6033 = vmatprep.subr.bf16.mxu1 %v10693_v30 }
 0x68b   :  { %4806 = vmatmul.mubr.bf16.gmra.mxu0 %v6489_v37  ;;  %4903 = vmatmul.mubr.bf16.gmra.mxu1 %v6490_v2 }
 0x68c   :  { %4813 = vmatprep.mubr.bf16.mxu0 %v6491_v22  ;;  %4910 = vmatprep.mubr.bf16.mxu1 %v6493_v44 }
 0x693   :  { %4814 = vmatmul.mubr.bf16.gmra.mxu0 %v6495_v41  ;;  %4911 = vmatmul.mubr.bf16.gmra.mxu1 %v6496_v4 }
 0x694   :  { %4821 = vmatprep.mubr.bf16.mxu0 %v6497_v47  ;;  %4918 = vmatprep.mubr.bf16.mxu1 %v6499_v62 }
 0x69b   :  { %4822 = vmatmul.mubr.bf16.gmra.mxu0 %v6501_v32  ;;  %4919 = vmatmul.mubr.bf16.gmra.mxu1 %v6502_v19 }
 0x69c   :  { %4829 = vmatprep.mubr.bf16.mxu0 %v6503_v42  ;;  %4926 = vmatprep.mubr.bf16.mxu1 %v6505_v43 }
 0x6a3   :  { %4830 = vmatmul.mubr.bf16.gmra.mxu0 %v6507_v18  ;;  %4927 = vmatmul.mubr.bf16.gmra.mxu1 %v6508_v27 }
 0x6a4   :  { %4967 = vmatprep.mubr.bf16.mxu0 %v6511_v63  ;;  %5064 = vmatprep.mubr.bf16.mxu1 %v6514_v53 }
 0x6ab   :  { %4968 = vmatmul.mubr.bf16.vlgmr.msra.gmra.mxu0 %v6509_v12  ;;  %5065 = vmatmul.mubr.bf16.vlgmr.msra.gmra.mxu1 %v6512_v61 }
 0x6ac   :  { %6010 = vmatpush3.bf16.msra.mxu0 %v10693_v30  ;;  %6037 = vmatpush3.bf16.msra.mxu1 %v10693_v30  ;;  %v6525_v30 = vld [vmem:[#allocation2 + $0xa0] ss:$36 sps:$4 sm:$0xff]  }
 0x6ad   :  { %4975 = vmatprep.mubr.bf16.mxu0 %v6515_v17  ;;  %5072 = vmatprep.mubr.bf16.mxu1 %v6517_v55 }
 0x6ae   :  { %6011 = vmatprep.subr.bf16.mxu0 %v10691_v5  ;;  %6034 = vmatprep.subr.bf16.mxu1 %v10691_v5 }
 0x6b0   :  { %6012 = vmatpush3.bf16.msra.mxu0 %v10691_v5  ;;  %6038 = vmatpush3.bf16.msra.mxu1 %v10691_v5  ;;  %v6529_v5 = vld [vmem:[#allocation2 + $0xf4] ss:$36 sps:$4 sm:$0xff]  }
 0x6b1   :  { %6013 = vmatprep.subr.bf16.mxu0 %v10687_v29  ;;  %6035 = vmatprep.subr.bf16.mxu1 %v10687_v29 }
 0x6b3   :  { %4976 = vmatmul.mubr.bf16.gmra.mxu0 %v6519_v59  ;;  %5073 = vmatmul.mubr.bf16.gmra.mxu1 %v6520_v48 }
 0x6b4   :  { %4983 = vmatprep.mubr.bf16.mxu0 %v6521_v6  ;;  %5080 = vmatprep.mubr.bf16.mxu1 %v6523_v0 }
 0x6b5   :  { %6014 = vmatpush3.bf16.msra.mxu0 %v10687_v29  ;;  %6039 = vmatpush3.bf16.msra.mxu1 %v10687_v29  ;;  %v6535_v29 = vld [vmem:[#allocation2 + $0x13c] ss:$36 sps:$4 sm:$0xff]  }
 0x6b6   :  { %6015 = vmatprep.subr.bf16.mxu0 %v10681_v25  ;;  %6036 = vmatprep.subr.bf16.mxu1 %v10681_v25 }
 0x6b9   :  { %6016 = vmatpush3.bf16.msra.mxu0 %v10681_v25  ;;  %6040 = vmatpush3.bf16.msra.mxu1 %v10681_v25  ;;  %v6543_v25 = vld [vmem:[#allocation2 + $0x178] ss:$36 sps:$4 sm:$0xff]  }
 0x6bb   :  { %4984 = vmatmul.mubr.bf16.gmra.mxu0 %v6525_v30  ;;  %5081 = vmatmul.mubr.bf16.gmra.mxu1 %v6526_v60 }
 0x6bc   :  { %4991 = vmatprep.mubr.bf16.mxu0 %v6527_v45  ;;  %5088 = vmatprep.mubr.bf16.mxu1 %v6529_v5 }
 0x6c3   :  { %4992 = vmatmul.mubr.bf16.gmra.mxu0 %v6531_v34  ;;  %5089 = vmatmul.mubr.bf16.gmra.mxu1 %v6532_v52 }
 0x6c4   :  { %4999 = vmatprep.mubr.bf16.mxu0 %v6533_v33  ;;  %5096 = vmatprep.mubr.bf16.mxu1 %v6535_v29 }
 0x6cb   :  { %5000 = vmatmul.mubr.bf16.gmra.mxu0 %v6537_v8  ;;  %5097 = vmatmul.mubr.bf16.gmra.mxu1 %v6538_v13 }
 0x6cc   :  { %5007 = vmatprep.mubr.bf16.mxu0 %v6539_v28  ;;  %5104 = vmatprep.mubr.bf16.mxu1 %v6541_v36 }
 0x6d3   :  { %5008 = vmatmul.mubr.bf16.gmra.mxu0 %v6543_v25  ;;  %5105 = vmatmul.mubr.bf16.gmra.mxu1 %v6544_v49 }
 0x6d4   :  { %5015 = vmatprep.mubr.bf16.mxu0 %v6545_v14  ;;  %5112 = vmatprep.mubr.bf16.mxu1 %v6547_v40 }
 0x6db   :  { %5016 = vmatmul.mubr.bf16.gmra.mxu0 %v6549_v24  ;;  %5113 = vmatmul.mubr.bf16.gmra.mxu1 %v6550_v56 }
 0x6dc   :  { %5023 = vmatprep.mubr.bf16.mxu0 %v6551_v50  ;;  %5120 = vmatprep.mubr.bf16.mxu1 %v6553_v51 }
 0x6e3   :  { %5024 = vmatmul.mubr.bf16.gmra.mxu0 %v6555_v1  ;;  %5121 = vmatmul.mubr.bf16.gmra.mxu1 %v6556_v10 }
 0x6e4   :  { %6017 = vmatprep.mubr.msk.bf16.mxu0 %vm4716_vm1, %v6557_v9  ;;  %6025 = vmatprep.mubr.msk.bf16.mxu1 %vm4716_vm1, %v6558_v20 }
 0x6eb   :  { %6018 = vmatmul.mubr.msk.bf16.vlgmr.msra.gmra.mxu0 %vm4716_vm1, %v6559_v16  ;;  %6026 = vmatmul.mubr.msk.bf16.vlgmr.msra.gmra.mxu1 %vm4716_vm1, %v6560_v39 }
 0x6ec   :  { %6021 = vmatprep.mubr.msk.bf16.mxu0 %vm4716_vm1, %v6561_v38  ;;  %6029 = vmatprep.mubr.msk.bf16.mxu1 %vm4716_vm1, %v6562_v11 }
 0x6f3   :  { %6022 = vmatmul.mubr.msk.bf16.gmra.mxu0 %vm4716_vm1, %v6563_v58  ;;  %6030 = vmatmul.mubr.msk.bf16.gmra.mxu1 %vm4716_vm1, %v6564_v7 }
 0x72b   :  { %v5757_v23 = vpop.f32.mrf.mxu0  ;;  %v5821_v35 = vpop.f32.mrf.mxu1 }
 0x72d   :  { %v5758_v21 = vpop.f32.mrf.mxu0  ;;  %v5822_v31 = vpop.f32.mrf.mxu1 }
 0x72e   :  { %v5759_v15 = vadd.f32 %v5758_v21, %v5757_v23  ;;  %v5823_v3 = vadd.f32 %v5822_v31, %v5821_v35 }
 0x72f   :  { %v5760_v26 = vpop.f32.mrf.mxu0  ;;  %v5824_v37 = vpop.f32.mrf.mxu1 }
 0x730   :  { %v10785_v2 = vadd.f32 %v5823_v3, %v5759_v15 }
 0x731   :  { %v5761_v22 = vpop.f32.mrf.mxu0  ;;  %v5825_v44 = vpop.f32.mrf.mxu1 }
 0x732   :  { %v5762_v57 = vadd.f32 %v5761_v22, %v5760_v26  ;;  %v5826_v54 = vadd.f32 %v5825_v44, %v5824_v37 }
 0x733   :  { %v5763_v41 = vpop.f32.mrf.mxu0  ;;  %v5827_v4 = vpop.f32.mrf.mxu1 }
 0x734   :  { %v10787_v47 = vadd.f32 %v5826_v54, %v5762_v57 }
 0x735   :  { %v5764_v62 = vpop.f32.mrf.mxu0  ;;  %v5828_v32 = vpop.f32.mrf.mxu1 }
 0x736   :  { %v5765_v19 = vadd.f32 %v5764_v62, %v5763_v41  ;;  %v5829_v42 = vadd.f32 %v5828_v32, %v5827_v4 }
 0x737   :  { %v5766_v43 = vpop.f32.mrf.mxu0  ;;  %v5830_v18 = vpop.f32.mrf.mxu1 }
 0x738   :  { %v10789_v27 = vadd.f32 %v5829_v42, %v5765_v19 }
 0x739   :  { %v5767_v63 = vpop.f32.mrf.mxu0  ;;  %v5831_v53 = vpop.f32.mrf.mxu1 }
 0x73a   :  { %v5768_v12 = vadd.f32 %v5767_v63, %v5766_v43  ;;  %v5832_v61 = vadd.f32 %v5831_v53, %v5830_v18 }
 0x73b   :  { %v5769_v17 = vpop.f32.mrf.mxu0  ;;  %v5833_v55 = vpop.f32.mrf.mxu1 }
 0x73c   :  { %v10791_v59 = vadd.f32 %v5832_v61, %v5768_v12 }
 0x73d   :  { %v5770_v48 = vpop.f32.mrf.mxu0  ;;  %v5834_v6 = vpop.f32.mrf.mxu1 }
 0x73e   :  { %v5771_v0 = vadd.f32 %v5770_v48, %v5769_v17  ;;  %v5835_v30 = vadd.f32 %v5834_v6, %v5833_v55 }
 0x73f   :  { %v5772_v60 = vpop.f32.mrf.mxu0  ;;  %v5836_v45 = vpop.f32.mrf.mxu1 }
 0x740   :  { %v10793_v5 = vadd.f32 %v5835_v30, %v5771_v0 }
 0x741   :  { %v5773_v34 = vpop.f32.mrf.mxu0  ;;  %v5837_v52 = vpop.f32.mrf.mxu1 }
 0x742   :  { %v5774_v33 = vadd.f32 %v5773_v34, %v5772_v60  ;;  %v5838_v29 = vadd.f32 %v5837_v52, %v5836_v45 }
 0x743   :  { %v5775_v8 = vpop.f32.mrf.mxu0  ;;  %v5839_v13 = vpop.f32.mrf.mxu1 }
 0x744   :  { %v10795_v28 = vadd.f32 %v5838_v29, %v5774_v33 }
 0x745   :  { %v5776_v36 = vpop.f32.mrf.mxu0  ;;  %v5840_v25 = vpop.f32.mrf.mxu1 }
 0x746   :  { %v5777_v49 = vadd.f32 %v5776_v36, %v5775_v8  ;;  %v5841_v14 = vadd.f32 %v5840_v25, %v5839_v13 }
 0x747   :  { %v5778_v40 = vpop.f32.mrf.mxu0  ;;  %v5842_v24 = vpop.f32.mrf.mxu1 }
 0x748   :  { %v10797_v56 = vadd.f32 %v5841_v14, %v5777_v49 }
 0x749   :  { %v5779_v50 = vpop.f32.mrf.mxu0  ;;  %v5843_v51 = vpop.f32.mrf.mxu1 }
 0x74a   :  { %v5780_v1 = vadd.f32 %v5779_v50, %v5778_v40  ;;  %v5844_v10 = vadd.f32 %v5843_v51, %v5842_v24 }
 0x74b   :  { %v5781_v9 = vpop.f32.mrf.mxu0  ;;  %v5845_v20 = vpop.f32.mrf.mxu1 }
 0x74c   :  { %v10799_v16 = vadd.f32 %v5844_v10, %v5780_v1 }
 0x74d   :  { %v5782_v39 = vpop.f32.mrf.mxu0  ;;  %v5846_v38 = vpop.f32.mrf.mxu1 }
 0x74e   :  { %v5783_v11 = vadd.f32 %v5782_v39, %v5781_v9  ;;  %v5847_v58 = vadd.f32 %v5846_v38, %v5845_v20 }
 0x74f   :  { %v5784_v7 = vpop.f32.mrf.mxu0  ;;  %v5848_v23 = vpop.f32.mrf.mxu1 }
 0x750   :  { %v10801_v35 = vadd.f32 %v5847_v58, %v5783_v11 }
 0x751   :  { %v5785_v21 = vpop.f32.mrf.mxu0  ;;  %v5849_v31 = vpop.f32.mrf.mxu1 }
 0x752   :  { %v5786_v15 = vadd.f32 %v5785_v21, %v5784_v7  ;;  %v5850_v3 = vadd.f32 %v5849_v31, %v5848_v23 }
 0x753   :  { %v5787_v26 = vpop.f32.mrf.mxu0  ;;  %v5851_v37 = vpop.f32.mrf.mxu1 }
 0x754   :  { %v10803_v22 = vadd.f32 %v5850_v3, %v5786_v15 }
 0x755   :  { %v5788_v44 = vpop.f32.mrf.mxu0  ;;  %v5852_v57 = vpop.f32.mrf.mxu1 }
 0x756   :  { %v5789_v54 = vadd.f32 %v5788_v44, %v5787_v26  ;;  %v5853_v41 = vadd.f32 %v5852_v57, %v5851_v37 }
 0x757   :  { %v5790_v4 = vpop.f32.mrf.mxu0  ;;  %v5854_v62 = vpop.f32.mrf.mxu1 }
 0x758   :  { %v10805_v32 = vadd.f32 %v5853_v41, %v5789_v54 }
 0x759   :  { %v5791_v19 = vpop.f32.mrf.mxu0  ;;  %v5855_v42 = vpop.f32.mrf.mxu1 }
 0x75a   :  { %v5792_v43 = vadd.f32 %v5791_v19, %v5790_v4  ;;  %v5856_v18 = vadd.f32 %v5855_v42, %v5854_v62 }
 0x75b   :  { %v5793_v63 = vpop.f32.mrf.mxu0  ;;  %v5857_v53 = vpop.f32.mrf.mxu1 }
 0x75c   :  { %v10807_v12 = vadd.f32 %v5856_v18, %v5792_v43 }
 0x75d   :  { %v5794_v61 = vpop.f32.mrf.mxu0  ;;  %v5858_v17 = vpop.f32.mrf.mxu1 }
 0x75e   :  { %v5795_v55 = vadd.f32 %v5794_v61, %v5793_v63  ;;  %v5859_v48 = vadd.f32 %v5858_v17, %v5857_v53 }
 0x75f   :  { %v5796_v6 = vpop.f32.mrf.mxu0  ;;  %v5860_v0 = vpop.f32.mrf.mxu1 }
 0x760   :  { %v10809_v30 = vadd.f32 %v5859_v48, %v5795_v55 }
 0x761   :  { %v5797_v60 = vpop.f32.mrf.mxu0  ;;  %v5861_v45 = vpop.f32.mrf.mxu1 }
 0x762   :  { %v5798_v34 = vadd.f32 %v5797_v60, %v5796_v6  ;;  %v5862_v52 = vadd.f32 %v5861_v45, %v5860_v0 }
 0x763   :  { %v5799_v33 = vpop.f32.mrf.mxu0  ;;  %v5863_v29 = vpop.f32.mrf.mxu1 }
 0x764   :  { %v10811_v8 = vadd.f32 %v5862_v52, %v5798_v34 }
 0x765   :  { %v5800_v13 = vpop.f32.mrf.mxu0  ;;  %v5864_v36 = vpop.f32.mrf.mxu1 }
 0x766   :  { %12581 = vst [vmem:[#allocation79_spill] sm:$0xff] %v10811_v8  ;;  %v5801_v25 = vadd.f32 %v5800_v13, %v5799_v33  ;;  %v5865_v49 = vadd.f32 %v5864_v36, %v5863_v29 }
 0x767   :  { %v5802_v14 = vpop.f32.mrf.mxu0  ;;  %v5866_v40 = vpop.f32.mrf.mxu1 }
 0x768   :  { %v10813_v24 = vadd.f32 %v5865_v49, %v5801_v25 }
 0x769   :  { %v5803_v50 = vpop.f32.mrf.mxu0  ;;  %v5867_v51 = vpop.f32.mrf.mxu1 }
 0x76a   :  { %12582 = vst [vmem:[#allocation89_spill] sm:$0xff] %v10813_v24  ;;  %v5804_v1 = vadd.f32 %v5803_v50, %v5802_v14  ;;  %v5868_v10 = vadd.f32 %v5867_v51, %v5866_v40 }
 0x76b   :  { %v5885_v9 = vpop.f32.mrf.mxu0  ;;  %v5949_v20 = vpop.f32.mrf.mxu1 }
 0x76c   :  { %v10815_v39 = vadd.f32 %v5868_v10, %v5804_v1 }
 0x76d   :  { %v5886_v38 = vpop.f32.mrf.mxu0  ;;  %v5950_v11 = vpop.f32.mrf.mxu1 }
 0x76e   :  { %v5887_v58 = vadd.f32 %v5886_v38, %v5885_v9  ;;  %v5951_v31 = vadd.f32 %v5950_v11, %v5949_v20 }
 0x76f   :  { %v5888_v7 = vpop.f32.mrf.mxu0  ;;  %v5952_v23 = vpop.f32.mrf.mxu1 }
 0x770   :  { %v4970_v21 = vadd.f32 %v5887_v58, %v10785_v2 }
 0x771   :  { %v5889_v15 = vpop.f32.mrf.mxu0  ;;  %v5953_v3 = vpop.f32.mrf.mxu1 }
 0x772   :  { %v5890_v26 = vadd.f32 %v5889_v15, %v5888_v7  ;;  %v5954_v37 = vadd.f32 %v5953_v3, %v5952_v23  ;;  %v10818_v44 = vadd.f32 %v5951_v31, %v4970_v21 }
 0x773   :  { %v5891_v57 = vpop.f32.mrf.mxu0  ;;  %v10820_v54 = vpop.f32.mrf.mxu1 }
 0x774   :  { %v4973_v41 = vadd.f32 %v5890_v26, %v10787_v47 }
 0x775   :  { %v5892_v4 = vpop.f32.mrf.mxu0  ;;  %v10823_v62 = vpop.f32.mrf.mxu1 }
 0x776   :  { %v10825_v19 = vadd.f32 %v5954_v37, %v4973_v41 }
 0x777   :  { %v5894_v42 = vpop.f32.mrf.mxu0  ;;  %v10827_v43 = vpop.f32.mrf.mxu1 }
 0x779   :  { %v5895_v2 = vpop.f32.mrf.mxu0  ;;  %v10829_v18 = vpop.f32.mrf.mxu1 }
 0x77b   :  { %v5897_v63 = vpop.f32.mrf.mxu0  ;;  %v5961_v53 = vpop.f32.mrf.mxu1 }
 0x77d   :  { %v5898_v61 = vpop.f32.mrf.mxu0  ;;  %v5962_v17 = vpop.f32.mrf.mxu1 }
 0x77e   :  { %v5899_v55 = vadd.f32 %v5898_v61, %v5897_v63  ;;  %v5963_v0 = vadd.f32 %v5962_v17, %v5961_v53 }
 0x77f   :  { %v5900_v48 = vpop.f32.mrf.mxu0  ;;  %v5964_v6 = vpop.f32.mrf.mxu1 }
 0x780   :  { %v4986_v47 = vadd.f32 %v5899_v55, %v10793_v5 }
 0x781   :  { %v5901_v60 = vpop.f32.mrf.mxu0  ;;  %v5965_v45 = vpop.f32.mrf.mxu1 }
 0x782   :  { %v5902_v34 = vadd.f32 %v5901_v60, %v5900_v48  ;;  %v10832_v52 = vadd.f32 %v5963_v0, %v4986_v47  ;;  %v5966_v36 = vadd.f32 %v5965_v45, %v5964_v6  ;;  %v5893_v47 = vadd.f32 %v5892_v4, %v5891_v57 }
 0x783   :  { %v10834_v33 = vpop.f32.mrf.mxu0  ;;  %v10836_v29 = vpop.f32.mrf.mxu1  ;;  %v5957_v57 = vadd.f32 %v10823_v62, %v10820_v54 }
 0x784   :  { %v4989_v13 = vadd.f32 %v5902_v34, %v10795_v28  ;;  %v5896_v34 = vadd.f32 %v5895_v2, %v5894_v42  ;;  %v4978_v46 = vadd.f32 %v5893_v47, %v10789_v27  ;;  %v5960_v27 = vadd.f32 %v10829_v18, %v10827_v43 }
 0x785   :  { %v10839_v25 = vpop.f32.mrf.mxu0  ;;  %v10841_v49 = vpop.f32.mrf.mxu1 }
 0x786   :  { %v10843_v14 = vadd.f32 %v5966_v36, %v4989_v13 }
 0x787   :  { %v10845_v5 = vpop.f32.mrf.mxu0  ;;  %v10847_v40 = vpop.f32.mrf.mxu1 }
 0x788   :  { %12583 = vst [vmem:[#allocation183_spill] sm:$0xff] %v10843_v14 }
 0x789   :  { %v10849_v50 = vpop.f32.mrf.mxu0  ;;  %v10851_v51 = vpop.f32.mrf.mxu1 }
 0x78a   :  { %v5908_v18 = vadd.f32 %v10849_v50, %v10845_v5 }
 0x78b   :  { %v5909_v1 = vpop.f32.mrf.mxu0  ;;  %v5973_v10 = vpop.f32.mrf.mxu1 }
 0x78d   :  { %v5910_v9 = vpop.f32.mrf.mxu0  ;;  %v5974_v20 = vpop.f32.mrf.mxu1 }
 0x78e   :  { %v5975_v62 = vadd.f32 %v5974_v20, %v5973_v10 }
 0x78f   :  { %v5912_v28 = vpop.f32.mrf.mxu0  ;;  %v10853_v38 = vpop.f32.mrf.mxu1 }
 0x791   :  { %v5913_v11 = vpop.f32.mrf.mxu0  ;;  %v10855_v58 = vpop.f32.mrf.mxu1 }
 0x792   :  { %v5914_v47 = vadd.f32 %v5913_v11, %v5912_v28 }
 0x793   :  { %v5915_v7 = vpop.f32.mrf.mxu0  ;;  %v5979_v23 = vpop.f32.mrf.mxu1 }
 0x794   :  { %v5005_v28 = vadd.f32 %v5914_v47, %v10803_v22 }
 0x795   :  { %v5916_v21 = vpop.f32.mrf.mxu0  ;;  %v5980_v31 = vpop.f32.mrf.mxu1 }
 0x796   :  { %v5917_v0 = vadd.f32 %v5916_v21, %v5915_v7  ;;  %v5981_v4 = vadd.f32 %v5980_v31, %v5979_v23  ;;  %v4981_v21 = vadd.f32 %v5896_v34, %v10791_v59  ;;  %v5969_v34 = vadd.f32 %v10841_v49, %v10836_v29 }
 0x797   :  { %v5918_v15 = vpop.f32.mrf.mxu0  ;;  %v5982_v3 = vpop.f32.mrf.mxu1 }
 0x798   :  { %v5010_v14 = vadd.f32 %v5917_v0, %v10805_v32  ;;  %v5078_v31 = vadd.f32 %v5960_v27, %v4981_v21 }
 0x799   :  { %v5919_v26 = vpop.f32.mrf.mxu0  ;;  %v5983_v37 = vpop.f32.mrf.mxu1 }
 0x79a   :  { %v5920_v7 = vadd.f32 %v5919_v26, %v5918_v15 }
 0x79b   :  { %v10857_v41 = vpop.f32.mrf.mxu0  ;;  %v10859_v63 = vpop.f32.mrf.mxu1 }
 0x79c   :  { %v5013_v0 = vadd.f32 %v5920_v7, %v10807_v12  ;;  %v5905_v12 = vadd.f32 %v10839_v25, %v10834_v33 }
 0x79d   :  { %v10861_v53 = vpop.f32.mrf.mxu0  ;;  %v10863_v61 = vpop.f32.mrf.mxu1 }
 0x79e   :  { %v5923_v29 = vadd.f32 %v10861_v53, %v10857_v41 }
 0x79f   :  { %v10865_v17 = vpop.f32.mrf.mxu0  ;;  %v10867_v55 = vpop.f32.mrf.mxu1 }
 0x7a0   :  { %12584 = vst [vmem:[#allocation58_spill] sm:$0xff] %v10867_v55  ;;  %v5911_v55 = vadd.f32 %v5910_v9, %v5909_v1  ;;  %v5018_v41 = vadd.f32 %v5923_v29, %v10809_v30 }
 0x7a1   :  { %v10869_v48 = vpop.f32.mrf.mxu0  ;;  %v10871_v6 = vpop.f32.mrf.mxu1 }
 0x7a2   :  { %12585 = vst [vmem:[#allocation184_spill] sm:$0xff] %v10871_v6  ;;  %v5107_v6 = vadd.f32 %v5981_v4, %v5010_v14  ;;  %v5002_v32 = vadd.f32 %v5911_v55, %v10801_v35 }
 0x7a3   :  { %v10873_v60 = vpop.f32.mrf.mxu0  ;;  %v10875_v45 = vpop.f32.mrf.mxu1 }
 0x7a4   :  { %12586 = vst [vmem:[#allocation87_spill] sm:$0xff] %v10875_v45  ;;  %v5075_v45 = vadd.f32 %v5957_v57, %v4978_v46  ;;  %v5984_v46 = vadd.f32 %v5983_v37, %v5982_v3  ;;  %v5978_v3 = vadd.f32 %v10855_v58, %v10853_v38  ;;  %v4997_v38 = vadd.f32 %v5908_v18, %v10799_v16  ;;  %v12594_v18 = vld [vmem:[#allocation183_spill] sm:$0xff] }
 0x7a5   :  { %v10877_v13 = vpop.f32.mrf.mxu0  ;;  %v10879_v36 = vpop.f32.mrf.mxu1  ;;  %v5972_v57 = vadd.f32 %v10851_v51, %v10847_v40 }
 0x7a6   :  { %12587 = vst [vmem:[#allocation93_spill] sm:$0xff] %v10879_v36  ;;  %v5110_v15 = vadd.f32 %v5984_v46, %v5013_v0 }
 0x7a7   :  { %v5930_v24 = vpop.f32.mrf.mxu0  ;;  %v10883_v8 = vpop.f32.mrf.mxu1 }
 0x7a9   :  { %v5931_v42 = vpop.f32.mrf.mxu0  ;;  %v5995_v2 = vpop.f32.mrf.mxu1 }
 0x7aa   :  { %v5932_v58 = vadd.f32 %v5931_v42, %v5930_v24  ;;  %v5996_v51 = vadd.f32 %v5995_v2, %v10883_v8  ;;  %v5929_v8 = vadd.f32 %v10877_v13, %v10873_v60  ;;  %v5987_v2 = vadd.f32 %v10863_v61, %v10859_v63  ;;  %v12589_v60 = vld [vmem:[#allocation89_spill] sm:$0xff]  ;;  %v12590_v63 = vld [vmem:[#allocation58_spill] sm:$0xff]  ;;  %v12591_v61 = vld [vmem:[#allocation184_spill] sm:$0xff] }
 0x7ab   :  { %v6019_v1 = vpop.f32.mrf.mxu0  ;;  %v6027_v9 = vpop.f32.mrf.mxu1  ;;  %v12592_v46 = vld [vmem:[#allocation87_spill] sm:$0xff] }
 0x7ac   :  { %v10892_v36 = vadd.f32 %v6019_v1, %v5075_v45  ;;  %v10894_v54 = vadd.f32 %v6027_v9, %v5107_v6  ;;  %v4994_v6 = vadd.f32 %v5905_v12, %v10797_v56  ;;  %v5102_v45 = vadd.f32 %v5978_v3, %v5005_v28 }
 0x7ad   :  { %v5163_v59 = vpop.f32.mrf.mxu0  ;;  %v5195_v23 = vpop.f32.mrf.mxu1  ;;  %v5029_v49 = vadd.f32 %v5932_v58, %v10815_v39  ;;  %v5926_v39 = vadd.f32 %v10869_v48, %v10865_v17  ;;  %v12588_v17 = vld [vmem:[#allocation79_spill] sm:$0xff]  ;;  %v5026_v13 = vadd.f32 %v5929_v8, %v12589_v60 }
 0x7ae   :  { %v10897_v14 = vadd.f32 %v5163_v59, %v10818_v44  ;;  %v5256_v35 = vsel %vm667_vm0, %v10894_v54, 0.0  ;;  %v5232_v43 = vsel %vm667_vm0, %v10892_v36, 0.0  ;;  %v5099_v44 = vadd.f32 %v5975_v62, %v5002_v32 }
 0x7af   :  { %v6020_v10 = vpop.f32.mrf.mxu0  ;;  %v6028_v20 = vpop.f32.mrf.mxu1  ;;  %5257 = vadd.xlane.f32.xlu0 %v5256_v35  ;;  %5233 = vadd.xlane.f32.xlu1 %v5232_v43  ;;  %v5091_v40 = vadd.f32 %v5969_v34, %v4994_v6  ;;  %v5126_v53 = vadd.f32 %v5996_v51, %v5029_v49  ;;  %v5021_v48 = vadd.f32 %v5926_v39, %v12588_v17  ;;  %v12593_v35 = vld [vmem:[#allocation93_spill] sm:$0xff] }
 0x7b0   :  { %v10908_v11 = vadd.f32 %v6020_v10, %v5078_v31  ;;  %v10912_v55 = vadd.f32 %v5195_v23, %v5099_v44  ;;  %v10914_v33 = vadd.f32 %v6028_v20, %v5110_v15  ;;  %v5226_v5 = vsel %vm667_vm0, %v10897_v14, 0.0 }
 0x7b1   :  { %v5166_v26 = vpop.f32.mrf.mxu0  ;;  %v5198_v37 = vpop.f32.mrf.mxu1  ;;  %v5115_v31 = vadd.f32 %v5987_v2, %v5018_v41  ;;  %v5993_v43 = vadd.f32 %v12593_v35, %v12592_v46 }
 0x7b2   :  { %v5235_v25 = vsel %vm667_vm0, %v10908_v11, 0.0  ;;  %v10927_v7 = vadd.f32 %v5166_v26, %v10825_v19  ;;  %v10929_v21 = vadd.f32 %v5198_v37, %v5102_v45  ;;  %v5259_v27 = vsel %vm667_vm0, %v10914_v33, 0.0 }
 0x7b3   :  { %v6023_v22 = vpop.f32.mrf.mxu0  ;;  %v6031_v50 = vpop.f32.mrf.mxu1  ;;  %5236 = vadd.xlane.f32.xlu1 %v5235_v25  ;;  %5227 = vadd.xlane.f32.xlu0 %v5226_v5  ;;  %v5250_v56 = vsel %vm667_vm0, %v10912_v55, 0.0  ;;  %v5094_v19 = vadd.f32 %v5972_v57, %v4997_v38  ;;  %v5123_v15 = vadd.f32 %v5993_v43, %v5026_v13 }
 0x7b4   :  { %v10939_v42 = vadd.f32 %v6023_v22, %v5091_v40  ;;  %v5253_v1 = vsel %vm667_vm0, %v10929_v21, 0.0  ;;  %v5229_v9 = vsel %vm667_vm0, %v10927_v7, 0.0 }
 0x7b5   :  { %v5179_v4 = vpop.f32.mrf.mxu0  ;;  %v5211_v16 = vpop.f32.mrf.mxu1  ;;  %v10978_v26 = vadd.f32 %v6031_v50, %v5123_v15 }
 0x7b6   :  { %v10955_v0 = vadd.f32 %v5179_v4, %v10832_v52  ;;  %v5244_v30 = vsel %vm667_vm0, %v10939_v42, 0.0  ;;  %v5990_v52 = vadd.f32 %v12591_v61, %v12590_v63  ;;  %v10969_v12 = vadd.f32 %v5211_v16, %v5115_v31 }
 0x7b7   :  { %v6024_v24 = vpop.f32.mrf.mxu0  ;;  %5260 = vadd.xlane.f32.xlu1 %v5259_v27  ;;  %5251 = vadd.xlane.f32.xlu0 %v5250_v56  ;;  %v6032_v47 = vpop.f32.mrf.mxu1  ;;  %v5268_v6 = vsel %vm667_vm0, %v10978_v26, 0.0 }
 0x7b8   :  { %v10941_v32 = vadd.f32 %v6024_v24, %v5094_v19  ;;  %v10957_v62 = vadd.f32 %v6032_v47, %v5126_v53  ;;  %v5238_v28 = vsel %vm667_vm0, %v10955_v0, 0.0  ;;  %v5118_v3 = vadd.f32 %v5990_v52, %v5021_v48 }
 0x7b9   :  { %v5182_v23 = vpop.f32.mrf.mxu0  ;;  %v5214_v44 = vpop.f32.mrf.mxu1  ;;  %v5262_v5 = vsel %vm667_vm0, %v10969_v12, 0.0 }
 0x7ba   :  { %v5247_v59 = vsel %vm667_vm0, %v10941_v32, 0.0  ;;  %v10972_v10 = vadd.f32 %v5182_v23, %v12594_v18  ;;  %v5271_v20 = vsel %vm667_vm0, %v10957_v62, 0.0  ;;  %v10980_v37 = vadd.f32 %v5214_v44, %v5118_v3 }
 0x7bb   :  { %5254 = vadd.xlane.f32.xlu1 %v5253_v1  ;;  %5230 = vadd.xlane.f32.xlu0 %v5229_v9 }
 0x7bc   :  { %v5241_v25 = vsel %vm667_vm0, %v10972_v10, 0.0  ;;  %v5265_v22 = vsel %vm667_vm0, %v10980_v37, 0.0 }
 0x7bf   :  { %5248 = vadd.xlane.f32.xlu1 %v5247_v59  ;;  %5245 = vadd.xlane.f32.xlu0 %v5244_v30 }
 0x7c3   :  { %5272 = vadd.xlane.f32.xlu1 %v5271_v20  ;;  %5239 = vadd.xlane.f32.xlu0 %v5238_v28 }
 0x7c7   :  { %5242 = vadd.xlane.f32.xlu1 %v5241_v25  ;;  %5263 = vadd.xlane.f32.xlu0 %v5262_v5 }
 0x7cb   :  { %5266 = vadd.xlane.f32.xlu1 %v5265_v22  ;;  %5269 = vadd.xlane.f32.xlu0 %v5268_v6 }
 0x838   :  { %v5258_v50 = vpop.xlane.xlu0 %5257  ;;  %v5234_v38 = vpop.xlane.xlu1 %5233 }
 0x839   :  { %v5284_v58 = vmul.f32 0.020408163, %v5258_v50  ;;  %v5276_v45 = vmul.f32 0.020408163, %v5234_v38  ;;  %v12595_v38 = vld [vmem:[#allocation130_spill] sm:$0xff] }
 0x83b   :  { %v10991_v34 = vsub.f32 %v10894_v54, %v5284_v58  ;;  %v10994_v57 = vsub.f32 %v10892_v36, %v5276_v45  ;;  %v12596_v58 = vld [vmem:[#allocation134_spill] sm:$0xff]  ;;  %v12597_v45 = vld [vmem:[#allocation135_spill] sm:$0xff] }
 0x83c   :  { %v5237_v4 = vpop.xlane.xlu1 %5236  ;;  %v5228_v27 = vpop.xlane.xlu0 %5227 }
 0x83d   :  { %v5277_v56 = vmul.f32 0.020408163, %v5237_v4  ;;  %v5274_v16 = vmul.f32 0.020408163, %v5228_v27  ;;  %v5308_v24 = vmul.f32 %v10994_v57, %v10994_v57  ;;  %v5316_v54 = vmul.f32 %v10991_v34, %v10991_v34  ;;  %v12598_v4 = vld [vmem:[#allocation139_spill] sm:$0xff]  ;;  %v12599_v27 = vld [vmem:[#allocation142_spill] sm:$0xff] }
 0x83f   :  { %v10999_v29 = vsub.f32 %v10908_v11, %v5277_v56  ;;  %v11002_v49 = vsub.f32 %v10897_v14, %v5274_v16  ;;  %v5328_v40 = vsel %vm667_vm0, %v5308_v24, 0.0  ;;  %v5352_v39 = vsel %vm667_vm0, %v5316_v54, 0.0  ;;  %v12601_v56 = vld [vmem:[#allocation137_spill] sm:$0xff]  ;;  %v12602_v16 = vld [vmem:[#allocation140_spill] sm:$0xff]  ;;  %v12604_v54 = vld [vmem:[#allocation147_spill] sm:$0xff] }
 0x840   :  { %v5261_v36 = vpop.xlane.xlu1 %5260  ;;  %5329 = vadd.xlane.f32.xlu0 %v5328_v40  ;;  %v5252_v19 = vpop.xlane.xlu0 %5251  ;;  %v12603_v24 = vld [vmem:[#allocation144_spill] sm:$0xff] }
 0x841   :  { %v5285_v51 = vmul.f32 0.020408163, %v5261_v36  ;;  %v5282_v1 = vmul.f32 0.020408163, %v5252_v19  ;;  %v5309_v9 = vmul.f32 %v10999_v29, %v10999_v29  ;;  %v5306_v11 = vmul.f32 %v11002_v49, %v11002_v49  ;;  %v12605_v19 = vld [vmem:[#allocation150_spill] sm:$0xff] }
 0x843   :  { %v11012_v47 = vsub.f32 %v10914_v33, %v5285_v51  ;;  %v11015_v14 = vsub.f32 %v10912_v55, %v5282_v1  ;;  %v5331_v41 = vsel %vm667_vm0, %v5309_v9, 0.0  ;;  %v5322_v23 = vsel %vm667_vm0, %v5306_v11, 0.0 }
 0x844   :  { %5332 = vadd.xlane.f32.xlu1 %v5331_v41  ;;  %v5255_v8 = vpop.xlane.xlu1 %5254  ;;  %5353 = vadd.xlane.f32.xlu0 %v5352_v39  ;;  %v5231_v53 = vpop.xlane.xlu0 %5230  ;;  %v12606_v1 = vmov 0  }
 0x845   :  { %v5283_v2 = vmul.f32 0.020408163, %v5255_v8  ;;  %v5275_v59 = vmul.f32 0.020408163, %v5231_v53  ;;  %v5317_v30 = vmul.f32 %v11012_v47, %v11012_v47  ;;  %v5314_v48 = vmul.f32 %v11015_v14, %v11015_v14 }
 0x847   :  { %v11023_v33 = vsub.f32 %v10929_v21, %v5283_v2  ;;  %v11026_v55 = vsub.f32 %v10927_v7, %v5275_v59  ;;  %v5355_v17 = vsel %vm667_vm0, %v5317_v30, 0.0  ;;  %v5346_v21 = vsel %vm667_vm0, %v5314_v48, 0.0 }
 0x848   :  { %5356 = vadd.xlane.f32.xlu1 %v5355_v17  ;;  %5323 = vadd.xlane.f32.xlu0 %v5322_v23  ;;  %v5246_v60 = vpop.xlane.xlu0 %5245  ;;  %v5249_v40 = vpop.xlane.xlu1 %5248 }
 0x849   :  { %v5280_v13 = vmul.f32 0.020408163, %v5246_v60  ;;  %v5307_v31 = vmul.f32 %v11026_v55, %v11026_v55  ;;  %v5315_v61 = vmul.f32 %v11023_v33, %v11023_v33  ;;  %v5281_v51 = vmul.f32 0.020408163, %v5249_v40 }
 0x84b   :  { %v11034_v63 = vsub.f32 %v10939_v42, %v5280_v13  ;;  %v5325_v7 = vsel %vm667_vm0, %v5307_v31, 0.0  ;;  %v5349_v42 = vsel %vm667_vm0, %v5315_v61, 0.0  ;;  %v11075_v11 = vsub.f32 %v10941_v32, %v5281_v51  ;;  %v12607_v31 = vld [vmem:[#allocation145_spill] sm:$0xff] }
 0x84c   :  { %5347 = vadd.xlane.f32.xlu0 %v5346_v21  ;;  %5326 = vadd.xlane.f32.xlu1 %v5325_v7  ;;  %v5240_v52 = vpop.xlane.xlu0 %5239  ;;  %v5273_v36 = vpop.xlane.xlu1 %5272  ;;  %v12608_v21 = vld [vmem:[#allocation149_spill] sm:$0xff] }
 0x84d   :  { %v5278_v46 = vmul.f32 0.020408163, %v5240_v52  ;;  %v5312_v35 = vmul.f32 %v11034_v63, %v11034_v63  ;;  %v5289_v41 = vmul.f32 0.020408163, %v5273_v36  ;;  %v5313_v53 = vmul.f32 %v11075_v11, %v11075_v11 }
 0x84f   :  { %v11043_v43 = vsub.f32 %v10955_v0, %v5278_v46  ;;  %v5340_v18 = vsel %vm667_vm0, %v5312_v35, 0.0  ;;  %v11078_v39 = vsub.f32 %v10957_v62, %v5289_v41  ;;  %v5343_v23 = vsel %vm667_vm0, %v5313_v53, 0.0 }
 0x850   :  { %5350 = vadd.xlane.f32.xlu1 %v5349_v42  ;;  %5341 = vadd.xlane.f32.xlu0 %v5340_v18  ;;  %v5264_v20 = vpop.xlane.xlu0 %5263  ;;  %v5243_v9 = vpop.xlane.xlu1 %5242 }
 0x851   :  { %v5286_v28 = vmul.f32 0.020408163, %v5264_v20  ;;  %v5310_v44 = vmul.f32 %v11043_v43, %v11043_v43  ;;  %v5279_v8 = vmul.f32 0.020408163, %v5243_v9  ;;  %v5321_v17 = vmul.f32 %v11078_v39, %v11078_v39 }
 0x853   :  { %v11050_v15 = vsub.f32 %v10969_v12, %v5286_v28  ;;  %v5334_v3 = vsel %vm667_vm0, %v5310_v44, 0.0  ;;  %v11083_v59 = vsub.f32 %v10972_v10, %v5279_v8  ;;  %v5367_v62 = vsel %vm667_vm0, %v5321_v17, 0.0 }
 0x854   :  { %5335 = vadd.xlane.f32.xlu0 %v5334_v3  ;;  %v5270_v25 = vpop.xlane.xlu0 %5269  ;;  %v5267_v2 = vpop.xlane.xlu1 %5266 }
 0x855   :  { %v5288_v0 = vmul.f32 0.020408163, %v5270_v25  ;;  %v5318_v5 = vmul.f32 %v11050_v15, %v11050_v15  ;;  %v5287_v30 = vmul.f32 0.020408163, %v5267_v2  ;;  %v5311_v48 = vmul.f32 %v11083_v59, %v11083_v59 }
 0x857   :  { %v11056_v22 = vsub.f32 %v10978_v26, %v5288_v0  ;;  %v5358_v6 = vsel %vm667_vm0, %v5318_v5, 0.0  ;;  %v12600_v26 = vld [vmem:[#allocation132_spill] sm:$0xff]  ;;  %v11089_v32 = vsub.f32 %v10980_v37, %v5287_v30  ;;  %v5337_v60 = vsel %vm667_vm0, %v5311_v48, 0.0 }
 0x858   :  { %5359 = vadd.xlane.f32.xlu0 %v5358_v6  ;;  %v12609_v37 = vld [vmem:[#allocation152_spill] sm:$0xff] }
 0x859   :  { %v5320_v50 = vmul.f32 %v11056_v22, %v11056_v22  ;;  %v5319_v10 = vmul.f32 %v11089_v32, %v11089_v32 }
 0x85b   :  { %v5364_v12 = vsel %vm667_vm0, %v5320_v50, 0.0  ;;  %v5361_v13 = vsel %vm667_vm0, %v5319_v10, 0.0 }
 0x85c   :  { %5365 = vadd.xlane.f32.xlu0 %v5364_v12 }
 0x861   :  { %5532 = vperm.xlu1 %6455, %v12595_v38  }
 0x865   :  { %5542 = vperm.xlu1 %6455, %v12596_v58  }
 0x869   :  { %5547 = vperm.xlu1 %6455, %v12597_v45  }
 0x86d   :  { %5557 = vperm.xlu1 %6455, %v12598_v4  }
 0x871   :  { %5567 = vperm.xlu1 %6455, %v12599_v27  }
 0x872   :  { %5537 = vperm.xlu0 %6456, %v12600_v26  }
 0x876   :  { %5552 = vperm.xlu0 %6456, %v12601_v56  }
 0x87a   :  { %5562 = vperm.xlu0 %6456, %v12602_v16  }
 0x87e   :  { %5572 = vperm.xlu0 %6456, %v12603_v24  }
 0x882   :  { %5582 = vperm.xlu0 %6456, %v12604_v54  }
 0x886   :  { %5592 = vperm.xlu0 %6456, %v12605_v19  }
 0x88a   :  { %6458 = vset.pattern.permute.xlu0 %v12606_v1 }
 0x895   :  { %5344 = vadd.xlane.f32.xlu1 %v5343_v23 }
 0x899   :  { %5368 = vadd.xlane.f32.xlu1 %v5367_v62 }
 0x89d   :  { %5338 = vadd.xlane.f32.xlu1 %v5337_v60 }
 0x8a1   :  { %5362 = vadd.xlane.f32.xlu1 %v5361_v13 }
 0x8b2   :  { %5577 = vperm.xlu1 %6455, %v12607_v31  }
 0x8b6   :  { %5587 = vperm.xlu1 %6455, %v12608_v21  }
 0x8ba   :  { %5597 = vperm.xlu1 %6455, %v12609_v37  }
 0x8be   :  { %6457 = vset.pattern.permute.xlu1 %v12606_v1 }
 0x8c9   :  { %v5330_v7 = vpop.xlane.xlu0 %5329 }
 0x8ca   :  { %v5372_v61 = vmul.f32 0.020408163, %v5330_v7 }
 0x8cc   :  { %v5388_v52 = vadd.f32 1e-05, %v5372_v61 }
 0x8cd   :  { %v5333_v46 = vpop.xlane.xlu1 %5332  ;;  %v5354_v35 = vpop.xlane.xlu0 %5353 }
 0x8ce   :  { %6565 = vrsqrt.f32 %v5388_v52  ;;  %v5380_v42 = vmul.f32 0.020408163, %v5354_v35  ;;  %v5373_v0 = vmul.f32 0.020408163, %v5333_v46 }
 0x8d0   :  { %v5396_v18 = vadd.f32 1e-05, %v5380_v42  ;;  %v5389_v36 = vadd.f32 1e-05, %v5373_v0 }
 0x8d1   :  { %v5357_v20 = vpop.xlane.xlu1 %5356  ;;  %v5324_v28 = vpop.xlane.xlu0 %5323 }
 0x8d2   :  { %v5381_v44 = vmul.f32 0.020408163, %v5357_v20  ;;  %v5370_v3 = vmul.f32 0.020408163, %v5324_v28  ;;  %6567 = vrsqrt.f32 %v5396_v18 }
 0x8d4   :  { %v5386_v25 = vadd.f32 1e-05, %v5370_v3  ;;  %v5397_v5 = vadd.f32 1e-05, %v5381_v44 }
 0x8d5   :  { %v5327_v6 = vpop.xlane.xlu1 %5326  ;;  %v5348_v50 = vpop.xlane.xlu0 %5347 }
 0x8d6   :  { %v5378_v12 = vmul.f32 0.020408163, %v5348_v50  ;;  %6569 = vrsqrt.f32 %v5386_v25  ;;  %v5371_v51 = vmul.f32 0.020408163, %v5327_v6 }
 0x8d7   :  { %6571 = vrsqrt.f32 %v5397_v5 }
 0x8d8   :  { %v5394_v40 = vadd.f32 1e-05, %v5378_v12  ;;  %v5387_v30 = vadd.f32 1e-05, %v5371_v51  ;;  %v12610_v12 = vld [vmem:[#allocation154_spill] sm:$0xff] }
 0x8d9   :  { %v5351_v1 = vpop.xlane.xlu1 %5350  ;;  %v5342_v9 = vpop.xlane.xlu0 %5341 }
 0x8da   :  { %v5379_v41 = vmul.f32 0.020408163, %v5351_v1  ;;  %6573 = vrsqrt.f32 %v5394_v40  ;;  %v5376_v23 = vmul.f32 0.020408163, %v5342_v9 }
 0x8db   :  { %v6566_v8 = vpop.eup %6565  ;;  %6575 = vrsqrt.f32 %v5389_v36 }
 0x8dc   :  { %v5395_v53 = vadd.f32 1e-05, %v5379_v41  ;;  %v5420_v2 = vmul.f32 %v6566_v8, %v12596_v58  ;;  %v5392_v48 = vadd.f32 1e-05, %v5376_v23 }
 0x8dd   :  { %v5336_v17 = vpop.xlane.xlu0 %5335  ;;  %v5533_v1 = vpop.permute.xlu1 %5532 }
 0x8de   :  { %6577 = vrsqrt.f32 %v5395_v53  ;;  %5446 = vperm.xlu1 %6457, %v5420_v2   ;;  %v5374_v7 = vmul.f32 0.020408163, %v5336_v17 }
 0x8df   :  { %v6568_v62 = vpop.eup %6567  ;;  %6579 = vrsqrt.f32 %v5387_v30 }
 0x8e0   :  { %v5428_v10 = vmul.f32 %v6568_v62, %v12604_v54  ;;  %6581 = vrsqrt.f32 %v5392_v48  ;;  %v5390_v18 = vadd.f32 1e-05, %v5374_v7 }
 0x8e1   :  { %v5360_v60 = vpop.xlane.xlu0 %5359  ;;  %v5543_v9 = vpop.permute.xlu1 %5542 }
 0x8e2   :  { %5486 = vperm.xlu1 %6457, %v5428_v10   ;;  %v5382_v20 = vmul.f32 0.020408163, %v5360_v60 }
 0x8e3   :  { %v6570_v13 = vpop.eup %6569 }
 0x8e4   :  { %v5418_v52 = vmul.f32 %v6570_v13, %v12595_v38  ;;  %v6572_v58 = vpop.eup %6571  ;;  %v5398_v38 = vadd.f32 1e-05, %v5382_v20 }
 0x8e5   :  { %v5366_v61 = vpop.xlane.xlu0 %5365  ;;  %v5429_v28 = vmul.f32 %v6572_v58, %v12608_v21 }
 0x8e6   :  { %v5384_v46 = vmul.f32 0.020408163, %v5366_v61  ;;  %5436 = vperm.xlu0 %6458, %v5418_v52   ;;  %v12611_v52 = vld [vmem:[#allocation155_spill] sm:$0xff] }
 0x8e7   :  { %v6574_v35 = vpop.eup %6573 }
 0x8e8   :  { %v5400_v42 = vadd.f32 1e-05, %v5384_v46  ;;  %v5426_v44 = vmul.f32 %v6574_v35, %v12603_v24  ;;  %v6576_v3 = vpop.eup %6575 }
 0x8e9   :  { %v5421_v0 = vmul.f32 %v6576_v3, %v12597_v45 }
 0x8ea   :  { %6583 = vrsqrt.f32 %v5400_v42  ;;  %5491 = vperm.xlu0 %6458, %v5429_v28   ;;  %5476 = vperm.xlu1 %6457, %v5426_v44   ;;  %v12612_v28 = vmov 1  }
 0x8eb   :  { %v6578_v54 = vpop.eup %6577  ;;  %6585 = vrsqrt.f32 %v5390_v18 }
 0x8ec   :  { %v5427_v25 = vmul.f32 %v6578_v54, %v12607_v31  ;;  %v6580_v5 = vpop.eup %6579  ;;  %6587 = vrsqrt.f32 %v5398_v38 }
 0x8ed   :  { %v5419_v6 = vmul.f32 %v6580_v5, %v12600_v26  ;;  %v6582_v21 = vpop.eup %6581  ;;  %v11114_v26 = vpop.permute.xlu1 %5547 }
 0x8ee   :  { %5481 = vperm.xlu0 %6458, %v5427_v25   ;;  %5451 = vperm.xlu1 %6457, %v5421_v0   ;;  %v5424_v24 = vmul.f32 %v6582_v21, %v12602_v16  ;;  %v5538_v20 = vpop.permute.xlu0 %5537 }
 0x8f1   :  { %v11116_v41 = vpop.permute.xlu1 %5557 }
 0x8f2   :  { %5441 = vperm.xlu1 %6457, %v5419_v6  }
 0x8f5   :  { %v11118_v16 = vpop.permute.xlu1 %5567 }
 0x8f6   :  { %5466 = vperm.xlu1 %6457, %v5424_v24  }
 0x8f7   :  { %v6584_v50 = vpop.eup %6583 }
 0x8f8   :  { %v5432_v40 = vmul.f32 %v6584_v50, %v12610_v12  ;;  %v6586_v36 = vpop.eup %6585 }
 0x8f9   :  { %v5422_v31 = vmul.f32 %v6586_v36, %v12601_v56  ;;  %v6588_v51 = vpop.eup %6587 }
 0x8fa   :  { %5506 = vperm.xlu1 %6457, %v5432_v40   ;;  %v5430_v45 = vmul.f32 %v6588_v51, %v12605_v19 }
 0x8fe   :  { %5456 = vperm.xlu1 %6457, %v5422_v31  }
 0x902   :  { %5496 = vperm.xlu1 %6457, %v5430_v45  }
 0x91e   :  { %v5345_v8 = vpop.xlane.xlu1 %5344 }
 0x91f   :  { %v5377_v53 = vmul.f32 0.020408163, %v5345_v8 }
 0x921   :  { %v5393_v2 = vadd.f32 1e-05, %v5377_v53 }
 0x922   :  { %v5369_v30 = vpop.xlane.xlu1 %5368 }
 0x923   :  { %6589 = vrsqrt.f32 %v5393_v2  ;;  %v5385_v23 = vmul.f32 0.020408163, %v5369_v30 }
 0x925   :  { %v5401_v56 = vadd.f32 1e-05, %v5385_v23 }
 0x926   :  { %v5339_v17 = vpop.xlane.xlu1 %5338 }
 0x927   :  { %6591 = vrsqrt.f32 %v5401_v56  ;;  %v5375_v62 = vmul.f32 0.020408163, %v5339_v17 }
 0x929   :  { %v5391_v19 = vadd.f32 1e-05, %v5375_v62 }
 0x92a   :  { %v5363_v48 = vpop.xlane.xlu1 %5362 }
 0x92b   :  { %6593 = vrsqrt.f32 %v5391_v19  ;;  %v5383_v60 = vmul.f32 0.020408163, %v5363_v48 }
 0x92d   :  { %v5399_v10 = vadd.f32 1e-05, %v5383_v60 }
 0x92e   :  { %v5578_v44 = vpop.permute.xlu1 %5577 }
 0x92f   :  { %6595 = vrsqrt.f32 %v5399_v10 }
 0x930   :  { %v6590_v13 = vpop.eup %6589 }
 0x931   :  { %v5425_v7 = vmul.f32 %v6590_v13, %v12599_v27  ;;  %v5553_v27 = vpop.permute.xlu0 %5552 }
 0x932   :  { %v5588_v54 = vpop.permute.xlu1 %5587 }
 0x933   :  { %5471 = vperm.xlu1 %6457, %v5425_v7  }
 0x934   :  { %v6592_v61 = vpop.eup %6591 }
 0x935   :  { %v5433_v58 = vmul.f32 %v6592_v61, %v12611_v52  ;;  %v5563_v3 = vpop.permute.xlu0 %5562 }
 0x937   :  { %5511 = vperm.xlu0 %6458, %v5433_v58  }
 0x938   :  { %v6594_v46 = vpop.eup %6593 }
 0x939   :  { %v5423_v35 = vmul.f32 %v6594_v46, %v12598_v4  ;;  %v5573_v25 = vpop.permute.xlu0 %5572  ;;  %v5598_v4 = vpop.permute.xlu1 %5597 }
 0x93b   :  { %5461 = vperm.xlu1 %6457, %v5423_v35  }
 0x93c   :  { %v6596_v42 = vpop.eup %6595 }
 0x93d   :  { %v5431_v18 = vmul.f32 %v6596_v42, %v12609_v37  ;;  %v5583_v38 = vpop.permute.xlu0 %5582 }
 0x93f   :  { %5501 = vperm.xlu0 %6458, %v5431_v18   ;;  %6460 = vset.pattern.permute.xlu1 %v12612_v28 }
 0x940   :  { %5607 = vperm.xlu1 %6460, %v12611_v52  }
 0x941   :  { %v5593_v6 = vpop.permute.xlu0 %5592 }
 0x943   :  { %6459 = vset.pattern.permute.xlu0 %v12612_v28 }
 0x944   :  { %5602 = vperm.xlu0 %6459, %v12610_v12  }
 0x959   :  { %v5447_v0 = vpop.permute.xlu1 %5446 }
 0x95a   :  { %v5516_v37 = vmul.f32 %v5447_v0, %v10994_v57 }
 0x95c   :  { %v5612_v5 = vadd.f32 %v5543_v9, %v5516_v37 }
 0x95d   :  { %v5487_v21 = vpop.permute.xlu1 %5486 }
 0x95e   :  { %5628 = vst.msk [vmem:[%s11215_s4 + $0x10] sm:$0xff] %vm667_vm0, %v5612_v5  ;;  %v5524_v24 = vmul.f32 %v5487_v21, %v10991_v34 }
 0x960   :  { %v5620_v50 = vadd.f32 %v5583_v38, %v5524_v24 }
 0x961   :  { %v5437_v12 = vpop.permute.xlu0 %5436 }
 0x962   :  { %5636 = vst.msk [vmem:[%s11215_s4 + $0x50] sm:$0xff] %vm667_vm0, %v5620_v50  ;;  %v5514_v40 = vmul.f32 %v5437_v12, %v11002_v49 }
 0x964   :  { %v5610_v57 = vadd.f32 %v5533_v1, %v5514_v40 }
 0x965   :  { %v5477_v36 = vpop.permute.xlu1 %5476  ;;  %v5492_v31 = vpop.permute.xlu0 %5491 }
 0x966   :  { %5626 = vst.msk [vmem:[%s11215_s4] sm:$0xff] %vm667_vm0, %v5610_v57  ;;  %v5522_v51 = vmul.f32 %v5477_v36, %v11015_v14  ;;  %v5525_v34 = vmul.f32 %v5492_v31, %v11012_v47 }
 0x968   :  { %v5618_v45 = vadd.f32 %v5573_v25, %v5522_v51  ;;  %v5621_v9 = vadd.f32 %v5588_v54, %v5525_v34 }
 0x969   :  { %v5452_v8 = vpop.permute.xlu1 %5451  ;;  %v5482_v53 = vpop.permute.xlu0 %5481 }
 0x96a   :  { %5634 = vst.msk [vmem:[%s11215_s4 + $0x40] sm:$0xff] %vm667_vm0, %v5618_v45  ;;  %5637 = vst.msk [vmem:[%s11215_s4 + $0x58] sm:$0xff] %vm667_vm0, %v5621_v9  ;;  %v5517_v49 = vmul.f32 %v5452_v8, %v10999_v29  ;;  %v5523_v14 = vmul.f32 %v5482_v53, %v11023_v33 }
 0x96c   :  { %v5613_v47 = vadd.f32 %v11114_v26, %v5517_v49  ;;  %v5619_v1 = vadd.f32 %v5578_v44, %v5523_v14 }
 0x96d   :  { %v5442_v2 = vpop.permute.xlu1 %5441 }
 0x96e   :  { %5629 = vst.msk [vmem:[%s11215_s4 + $0x18] sm:$0xff] %vm667_vm0, %v5613_v47  ;;  %5635 = vst.msk [vmem:[%s11215_s4 + $0x48] sm:$0xff] %vm667_vm0, %v5619_v1  ;;  %v5515_v30 = vmul.f32 %v5442_v2, %v11026_v55 }
 0x970   :  { %v5611_v23 = vadd.f32 %v5538_v20, %v5515_v30 }
 0x971   :  { %v5467_v29 = vpop.permute.xlu1 %5466 }
 0x972   :  { %5627 = vst.msk [vmem:[%s11215_s4 + $0x8] sm:$0xff] %vm667_vm0, %v5611_v23  ;;  %v5520_v33 = vmul.f32 %v5467_v29, %v11034_v63 }
 0x974   :  { %v5616_v26 = vadd.f32 %v5563_v3, %v5520_v33 }
 0x975   :  { %v5507_v56 = vpop.permute.xlu1 %5506 }
 0x976   :  { %5632 = vst.msk [vmem:[%s11215_s4 + $0x30] sm:$0xff] %vm667_vm0, %v5616_v26  ;;  %v5528_v42 = vmul.f32 %v5507_v56, %v11056_v22 }
 0x979   :  { %v5457_v17 = vpop.permute.xlu1 %5456 }
 0x97a   :  { %v5518_v62 = vmul.f32 %v5457_v17, %v11043_v43 }
 0x97c   :  { %v5614_v55 = vadd.f32 %v5553_v27, %v5518_v62 }
 0x97d   :  { %v5497_v19 = vpop.permute.xlu1 %5496 }
 0x97e   :  { %5630 = vst.msk [vmem:[%s11215_s4 + $0x20] sm:$0xff] %vm667_vm0, %v5614_v55  ;;  %v5526_v48 = vmul.f32 %v5497_v19, %v11050_v15 }
 0x980   :  { %v5622_v63 = vadd.f32 %v5593_v6, %v5526_v48 }
 0x982   :  { %5638 = vst.msk [vmem:[%s11215_s4 + $0x60] sm:$0xff] %vm667_vm0, %v5622_v63 }
 0x9ae   :  { %v5472_v60 = vpop.permute.xlu1 %5471 }
 0x9af   :  { %v5521_v10 = vmul.f32 %v5472_v60, %v11075_v11 }
 0x9b1   :  { %v5617_v43 = vadd.f32 %v11118_v16, %v5521_v10 }
 0x9b2   :  { %v5512_v13 = vpop.permute.xlu0 %5511 }
 0x9b3   :  { %5633 = vst.msk [vmem:[%s11215_s4 + $0x38] sm:$0xff] %vm667_vm0, %v5617_v43  ;;  %v5529_v52 = vmul.f32 %v5512_v13, %v11078_v39 }
 0x9b6   :  { %v5462_v7 = vpop.permute.xlu1 %5461 }
 0x9b7   :  { %v5519_v15 = vmul.f32 %v5462_v7, %v11083_v59 }
 0x9b9   :  { %v5615_v61 = vadd.f32 %v11116_v41, %v5519_v15 }
 0x9ba   :  { %v5502_v58 = vpop.permute.xlu0 %5501 }
 0x9bb   :  { %5631 = vst.msk [vmem:[%s11215_s4 + $0x28] sm:$0xff] %vm667_vm0, %v5615_v61  ;;  %v5527_v11 = vmul.f32 %v5502_v58, %v11089_v32  ;;  %v5608_v16 = vpop.permute.xlu1 %5607 }
 0x9bc   :  { %v5625_v46 = vadd.f32 %v5608_v16, %v5529_v52 }
 0x9bd   :  { %v5623_v35 = vadd.f32 %v5598_v4, %v5527_v11 }
 0x9be   :  { %5641 = vst.msk [vmem:[%s11215_s4 + $0x78] sm:$0xff] %vm667_vm0, %v5625_v46 }
 0x9bf   :  { %5639 = vst.msk [vmem:[%s11215_s4 + $0x68] sm:$0xff] %vm667_vm0, %v5623_v35  ;;  %v5603_v39 = vpop.permute.xlu0 %5602 }
 0x9c0   :  { %v5624_v59 = vadd.f32 %v5603_v39, %v5528_v42 }
 0x9c2   :  { %5640 = vst.msk [vmem:[%s11215_s4 + $0x70] sm:$0xff] %vm667_vm0, %v5624_v59 }
 0x9c3   :  { %5646 = vsyncmov [#allocation3] }
 0x9c6   :  { %s5647_s14 = vpop.sfrf %5646 }
 0x9c7   :  { %p5740_p0 = scmp.ne.s32.totalorder %s5647_s14, 0 }
 0x9c9   :  { %5651 = shalt.err (%p5740_p0)  }

</bundles_post_ra>
